<compile_context>
chip_gen: v7x
topology: tpu7x:2x2x1
jax: 0.10.0
libtpu: 0.0.40
codegen_flags: <defaults>
</compile_context>

<pallas_src>
import functools

import numpy as np
import jax
import jax.numpy as jnp
from jax.experimental import pallas as pl
from jax.experimental.pallas import tpu as pltpu


PAD = 8  # zero border (>= K//2) around the image inside the VMEM scratch


def _residual_block_kernel(w1_ref, b1_ref, w2_ref, b2_ref, x_ref, o_ref, xpad_ref,
                           *, C, K, H, W, negative_slope):
    """One grid step = one image (all channels), fully fused residual block.

    w1_ref/w2_ref : (C*C*K*K,) conv weights in SMEM, layout [co, ci, ky, kx].
    b1_ref/b2_ref : (C,) biases in SMEM.
    x_ref         : (C, H, W) input image in VMEM.
    o_ref         : (C, H, W) output image in VMEM.
    xpad_ref      : (C, H + 2*PAD, W + 2*PAD) f32 zero-bordered VMEM scratch.
    """
    P = K // 2
    f32 = jnp.float32

    # ---- zero-bordered copy of x (border re-zeroed every step; it's tiny) ----
    xpad_ref[...] = jnp.zeros_like(xpad_ref)
    xpad_ref[:, PAD:PAD + H, PAD:PAD + W] = x_ref[...].astype(f32)

    def conv(w_ref, b_ref):
        # Direct conv: scalar SMEM weight * shifted VMEM slice, MAC on the VPU.
        accs = [jnp.zeros((H, W), f32) + b_ref[co] for co in range(C)]
        for ci in range(C):
            for ky in range(K):
                r0 = PAD - P + ky
                for kx in range(K):
                    l0 = PAD - P + kx
                    s = xpad_ref[ci, r0:r0 + H, l0:l0 + W]
                    for co in range(C):
                        w = w_ref[((co * C + ci) * K + ky) * K + kx]
                        accs[co] = accs[co] + w * s
        return accs

    # ---- conv1 + activation --------------------------------------------------
    h = conv(w1_ref, b1_ref)
    if negative_slope == 0.0:
        h = [jnp.maximum(v, 0.0) for v in h]
    else:
        h = [jnp.where(v >= 0.0, v, negative_slope * v) for v in h]

    # ---- write activation back into the (still zero-bordered) scratch -------
    for co in range(C):
        xpad_ref[co, PAD:PAD + H, PAD:PAD + W] = h[co]

    # ---- conv2 + residual ----------------------------------------------------
    out = conv(w2_ref, b2_ref)
    for co in range(C):
        o_ref[co] = (out[co] + x_ref[co].astype(f32)).astype(o_ref.dtype)


def residual_block(x, w1, b1, w2, b2, *, act="relu"):
    """out = conv2(act(conv1(x))) + x with 'same' KxK convs.  NCHW like PyTorch.

    x : (N, C, H, W);  w1, w2 : (C, C, K, K);  b1, b2 : (C,)
    stride=1, dilation=1, padding=K//2 assumed (required for the residual add).
    """
    N, C, H, W = x.shape
    K = w1.shape[-1]
    assert w1.shape == (C, C, K, K) and w2.shape == (C, C, K, K)
    assert b1.shape == (C,) and b2.shape == (C,)
    assert K % 2 == 1 and K // 2 <= PAD, "odd K with padding = K // 2 expected"
    negative_slope = 0.0 if act == "relu" else 0.1

    kernel = functools.partial(
        _residual_block_kernel, C=C, K=K, H=H, W=W, negative_slope=negative_slope)

    smem_spec = pl.BlockSpec(memory_space=pltpu.MemorySpace.SMEM)
    img_spec = pl.BlockSpec((None, C, H, W), lambda n: (n, 0, 0, 0))

    return pl.pallas_call(
        kernel,
        out_shape=jax.ShapeDtypeStruct((N, C, H, W), x.dtype),
        grid=(N,),
        in_specs=[smem_spec, smem_spec, smem_spec, smem_spec, img_spec],
        out_specs=img_spec,
        scratch_shapes=[
            pltpu.VMEM((C, H + 2 * PAD, W + 2 * PAD), jnp.float32),
        ],
        compiler_params=pltpu.CompilerParams(
            dimension_semantics=("parallel",),
        ),
    )(
        w1.astype(jnp.float32).reshape(-1),
        b1.astype(jnp.float32),
        w2.astype(jnp.float32).reshape(-1),
        b2.astype(jnp.float32),
        x,
    )


def _reference(x, w1, b1, w2, b2, *, act="relu"):
    """Pure-JAX (XLA) reference matching PyTorch ResidualBlock.forward."""
    def conv(h, w, b):
        p = w.shape[-1] // 2
        y = jax.lax.conv_general_dilated(
            h, w, window_strides=(1, 1), padding=((p, p), (p, p)),
            dimension_numbers=("NCHW", "OIHW", "NCHW"),
            precision=jax.lax.Precision.HIGHEST)
        return y + b[None, :, None, None]

    h = conv(x, w1, b1)
    h = jnp.maximum(h, 0.0) if act == "relu" else jnp.where(h >= 0.0, h, 0.1 * h)
    return conv(h, w2, b2) + x


if __name__ == "__main__":
    nf, K = 4, 3
    N, H, W = 2, 16, 16

    key = jax.random.PRNGKey(0)
    kx, k1, kb1, k2, kb2 = jax.random.split(key, 5)
    x = jax.random.normal(kx, (N, nf, H, W), dtype=jnp.float32)
    w1 = jax.random.normal(k1, (nf, nf, K, K), dtype=jnp.float32) * 0.1
    b1 = jax.random.normal(kb1, (nf,), dtype=jnp.float32) * 0.1
    w2 = jax.random.normal(k2, (nf, nf, K, K), dtype=jnp.float32) * 0.1
    b2 = jax.random.normal(kb2, (nf,), dtype=jnp.float32) * 0.1

    for act in ("relu", "leaky"):
        y = residual_block(x, w1, b1, w2, b2, act=act)
        jax.block_until_ready(y)
        ref = _reference(x, w1, b1, w2, b2, act=act)
        assert y.shape == ref.shape == (N, nf, H, W)
        np.testing.assert_allclose(np.asarray(y), np.asarray(ref),
                                   rtol=2e-5, atol=2e-5)

    print("KERNEL_OK")
</pallas_src>

<mosaic_0001>
module attributes {stable_mosaic.version = 11 : i64} {
  func.func @_residual_block_kernel(%arg0: i32, %arg1: memref<144xf32, #tpu.memory_space<smem>>, %arg2: memref<4xf32, #tpu.memory_space<smem>>, %arg3: memref<144xf32, #tpu.memory_space<smem>>, %arg4: memref<4xf32, #tpu.memory_space<smem>>, %arg5: memref<1x4x16x16xf32, #tpu.memory_space<vmem>>, %arg6: memref<1x4x16x16xf32, #tpu.memory_space<vmem>>, %arg7: memref<4x32x32xf32, #tpu.memory_space<vmem>>) attributes {dimension_semantics = [#tpu.dimension_semantics<parallel>], iteration_bounds = array<i64: 2>, scalar_prefetch = 0 : i64, scratch_operands = 1 : i64, tpu.core_type = #tpu.core_type<tc>, window_params = [{transform_indices = @transform_0, window_bounds = array<i64: 144>}, {transform_indices = @transform_1, window_bounds = array<i64: 4>}, {transform_indices = @transform_2, window_bounds = array<i64: 144>}, {transform_indices = @transform_3, window_bounds = array<i64: 4>}, {transform_indices = @transform_4, window_bounds = array<i64: 1, 4, 16, 16>}, {transform_indices = @transform_5, window_bounds = array<i64: 1, 4, 16, 16>}]} {
    %cst = arith.constant 0.000000e+00 : f32
    %0 = vector.broadcast %cst : f32 to vector<4x32x32xf32>
    %c0 = arith.constant 0 : index
    %c0_0 = arith.constant 0 : index
    %c0_1 = arith.constant 0 : index
    %1 = vector.load %arg7[%c0, %c0_0, %c0_1] : memref<4x32x32xf32, #tpu.memory_space<vmem>>, vector<4x32x32xf32>
    tpu.vector_store %arg7[%c0, %c0_0, %c0_1], %0 {strides = array<i32>} : memref<4x32x32xf32, #tpu.memory_space<vmem>>, vector<4x32x32xf32>,
    %c0_2 = arith.constant 0 : index
    %c0_3 = arith.constant 0 : index
    %c0_4 = arith.constant 0 : index
    %c0_5 = arith.constant 0 : index
    %2 = vector.load %arg5[%c0_2, %c0_3, %c0_4, %c0_5] : memref<1x4x16x16xf32, #tpu.memory_space<vmem>>, vector<1x4x16x16xf32>
    %3 = vector.shape_cast %2 : vector<1x4x16x16xf32> to vector<4x16x16xf32>
    %c0_6 = arith.constant 0 : index
    %c8 = arith.constant 8 : index
    %c8_7 = arith.constant 8 : index
    %4 = vector.load %arg7[%c0_6, %c8, %c8_7] : memref<4x32x32xf32, #tpu.memory_space<vmem>>, vector<4x16x16xf32>
    tpu.vector_store %arg7[%c0_6, %c8, %c8_7], %3 {strides = array<i32>} : memref<4x32x32xf32, #tpu.memory_space<vmem>>, vector<4x16x16xf32>,
    %cst_8 = arith.constant 0.000000e+00 : f32
    %5 = vector.broadcast %cst_8 : f32 to vector<16x16xf32>
    %c0_9 = arith.constant 0 : index
    %6 = memref.load %arg2[%c0_9] : memref<4xf32, #tpu.memory_space<smem>>
    %7 = vector.broadcast %6 : f32 to vector<16x16xf32>
    %8 = arith.addf %5, %7 : vector<16x16xf32>
    %cst_10 = arith.constant 0.000000e+00 : f32
    %9 = vector.broadcast %cst_10 : f32 to vector<16x16xf32>
    %c1 = arith.constant 1 : index
    %10 = memref.load %arg2[%c1] : memref<4xf32, #tpu.memory_space<smem>>
    %11 = vector.broadcast %10 : f32 to vector<16x16xf32>
    %12 = arith.addf %9, %11 : vector<16x16xf32>
    %cst_11 = arith.constant 0.000000e+00 : f32
    %13 = vector.broadcast %cst_11 : f32 to vector<16x16xf32>
    %c2 = arith.constant 2 : index
    %14 = memref.load %arg2[%c2] : memref<4xf32, #tpu.memory_space<smem>>
    %15 = vector.broadcast %14 : f32 to vector<16x16xf32>
    %16 = arith.addf %13, %15 : vector<16x16xf32>
    %cst_12 = arith.constant 0.000000e+00 : f32
    %17 = vector.broadcast %cst_12 : f32 to vector<16x16xf32>
    %c3 = arith.constant 3 : index
    %18 = memref.load %arg2[%c3] : memref<4xf32, #tpu.memory_space<smem>>
    %19 = vector.broadcast %18 : f32 to vector<16x16xf32>
    %20 = arith.addf %17, %19 : vector<16x16xf32>
    %c0_13 = arith.constant 0 : index
    %c7 = arith.constant 7 : index
    %c7_14 = arith.constant 7 : index
    %21 = vector.load %arg7[%c0_13, %c7, %c7_14] : memref<4x32x32xf32, #tpu.memory_space<vmem>>, vector<1x16x16xf32>
    %22 = vector.shape_cast %21 : vector<1x16x16xf32> to vector<16x16xf32>
    %c0_15 = arith.constant 0 : index
    %23 = memref.load %arg1[%c0_15] : memref<144xf32, #tpu.memory_space<smem>>
    %24 = vector.broadcast %23 : f32 to vector<16x16xf32>
    %25 = arith.mulf %24, %22 : vector<16x16xf32>
    %26 = arith.addf %8, %25 : vector<16x16xf32>
    %c36 = arith.constant 36 : index
    %27 = memref.load %arg1[%c36] : memref<144xf32, #tpu.memory_space<smem>>
    %28 = vector.broadcast %27 : f32 to vector<16x16xf32>
    %29 = arith.mulf %28, %22 : vector<16x16xf32>
    %30 = arith.addf %12, %29 : vector<16x16xf32>
    %c72 = arith.constant 72 : index
    %31 = memref.load %arg1[%c72] : memref<144xf32, #tpu.memory_space<smem>>
    %32 = vector.broadcast %31 : f32 to vector<16x16xf32>
    %33 = arith.mulf %32, %22 : vector<16x16xf32>
    %34 = arith.addf %16, %33 : vector<16x16xf32>
    %c108 = arith.constant 108 : index
    %35 = memref.load %arg1[%c108] : memref<144xf32, #tpu.memory_space<smem>>
    %36 = vector.broadcast %35 : f32 to vector<16x16xf32>
    %37 = arith.mulf %36, %22 : vector<16x16xf32>
    %38 = arith.addf %20, %37 : vector<16x16xf32>
    %c0_16 = arith.constant 0 : index
    %c7_17 = arith.constant 7 : index
    %c8_18 = arith.constant 8 : index
    %39 = vector.load %arg7[%c0_16, %c7_17, %c8_18] : memref<4x32x32xf32, #tpu.memory_space<vmem>>, vector<1x16x16xf32>
    %40 = vector.shape_cast %39 : vector<1x16x16xf32> to vector<16x16xf32>
    %c1_19 = arith.constant 1 : index
    %41 = memref.load %arg1[%c1_19] : memref<144xf32, #tpu.memory_space<smem>>
    %42 = vector.broadcast %41 : f32 to vector<16x16xf32>
    %43 = arith.mulf %42, %40 : vector<16x16xf32>
    %44 = arith.addf %26, %43 : vector<16x16xf32>
    %c37 = arith.constant 37 : index
    %45 = memref.load %arg1[%c37] : memref<144xf32, #tpu.memory_space<smem>>
    %46 = vector.broadcast %45 : f32 to vector<16x16xf32>
    %47 = arith.mulf %46, %40 : vector<16x16xf32>
    %48 = arith.addf %30, %47 : vector<16x16xf32>
    %c73 = arith.constant 73 : index
    %49 = memref.load %arg1[%c73] : memref<144xf32, #tpu.memory_space<smem>>
    %50 = vector.broadcast %49 : f32 to vector<16x16xf32>
    %51 = arith.mulf %50, %40 : vector<16x16xf32>
    %52 = arith.addf %34, %51 : vector<16x16xf32>
    %c109 = arith.constant 109 : index
    %53 = memref.load %arg1[%c109] : memref<144xf32, #tpu.memory_space<smem>>
    %54 = vector.broadcast %53 : f32 to vector<16x16xf32>
    %55 = arith.mulf %54, %40 : vector<16x16xf32>
    %56 = arith.addf %38, %55 : vector<16x16xf32>
    %c0_20 = arith.constant 0 : index
    %c7_21 = arith.constant 7 : index
    %c9 = arith.constant 9 : index
    %57 = vector.load %arg7[%c0_20, %c7_21, %c9] : memref<4x32x32xf32, #tpu.memory_space<vmem>>, vector<1x16x16xf32>
    %58 = vector.shape_cast %57 : vector<1x16x16xf32> to vector<16x16xf32>
    %c2_22 = arith.constant 2 : index
    %59 = memref.load %arg1[%c2_22] : memref<144xf32, #tpu.memory_space<smem>>
    %60 = vector.broadcast %59 : f32 to vector<16x16xf32>
    %61 = arith.mulf %60, %58 : vector<16x16xf32>
    %62 = arith.addf %44, %61 : vector<16x16xf32>
    %c38 = arith.constant 38 : index
    %63 = memref.load %arg1[%c38] : memref<144xf32, #tpu.memory_space<smem>>
    %64 = vector.broadcast %63 : f32 to vector<16x16xf32>
    %65 = arith.mulf %64, %58 : vector<16x16xf32>
    %66 = arith.addf %48, %65 : vector<16x16xf32>
    %c74 = arith.constant 74 : index
    %67 = memref.load %arg1[%c74] : memref<144xf32, #tpu.memory_space<smem>>
    %68 = vector.broadcast %67 : f32 to vector<16x16xf32>
    %69 = arith.mulf %68, %58 : vector<16x16xf32>
    %70 = arith.addf %52, %69 : vector<16x16xf32>
    %c110 = arith.constant 110 : index
    %71 = memref.load %arg1[%c110] : memref<144xf32, #tpu.memory_space<smem>>
    %72 = vector.broadcast %71 : f32 to vector<16x16xf32>
    %73 = arith.mulf %72, %58 : vector<16x16xf32>
    %74 = arith.addf %56, %73 : vector<16x16xf32>
    %c0_23 = arith.constant 0 : index
    %c8_24 = arith.constant 8 : index
    %c7_25 = arith.constant 7 : index
    %75 = vector.load %arg7[%c0_23, %c8_24, %c7_25] : memref<4x32x32xf32, #tpu.memory_space<vmem>>, vector<1x16x16xf32>
    %76 = vector.shape_cast %75 : vector<1x16x16xf32> to vector<16x16xf32>
    %c3_26 = arith.constant 3 : index
    %77 = memref.load %arg1[%c3_26] : memref<144xf32, #tpu.memory_space<smem>>
    %78 = vector.broadcast %77 : f32 to vector<16x16xf32>
    %79 = arith.mulf %78, %76 : vector<16x16xf32>
    %80 = arith.addf %62, %79 : vector<16x16xf32>
    %c39 = arith.constant 39 : index
    %81 = memref.load %arg1[%c39] : memref<144xf32, #tpu.memory_space<smem>>
    %82 = vector.broadcast %81 : f32 to vector<16x16xf32>
    %83 = arith.mulf %82, %76 : vector<16x16xf32>
    %84 = arith.addf %66, %83 : vector<16x16xf32>
    %c75 = arith.constant 75 : index
    %85 = memref.load %arg1[%c75] : memref<144xf32, #tpu.memory_space<smem>>
    %86 = vector.broadcast %85 : f32 to vector<16x16xf32>
    %87 = arith.mulf %86, %76 : vector<16x16xf32>
    %88 = arith.addf %70, %87 : vector<16x16xf32>
    %c111 = arith.constant 111 : index
    %89 = memref.load %arg1[%c111] : memref<144xf32, #tpu.memory_space<smem>>
    %90 = vector.broadcast %89 : f32 to vector<16x16xf32>
    %91 = arith.mulf %90, %76 : vector<16x16xf32>
    %92 = arith.addf %74, %91 : vector<16x16xf32>
    %c0_27 = arith.constant 0 : index
    %c8_28 = arith.constant 8 : index
    %c8_29 = arith.constant 8 : index
    %93 = vector.load %arg7[%c0_27, %c8_28, %c8_29] : memref<4x32x32xf32, #tpu.memory_space<vmem>>, vector<1x16x16xf32>
    %94 = vector.shape_cast %93 : vector<1x16x16xf32> to vector<16x16xf32>
    %c4 = arith.constant 4 : index
    %95 = memref.load %arg1[%c4] : memref<144xf32, #tpu.memory_space<smem>>
    %96 = vector.broadcast %95 : f32 to vector<16x16xf32>
    %97 = arith.mulf %96, %94 : vector<16x16xf32>
    %98 = arith.addf %80, %97 : vector<16x16xf32>
    %c40 = arith.constant 40 : index
    %99 = memref.load %arg1[%c40] : memref<144xf32, #tpu.memory_space<smem>>
    %100 = vector.broadcast %99 : f32 to vector<16x16xf32>
    %101 = arith.mulf %100, %94 : vector<16x16xf32>
    %102 = arith.addf %84, %101 : vector<16x16xf32>
    %c76 = arith.constant 76 : index
    %103 = memref.load %arg1[%c76] : memref<144xf32, #tpu.memory_space<smem>>
    %104 = vector.broadcast %103 : f32 to vector<16x16xf32>
    %105 = arith.mulf %104, %94 : vector<16x16xf32>
    %106 = arith.addf %88, %105 : vector<16x16xf32>
    %c112 = arith.constant 112 : index
    %107 = memref.load %arg1[%c112] : memref<144xf32, #tpu.memory_space<smem>>
    %108 = vector.broadcast %107 : f32 to vector<16x16xf32>
    %109 = arith.mulf %108, %94 : vector<16x16xf32>
    %110 = arith.addf %92, %109 : vector<16x16xf32>
    %c0_30 = arith.constant 0 : index
    %c8_31 = arith.constant 8 : index
    %c9_32 = arith.constant 9 : index
    %111 = vector.load %arg7[%c0_30, %c8_31, %c9_32] : memref<4x32x32xf32, #tpu.memory_space<vmem>>, vector<1x16x16xf32>
    %112 = vector.shape_cast %111 : vector<1x16x16xf32> to vector<16x16xf32>
    %c5 = arith.constant 5 : index
    %113 = memref.load %arg1[%c5] : memref<144xf32, #tpu.memory_space<smem>>
    %114 = vector.broadcast %113 : f32 to vector<16x16xf32>
    %115 = arith.mulf %114, %112 : vector<16x16xf32>
    %116 = arith.addf %98, %115 : vector<16x16xf32>
    %c41 = arith.constant 41 : index
    %117 = memref.load %arg1[%c41] : memref<144xf32, #tpu.memory_space<smem>>
    %118 = vector.broadcast %117 : f32 to vector<16x16xf32>
    %119 = arith.mulf %118, %112 : vector<16x16xf32>
    %120 = arith.addf %102, %119 : vector<16x16xf32>
    %c77 = arith.constant 77 : index
    %121 = memref.load %arg1[%c77] : memref<144xf32, #tpu.memory_space<smem>>
    %122 = vector.broadcast %121 : f32 to vector<16x16xf32>
    %123 = arith.mulf %122, %112 : vector<16x16xf32>
    %124 = arith.addf %106, %123 : vector<16x16xf32>
    %c113 = arith.constant 113 : index
    %125 = memref.load %arg1[%c113] : memref<144xf32, #tpu.memory_space<smem>>
    %126 = vector.broadcast %125 : f32 to vector<16x16xf32>
    %127 = arith.mulf %126, %112 : vector<16x16xf32>
    %128 = arith.addf %110, %127 : vector<16x16xf32>
    %c0_33 = arith.constant 0 : index
    %c9_34 = arith.constant 9 : index
    %c7_35 = arith.constant 7 : index
    %129 = vector.load %arg7[%c0_33, %c9_34, %c7_35] : memref<4x32x32xf32, #tpu.memory_space<vmem>>, vector<1x16x16xf32>
    %130 = vector.shape_cast %129 : vector<1x16x16xf32> to vector<16x16xf32>
    %c6 = arith.constant 6 : index
    %131 = memref.load %arg1[%c6] : memref<144xf32, #tpu.memory_space<smem>>
    %132 = vector.broadcast %131 : f32 to vector<16x16xf32>
    %133 = arith.mulf %132, %130 : vector<16x16xf32>
    %134 = arith.addf %116, %133 : vector<16x16xf32>
    %c42 = arith.constant 42 : index
    %135 = memref.load %arg1[%c42] : memref<144xf32, #tpu.memory_space<smem>>
    %136 = vector.broadcast %135 : f32 to vector<16x16xf32>
    %137 = arith.mulf %136, %130 : vector<16x16xf32>
    %138 = arith.addf %120, %137 : vector<16x16xf32>
    %c78 = arith.constant 78 : index
    %139 = memref.load %arg1[%c78] : memref<144xf32, #tpu.memory_space<smem>>
    %140 = vector.broadcast %139 : f32 to vector<16x16xf32>
    %141 = arith.mulf %140, %130 : vector<16x16xf32>
    %142 = arith.addf %124, %141 : vector<16x16xf32>
    %c114 = arith.constant 114 : index
    %143 = memref.load %arg1[%c114] : memref<144xf32, #tpu.memory_space<smem>>
    %144 = vector.broadcast %143 : f32 to vector<16x16xf32>
    %145 = arith.mulf %144, %130 : vector<16x16xf32>
    %146 = arith.addf %128, %145 : vector<16x16xf32>
    %c0_36 = arith.constant 0 : index
    %c9_37 = arith.constant 9 : index
    %c8_38 = arith.constant 8 : index
    %147 = vector.load %arg7[%c0_36, %c9_37, %c8_38] : memref<4x32x32xf32, #tpu.memory_space<vmem>>, vector<1x16x16xf32>
    %148 = vector.shape_cast %147 : vector<1x16x16xf32> to vector<16x16xf32>
    %c7_39 = arith.constant 7 : index
    %149 = memref.load %arg1[%c7_39] : memref<144xf32, #tpu.memory_space<smem>>
    %150 = vector.broadcast %149 : f32 to vector<16x16xf32>
    %151 = arith.mulf %150, %148 : vector<16x16xf32>
    %152 = arith.addf %134, %151 : vector<16x16xf32>
    %c43 = arith.constant 43 : index
    %153 = memref.load %arg1[%c43] : memref<144xf32, #tpu.memory_space<smem>>
    %154 = vector.broadcast %153 : f32 to vector<16x16xf32>
    %155 = arith.mulf %154, %148 : vector<16x16xf32>
    %156 = arith.addf %138, %155 : vector<16x16xf32>
    %c79 = arith.constant 79 : index
    %157 = memref.load %arg1[%c79] : memref<144xf32, #tpu.memory_space<smem>>
    %158 = vector.broadcast %157 : f32 to vector<16x16xf32>
    %159 = arith.mulf %158, %148 : vector<16x16xf32>
    %160 = arith.addf %142, %159 : vector<16x16xf32>
    %c115 = arith.constant 115 : index
    %161 = memref.load %arg1[%c115] : memref<144xf32, #tpu.memory_space<smem>>
    %162 = vector.broadcast %161 : f32 to vector<16x16xf32>
    %163 = arith.mulf %162, %148 : vector<16x16xf32>
    %164 = arith.addf %146, %163 : vector<16x16xf32>
    %c0_40 = arith.constant 0 : index
    %c9_41 = arith.constant 9 : index
    %c9_42 = arith.constant 9 : index
    %165 = vector.load %arg7[%c0_40, %c9_41, %c9_42] : memref<4x32x32xf32, #tpu.memory_space<vmem>>, vector<1x16x16xf32>
    %166 = vector.shape_cast %165 : vector<1x16x16xf32> to vector<16x16xf32>
    %c8_43 = arith.constant 8 : index
    %167 = memref.load %arg1[%c8_43] : memref<144xf32, #tpu.memory_space<smem>>
    %168 = vector.broadcast %167 : f32 to vector<16x16xf32>
    %169 = arith.mulf %168, %166 : vector<16x16xf32>
    %170 = arith.addf %152, %169 : vector<16x16xf32>
    %c44 = arith.constant 44 : index
    %171 = memref.load %arg1[%c44] : memref<144xf32, #tpu.memory_space<smem>>
    %172 = vector.broadcast %171 : f32 to vector<16x16xf32>
    %173 = arith.mulf %172, %166 : vector<16x16xf32>
    %174 = arith.addf %156, %173 : vector<16x16xf32>
    %c80 = arith.constant 80 : index
    %175 = memref.load %arg1[%c80] : memref<144xf32, #tpu.memory_space<smem>>
    %176 = vector.broadcast %175 : f32 to vector<16x16xf32>
    %177 = arith.mulf %176, %166 : vector<16x16xf32>
    %178 = arith.addf %160, %177 : vector<16x16xf32>
    %c116 = arith.constant 116 : index
    %179 = memref.load %arg1[%c116] : memref<144xf32, #tpu.memory_space<smem>>
    %180 = vector.broadcast %179 : f32 to vector<16x16xf32>
    %181 = arith.mulf %180, %166 : vector<16x16xf32>
    %182 = arith.addf %164, %181 : vector<16x16xf32>
    %c1_44 = arith.constant 1 : index
    %c7_45 = arith.constant 7 : index
    %c7_46 = arith.constant 7 : index
    %183 = vector.load %arg7[%c1_44, %c7_45, %c7_46] : memref<4x32x32xf32, #tpu.memory_space<vmem>>, vector<1x16x16xf32>
    %184 = vector.shape_cast %183 : vector<1x16x16xf32> to vector<16x16xf32>
    %c9_47 = arith.constant 9 : index
    %185 = memref.load %arg1[%c9_47] : memref<144xf32, #tpu.memory_space<smem>>
    %186 = vector.broadcast %185 : f32 to vector<16x16xf32>
    %187 = arith.mulf %186, %184 : vector<16x16xf32>
    %188 = arith.addf %170, %187 : vector<16x16xf32>
    %c45 = arith.constant 45 : index
    %189 = memref.load %arg1[%c45] : memref<144xf32, #tpu.memory_space<smem>>
    %190 = vector.broadcast %189 : f32 to vector<16x16xf32>
    %191 = arith.mulf %190, %184 : vector<16x16xf32>
    %192 = arith.addf %174, %191 : vector<16x16xf32>
    %c81 = arith.constant 81 : index
    %193 = memref.load %arg1[%c81] : memref<144xf32, #tpu.memory_space<smem>>
    %194 = vector.broadcast %193 : f32 to vector<16x16xf32>
    %195 = arith.mulf %194, %184 : vector<16x16xf32>
    %196 = arith.addf %178, %195 : vector<16x16xf32>
    %c117 = arith.constant 117 : index
    %197 = memref.load %arg1[%c117] : memref<144xf32, #tpu.memory_space<smem>>
    %198 = vector.broadcast %197 : f32 to vector<16x16xf32>
    %199 = arith.mulf %198, %184 : vector<16x16xf32>
    %200 = arith.addf %182, %199 : vector<16x16xf32>
    %c1_48 = arith.constant 1 : index
    %c7_49 = arith.constant 7 : index
    %c8_50 = arith.constant 8 : index
    %201 = vector.load %arg7[%c1_48, %c7_49, %c8_50] : memref<4x32x32xf32, #tpu.memory_space<vmem>>, vector<1x16x16xf32>
    %202 = vector.shape_cast %201 : vector<1x16x16xf32> to vector<16x16xf32>
    %c10 = arith.constant 10 : index
    %203 = memref.load %arg1[%c10] : memref<144xf32, #tpu.memory_space<smem>>
    %204 = vector.broadcast %203 : f32 to vector<16x16xf32>
    %205 = arith.mulf %204, %202 : vector<16x16xf32>
    %206 = arith.addf %188, %205 : vector<16x16xf32>
    %c46 = arith.constant 46 : index
    %207 = memref.load %arg1[%c46] : memref<144xf32, #tpu.memory_space<smem>>
    %208 = vector.broadcast %207 : f32 to vector<16x16xf32>
    %209 = arith.mulf %208, %202 : vector<16x16xf32>
    %210 = arith.addf %192, %209 : vector<16x16xf32>
    %c82 = arith.constant 82 : index
    %211 = memref.load %arg1[%c82] : memref<144xf32, #tpu.memory_space<smem>>
    %212 = vector.broadcast %211 : f32 to vector<16x16xf32>
    %213 = arith.mulf %212, %202 : vector<16x16xf32>
    %214 = arith.addf %196, %213 : vector<16x16xf32>
    %c118 = arith.constant 118 : index
    %215 = memref.load %arg1[%c118] : memref<144xf32, #tpu.memory_space<smem>>
    %216 = vector.broadcast %215 : f32 to vector<16x16xf32>
    %217 = arith.mulf %216, %202 : vector<16x16xf32>
    %218 = arith.addf %200, %217 : vector<16x16xf32>
    %c1_51 = arith.constant 1 : index
    %c7_52 = arith.constant 7 : index
    %c9_53 = arith.constant 9 : index
    %219 = vector.load %arg7[%c1_51, %c7_52, %c9_53] : memref<4x32x32xf32, #tpu.memory_space<vmem>>, vector<1x16x16xf32>
    %220 = vector.shape_cast %219 : vector<1x16x16xf32> to vector<16x16xf32>
    %c11 = arith.constant 11 : index
    %221 = memref.load %arg1[%c11] : memref<144xf32, #tpu.memory_space<smem>>
    %222 = vector.broadcast %221 : f32 to vector<16x16xf32>
    %223 = arith.mulf %222, %220 : vector<16x16xf32>
    %224 = arith.addf %206, %223 : vector<16x16xf32>
    %c47 = arith.constant 47 : index
    %225 = memref.load %arg1[%c47] : memref<144xf32, #tpu.memory_space<smem>>
    %226 = vector.broadcast %225 : f32 to vector<16x16xf32>
    %227 = arith.mulf %226, %220 : vector<16x16xf32>
    %228 = arith.addf %210, %227 : vector<16x16xf32>
    %c83 = arith.constant 83 : index
    %229 = memref.load %arg1[%c83] : memref<144xf32, #tpu.memory_space<smem>>
    %230 = vector.broadcast %229 : f32 to vector<16x16xf32>
    %231 = arith.mulf %230, %220 : vector<16x16xf32>
    %232 = arith.addf %214, %231 : vector<16x16xf32>
    %c119 = arith.constant 119 : index
    %233 = memref.load %arg1[%c119] : memref<144xf32, #tpu.memory_space<smem>>
    %234 = vector.broadcast %233 : f32 to vector<16x16xf32>
    %235 = arith.mulf %234, %220 : vector<16x16xf32>
    %236 = arith.addf %218, %235 : vector<16x16xf32>
    %c1_54 = arith.constant 1 : index
    %c8_55 = arith.constant 8 : index
    %c7_56 = arith.constant 7 : index
    %237 = vector.load %arg7[%c1_54, %c8_55, %c7_56] : memref<4x32x32xf32, #tpu.memory_space<vmem>>, vector<1x16x16xf32>
    %238 = vector.shape_cast %237 : vector<1x16x16xf32> to vector<16x16xf32>
    %c12 = arith.constant 12 : index
    %239 = memref.load %arg1[%c12] : memref<144xf32, #tpu.memory_space<smem>>
    %240 = vector.broadcast %239 : f32 to vector<16x16xf32>
    %241 = arith.mulf %240, %238 : vector<16x16xf32>
    %242 = arith.addf %224, %241 : vector<16x16xf32>
    %c48 = arith.constant 48 : index
    %243 = memref.load %arg1[%c48] : memref<144xf32, #tpu.memory_space<smem>>
    %244 = vector.broadcast %243 : f32 to vector<16x16xf32>
    %245 = arith.mulf %244, %238 : vector<16x16xf32>
    %246 = arith.addf %228, %245 : vector<16x16xf32>
    %c84 = arith.constant 84 : index
    %247 = memref.load %arg1[%c84] : memref<144xf32, #tpu.memory_space<smem>>
    %248 = vector.broadcast %247 : f32 to vector<16x16xf32>
    %249 = arith.mulf %248, %238 : vector<16x16xf32>
    %250 = arith.addf %232, %249 : vector<16x16xf32>
    %c120 = arith.constant 120 : index
    %251 = memref.load %arg1[%c120] : memref<144xf32, #tpu.memory_space<smem>>
    %252 = vector.broadcast %251 : f32 to vector<16x16xf32>
    %253 = arith.mulf %252, %238 : vector<16x16xf32>
    %254 = arith.addf %236, %253 : vector<16x16xf32>
    %c1_57 = arith.constant 1 : index
    %c8_58 = arith.constant 8 : index
    %c8_59 = arith.constant 8 : index
    %255 = vector.load %arg7[%c1_57, %c8_58, %c8_59] : memref<4x32x32xf32, #tpu.memory_space<vmem>>, vector<1x16x16xf32>
    %256 = vector.shape_cast %255 : vector<1x16x16xf32> to vector<16x16xf32>
    %c13 = arith.constant 13 : index
    %257 = memref.load %arg1[%c13] : memref<144xf32, #tpu.memory_space<smem>>
    %258 = vector.broadcast %257 : f32 to vector<16x16xf32>
    %259 = arith.mulf %258, %256 : vector<16x16xf32>
    %260 = arith.addf %242, %259 : vector<16x16xf32>
    %c49 = arith.constant 49 : index
    %261 = memref.load %arg1[%c49] : memref<144xf32, #tpu.memory_space<smem>>
    %262 = vector.broadcast %261 : f32 to vector<16x16xf32>
    %263 = arith.mulf %262, %256 : vector<16x16xf32>
    %264 = arith.addf %246, %263 : vector<16x16xf32>
    %c85 = arith.constant 85 : index
    %265 = memref.load %arg1[%c85] : memref<144xf32, #tpu.memory_space<smem>>
    %266 = vector.broadcast %265 : f32 to vector<16x16xf32>
    %267 = arith.mulf %266, %256 : vector<16x16xf32>
    %268 = arith.addf %250, %267 : vector<16x16xf32>
    %c121 = arith.constant 121 : index
    %269 = memref.load %arg1[%c121] : memref<144xf32, #tpu.memory_space<smem>>
    %270 = vector.broadcast %269 : f32 to vector<16x16xf32>
    %271 = arith.mulf %270, %256 : vector<16x16xf32>
    %272 = arith.addf %254, %271 : vector<16x16xf32>
    %c1_60 = arith.constant 1 : index
    %c8_61 = arith.constant 8 : index
    %c9_62 = arith.constant 9 : index
    %273 = vector.load %arg7[%c1_60, %c8_61, %c9_62] : memref<4x32x32xf32, #tpu.memory_space<vmem>>, vector<1x16x16xf32>
    %274 = vector.shape_cast %273 : vector<1x16x16xf32> to vector<16x16xf32>
    %c14 = arith.constant 14 : index
    %275 = memref.load %arg1[%c14] : memref<144xf32, #tpu.memory_space<smem>>
    %276 = vector.broadcast %275 : f32 to vector<16x16xf32>
    %277 = arith.mulf %276, %274 : vector<16x16xf32>
    %278 = arith.addf %260, %277 : vector<16x16xf32>
    %c50 = arith.constant 50 : index
    %279 = memref.load %arg1[%c50] : memref<144xf32, #tpu.memory_space<smem>>
    %280 = vector.broadcast %279 : f32 to vector<16x16xf32>
    %281 = arith.mulf %280, %274 : vector<16x16xf32>
    %282 = arith.addf %264, %281 : vector<16x16xf32>
    %c86 = arith.constant 86 : index
    %283 = memref.load %arg1[%c86] : memref<144xf32, #tpu.memory_space<smem>>
    %284 = vector.broadcast %283 : f32 to vector<16x16xf32>
    %285 = arith.mulf %284, %274 : vector<16x16xf32>
    %286 = arith.addf %268, %285 : vector<16x16xf32>
    %c122 = arith.constant 122 : index
    %287 = memref.load %arg1[%c122] : memref<144xf32, #tpu.memory_space<smem>>
    %288 = vector.broadcast %287 : f32 to vector<16x16xf32>
    %289 = arith.mulf %288, %274 : vector<16x16xf32>
    %290 = arith.addf %272, %289 : vector<16x16xf32>
    %c1_63 = arith.constant 1 : index
    %c9_64 = arith.constant 9 : index
    %c7_65 = arith.constant 7 : index
    %291 = vector.load %arg7[%c1_63, %c9_64, %c7_65] : memref<4x32x32xf32, #tpu.memory_space<vmem>>, vector<1x16x16xf32>
    %292 = vector.shape_cast %291 : vector<1x16x16xf32> to vector<16x16xf32>
    %c15 = arith.constant 15 : index
    %293 = memref.load %arg1[%c15] : memref<144xf32, #tpu.memory_space<smem>>
    %294 = vector.broadcast %293 : f32 to vector<16x16xf32>
    %295 = arith.mulf %294, %292 : vector<16x16xf32>
    %296 = arith.addf %278, %295 : vector<16x16xf32>
    %c51 = arith.constant 51 : index
    %297 = memref.load %arg1[%c51] : memref<144xf32, #tpu.memory_space<smem>>
    %298 = vector.broadcast %297 : f32 to vector<16x16xf32>
    %299 = arith.mulf %298, %292 : vector<16x16xf32>
    %300 = arith.addf %282, %299 : vector<16x16xf32>
    %c87 = arith.constant 87 : index
    %301 = memref.load %arg1[%c87] : memref<144xf32, #tpu.memory_space<smem>>
    %302 = vector.broadcast %301 : f32 to vector<16x16xf32>
    %303 = arith.mulf %302, %292 : vector<16x16xf32>
    %304 = arith.addf %286, %303 : vector<16x16xf32>
    %c123 = arith.constant 123 : index
    %305 = memref.load %arg1[%c123] : memref<144xf32, #tpu.memory_space<smem>>
    %306 = vector.broadcast %305 : f32 to vector<16x16xf32>
    %307 = arith.mulf %306, %292 : vector<16x16xf32>
    %308 = arith.addf %290, %307 : vector<16x16xf32>
    %c1_66 = arith.constant 1 : index
    %c9_67 = arith.constant 9 : index
    %c8_68 = arith.constant 8 : index
    %309 = vector.load %arg7[%c1_66, %c9_67, %c8_68] : memref<4x32x32xf32, #tpu.memory_space<vmem>>, vector<1x16x16xf32>
    %310 = vector.shape_cast %309 : vector<1x16x16xf32> to vector<16x16xf32>
    %c16 = arith.constant 16 : index
    %311 = memref.load %arg1[%c16] : memref<144xf32, #tpu.memory_space<smem>>
    %312 = vector.broadcast %311 : f32 to vector<16x16xf32>
    %313 = arith.mulf %312, %310 : vector<16x16xf32>
    %314 = arith.addf %296, %313 : vector<16x16xf32>
    %c52 = arith.constant 52 : index
    %315 = memref.load %arg1[%c52] : memref<144xf32, #tpu.memory_space<smem>>
    %316 = vector.broadcast %315 : f32 to vector<16x16xf32>
    %317 = arith.mulf %316, %310 : vector<16x16xf32>
    %318 = arith.addf %300, %317 : vector<16x16xf32>
    %c88 = arith.constant 88 : index
    %319 = memref.load %arg1[%c88] : memref<144xf32, #tpu.memory_space<smem>>
    %320 = vector.broadcast %319 : f32 to vector<16x16xf32>
    %321 = arith.mulf %320, %310 : vector<16x16xf32>
    %322 = arith.addf %304, %321 : vector<16x16xf32>
    %c124 = arith.constant 124 : index
    %323 = memref.load %arg1[%c124] : memref<144xf32, #tpu.memory_space<smem>>
    %324 = vector.broadcast %323 : f32 to vector<16x16xf32>
    %325 = arith.mulf %324, %310 : vector<16x16xf32>
    %326 = arith.addf %308, %325 : vector<16x16xf32>
    %c1_69 = arith.constant 1 : index
    %c9_70 = arith.constant 9 : index
    %c9_71 = arith.constant 9 : index
    %327 = vector.load %arg7[%c1_69, %c9_70, %c9_71] : memref<4x32x32xf32, #tpu.memory_space<vmem>>, vector<1x16x16xf32>
    %328 = vector.shape_cast %327 : vector<1x16x16xf32> to vector<16x16xf32>
    %c17 = arith.constant 17 : index
    %329 = memref.load %arg1[%c17] : memref<144xf32, #tpu.memory_space<smem>>
    %330 = vector.broadcast %329 : f32 to vector<16x16xf32>
    %331 = arith.mulf %330, %328 : vector<16x16xf32>
    %332 = arith.addf %314, %331 : vector<16x16xf32>
    %c53 = arith.constant 53 : index
    %333 = memref.load %arg1[%c53] : memref<144xf32, #tpu.memory_space<smem>>
    %334 = vector.broadcast %333 : f32 to vector<16x16xf32>
    %335 = arith.mulf %334, %328 : vector<16x16xf32>
    %336 = arith.addf %318, %335 : vector<16x16xf32>
    %c89 = arith.constant 89 : index
    %337 = memref.load %arg1[%c89] : memref<144xf32, #tpu.memory_space<smem>>
    %338 = vector.broadcast %337 : f32 to vector<16x16xf32>
    %339 = arith.mulf %338, %328 : vector<16x16xf32>
    %340 = arith.addf %322, %339 : vector<16x16xf32>
    %c125 = arith.constant 125 : index
    %341 = memref.load %arg1[%c125] : memref<144xf32, #tpu.memory_space<smem>>
    %342 = vector.broadcast %341 : f32 to vector<16x16xf32>
    %343 = arith.mulf %342, %328 : vector<16x16xf32>
    %344 = arith.addf %326, %343 : vector<16x16xf32>
    %c2_72 = arith.constant 2 : index
    %c7_73 = arith.constant 7 : index
    %c7_74 = arith.constant 7 : index
    %345 = vector.load %arg7[%c2_72, %c7_73, %c7_74] : memref<4x32x32xf32, #tpu.memory_space<vmem>>, vector<1x16x16xf32>
    %346 = vector.shape_cast %345 : vector<1x16x16xf32> to vector<16x16xf32>
    %c18 = arith.constant 18 : index
    %347 = memref.load %arg1[%c18] : memref<144xf32, #tpu.memory_space<smem>>
    %348 = vector.broadcast %347 : f32 to vector<16x16xf32>
    %349 = arith.mulf %348, %346 : vector<16x16xf32>
    %350 = arith.addf %332, %349 : vector<16x16xf32>
    %c54 = arith.constant 54 : index
    %351 = memref.load %arg1[%c54] : memref<144xf32, #tpu.memory_space<smem>>
    %352 = vector.broadcast %351 : f32 to vector<16x16xf32>
    %353 = arith.mulf %352, %346 : vector<16x16xf32>
    %354 = arith.addf %336, %353 : vector<16x16xf32>
    %c90 = arith.constant 90 : index
    %355 = memref.load %arg1[%c90] : memref<144xf32, #tpu.memory_space<smem>>
    %356 = vector.broadcast %355 : f32 to vector<16x16xf32>
    %357 = arith.mulf %356, %346 : vector<16x16xf32>
    %358 = arith.addf %340, %357 : vector<16x16xf32>
    %c126 = arith.constant 126 : index
    %359 = memref.load %arg1[%c126] : memref<144xf32, #tpu.memory_space<smem>>
    %360 = vector.broadcast %359 : f32 to vector<16x16xf32>
    %361 = arith.mulf %360, %346 : vector<16x16xf32>
    %362 = arith.addf %344, %361 : vector<16x16xf32>
    %c2_75 = arith.constant 2 : index
    %c7_76 = arith.constant 7 : index
    %c8_77 = arith.constant 8 : index
    %363 = vector.load %arg7[%c2_75, %c7_76, %c8_77] : memref<4x32x32xf32, #tpu.memory_space<vmem>>, vector<1x16x16xf32>
    %364 = vector.shape_cast %363 : vector<1x16x16xf32> to vector<16x16xf32>
    %c19 = arith.constant 19 : index
    %365 = memref.load %arg1[%c19] : memref<144xf32, #tpu.memory_space<smem>>
    %366 = vector.broadcast %365 : f32 to vector<16x16xf32>
    %367 = arith.mulf %366, %364 : vector<16x16xf32>
    %368 = arith.addf %350, %367 : vector<16x16xf32>
    %c55 = arith.constant 55 : index
    %369 = memref.load %arg1[%c55] : memref<144xf32, #tpu.memory_space<smem>>
    %370 = vector.broadcast %369 : f32 to vector<16x16xf32>
    %371 = arith.mulf %370, %364 : vector<16x16xf32>
    %372 = arith.addf %354, %371 : vector<16x16xf32>
    %c91 = arith.constant 91 : index
    %373 = memref.load %arg1[%c91] : memref<144xf32, #tpu.memory_space<smem>>
    %374 = vector.broadcast %373 : f32 to vector<16x16xf32>
    %375 = arith.mulf %374, %364 : vector<16x16xf32>
    %376 = arith.addf %358, %375 : vector<16x16xf32>
    %c127 = arith.constant 127 : index
    %377 = memref.load %arg1[%c127] : memref<144xf32, #tpu.memory_space<smem>>
    %378 = vector.broadcast %377 : f32 to vector<16x16xf32>
    %379 = arith.mulf %378, %364 : vector<16x16xf32>
    %380 = arith.addf %362, %379 : vector<16x16xf32>
    %c2_78 = arith.constant 2 : index
    %c7_79 = arith.constant 7 : index
    %c9_80 = arith.constant 9 : index
    %381 = vector.load %arg7[%c2_78, %c7_79, %c9_80] : memref<4x32x32xf32, #tpu.memory_space<vmem>>, vector<1x16x16xf32>
    %382 = vector.shape_cast %381 : vector<1x16x16xf32> to vector<16x16xf32>
    %c20 = arith.constant 20 : index
    %383 = memref.load %arg1[%c20] : memref<144xf32, #tpu.memory_space<smem>>
    %384 = vector.broadcast %383 : f32 to vector<16x16xf32>
    %385 = arith.mulf %384, %382 : vector<16x16xf32>
    %386 = arith.addf %368, %385 : vector<16x16xf32>
    %c56 = arith.constant 56 : index
    %387 = memref.load %arg1[%c56] : memref<144xf32, #tpu.memory_space<smem>>
    %388 = vector.broadcast %387 : f32 to vector<16x16xf32>
    %389 = arith.mulf %388, %382 : vector<16x16xf32>
    %390 = arith.addf %372, %389 : vector<16x16xf32>
    %c92 = arith.constant 92 : index
    %391 = memref.load %arg1[%c92] : memref<144xf32, #tpu.memory_space<smem>>
    %392 = vector.broadcast %391 : f32 to vector<16x16xf32>
    %393 = arith.mulf %392, %382 : vector<16x16xf32>
    %394 = arith.addf %376, %393 : vector<16x16xf32>
    %c128 = arith.constant 128 : index
    %395 = memref.load %arg1[%c128] : memref<144xf32, #tpu.memory_space<smem>>
    %396 = vector.broadcast %395 : f32 to vector<16x16xf32>
    %397 = arith.mulf %396, %382 : vector<16x16xf32>
    %398 = arith.addf %380, %397 : vector<16x16xf32>
    %c2_81 = arith.constant 2 : index
    %c8_82 = arith.constant 8 : index
    %c7_83 = arith.constant 7 : index
    %399 = vector.load %arg7[%c2_81, %c8_82, %c7_83] : memref<4x32x32xf32, #tpu.memory_space<vmem>>, vector<1x16x16xf32>
    %400 = vector.shape_cast %399 : vector<1x16x16xf32> to vector<16x16xf32>
    %c21 = arith.constant 21 : index
    %401 = memref.load %arg1[%c21] : memref<144xf32, #tpu.memory_space<smem>>
    %402 = vector.broadcast %401 : f32 to vector<16x16xf32>
    %403 = arith.mulf %402, %400 : vector<16x16xf32>
    %404 = arith.addf %386, %403 : vector<16x16xf32>
    %c57 = arith.constant 57 : index
    %405 = memref.load %arg1[%c57] : memref<144xf32, #tpu.memory_space<smem>>
    %406 = vector.broadcast %405 : f32 to vector<16x16xf32>
    %407 = arith.mulf %406, %400 : vector<16x16xf32>
    %408 = arith.addf %390, %407 : vector<16x16xf32>
    %c93 = arith.constant 93 : index
    %409 = memref.load %arg1[%c93] : memref<144xf32, #tpu.memory_space<smem>>
    %410 = vector.broadcast %409 : f32 to vector<16x16xf32>
    %411 = arith.mulf %410, %400 : vector<16x16xf32>
    %412 = arith.addf %394, %411 : vector<16x16xf32>
    %c129 = arith.constant 129 : index
    %413 = memref.load %arg1[%c129] : memref<144xf32, #tpu.memory_space<smem>>
    %414 = vector.broadcast %413 : f32 to vector<16x16xf32>
    %415 = arith.mulf %414, %400 : vector<16x16xf32>
    %416 = arith.addf %398, %415 : vector<16x16xf32>
    %c2_84 = arith.constant 2 : index
    %c8_85 = arith.constant 8 : index
    %c8_86 = arith.constant 8 : index
    %417 = vector.load %arg7[%c2_84, %c8_85, %c8_86] : memref<4x32x32xf32, #tpu.memory_space<vmem>>, vector<1x16x16xf32>
    %418 = vector.shape_cast %417 : vector<1x16x16xf32> to vector<16x16xf32>
    %c22 = arith.constant 22 : index
    %419 = memref.load %arg1[%c22] : memref<144xf32, #tpu.memory_space<smem>>
    %420 = vector.broadcast %419 : f32 to vector<16x16xf32>
    %421 = arith.mulf %420, %418 : vector<16x16xf32>
    %422 = arith.addf %404, %421 : vector<16x16xf32>
    %c58 = arith.constant 58 : index
    %423 = memref.load %arg1[%c58] : memref<144xf32, #tpu.memory_space<smem>>
    %424 = vector.broadcast %423 : f32 to vector<16x16xf32>
    %425 = arith.mulf %424, %418 : vector<16x16xf32>
    %426 = arith.addf %408, %425 : vector<16x16xf32>
    %c94 = arith.constant 94 : index
    %427 = memref.load %arg1[%c94] : memref<144xf32, #tpu.memory_space<smem>>
    %428 = vector.broadcast %427 : f32 to vector<16x16xf32>
    %429 = arith.mulf %428, %418 : vector<16x16xf32>
    %430 = arith.addf %412, %429 : vector<16x16xf32>
    %c130 = arith.constant 130 : index
    %431 = memref.load %arg1[%c130] : memref<144xf32, #tpu.memory_space<smem>>
    %432 = vector.broadcast %431 : f32 to vector<16x16xf32>
    %433 = arith.mulf %432, %418 : vector<16x16xf32>
    %434 = arith.addf %416, %433 : vector<16x16xf32>
    %c2_87 = arith.constant 2 : index
    %c8_88 = arith.constant 8 : index
    %c9_89 = arith.constant 9 : index
    %435 = vector.load %arg7[%c2_87, %c8_88, %c9_89] : memref<4x32x32xf32, #tpu.memory_space<vmem>>, vector<1x16x16xf32>
    %436 = vector.shape_cast %435 : vector<1x16x16xf32> to vector<16x16xf32>
    %c23 = arith.constant 23 : index
    %437 = memref.load %arg1[%c23] : memref<144xf32, #tpu.memory_space<smem>>
    %438 = vector.broadcast %437 : f32 to vector<16x16xf32>
    %439 = arith.mulf %438, %436 : vector<16x16xf32>
    %440 = arith.addf %422, %439 : vector<16x16xf32>
    %c59 = arith.constant 59 : index
    %441 = memref.load %arg1[%c59] : memref<144xf32, #tpu.memory_space<smem>>
    %442 = vector.broadcast %441 : f32 to vector<16x16xf32>
    %443 = arith.mulf %442, %436 : vector<16x16xf32>
    %444 = arith.addf %426, %443 : vector<16x16xf32>
    %c95 = arith.constant 95 : index
    %445 = memref.load %arg1[%c95] : memref<144xf32, #tpu.memory_space<smem>>
    %446 = vector.broadcast %445 : f32 to vector<16x16xf32>
    %447 = arith.mulf %446, %436 : vector<16x16xf32>
    %448 = arith.addf %430, %447 : vector<16x16xf32>
    %c131 = arith.constant 131 : index
    %449 = memref.load %arg1[%c131] : memref<144xf32, #tpu.memory_space<smem>>
    %450 = vector.broadcast %449 : f32 to vector<16x16xf32>
    %451 = arith.mulf %450, %436 : vector<16x16xf32>
    %452 = arith.addf %434, %451 : vector<16x16xf32>
    %c2_90 = arith.constant 2 : index
    %c9_91 = arith.constant 9 : index
    %c7_92 = arith.constant 7 : index
    %453 = vector.load %arg7[%c2_90, %c9_91, %c7_92] : memref<4x32x32xf32, #tpu.memory_space<vmem>>, vector<1x16x16xf32>
    %454 = vector.shape_cast %453 : vector<1x16x16xf32> to vector<16x16xf32>
    %c24 = arith.constant 24 : index
    %455 = memref.load %arg1[%c24] : memref<144xf32, #tpu.memory_space<smem>>
    %456 = vector.broadcast %455 : f32 to vector<16x16xf32>
    %457 = arith.mulf %456, %454 : vector<16x16xf32>
    %458 = arith.addf %440, %457 : vector<16x16xf32>
    %c60 = arith.constant 60 : index
    %459 = memref.load %arg1[%c60] : memref<144xf32, #tpu.memory_space<smem>>
    %460 = vector.broadcast %459 : f32 to vector<16x16xf32>
    %461 = arith.mulf %460, %454 : vector<16x16xf32>
    %462 = arith.addf %444, %461 : vector<16x16xf32>
    %c96 = arith.constant 96 : index
    %463 = memref.load %arg1[%c96] : memref<144xf32, #tpu.memory_space<smem>>
    %464 = vector.broadcast %463 : f32 to vector<16x16xf32>
    %465 = arith.mulf %464, %454 : vector<16x16xf32>
    %466 = arith.addf %448, %465 : vector<16x16xf32>
    %c132 = arith.constant 132 : index
    %467 = memref.load %arg1[%c132] : memref<144xf32, #tpu.memory_space<smem>>
    %468 = vector.broadcast %467 : f32 to vector<16x16xf32>
    %469 = arith.mulf %468, %454 : vector<16x16xf32>
    %470 = arith.addf %452, %469 : vector<16x16xf32>
    %c2_93 = arith.constant 2 : index
    %c9_94 = arith.constant 9 : index
    %c8_95 = arith.constant 8 : index
    %471 = vector.load %arg7[%c2_93, %c9_94, %c8_95] : memref<4x32x32xf32, #tpu.memory_space<vmem>>, vector<1x16x16xf32>
    %472 = vector.shape_cast %471 : vector<1x16x16xf32> to vector<16x16xf32>
    %c25 = arith.constant 25 : index
    %473 = memref.load %arg1[%c25] : memref<144xf32, #tpu.memory_space<smem>>
    %474 = vector.broadcast %473 : f32 to vector<16x16xf32>
    %475 = arith.mulf %474, %472 : vector<16x16xf32>
    %476 = arith.addf %458, %475 : vector<16x16xf32>
    %c61 = arith.constant 61 : index
    %477 = memref.load %arg1[%c61] : memref<144xf32, #tpu.memory_space<smem>>
    %478 = vector.broadcast %477 : f32 to vector<16x16xf32>
    %479 = arith.mulf %478, %472 : vector<16x16xf32>
    %480 = arith.addf %462, %479 : vector<16x16xf32>
    %c97 = arith.constant 97 : index
    %481 = memref.load %arg1[%c97] : memref<144xf32, #tpu.memory_space<smem>>
    %482 = vector.broadcast %481 : f32 to vector<16x16xf32>
    %483 = arith.mulf %482, %472 : vector<16x16xf32>
    %484 = arith.addf %466, %483 : vector<16x16xf32>
    %c133 = arith.constant 133 : index
    %485 = memref.load %arg1[%c133] : memref<144xf32, #tpu.memory_space<smem>>
    %486 = vector.broadcast %485 : f32 to vector<16x16xf32>
    %487 = arith.mulf %486, %472 : vector<16x16xf32>
    %488 = arith.addf %470, %487 : vector<16x16xf32>
    %c2_96 = arith.constant 2 : index
    %c9_97 = arith.constant 9 : index
    %c9_98 = arith.constant 9 : index
    %489 = vector.load %arg7[%c2_96, %c9_97, %c9_98] : memref<4x32x32xf32, #tpu.memory_space<vmem>>, vector<1x16x16xf32>
    %490 = vector.shape_cast %489 : vector<1x16x16xf32> to vector<16x16xf32>
    %c26 = arith.constant 26 : index
    %491 = memref.load %arg1[%c26] : memref<144xf32, #tpu.memory_space<smem>>
    %492 = vector.broadcast %491 : f32 to vector<16x16xf32>
    %493 = arith.mulf %492, %490 : vector<16x16xf32>
    %494 = arith.addf %476, %493 : vector<16x16xf32>
    %c62 = arith.constant 62 : index
    %495 = memref.load %arg1[%c62] : memref<144xf32, #tpu.memory_space<smem>>
    %496 = vector.broadcast %495 : f32 to vector<16x16xf32>
    %497 = arith.mulf %496, %490 : vector<16x16xf32>
    %498 = arith.addf %480, %497 : vector<16x16xf32>
    %c98 = arith.constant 98 : index
    %499 = memref.load %arg1[%c98] : memref<144xf32, #tpu.memory_space<smem>>
    %500 = vector.broadcast %499 : f32 to vector<16x16xf32>
    %501 = arith.mulf %500, %490 : vector<16x16xf32>
    %502 = arith.addf %484, %501 : vector<16x16xf32>
    %c134 = arith.constant 134 : index
    %503 = memref.load %arg1[%c134] : memref<144xf32, #tpu.memory_space<smem>>
    %504 = vector.broadcast %503 : f32 to vector<16x16xf32>
    %505 = arith.mulf %504, %490 : vector<16x16xf32>
    %506 = arith.addf %488, %505 : vector<16x16xf32>
    %c3_99 = arith.constant 3 : index
    %c7_100 = arith.constant 7 : index
    %c7_101 = arith.constant 7 : index
    %507 = vector.load %arg7[%c3_99, %c7_100, %c7_101] : memref<4x32x32xf32, #tpu.memory_space<vmem>>, vector<1x16x16xf32>
    %508 = vector.shape_cast %507 : vector<1x16x16xf32> to vector<16x16xf32>
    %c27 = arith.constant 27 : index
    %509 = memref.load %arg1[%c27] : memref<144xf32, #tpu.memory_space<smem>>
    %510 = vector.broadcast %509 : f32 to vector<16x16xf32>
    %511 = arith.mulf %510, %508 : vector<16x16xf32>
    %512 = arith.addf %494, %511 : vector<16x16xf32>
    %c63 = arith.constant 63 : index
    %513 = memref.load %arg1[%c63] : memref<144xf32, #tpu.memory_space<smem>>
    %514 = vector.broadcast %513 : f32 to vector<16x16xf32>
    %515 = arith.mulf %514, %508 : vector<16x16xf32>
    %516 = arith.addf %498, %515 : vector<16x16xf32>
    %c99 = arith.constant 99 : index
    %517 = memref.load %arg1[%c99] : memref<144xf32, #tpu.memory_space<smem>>
    %518 = vector.broadcast %517 : f32 to vector<16x16xf32>
    %519 = arith.mulf %518, %508 : vector<16x16xf32>
    %520 = arith.addf %502, %519 : vector<16x16xf32>
    %c135 = arith.constant 135 : index
    %521 = memref.load %arg1[%c135] : memref<144xf32, #tpu.memory_space<smem>>
    %522 = vector.broadcast %521 : f32 to vector<16x16xf32>
    %523 = arith.mulf %522, %508 : vector<16x16xf32>
    %524 = arith.addf %506, %523 : vector<16x16xf32>
    %c3_102 = arith.constant 3 : index
    %c7_103 = arith.constant 7 : index
    %c8_104 = arith.constant 8 : index
    %525 = vector.load %arg7[%c3_102, %c7_103, %c8_104] : memref<4x32x32xf32, #tpu.memory_space<vmem>>, vector<1x16x16xf32>
    %526 = vector.shape_cast %525 : vector<1x16x16xf32> to vector<16x16xf32>
    %c28 = arith.constant 28 : index
    %527 = memref.load %arg1[%c28] : memref<144xf32, #tpu.memory_space<smem>>
    %528 = vector.broadcast %527 : f32 to vector<16x16xf32>
    %529 = arith.mulf %528, %526 : vector<16x16xf32>
    %530 = arith.addf %512, %529 : vector<16x16xf32>
    %c64 = arith.constant 64 : index
    %531 = memref.load %arg1[%c64] : memref<144xf32, #tpu.memory_space<smem>>
    %532 = vector.broadcast %531 : f32 to vector<16x16xf32>
    %533 = arith.mulf %532, %526 : vector<16x16xf32>
    %534 = arith.addf %516, %533 : vector<16x16xf32>
    %c100 = arith.constant 100 : index
    %535 = memref.load %arg1[%c100] : memref<144xf32, #tpu.memory_space<smem>>
    %536 = vector.broadcast %535 : f32 to vector<16x16xf32>
    %537 = arith.mulf %536, %526 : vector<16x16xf32>
    %538 = arith.addf %520, %537 : vector<16x16xf32>
    %c136 = arith.constant 136 : index
    %539 = memref.load %arg1[%c136] : memref<144xf32, #tpu.memory_space<smem>>
    %540 = vector.broadcast %539 : f32 to vector<16x16xf32>
    %541 = arith.mulf %540, %526 : vector<16x16xf32>
    %542 = arith.addf %524, %541 : vector<16x16xf32>
    %c3_105 = arith.constant 3 : index
    %c7_106 = arith.constant 7 : index
    %c9_107 = arith.constant 9 : index
    %543 = vector.load %arg7[%c3_105, %c7_106, %c9_107] : memref<4x32x32xf32, #tpu.memory_space<vmem>>, vector<1x16x16xf32>
    %544 = vector.shape_cast %543 : vector<1x16x16xf32> to vector<16x16xf32>
    %c29 = arith.constant 29 : index
    %545 = memref.load %arg1[%c29] : memref<144xf32, #tpu.memory_space<smem>>
    %546 = vector.broadcast %545 : f32 to vector<16x16xf32>
    %547 = arith.mulf %546, %544 : vector<16x16xf32>
    %548 = arith.addf %530, %547 : vector<16x16xf32>
    %c65 = arith.constant 65 : index
    %549 = memref.load %arg1[%c65] : memref<144xf32, #tpu.memory_space<smem>>
    %550 = vector.broadcast %549 : f32 to vector<16x16xf32>
    %551 = arith.mulf %550, %544 : vector<16x16xf32>
    %552 = arith.addf %534, %551 : vector<16x16xf32>
    %c101 = arith.constant 101 : index
    %553 = memref.load %arg1[%c101] : memref<144xf32, #tpu.memory_space<smem>>
    %554 = vector.broadcast %553 : f32 to vector<16x16xf32>
    %555 = arith.mulf %554, %544 : vector<16x16xf32>
    %556 = arith.addf %538, %555 : vector<16x16xf32>
    %c137 = arith.constant 137 : index
    %557 = memref.load %arg1[%c137] : memref<144xf32, #tpu.memory_space<smem>>
    %558 = vector.broadcast %557 : f32 to vector<16x16xf32>
    %559 = arith.mulf %558, %544 : vector<16x16xf32>
    %560 = arith.addf %542, %559 : vector<16x16xf32>
    %c3_108 = arith.constant 3 : index
    %c8_109 = arith.constant 8 : index
    %c7_110 = arith.constant 7 : index
    %561 = vector.load %arg7[%c3_108, %c8_109, %c7_110] : memref<4x32x32xf32, #tpu.memory_space<vmem>>, vector<1x16x16xf32>
    %562 = vector.shape_cast %561 : vector<1x16x16xf32> to vector<16x16xf32>
    %c30 = arith.constant 30 : index
    %563 = memref.load %arg1[%c30] : memref<144xf32, #tpu.memory_space<smem>>
    %564 = vector.broadcast %563 : f32 to vector<16x16xf32>
    %565 = arith.mulf %564, %562 : vector<16x16xf32>
    %566 = arith.addf %548, %565 : vector<16x16xf32>
    %c66 = arith.constant 66 : index
    %567 = memref.load %arg1[%c66] : memref<144xf32, #tpu.memory_space<smem>>
    %568 = vector.broadcast %567 : f32 to vector<16x16xf32>
    %569 = arith.mulf %568, %562 : vector<16x16xf32>
    %570 = arith.addf %552, %569 : vector<16x16xf32>
    %c102 = arith.constant 102 : index
    %571 = memref.load %arg1[%c102] : memref<144xf32, #tpu.memory_space<smem>>
    %572 = vector.broadcast %571 : f32 to vector<16x16xf32>
    %573 = arith.mulf %572, %562 : vector<16x16xf32>
    %574 = arith.addf %556, %573 : vector<16x16xf32>
    %c138 = arith.constant 138 : index
    %575 = memref.load %arg1[%c138] : memref<144xf32, #tpu.memory_space<smem>>
    %576 = vector.broadcast %575 : f32 to vector<16x16xf32>
    %577 = arith.mulf %576, %562 : vector<16x16xf32>
    %578 = arith.addf %560, %577 : vector<16x16xf32>
    %c3_111 = arith.constant 3 : index
    %c8_112 = arith.constant 8 : index
    %c8_113 = arith.constant 8 : index
    %579 = vector.load %arg7[%c3_111, %c8_112, %c8_113] : memref<4x32x32xf32, #tpu.memory_space<vmem>>, vector<1x16x16xf32>
    %580 = vector.shape_cast %579 : vector<1x16x16xf32> to vector<16x16xf32>
    %c31 = arith.constant 31 : index
    %581 = memref.load %arg1[%c31] : memref<144xf32, #tpu.memory_space<smem>>
    %582 = vector.broadcast %581 : f32 to vector<16x16xf32>
    %583 = arith.mulf %582, %580 : vector<16x16xf32>
    %584 = arith.addf %566, %583 : vector<16x16xf32>
    %c67 = arith.constant 67 : index
    %585 = memref.load %arg1[%c67] : memref<144xf32, #tpu.memory_space<smem>>
    %586 = vector.broadcast %585 : f32 to vector<16x16xf32>
    %587 = arith.mulf %586, %580 : vector<16x16xf32>
    %588 = arith.addf %570, %587 : vector<16x16xf32>
    %c103 = arith.constant 103 : index
    %589 = memref.load %arg1[%c103] : memref<144xf32, #tpu.memory_space<smem>>
    %590 = vector.broadcast %589 : f32 to vector<16x16xf32>
    %591 = arith.mulf %590, %580 : vector<16x16xf32>
    %592 = arith.addf %574, %591 : vector<16x16xf32>
    %c139 = arith.constant 139 : index
    %593 = memref.load %arg1[%c139] : memref<144xf32, #tpu.memory_space<smem>>
    %594 = vector.broadcast %593 : f32 to vector<16x16xf32>
    %595 = arith.mulf %594, %580 : vector<16x16xf32>
    %596 = arith.addf %578, %595 : vector<16x16xf32>
    %c3_114 = arith.constant 3 : index
    %c8_115 = arith.constant 8 : index
    %c9_116 = arith.constant 9 : index
    %597 = vector.load %arg7[%c3_114, %c8_115, %c9_116] : memref<4x32x32xf32, #tpu.memory_space<vmem>>, vector<1x16x16xf32>
    %598 = vector.shape_cast %597 : vector<1x16x16xf32> to vector<16x16xf32>
    %c32 = arith.constant 32 : index
    %599 = memref.load %arg1[%c32] : memref<144xf32, #tpu.memory_space<smem>>
    %600 = vector.broadcast %599 : f32 to vector<16x16xf32>
    %601 = arith.mulf %600, %598 : vector<16x16xf32>
    %602 = arith.addf %584, %601 : vector<16x16xf32>
    %c68 = arith.constant 68 : index
    %603 = memref.load %arg1[%c68] : memref<144xf32, #tpu.memory_space<smem>>
    %604 = vector.broadcast %603 : f32 to vector<16x16xf32>
    %605 = arith.mulf %604, %598 : vector<16x16xf32>
    %606 = arith.addf %588, %605 : vector<16x16xf32>
    %c104 = arith.constant 104 : index
    %607 = memref.load %arg1[%c104] : memref<144xf32, #tpu.memory_space<smem>>
    %608 = vector.broadcast %607 : f32 to vector<16x16xf32>
    %609 = arith.mulf %608, %598 : vector<16x16xf32>
    %610 = arith.addf %592, %609 : vector<16x16xf32>
    %c140 = arith.constant 140 : index
    %611 = memref.load %arg1[%c140] : memref<144xf32, #tpu.memory_space<smem>>
    %612 = vector.broadcast %611 : f32 to vector<16x16xf32>
    %613 = arith.mulf %612, %598 : vector<16x16xf32>
    %614 = arith.addf %596, %613 : vector<16x16xf32>
    %c3_117 = arith.constant 3 : index
    %c9_118 = arith.constant 9 : index
    %c7_119 = arith.constant 7 : index
    %615 = vector.load %arg7[%c3_117, %c9_118, %c7_119] : memref<4x32x32xf32, #tpu.memory_space<vmem>>, vector<1x16x16xf32>
    %616 = vector.shape_cast %615 : vector<1x16x16xf32> to vector<16x16xf32>
    %c33 = arith.constant 33 : index
    %617 = memref.load %arg1[%c33] : memref<144xf32, #tpu.memory_space<smem>>
    %618 = vector.broadcast %617 : f32 to vector<16x16xf32>
    %619 = arith.mulf %618, %616 : vector<16x16xf32>
    %620 = arith.addf %602, %619 : vector<16x16xf32>
    %c69 = arith.constant 69 : index
    %621 = memref.load %arg1[%c69] : memref<144xf32, #tpu.memory_space<smem>>
    %622 = vector.broadcast %621 : f32 to vector<16x16xf32>
    %623 = arith.mulf %622, %616 : vector<16x16xf32>
    %624 = arith.addf %606, %623 : vector<16x16xf32>
    %c105 = arith.constant 105 : index
    %625 = memref.load %arg1[%c105] : memref<144xf32, #tpu.memory_space<smem>>
    %626 = vector.broadcast %625 : f32 to vector<16x16xf32>
    %627 = arith.mulf %626, %616 : vector<16x16xf32>
    %628 = arith.addf %610, %627 : vector<16x16xf32>
    %c141 = arith.constant 141 : index
    %629 = memref.load %arg1[%c141] : memref<144xf32, #tpu.memory_space<smem>>
    %630 = vector.broadcast %629 : f32 to vector<16x16xf32>
    %631 = arith.mulf %630, %616 : vector<16x16xf32>
    %632 = arith.addf %614, %631 : vector<16x16xf32>
    %c3_120 = arith.constant 3 : index
    %c9_121 = arith.constant 9 : index
    %c8_122 = arith.constant 8 : index
    %633 = vector.load %arg7[%c3_120, %c9_121, %c8_122] : memref<4x32x32xf32, #tpu.memory_space<vmem>>, vector<1x16x16xf32>
    %634 = vector.shape_cast %633 : vector<1x16x16xf32> to vector<16x16xf32>
    %c34 = arith.constant 34 : index
    %635 = memref.load %arg1[%c34] : memref<144xf32, #tpu.memory_space<smem>>
    %636 = vector.broadcast %635 : f32 to vector<16x16xf32>
    %637 = arith.mulf %636, %634 : vector<16x16xf32>
    %638 = arith.addf %620, %637 : vector<16x16xf32>
    %c70 = arith.constant 70 : index
    %639 = memref.load %arg1[%c70] : memref<144xf32, #tpu.memory_space<smem>>
    %640 = vector.broadcast %639 : f32 to vector<16x16xf32>
    %641 = arith.mulf %640, %634 : vector<16x16xf32>
    %642 = arith.addf %624, %641 : vector<16x16xf32>
    %c106 = arith.constant 106 : index
    %643 = memref.load %arg1[%c106] : memref<144xf32, #tpu.memory_space<smem>>
    %644 = vector.broadcast %643 : f32 to vector<16x16xf32>
    %645 = arith.mulf %644, %634 : vector<16x16xf32>
    %646 = arith.addf %628, %645 : vector<16x16xf32>
    %c142 = arith.constant 142 : index
    %647 = memref.load %arg1[%c142] : memref<144xf32, #tpu.memory_space<smem>>
    %648 = vector.broadcast %647 : f32 to vector<16x16xf32>
    %649 = arith.mulf %648, %634 : vector<16x16xf32>
    %650 = arith.addf %632, %649 : vector<16x16xf32>
    %c3_123 = arith.constant 3 : index
    %c9_124 = arith.constant 9 : index
    %c9_125 = arith.constant 9 : index
    %651 = vector.load %arg7[%c3_123, %c9_124, %c9_125] : memref<4x32x32xf32, #tpu.memory_space<vmem>>, vector<1x16x16xf32>
    %652 = vector.shape_cast %651 : vector<1x16x16xf32> to vector<16x16xf32>
    %c35 = arith.constant 35 : index
    %653 = memref.load %arg1[%c35] : memref<144xf32, #tpu.memory_space<smem>>
    %654 = vector.broadcast %653 : f32 to vector<16x16xf32>
    %655 = arith.mulf %654, %652 : vector<16x16xf32>
    %656 = arith.addf %638, %655 : vector<16x16xf32>
    %c71 = arith.constant 71 : index
    %657 = memref.load %arg1[%c71] : memref<144xf32, #tpu.memory_space<smem>>
    %658 = vector.broadcast %657 : f32 to vector<16x16xf32>
    %659 = arith.mulf %658, %652 : vector<16x16xf32>
    %660 = arith.addf %642, %659 : vector<16x16xf32>
    %c107 = arith.constant 107 : index
    %661 = memref.load %arg1[%c107] : memref<144xf32, #tpu.memory_space<smem>>
    %662 = vector.broadcast %661 : f32 to vector<16x16xf32>
    %663 = arith.mulf %662, %652 : vector<16x16xf32>
    %664 = arith.addf %646, %663 : vector<16x16xf32>
    %c143 = arith.constant 143 : index
    %665 = memref.load %arg1[%c143] : memref<144xf32, #tpu.memory_space<smem>>
    %666 = vector.broadcast %665 : f32 to vector<16x16xf32>
    %667 = arith.mulf %666, %652 : vector<16x16xf32>
    %668 = arith.addf %650, %667 : vector<16x16xf32>
    %cst_126 = arith.constant 0.000000e+00 : f32
    %669 = vector.broadcast %cst_126 : f32 to vector<16x16xf32>
    %670 = arith.maximumf %656, %669 : vector<16x16xf32>
    %cst_127 = arith.constant 0.000000e+00 : f32
    %671 = vector.broadcast %cst_127 : f32 to vector<16x16xf32>
    %672 = arith.maximumf %660, %671 : vector<16x16xf32>
    %cst_128 = arith.constant 0.000000e+00 : f32
    %673 = vector.broadcast %cst_128 : f32 to vector<16x16xf32>
    %674 = arith.maximumf %664, %673 : vector<16x16xf32>
    %cst_129 = arith.constant 0.000000e+00 : f32
    %675 = vector.broadcast %cst_129 : f32 to vector<16x16xf32>
    %676 = arith.maximumf %668, %675 : vector<16x16xf32>
    %c0_130 = arith.constant 0 : index
    %c8_131 = arith.constant 8 : index
    %c8_132 = arith.constant 8 : index
    %677 = vector.load %arg7[%c0_130, %c8_131, %c8_132] : memref<4x32x32xf32, #tpu.memory_space<vmem>>, vector<1x16x16xf32>
    %678 = vector.shape_cast %677 : vector<1x16x16xf32> to vector<16x16xf32>
    %679 = vector.shape_cast %670 : vector<16x16xf32> to vector<1x16x16xf32>
    tpu.vector_store %arg7[%c0_130, %c8_131, %c8_132], %679 {strides = array<i32>} : memref<4x32x32xf32, #tpu.memory_space<vmem>>, vector<1x16x16xf32>,
    %c1_133 = arith.constant 1 : index
    %c8_134 = arith.constant 8 : index
    %c8_135 = arith.constant 8 : index
    %680 = vector.load %arg7[%c1_133, %c8_134, %c8_135] : memref<4x32x32xf32, #tpu.memory_space<vmem>>, vector<1x16x16xf32>
    %681 = vector.shape_cast %680 : vector<1x16x16xf32> to vector<16x16xf32>
    %682 = vector.shape_cast %672 : vector<16x16xf32> to vector<1x16x16xf32>
    tpu.vector_store %arg7[%c1_133, %c8_134, %c8_135], %682 {strides = array<i32>} : memref<4x32x32xf32, #tpu.memory_space<vmem>>, vector<1x16x16xf32>,
    %c2_136 = arith.constant 2 : index
    %c8_137 = arith.constant 8 : index
    %c8_138 = arith.constant 8 : index
    %683 = vector.load %arg7[%c2_136, %c8_137, %c8_138] : memref<4x32x32xf32, #tpu.memory_space<vmem>>, vector<1x16x16xf32>
    %684 = vector.shape_cast %683 : vector<1x16x16xf32> to vector<16x16xf32>
    %685 = vector.shape_cast %674 : vector<16x16xf32> to vector<1x16x16xf32>
    tpu.vector_store %arg7[%c2_136, %c8_137, %c8_138], %685 {strides = array<i32>} : memref<4x32x32xf32, #tpu.memory_space<vmem>>, vector<1x16x16xf32>,
    %c3_139 = arith.constant 3 : index
    %c8_140 = arith.constant 8 : index
    %c8_141 = arith.constant 8 : index
    %686 = vector.load %arg7[%c3_139, %c8_140, %c8_141] : memref<4x32x32xf32, #tpu.memory_space<vmem>>, vector<1x16x16xf32>
    %687 = vector.shape_cast %686 : vector<1x16x16xf32> to vector<16x16xf32>
    %688 = vector.shape_cast %676 : vector<16x16xf32> to vector<1x16x16xf32>
    tpu.vector_store %arg7[%c3_139, %c8_140, %c8_141], %688 {strides = array<i32>} : memref<4x32x32xf32, #tpu.memory_space<vmem>>, vector<1x16x16xf32>,
    %cst_142 = arith.constant 0.000000e+00 : f32
    %689 = vector.broadcast %cst_142 : f32 to vector<16x16xf32>
    %c0_143 = arith.constant 0 : index
    %690 = memref.load %arg4[%c0_143] : memref<4xf32, #tpu.memory_space<smem>>
    %691 = vector.broadcast %690 : f32 to vector<16x16xf32>
    %692 = arith.addf %689, %691 : vector<16x16xf32>
    %cst_144 = arith.constant 0.000000e+00 : f32
    %693 = vector.broadcast %cst_144 : f32 to vector<16x16xf32>
    %c1_145 = arith.constant 1 : index
    %694 = memref.load %arg4[%c1_145] : memref<4xf32, #tpu.memory_space<smem>>
    %695 = vector.broadcast %694 : f32 to vector<16x16xf32>
    %696 = arith.addf %693, %695 : vector<16x16xf32>
    %cst_146 = arith.constant 0.000000e+00 : f32
    %697 = vector.broadcast %cst_146 : f32 to vector<16x16xf32>
    %c2_147 = arith.constant 2 : index
    %698 = memref.load %arg4[%c2_147] : memref<4xf32, #tpu.memory_space<smem>>
    %699 = vector.broadcast %698 : f32 to vector<16x16xf32>
    %700 = arith.addf %697, %699 : vector<16x16xf32>
    %cst_148 = arith.constant 0.000000e+00 : f32
    %701 = vector.broadcast %cst_148 : f32 to vector<16x16xf32>
    %c3_149 = arith.constant 3 : index
    %702 = memref.load %arg4[%c3_149] : memref<4xf32, #tpu.memory_space<smem>>
    %703 = vector.broadcast %702 : f32 to vector<16x16xf32>
    %704 = arith.addf %701, %703 : vector<16x16xf32>
    %c0_150 = arith.constant 0 : index
    %c7_151 = arith.constant 7 : index
    %c7_152 = arith.constant 7 : index
    %705 = vector.load %arg7[%c0_150, %c7_151, %c7_152] : memref<4x32x32xf32, #tpu.memory_space<vmem>>, vector<1x16x16xf32>
    %706 = vector.shape_cast %705 : vector<1x16x16xf32> to vector<16x16xf32>
    %c0_153 = arith.constant 0 : index
    %707 = memref.load %arg3[%c0_153] : memref<144xf32, #tpu.memory_space<smem>>
    %708 = vector.broadcast %707 : f32 to vector<16x16xf32>
    %709 = arith.mulf %708, %706 : vector<16x16xf32>
    %710 = arith.addf %692, %709 : vector<16x16xf32>
    %c36_154 = arith.constant 36 : index
    %711 = memref.load %arg3[%c36_154] : memref<144xf32, #tpu.memory_space<smem>>
    %712 = vector.broadcast %711 : f32 to vector<16x16xf32>
    %713 = arith.mulf %712, %706 : vector<16x16xf32>
    %714 = arith.addf %696, %713 : vector<16x16xf32>
    %c72_155 = arith.constant 72 : index
    %715 = memref.load %arg3[%c72_155] : memref<144xf32, #tpu.memory_space<smem>>
    %716 = vector.broadcast %715 : f32 to vector<16x16xf32>
    %717 = arith.mulf %716, %706 : vector<16x16xf32>
    %718 = arith.addf %700, %717 : vector<16x16xf32>
    %c108_156 = arith.constant 108 : index
    %719 = memref.load %arg3[%c108_156] : memref<144xf32, #tpu.memory_space<smem>>
    %720 = vector.broadcast %719 : f32 to vector<16x16xf32>
    %721 = arith.mulf %720, %706 : vector<16x16xf32>
    %722 = arith.addf %704, %721 : vector<16x16xf32>
    %c0_157 = arith.constant 0 : index
    %c7_158 = arith.constant 7 : index
    %c8_159 = arith.constant 8 : index
    %723 = vector.load %arg7[%c0_157, %c7_158, %c8_159] : memref<4x32x32xf32, #tpu.memory_space<vmem>>, vector<1x16x16xf32>
    %724 = vector.shape_cast %723 : vector<1x16x16xf32> to vector<16x16xf32>
    %c1_160 = arith.constant 1 : index
    %725 = memref.load %arg3[%c1_160] : memref<144xf32, #tpu.memory_space<smem>>
    %726 = vector.broadcast %725 : f32 to vector<16x16xf32>
    %727 = arith.mulf %726, %724 : vector<16x16xf32>
    %728 = arith.addf %710, %727 : vector<16x16xf32>
    %c37_161 = arith.constant 37 : index
    %729 = memref.load %arg3[%c37_161] : memref<144xf32, #tpu.memory_space<smem>>
    %730 = vector.broadcast %729 : f32 to vector<16x16xf32>
    %731 = arith.mulf %730, %724 : vector<16x16xf32>
    %732 = arith.addf %714, %731 : vector<16x16xf32>
    %c73_162 = arith.constant 73 : index
    %733 = memref.load %arg3[%c73_162] : memref<144xf32, #tpu.memory_space<smem>>
    %734 = vector.broadcast %733 : f32 to vector<16x16xf32>
    %735 = arith.mulf %734, %724 : vector<16x16xf32>
    %736 = arith.addf %718, %735 : vector<16x16xf32>
    %c109_163 = arith.constant 109 : index
    %737 = memref.load %arg3[%c109_163] : memref<144xf32, #tpu.memory_space<smem>>
    %738 = vector.broadcast %737 : f32 to vector<16x16xf32>
    %739 = arith.mulf %738, %724 : vector<16x16xf32>
    %740 = arith.addf %722, %739 : vector<16x16xf32>
    %c0_164 = arith.constant 0 : index
    %c7_165 = arith.constant 7 : index
    %c9_166 = arith.constant 9 : index
    %741 = vector.load %arg7[%c0_164, %c7_165, %c9_166] : memref<4x32x32xf32, #tpu.memory_space<vmem>>, vector<1x16x16xf32>
    %742 = vector.shape_cast %741 : vector<1x16x16xf32> to vector<16x16xf32>
    %c2_167 = arith.constant 2 : index
    %743 = memref.load %arg3[%c2_167] : memref<144xf32, #tpu.memory_space<smem>>
    %744 = vector.broadcast %743 : f32 to vector<16x16xf32>
    %745 = arith.mulf %744, %742 : vector<16x16xf32>
    %746 = arith.addf %728, %745 : vector<16x16xf32>
    %c38_168 = arith.constant 38 : index
    %747 = memref.load %arg3[%c38_168] : memref<144xf32, #tpu.memory_space<smem>>
    %748 = vector.broadcast %747 : f32 to vector<16x16xf32>
    %749 = arith.mulf %748, %742 : vector<16x16xf32>
    %750 = arith.addf %732, %749 : vector<16x16xf32>
    %c74_169 = arith.constant 74 : index
    %751 = memref.load %arg3[%c74_169] : memref<144xf32, #tpu.memory_space<smem>>
    %752 = vector.broadcast %751 : f32 to vector<16x16xf32>
    %753 = arith.mulf %752, %742 : vector<16x16xf32>
    %754 = arith.addf %736, %753 : vector<16x16xf32>
    %c110_170 = arith.constant 110 : index
    %755 = memref.load %arg3[%c110_170] : memref<144xf32, #tpu.memory_space<smem>>
    %756 = vector.broadcast %755 : f32 to vector<16x16xf32>
    %757 = arith.mulf %756, %742 : vector<16x16xf32>
    %758 = arith.addf %740, %757 : vector<16x16xf32>
    %c0_171 = arith.constant 0 : index
    %c8_172 = arith.constant 8 : index
    %c7_173 = arith.constant 7 : index
    %759 = vector.load %arg7[%c0_171, %c8_172, %c7_173] : memref<4x32x32xf32, #tpu.memory_space<vmem>>, vector<1x16x16xf32>
    %760 = vector.shape_cast %759 : vector<1x16x16xf32> to vector<16x16xf32>
    %c3_174 = arith.constant 3 : index
    %761 = memref.load %arg3[%c3_174] : memref<144xf32, #tpu.memory_space<smem>>
    %762 = vector.broadcast %761 : f32 to vector<16x16xf32>
    %763 = arith.mulf %762, %760 : vector<16x16xf32>
    %764 = arith.addf %746, %763 : vector<16x16xf32>
    %c39_175 = arith.constant 39 : index
    %765 = memref.load %arg3[%c39_175] : memref<144xf32, #tpu.memory_space<smem>>
    %766 = vector.broadcast %765 : f32 to vector<16x16xf32>
    %767 = arith.mulf %766, %760 : vector<16x16xf32>
    %768 = arith.addf %750, %767 : vector<16x16xf32>
    %c75_176 = arith.constant 75 : index
    %769 = memref.load %arg3[%c75_176] : memref<144xf32, #tpu.memory_space<smem>>
    %770 = vector.broadcast %769 : f32 to vector<16x16xf32>
    %771 = arith.mulf %770, %760 : vector<16x16xf32>
    %772 = arith.addf %754, %771 : vector<16x16xf32>
    %c111_177 = arith.constant 111 : index
    %773 = memref.load %arg3[%c111_177] : memref<144xf32, #tpu.memory_space<smem>>
    %774 = vector.broadcast %773 : f32 to vector<16x16xf32>
    %775 = arith.mulf %774, %760 : vector<16x16xf32>
    %776 = arith.addf %758, %775 : vector<16x16xf32>
    %c0_178 = arith.constant 0 : index
    %c8_179 = arith.constant 8 : index
    %c8_180 = arith.constant 8 : index
    %777 = vector.load %arg7[%c0_178, %c8_179, %c8_180] : memref<4x32x32xf32, #tpu.memory_space<vmem>>, vector<1x16x16xf32>
    %778 = vector.shape_cast %777 : vector<1x16x16xf32> to vector<16x16xf32>
    %c4_181 = arith.constant 4 : index
    %779 = memref.load %arg3[%c4_181] : memref<144xf32, #tpu.memory_space<smem>>
    %780 = vector.broadcast %779 : f32 to vector<16x16xf32>
    %781 = arith.mulf %780, %778 : vector<16x16xf32>
    %782 = arith.addf %764, %781 : vector<16x16xf32>
    %c40_182 = arith.constant 40 : index
    %783 = memref.load %arg3[%c40_182] : memref<144xf32, #tpu.memory_space<smem>>
    %784 = vector.broadcast %783 : f32 to vector<16x16xf32>
    %785 = arith.mulf %784, %778 : vector<16x16xf32>
    %786 = arith.addf %768, %785 : vector<16x16xf32>
    %c76_183 = arith.constant 76 : index
    %787 = memref.load %arg3[%c76_183] : memref<144xf32, #tpu.memory_space<smem>>
    %788 = vector.broadcast %787 : f32 to vector<16x16xf32>
    %789 = arith.mulf %788, %778 : vector<16x16xf32>
    %790 = arith.addf %772, %789 : vector<16x16xf32>
    %c112_184 = arith.constant 112 : index
    %791 = memref.load %arg3[%c112_184] : memref<144xf32, #tpu.memory_space<smem>>
    %792 = vector.broadcast %791 : f32 to vector<16x16xf32>
    %793 = arith.mulf %792, %778 : vector<16x16xf32>
    %794 = arith.addf %776, %793 : vector<16x16xf32>
    %c0_185 = arith.constant 0 : index
    %c8_186 = arith.constant 8 : index
    %c9_187 = arith.constant 9 : index
    %795 = vector.load %arg7[%c0_185, %c8_186, %c9_187] : memref<4x32x32xf32, #tpu.memory_space<vmem>>, vector<1x16x16xf32>
    %796 = vector.shape_cast %795 : vector<1x16x16xf32> to vector<16x16xf32>
    %c5_188 = arith.constant 5 : index
    %797 = memref.load %arg3[%c5_188] : memref<144xf32, #tpu.memory_space<smem>>
    %798 = vector.broadcast %797 : f32 to vector<16x16xf32>
    %799 = arith.mulf %798, %796 : vector<16x16xf32>
    %800 = arith.addf %782, %799 : vector<16x16xf32>
    %c41_189 = arith.constant 41 : index
    %801 = memref.load %arg3[%c41_189] : memref<144xf32, #tpu.memory_space<smem>>
    %802 = vector.broadcast %801 : f32 to vector<16x16xf32>
    %803 = arith.mulf %802, %796 : vector<16x16xf32>
    %804 = arith.addf %786, %803 : vector<16x16xf32>
    %c77_190 = arith.constant 77 : index
    %805 = memref.load %arg3[%c77_190] : memref<144xf32, #tpu.memory_space<smem>>
    %806 = vector.broadcast %805 : f32 to vector<16x16xf32>
    %807 = arith.mulf %806, %796 : vector<16x16xf32>
    %808 = arith.addf %790, %807 : vector<16x16xf32>
    %c113_191 = arith.constant 113 : index
    %809 = memref.load %arg3[%c113_191] : memref<144xf32, #tpu.memory_space<smem>>
    %810 = vector.broadcast %809 : f32 to vector<16x16xf32>
    %811 = arith.mulf %810, %796 : vector<16x16xf32>
    %812 = arith.addf %794, %811 : vector<16x16xf32>
    %c0_192 = arith.constant 0 : index
    %c9_193 = arith.constant 9 : index
    %c7_194 = arith.constant 7 : index
    %813 = vector.load %arg7[%c0_192, %c9_193, %c7_194] : memref<4x32x32xf32, #tpu.memory_space<vmem>>, vector<1x16x16xf32>
    %814 = vector.shape_cast %813 : vector<1x16x16xf32> to vector<16x16xf32>
    %c6_195 = arith.constant 6 : index
    %815 = memref.load %arg3[%c6_195] : memref<144xf32, #tpu.memory_space<smem>>
    %816 = vector.broadcast %815 : f32 to vector<16x16xf32>
    %817 = arith.mulf %816, %814 : vector<16x16xf32>
    %818 = arith.addf %800, %817 : vector<16x16xf32>
    %c42_196 = arith.constant 42 : index
    %819 = memref.load %arg3[%c42_196] : memref<144xf32, #tpu.memory_space<smem>>
    %820 = vector.broadcast %819 : f32 to vector<16x16xf32>
    %821 = arith.mulf %820, %814 : vector<16x16xf32>
    %822 = arith.addf %804, %821 : vector<16x16xf32>
    %c78_197 = arith.constant 78 : index
    %823 = memref.load %arg3[%c78_197] : memref<144xf32, #tpu.memory_space<smem>>
    %824 = vector.broadcast %823 : f32 to vector<16x16xf32>
    %825 = arith.mulf %824, %814 : vector<16x16xf32>
    %826 = arith.addf %808, %825 : vector<16x16xf32>
    %c114_198 = arith.constant 114 : index
    %827 = memref.load %arg3[%c114_198] : memref<144xf32, #tpu.memory_space<smem>>
    %828 = vector.broadcast %827 : f32 to vector<16x16xf32>
    %829 = arith.mulf %828, %814 : vector<16x16xf32>
    %830 = arith.addf %812, %829 : vector<16x16xf32>
    %c0_199 = arith.constant 0 : index
    %c9_200 = arith.constant 9 : index
    %c8_201 = arith.constant 8 : index
    %831 = vector.load %arg7[%c0_199, %c9_200, %c8_201] : memref<4x32x32xf32, #tpu.memory_space<vmem>>, vector<1x16x16xf32>
    %832 = vector.shape_cast %831 : vector<1x16x16xf32> to vector<16x16xf32>
    %c7_202 = arith.constant 7 : index
    %833 = memref.load %arg3[%c7_202] : memref<144xf32, #tpu.memory_space<smem>>
    %834 = vector.broadcast %833 : f32 to vector<16x16xf32>
    %835 = arith.mulf %834, %832 : vector<16x16xf32>
    %836 = arith.addf %818, %835 : vector<16x16xf32>
    %c43_203 = arith.constant 43 : index
    %837 = memref.load %arg3[%c43_203] : memref<144xf32, #tpu.memory_space<smem>>
    %838 = vector.broadcast %837 : f32 to vector<16x16xf32>
    %839 = arith.mulf %838, %832 : vector<16x16xf32>
    %840 = arith.addf %822, %839 : vector<16x16xf32>
    %c79_204 = arith.constant 79 : index
    %841 = memref.load %arg3[%c79_204] : memref<144xf32, #tpu.memory_space<smem>>
    %842 = vector.broadcast %841 : f32 to vector<16x16xf32>
    %843 = arith.mulf %842, %832 : vector<16x16xf32>
    %844 = arith.addf %826, %843 : vector<16x16xf32>
    %c115_205 = arith.constant 115 : index
    %845 = memref.load %arg3[%c115_205] : memref<144xf32, #tpu.memory_space<smem>>
    %846 = vector.broadcast %845 : f32 to vector<16x16xf32>
    %847 = arith.mulf %846, %832 : vector<16x16xf32>
    %848 = arith.addf %830, %847 : vector<16x16xf32>
    %c0_206 = arith.constant 0 : index
    %c9_207 = arith.constant 9 : index
    %c9_208 = arith.constant 9 : index
    %849 = vector.load %arg7[%c0_206, %c9_207, %c9_208] : memref<4x32x32xf32, #tpu.memory_space<vmem>>, vector<1x16x16xf32>
    %850 = vector.shape_cast %849 : vector<1x16x16xf32> to vector<16x16xf32>
    %c8_209 = arith.constant 8 : index
    %851 = memref.load %arg3[%c8_209] : memref<144xf32, #tpu.memory_space<smem>>
    %852 = vector.broadcast %851 : f32 to vector<16x16xf32>
    %853 = arith.mulf %852, %850 : vector<16x16xf32>
    %854 = arith.addf %836, %853 : vector<16x16xf32>
    %c44_210 = arith.constant 44 : index
    %855 = memref.load %arg3[%c44_210] : memref<144xf32, #tpu.memory_space<smem>>
    %856 = vector.broadcast %855 : f32 to vector<16x16xf32>
    %857 = arith.mulf %856, %850 : vector<16x16xf32>
    %858 = arith.addf %840, %857 : vector<16x16xf32>
    %c80_211 = arith.constant 80 : index
    %859 = memref.load %arg3[%c80_211] : memref<144xf32, #tpu.memory_space<smem>>
    %860 = vector.broadcast %859 : f32 to vector<16x16xf32>
    %861 = arith.mulf %860, %850 : vector<16x16xf32>
    %862 = arith.addf %844, %861 : vector<16x16xf32>
    %c116_212 = arith.constant 116 : index
    %863 = memref.load %arg3[%c116_212] : memref<144xf32, #tpu.memory_space<smem>>
    %864 = vector.broadcast %863 : f32 to vector<16x16xf32>
    %865 = arith.mulf %864, %850 : vector<16x16xf32>
    %866 = arith.addf %848, %865 : vector<16x16xf32>
    %c1_213 = arith.constant 1 : index
    %c7_214 = arith.constant 7 : index
    %c7_215 = arith.constant 7 : index
    %867 = vector.load %arg7[%c1_213, %c7_214, %c7_215] : memref<4x32x32xf32, #tpu.memory_space<vmem>>, vector<1x16x16xf32>
    %868 = vector.shape_cast %867 : vector<1x16x16xf32> to vector<16x16xf32>
    %c9_216 = arith.constant 9 : index
    %869 = memref.load %arg3[%c9_216] : memref<144xf32, #tpu.memory_space<smem>>
    %870 = vector.broadcast %869 : f32 to vector<16x16xf32>
    %871 = arith.mulf %870, %868 : vector<16x16xf32>
    %872 = arith.addf %854, %871 : vector<16x16xf32>
    %c45_217 = arith.constant 45 : index
    %873 = memref.load %arg3[%c45_217] : memref<144xf32, #tpu.memory_space<smem>>
    %874 = vector.broadcast %873 : f32 to vector<16x16xf32>
    %875 = arith.mulf %874, %868 : vector<16x16xf32>
    %876 = arith.addf %858, %875 : vector<16x16xf32>
    %c81_218 = arith.constant 81 : index
    %877 = memref.load %arg3[%c81_218] : memref<144xf32, #tpu.memory_space<smem>>
    %878 = vector.broadcast %877 : f32 to vector<16x16xf32>
    %879 = arith.mulf %878, %868 : vector<16x16xf32>
    %880 = arith.addf %862, %879 : vector<16x16xf32>
    %c117_219 = arith.constant 117 : index
    %881 = memref.load %arg3[%c117_219] : memref<144xf32, #tpu.memory_space<smem>>
    %882 = vector.broadcast %881 : f32 to vector<16x16xf32>
    %883 = arith.mulf %882, %868 : vector<16x16xf32>
    %884 = arith.addf %866, %883 : vector<16x16xf32>
    %c1_220 = arith.constant 1 : index
    %c7_221 = arith.constant 7 : index
    %c8_222 = arith.constant 8 : index
    %885 = vector.load %arg7[%c1_220, %c7_221, %c8_222] : memref<4x32x32xf32, #tpu.memory_space<vmem>>, vector<1x16x16xf32>
    %886 = vector.shape_cast %885 : vector<1x16x16xf32> to vector<16x16xf32>
    %c10_223 = arith.constant 10 : index
    %887 = memref.load %arg3[%c10_223] : memref<144xf32, #tpu.memory_space<smem>>
    %888 = vector.broadcast %887 : f32 to vector<16x16xf32>
    %889 = arith.mulf %888, %886 : vector<16x16xf32>
    %890 = arith.addf %872, %889 : vector<16x16xf32>
    %c46_224 = arith.constant 46 : index
    %891 = memref.load %arg3[%c46_224] : memref<144xf32, #tpu.memory_space<smem>>
    %892 = vector.broadcast %891 : f32 to vector<16x16xf32>
    %893 = arith.mulf %892, %886 : vector<16x16xf32>
    %894 = arith.addf %876, %893 : vector<16x16xf32>
    %c82_225 = arith.constant 82 : index
    %895 = memref.load %arg3[%c82_225] : memref<144xf32, #tpu.memory_space<smem>>
    %896 = vector.broadcast %895 : f32 to vector<16x16xf32>
    %897 = arith.mulf %896, %886 : vector<16x16xf32>
    %898 = arith.addf %880, %897 : vector<16x16xf32>
    %c118_226 = arith.constant 118 : index
    %899 = memref.load %arg3[%c118_226] : memref<144xf32, #tpu.memory_space<smem>>
    %900 = vector.broadcast %899 : f32 to vector<16x16xf32>
    %901 = arith.mulf %900, %886 : vector<16x16xf32>
    %902 = arith.addf %884, %901 : vector<16x16xf32>
    %c1_227 = arith.constant 1 : index
    %c7_228 = arith.constant 7 : index
    %c9_229 = arith.constant 9 : index
    %903 = vector.load %arg7[%c1_227, %c7_228, %c9_229] : memref<4x32x32xf32, #tpu.memory_space<vmem>>, vector<1x16x16xf32>
    %904 = vector.shape_cast %903 : vector<1x16x16xf32> to vector<16x16xf32>
    %c11_230 = arith.constant 11 : index
    %905 = memref.load %arg3[%c11_230] : memref<144xf32, #tpu.memory_space<smem>>
    %906 = vector.broadcast %905 : f32 to vector<16x16xf32>
    %907 = arith.mulf %906, %904 : vector<16x16xf32>
    %908 = arith.addf %890, %907 : vector<16x16xf32>
    %c47_231 = arith.constant 47 : index
    %909 = memref.load %arg3[%c47_231] : memref<144xf32, #tpu.memory_space<smem>>
    %910 = vector.broadcast %909 : f32 to vector<16x16xf32>
    %911 = arith.mulf %910, %904 : vector<16x16xf32>
    %912 = arith.addf %894, %911 : vector<16x16xf32>
    %c83_232 = arith.constant 83 : index
    %913 = memref.load %arg3[%c83_232] : memref<144xf32, #tpu.memory_space<smem>>
    %914 = vector.broadcast %913 : f32 to vector<16x16xf32>
    %915 = arith.mulf %914, %904 : vector<16x16xf32>
    %916 = arith.addf %898, %915 : vector<16x16xf32>
    %c119_233 = arith.constant 119 : index
    %917 = memref.load %arg3[%c119_233] : memref<144xf32, #tpu.memory_space<smem>>
    %918 = vector.broadcast %917 : f32 to vector<16x16xf32>
    %919 = arith.mulf %918, %904 : vector<16x16xf32>
    %920 = arith.addf %902, %919 : vector<16x16xf32>
    %c1_234 = arith.constant 1 : index
    %c8_235 = arith.constant 8 : index
    %c7_236 = arith.constant 7 : index
    %921 = vector.load %arg7[%c1_234, %c8_235, %c7_236] : memref<4x32x32xf32, #tpu.memory_space<vmem>>, vector<1x16x16xf32>
    %922 = vector.shape_cast %921 : vector<1x16x16xf32> to vector<16x16xf32>
    %c12_237 = arith.constant 12 : index
    %923 = memref.load %arg3[%c12_237] : memref<144xf32, #tpu.memory_space<smem>>
    %924 = vector.broadcast %923 : f32 to vector<16x16xf32>
    %925 = arith.mulf %924, %922 : vector<16x16xf32>
    %926 = arith.addf %908, %925 : vector<16x16xf32>
    %c48_238 = arith.constant 48 : index
    %927 = memref.load %arg3[%c48_238] : memref<144xf32, #tpu.memory_space<smem>>
    %928 = vector.broadcast %927 : f32 to vector<16x16xf32>
    %929 = arith.mulf %928, %922 : vector<16x16xf32>
    %930 = arith.addf %912, %929 : vector<16x16xf32>
    %c84_239 = arith.constant 84 : index
    %931 = memref.load %arg3[%c84_239] : memref<144xf32, #tpu.memory_space<smem>>
    %932 = vector.broadcast %931 : f32 to vector<16x16xf32>
    %933 = arith.mulf %932, %922 : vector<16x16xf32>
    %934 = arith.addf %916, %933 : vector<16x16xf32>
    %c120_240 = arith.constant 120 : index
    %935 = memref.load %arg3[%c120_240] : memref<144xf32, #tpu.memory_space<smem>>
    %936 = vector.broadcast %935 : f32 to vector<16x16xf32>
    %937 = arith.mulf %936, %922 : vector<16x16xf32>
    %938 = arith.addf %920, %937 : vector<16x16xf32>
    %c1_241 = arith.constant 1 : index
    %c8_242 = arith.constant 8 : index
    %c8_243 = arith.constant 8 : index
    %939 = vector.load %arg7[%c1_241, %c8_242, %c8_243] : memref<4x32x32xf32, #tpu.memory_space<vmem>>, vector<1x16x16xf32>
    %940 = vector.shape_cast %939 : vector<1x16x16xf32> to vector<16x16xf32>
    %c13_244 = arith.constant 13 : index
    %941 = memref.load %arg3[%c13_244] : memref<144xf32, #tpu.memory_space<smem>>
    %942 = vector.broadcast %941 : f32 to vector<16x16xf32>
    %943 = arith.mulf %942, %940 : vector<16x16xf32>
    %944 = arith.addf %926, %943 : vector<16x16xf32>
    %c49_245 = arith.constant 49 : index
    %945 = memref.load %arg3[%c49_245] : memref<144xf32, #tpu.memory_space<smem>>
    %946 = vector.broadcast %945 : f32 to vector<16x16xf32>
    %947 = arith.mulf %946, %940 : vector<16x16xf32>
    %948 = arith.addf %930, %947 : vector<16x16xf32>
    %c85_246 = arith.constant 85 : index
    %949 = memref.load %arg3[%c85_246] : memref<144xf32, #tpu.memory_space<smem>>
    %950 = vector.broadcast %949 : f32 to vector<16x16xf32>
    %951 = arith.mulf %950, %940 : vector<16x16xf32>
    %952 = arith.addf %934, %951 : vector<16x16xf32>
    %c121_247 = arith.constant 121 : index
    %953 = memref.load %arg3[%c121_247] : memref<144xf32, #tpu.memory_space<smem>>
    %954 = vector.broadcast %953 : f32 to vector<16x16xf32>
    %955 = arith.mulf %954, %940 : vector<16x16xf32>
    %956 = arith.addf %938, %955 : vector<16x16xf32>
    %c1_248 = arith.constant 1 : index
    %c8_249 = arith.constant 8 : index
    %c9_250 = arith.constant 9 : index
    %957 = vector.load %arg7[%c1_248, %c8_249, %c9_250] : memref<4x32x32xf32, #tpu.memory_space<vmem>>, vector<1x16x16xf32>
    %958 = vector.shape_cast %957 : vector<1x16x16xf32> to vector<16x16xf32>
    %c14_251 = arith.constant 14 : index
    %959 = memref.load %arg3[%c14_251] : memref<144xf32, #tpu.memory_space<smem>>
    %960 = vector.broadcast %959 : f32 to vector<16x16xf32>
    %961 = arith.mulf %960, %958 : vector<16x16xf32>
    %962 = arith.addf %944, %961 : vector<16x16xf32>
    %c50_252 = arith.constant 50 : index
    %963 = memref.load %arg3[%c50_252] : memref<144xf32, #tpu.memory_space<smem>>
    %964 = vector.broadcast %963 : f32 to vector<16x16xf32>
    %965 = arith.mulf %964, %958 : vector<16x16xf32>
    %966 = arith.addf %948, %965 : vector<16x16xf32>
    %c86_253 = arith.constant 86 : index
    %967 = memref.load %arg3[%c86_253] : memref<144xf32, #tpu.memory_space<smem>>
    %968 = vector.broadcast %967 : f32 to vector<16x16xf32>
    %969 = arith.mulf %968, %958 : vector<16x16xf32>
    %970 = arith.addf %952, %969 : vector<16x16xf32>
    %c122_254 = arith.constant 122 : index
    %971 = memref.load %arg3[%c122_254] : memref<144xf32, #tpu.memory_space<smem>>
    %972 = vector.broadcast %971 : f32 to vector<16x16xf32>
    %973 = arith.mulf %972, %958 : vector<16x16xf32>
    %974 = arith.addf %956, %973 : vector<16x16xf32>
    %c1_255 = arith.constant 1 : index
    %c9_256 = arith.constant 9 : index
    %c7_257 = arith.constant 7 : index
    %975 = vector.load %arg7[%c1_255, %c9_256, %c7_257] : memref<4x32x32xf32, #tpu.memory_space<vmem>>, vector<1x16x16xf32>
    %976 = vector.shape_cast %975 : vector<1x16x16xf32> to vector<16x16xf32>
    %c15_258 = arith.constant 15 : index
    %977 = memref.load %arg3[%c15_258] : memref<144xf32, #tpu.memory_space<smem>>
    %978 = vector.broadcast %977 : f32 to vector<16x16xf32>
    %979 = arith.mulf %978, %976 : vector<16x16xf32>
    %980 = arith.addf %962, %979 : vector<16x16xf32>
    %c51_259 = arith.constant 51 : index
    %981 = memref.load %arg3[%c51_259] : memref<144xf32, #tpu.memory_space<smem>>
    %982 = vector.broadcast %981 : f32 to vector<16x16xf32>
    %983 = arith.mulf %982, %976 : vector<16x16xf32>
    %984 = arith.addf %966, %983 : vector<16x16xf32>
    %c87_260 = arith.constant 87 : index
    %985 = memref.load %arg3[%c87_260] : memref<144xf32, #tpu.memory_space<smem>>
    %986 = vector.broadcast %985 : f32 to vector<16x16xf32>
    %987 = arith.mulf %986, %976 : vector<16x16xf32>
    %988 = arith.addf %970, %987 : vector<16x16xf32>
    %c123_261 = arith.constant 123 : index
    %989 = memref.load %arg3[%c123_261] : memref<144xf32, #tpu.memory_space<smem>>
    %990 = vector.broadcast %989 : f32 to vector<16x16xf32>
    %991 = arith.mulf %990, %976 : vector<16x16xf32>
    %992 = arith.addf %974, %991 : vector<16x16xf32>
    %c1_262 = arith.constant 1 : index
    %c9_263 = arith.constant 9 : index
    %c8_264 = arith.constant 8 : index
    %993 = vector.load %arg7[%c1_262, %c9_263, %c8_264] : memref<4x32x32xf32, #tpu.memory_space<vmem>>, vector<1x16x16xf32>
    %994 = vector.shape_cast %993 : vector<1x16x16xf32> to vector<16x16xf32>
    %c16_265 = arith.constant 16 : index
    %995 = memref.load %arg3[%c16_265] : memref<144xf32, #tpu.memory_space<smem>>
    %996 = vector.broadcast %995 : f32 to vector<16x16xf32>
    %997 = arith.mulf %996, %994 : vector<16x16xf32>
    %998 = arith.addf %980, %997 : vector<16x16xf32>
    %c52_266 = arith.constant 52 : index
    %999 = memref.load %arg3[%c52_266] : memref<144xf32, #tpu.memory_space<smem>>
    %1000 = vector.broadcast %999 : f32 to vector<16x16xf32>
    %1001 = arith.mulf %1000, %994 : vector<16x16xf32>
    %1002 = arith.addf %984, %1001 : vector<16x16xf32>
    %c88_267 = arith.constant 88 : index
    %1003 = memref.load %arg3[%c88_267] : memref<144xf32, #tpu.memory_space<smem>>
    %1004 = vector.broadcast %1003 : f32 to vector<16x16xf32>
    %1005 = arith.mulf %1004, %994 : vector<16x16xf32>
    %1006 = arith.addf %988, %1005 : vector<16x16xf32>
    %c124_268 = arith.constant 124 : index
    %1007 = memref.load %arg3[%c124_268] : memref<144xf32, #tpu.memory_space<smem>>
    %1008 = vector.broadcast %1007 : f32 to vector<16x16xf32>
    %1009 = arith.mulf %1008, %994 : vector<16x16xf32>
    %1010 = arith.addf %992, %1009 : vector<16x16xf32>
    %c1_269 = arith.constant 1 : index
    %c9_270 = arith.constant 9 : index
    %c9_271 = arith.constant 9 : index
    %1011 = vector.load %arg7[%c1_269, %c9_270, %c9_271] : memref<4x32x32xf32, #tpu.memory_space<vmem>>, vector<1x16x16xf32>
    %1012 = vector.shape_cast %1011 : vector<1x16x16xf32> to vector<16x16xf32>
    %c17_272 = arith.constant 17 : index
    %1013 = memref.load %arg3[%c17_272] : memref<144xf32, #tpu.memory_space<smem>>
    %1014 = vector.broadcast %1013 : f32 to vector<16x16xf32>
    %1015 = arith.mulf %1014, %1012 : vector<16x16xf32>
    %1016 = arith.addf %998, %1015 : vector<16x16xf32>
    %c53_273 = arith.constant 53 : index
    %1017 = memref.load %arg3[%c53_273] : memref<144xf32, #tpu.memory_space<smem>>
    %1018 = vector.broadcast %1017 : f32 to vector<16x16xf32>
    %1019 = arith.mulf %1018, %1012 : vector<16x16xf32>
    %1020 = arith.addf %1002, %1019 : vector<16x16xf32>
    %c89_274 = arith.constant 89 : index
    %1021 = memref.load %arg3[%c89_274] : memref<144xf32, #tpu.memory_space<smem>>
    %1022 = vector.broadcast %1021 : f32 to vector<16x16xf32>
    %1023 = arith.mulf %1022, %1012 : vector<16x16xf32>
    %1024 = arith.addf %1006, %1023 : vector<16x16xf32>
    %c125_275 = arith.constant 125 : index
    %1025 = memref.load %arg3[%c125_275] : memref<144xf32, #tpu.memory_space<smem>>
    %1026 = vector.broadcast %1025 : f32 to vector<16x16xf32>
    %1027 = arith.mulf %1026, %1012 : vector<16x16xf32>
    %1028 = arith.addf %1010, %1027 : vector<16x16xf32>
    %c2_276 = arith.constant 2 : index
    %c7_277 = arith.constant 7 : index
    %c7_278 = arith.constant 7 : index
    %1029 = vector.load %arg7[%c2_276, %c7_277, %c7_278] : memref<4x32x32xf32, #tpu.memory_space<vmem>>, vector<1x16x16xf32>
    %1030 = vector.shape_cast %1029 : vector<1x16x16xf32> to vector<16x16xf32>
    %c18_279 = arith.constant 18 : index
    %1031 = memref.load %arg3[%c18_279] : memref<144xf32, #tpu.memory_space<smem>>
    %1032 = vector.broadcast %1031 : f32 to vector<16x16xf32>
    %1033 = arith.mulf %1032, %1030 : vector<16x16xf32>
    %1034 = arith.addf %1016, %1033 : vector<16x16xf32>
    %c54_280 = arith.constant 54 : index
    %1035 = memref.load %arg3[%c54_280] : memref<144xf32, #tpu.memory_space<smem>>
    %1036 = vector.broadcast %1035 : f32 to vector<16x16xf32>
    %1037 = arith.mulf %1036, %1030 : vector<16x16xf32>
    %1038 = arith.addf %1020, %1037 : vector<16x16xf32>
    %c90_281 = arith.constant 90 : index
    %1039 = memref.load %arg3[%c90_281] : memref<144xf32, #tpu.memory_space<smem>>
    %1040 = vector.broadcast %1039 : f32 to vector<16x16xf32>
    %1041 = arith.mulf %1040, %1030 : vector<16x16xf32>
    %1042 = arith.addf %1024, %1041 : vector<16x16xf32>
    %c126_282 = arith.constant 126 : index
    %1043 = memref.load %arg3[%c126_282] : memref<144xf32, #tpu.memory_space<smem>>
    %1044 = vector.broadcast %1043 : f32 to vector<16x16xf32>
    %1045 = arith.mulf %1044, %1030 : vector<16x16xf32>
    %1046 = arith.addf %1028, %1045 : vector<16x16xf32>
    %c2_283 = arith.constant 2 : index
    %c7_284 = arith.constant 7 : index
    %c8_285 = arith.constant 8 : index
    %1047 = vector.load %arg7[%c2_283, %c7_284, %c8_285] : memref<4x32x32xf32, #tpu.memory_space<vmem>>, vector<1x16x16xf32>
    %1048 = vector.shape_cast %1047 : vector<1x16x16xf32> to vector<16x16xf32>
    %c19_286 = arith.constant 19 : index
    %1049 = memref.load %arg3[%c19_286] : memref<144xf32, #tpu.memory_space<smem>>
    %1050 = vector.broadcast %1049 : f32 to vector<16x16xf32>
    %1051 = arith.mulf %1050, %1048 : vector<16x16xf32>
    %1052 = arith.addf %1034, %1051 : vector<16x16xf32>
    %c55_287 = arith.constant 55 : index
    %1053 = memref.load %arg3[%c55_287] : memref<144xf32, #tpu.memory_space<smem>>
    %1054 = vector.broadcast %1053 : f32 to vector<16x16xf32>
    %1055 = arith.mulf %1054, %1048 : vector<16x16xf32>
    %1056 = arith.addf %1038, %1055 : vector<16x16xf32>
    %c91_288 = arith.constant 91 : index
    %1057 = memref.load %arg3[%c91_288] : memref<144xf32, #tpu.memory_space<smem>>
    %1058 = vector.broadcast %1057 : f32 to vector<16x16xf32>
    %1059 = arith.mulf %1058, %1048 : vector<16x16xf32>
    %1060 = arith.addf %1042, %1059 : vector<16x16xf32>
    %c127_289 = arith.constant 127 : index
    %1061 = memref.load %arg3[%c127_289] : memref<144xf32, #tpu.memory_space<smem>>
    %1062 = vector.broadcast %1061 : f32 to vector<16x16xf32>
    %1063 = arith.mulf %1062, %1048 : vector<16x16xf32>
    %1064 = arith.addf %1046, %1063 : vector<16x16xf32>
    %c2_290 = arith.constant 2 : index
    %c7_291 = arith.constant 7 : index
    %c9_292 = arith.constant 9 : index
    %1065 = vector.load %arg7[%c2_290, %c7_291, %c9_292] : memref<4x32x32xf32, #tpu.memory_space<vmem>>, vector<1x16x16xf32>
    %1066 = vector.shape_cast %1065 : vector<1x16x16xf32> to vector<16x16xf32>
    %c20_293 = arith.constant 20 : index
    %1067 = memref.load %arg3[%c20_293] : memref<144xf32, #tpu.memory_space<smem>>
    %1068 = vector.broadcast %1067 : f32 to vector<16x16xf32>
    %1069 = arith.mulf %1068, %1066 : vector<16x16xf32>
    %1070 = arith.addf %1052, %1069 : vector<16x16xf32>
    %c56_294 = arith.constant 56 : index
    %1071 = memref.load %arg3[%c56_294] : memref<144xf32, #tpu.memory_space<smem>>
    %1072 = vector.broadcast %1071 : f32 to vector<16x16xf32>
    %1073 = arith.mulf %1072, %1066 : vector<16x16xf32>
    %1074 = arith.addf %1056, %1073 : vector<16x16xf32>
    %c92_295 = arith.constant 92 : index
    %1075 = memref.load %arg3[%c92_295] : memref<144xf32, #tpu.memory_space<smem>>
    %1076 = vector.broadcast %1075 : f32 to vector<16x16xf32>
    %1077 = arith.mulf %1076, %1066 : vector<16x16xf32>
    %1078 = arith.addf %1060, %1077 : vector<16x16xf32>
    %c128_296 = arith.constant 128 : index
    %1079 = memref.load %arg3[%c128_296] : memref<144xf32, #tpu.memory_space<smem>>
    %1080 = vector.broadcast %1079 : f32 to vector<16x16xf32>
    %1081 = arith.mulf %1080, %1066 : vector<16x16xf32>
    %1082 = arith.addf %1064, %1081 : vector<16x16xf32>
    %c2_297 = arith.constant 2 : index
    %c8_298 = arith.constant 8 : index
    %c7_299 = arith.constant 7 : index
    %1083 = vector.load %arg7[%c2_297, %c8_298, %c7_299] : memref<4x32x32xf32, #tpu.memory_space<vmem>>, vector<1x16x16xf32>
    %1084 = vector.shape_cast %1083 : vector<1x16x16xf32> to vector<16x16xf32>
    %c21_300 = arith.constant 21 : index
    %1085 = memref.load %arg3[%c21_300] : memref<144xf32, #tpu.memory_space<smem>>
    %1086 = vector.broadcast %1085 : f32 to vector<16x16xf32>
    %1087 = arith.mulf %1086, %1084 : vector<16x16xf32>
    %1088 = arith.addf %1070, %1087 : vector<16x16xf32>
    %c57_301 = arith.constant 57 : index
    %1089 = memref.load %arg3[%c57_301] : memref<144xf32, #tpu.memory_space<smem>>
    %1090 = vector.broadcast %1089 : f32 to vector<16x16xf32>
    %1091 = arith.mulf %1090, %1084 : vector<16x16xf32>
    %1092 = arith.addf %1074, %1091 : vector<16x16xf32>
    %c93_302 = arith.constant 93 : index
    %1093 = memref.load %arg3[%c93_302] : memref<144xf32, #tpu.memory_space<smem>>
    %1094 = vector.broadcast %1093 : f32 to vector<16x16xf32>
    %1095 = arith.mulf %1094, %1084 : vector<16x16xf32>
    %1096 = arith.addf %1078, %1095 : vector<16x16xf32>
    %c129_303 = arith.constant 129 : index
    %1097 = memref.load %arg3[%c129_303] : memref<144xf32, #tpu.memory_space<smem>>
    %1098 = vector.broadcast %1097 : f32 to vector<16x16xf32>
    %1099 = arith.mulf %1098, %1084 : vector<16x16xf32>
    %1100 = arith.addf %1082, %1099 : vector<16x16xf32>
    %c2_304 = arith.constant 2 : index
    %c8_305 = arith.constant 8 : index
    %c8_306 = arith.constant 8 : index
    %1101 = vector.load %arg7[%c2_304, %c8_305, %c8_306] : memref<4x32x32xf32, #tpu.memory_space<vmem>>, vector<1x16x16xf32>
    %1102 = vector.shape_cast %1101 : vector<1x16x16xf32> to vector<16x16xf32>
    %c22_307 = arith.constant 22 : index
    %1103 = memref.load %arg3[%c22_307] : memref<144xf32, #tpu.memory_space<smem>>
    %1104 = vector.broadcast %1103 : f32 to vector<16x16xf32>
    %1105 = arith.mulf %1104, %1102 : vector<16x16xf32>
    %1106 = arith.addf %1088, %1105 : vector<16x16xf32>
    %c58_308 = arith.constant 58 : index
    %1107 = memref.load %arg3[%c58_308] : memref<144xf32, #tpu.memory_space<smem>>
    %1108 = vector.broadcast %1107 : f32 to vector<16x16xf32>
    %1109 = arith.mulf %1108, %1102 : vector<16x16xf32>
    %1110 = arith.addf %1092, %1109 : vector<16x16xf32>
    %c94_309 = arith.constant 94 : index
    %1111 = memref.load %arg3[%c94_309] : memref<144xf32, #tpu.memory_space<smem>>
    %1112 = vector.broadcast %1111 : f32 to vector<16x16xf32>
    %1113 = arith.mulf %1112, %1102 : vector<16x16xf32>
    %1114 = arith.addf %1096, %1113 : vector<16x16xf32>
    %c130_310 = arith.constant 130 : index
    %1115 = memref.load %arg3[%c130_310] : memref<144xf32, #tpu.memory_space<smem>>
    %1116 = vector.broadcast %1115 : f32 to vector<16x16xf32>
    %1117 = arith.mulf %1116, %1102 : vector<16x16xf32>
    %1118 = arith.addf %1100, %1117 : vector<16x16xf32>
    %c2_311 = arith.constant 2 : index
    %c8_312 = arith.constant 8 : index
    %c9_313 = arith.constant 9 : index
    %1119 = vector.load %arg7[%c2_311, %c8_312, %c9_313] : memref<4x32x32xf32, #tpu.memory_space<vmem>>, vector<1x16x16xf32>
    %1120 = vector.shape_cast %1119 : vector<1x16x16xf32> to vector<16x16xf32>
    %c23_314 = arith.constant 23 : index
    %1121 = memref.load %arg3[%c23_314] : memref<144xf32, #tpu.memory_space<smem>>
    %1122 = vector.broadcast %1121 : f32 to vector<16x16xf32>
    %1123 = arith.mulf %1122, %1120 : vector<16x16xf32>
    %1124 = arith.addf %1106, %1123 : vector<16x16xf32>
    %c59_315 = arith.constant 59 : index
    %1125 = memref.load %arg3[%c59_315] : memref<144xf32, #tpu.memory_space<smem>>
    %1126 = vector.broadcast %1125 : f32 to vector<16x16xf32>
    %1127 = arith.mulf %1126, %1120 : vector<16x16xf32>
    %1128 = arith.addf %1110, %1127 : vector<16x16xf32>
    %c95_316 = arith.constant 95 : index
    %1129 = memref.load %arg3[%c95_316] : memref<144xf32, #tpu.memory_space<smem>>
    %1130 = vector.broadcast %1129 : f32 to vector<16x16xf32>
    %1131 = arith.mulf %1130, %1120 : vector<16x16xf32>
    %1132 = arith.addf %1114, %1131 : vector<16x16xf32>
    %c131_317 = arith.constant 131 : index
    %1133 = memref.load %arg3[%c131_317] : memref<144xf32, #tpu.memory_space<smem>>
    %1134 = vector.broadcast %1133 : f32 to vector<16x16xf32>
    %1135 = arith.mulf %1134, %1120 : vector<16x16xf32>
    %1136 = arith.addf %1118, %1135 : vector<16x16xf32>
    %c2_318 = arith.constant 2 : index
    %c9_319 = arith.constant 9 : index
    %c7_320 = arith.constant 7 : index
    %1137 = vector.load %arg7[%c2_318, %c9_319, %c7_320] : memref<4x32x32xf32, #tpu.memory_space<vmem>>, vector<1x16x16xf32>
    %1138 = vector.shape_cast %1137 : vector<1x16x16xf32> to vector<16x16xf32>
    %c24_321 = arith.constant 24 : index
    %1139 = memref.load %arg3[%c24_321] : memref<144xf32, #tpu.memory_space<smem>>
    %1140 = vector.broadcast %1139 : f32 to vector<16x16xf32>
    %1141 = arith.mulf %1140, %1138 : vector<16x16xf32>
    %1142 = arith.addf %1124, %1141 : vector<16x16xf32>
    %c60_322 = arith.constant 60 : index
    %1143 = memref.load %arg3[%c60_322] : memref<144xf32, #tpu.memory_space<smem>>
    %1144 = vector.broadcast %1143 : f32 to vector<16x16xf32>
    %1145 = arith.mulf %1144, %1138 : vector<16x16xf32>
    %1146 = arith.addf %1128, %1145 : vector<16x16xf32>
    %c96_323 = arith.constant 96 : index
    %1147 = memref.load %arg3[%c96_323] : memref<144xf32, #tpu.memory_space<smem>>
    %1148 = vector.broadcast %1147 : f32 to vector<16x16xf32>
    %1149 = arith.mulf %1148, %1138 : vector<16x16xf32>
    %1150 = arith.addf %1132, %1149 : vector<16x16xf32>
    %c132_324 = arith.constant 132 : index
    %1151 = memref.load %arg3[%c132_324] : memref<144xf32, #tpu.memory_space<smem>>
    %1152 = vector.broadcast %1151 : f32 to vector<16x16xf32>
    %1153 = arith.mulf %1152, %1138 : vector<16x16xf32>
    %1154 = arith.addf %1136, %1153 : vector<16x16xf32>
    %c2_325 = arith.constant 2 : index
    %c9_326 = arith.constant 9 : index
    %c8_327 = arith.constant 8 : index
    %1155 = vector.load %arg7[%c2_325, %c9_326, %c8_327] : memref<4x32x32xf32, #tpu.memory_space<vmem>>, vector<1x16x16xf32>
    %1156 = vector.shape_cast %1155 : vector<1x16x16xf32> to vector<16x16xf32>
    %c25_328 = arith.constant 25 : index
    %1157 = memref.load %arg3[%c25_328] : memref<144xf32, #tpu.memory_space<smem>>
    %1158 = vector.broadcast %1157 : f32 to vector<16x16xf32>
    %1159 = arith.mulf %1158, %1156 : vector<16x16xf32>
    %1160 = arith.addf %1142, %1159 : vector<16x16xf32>
    %c61_329 = arith.constant 61 : index
    %1161 = memref.load %arg3[%c61_329] : memref<144xf32, #tpu.memory_space<smem>>
    %1162 = vector.broadcast %1161 : f32 to vector<16x16xf32>
    %1163 = arith.mulf %1162, %1156 : vector<16x16xf32>
    %1164 = arith.addf %1146, %1163 : vector<16x16xf32>
    %c97_330 = arith.constant 97 : index
    %1165 = memref.load %arg3[%c97_330] : memref<144xf32, #tpu.memory_space<smem>>
    %1166 = vector.broadcast %1165 : f32 to vector<16x16xf32>
    %1167 = arith.mulf %1166, %1156 : vector<16x16xf32>
    %1168 = arith.addf %1150, %1167 : vector<16x16xf32>
    %c133_331 = arith.constant 133 : index
    %1169 = memref.load %arg3[%c133_331] : memref<144xf32, #tpu.memory_space<smem>>
    %1170 = vector.broadcast %1169 : f32 to vector<16x16xf32>
    %1171 = arith.mulf %1170, %1156 : vector<16x16xf32>
    %1172 = arith.addf %1154, %1171 : vector<16x16xf32>
    %c2_332 = arith.constant 2 : index
    %c9_333 = arith.constant 9 : index
    %c9_334 = arith.constant 9 : index
    %1173 = vector.load %arg7[%c2_332, %c9_333, %c9_334] : memref<4x32x32xf32, #tpu.memory_space<vmem>>, vector<1x16x16xf32>
    %1174 = vector.shape_cast %1173 : vector<1x16x16xf32> to vector<16x16xf32>
    %c26_335 = arith.constant 26 : index
    %1175 = memref.load %arg3[%c26_335] : memref<144xf32, #tpu.memory_space<smem>>
    %1176 = vector.broadcast %1175 : f32 to vector<16x16xf32>
    %1177 = arith.mulf %1176, %1174 : vector<16x16xf32>
    %1178 = arith.addf %1160, %1177 : vector<16x16xf32>
    %c62_336 = arith.constant 62 : index
    %1179 = memref.load %arg3[%c62_336] : memref<144xf32, #tpu.memory_space<smem>>
    %1180 = vector.broadcast %1179 : f32 to vector<16x16xf32>
    %1181 = arith.mulf %1180, %1174 : vector<16x16xf32>
    %1182 = arith.addf %1164, %1181 : vector<16x16xf32>
    %c98_337 = arith.constant 98 : index
    %1183 = memref.load %arg3[%c98_337] : memref<144xf32, #tpu.memory_space<smem>>
    %1184 = vector.broadcast %1183 : f32 to vector<16x16xf32>
    %1185 = arith.mulf %1184, %1174 : vector<16x16xf32>
    %1186 = arith.addf %1168, %1185 : vector<16x16xf32>
    %c134_338 = arith.constant 134 : index
    %1187 = memref.load %arg3[%c134_338] : memref<144xf32, #tpu.memory_space<smem>>
    %1188 = vector.broadcast %1187 : f32 to vector<16x16xf32>
    %1189 = arith.mulf %1188, %1174 : vector<16x16xf32>
    %1190 = arith.addf %1172, %1189 : vector<16x16xf32>
    %c3_339 = arith.constant 3 : index
    %c7_340 = arith.constant 7 : index
    %c7_341 = arith.constant 7 : index
    %1191 = vector.load %arg7[%c3_339, %c7_340, %c7_341] : memref<4x32x32xf32, #tpu.memory_space<vmem>>, vector<1x16x16xf32>
    %1192 = vector.shape_cast %1191 : vector<1x16x16xf32> to vector<16x16xf32>
    %c27_342 = arith.constant 27 : index
    %1193 = memref.load %arg3[%c27_342] : memref<144xf32, #tpu.memory_space<smem>>
    %1194 = vector.broadcast %1193 : f32 to vector<16x16xf32>
    %1195 = arith.mulf %1194, %1192 : vector<16x16xf32>
    %1196 = arith.addf %1178, %1195 : vector<16x16xf32>
    %c63_343 = arith.constant 63 : index
    %1197 = memref.load %arg3[%c63_343] : memref<144xf32, #tpu.memory_space<smem>>
    %1198 = vector.broadcast %1197 : f32 to vector<16x16xf32>
    %1199 = arith.mulf %1198, %1192 : vector<16x16xf32>
    %1200 = arith.addf %1182, %1199 : vector<16x16xf32>
    %c99_344 = arith.constant 99 : index
    %1201 = memref.load %arg3[%c99_344] : memref<144xf32, #tpu.memory_space<smem>>
    %1202 = vector.broadcast %1201 : f32 to vector<16x16xf32>
    %1203 = arith.mulf %1202, %1192 : vector<16x16xf32>
    %1204 = arith.addf %1186, %1203 : vector<16x16xf32>
    %c135_345 = arith.constant 135 : index
    %1205 = memref.load %arg3[%c135_345] : memref<144xf32, #tpu.memory_space<smem>>
    %1206 = vector.broadcast %1205 : f32 to vector<16x16xf32>
    %1207 = arith.mulf %1206, %1192 : vector<16x16xf32>
    %1208 = arith.addf %1190, %1207 : vector<16x16xf32>
    %c3_346 = arith.constant 3 : index
    %c7_347 = arith.constant 7 : index
    %c8_348 = arith.constant 8 : index
    %1209 = vector.load %arg7[%c3_346, %c7_347, %c8_348] : memref<4x32x32xf32, #tpu.memory_space<vmem>>, vector<1x16x16xf32>
    %1210 = vector.shape_cast %1209 : vector<1x16x16xf32> to vector<16x16xf32>
    %c28_349 = arith.constant 28 : index
    %1211 = memref.load %arg3[%c28_349] : memref<144xf32, #tpu.memory_space<smem>>
    %1212 = vector.broadcast %1211 : f32 to vector<16x16xf32>
    %1213 = arith.mulf %1212, %1210 : vector<16x16xf32>
    %1214 = arith.addf %1196, %1213 : vector<16x16xf32>
    %c64_350 = arith.constant 64 : index
    %1215 = memref.load %arg3[%c64_350] : memref<144xf32, #tpu.memory_space<smem>>
    %1216 = vector.broadcast %1215 : f32 to vector<16x16xf32>
    %1217 = arith.mulf %1216, %1210 : vector<16x16xf32>
    %1218 = arith.addf %1200, %1217 : vector<16x16xf32>
    %c100_351 = arith.constant 100 : index
    %1219 = memref.load %arg3[%c100_351] : memref<144xf32, #tpu.memory_space<smem>>
    %1220 = vector.broadcast %1219 : f32 to vector<16x16xf32>
    %1221 = arith.mulf %1220, %1210 : vector<16x16xf32>
    %1222 = arith.addf %1204, %1221 : vector<16x16xf32>
    %c136_352 = arith.constant 136 : index
    %1223 = memref.load %arg3[%c136_352] : memref<144xf32, #tpu.memory_space<smem>>
    %1224 = vector.broadcast %1223 : f32 to vector<16x16xf32>
    %1225 = arith.mulf %1224, %1210 : vector<16x16xf32>
    %1226 = arith.addf %1208, %1225 : vector<16x16xf32>
    %c3_353 = arith.constant 3 : index
    %c7_354 = arith.constant 7 : index
    %c9_355 = arith.constant 9 : index
    %1227 = vector.load %arg7[%c3_353, %c7_354, %c9_355] : memref<4x32x32xf32, #tpu.memory_space<vmem>>, vector<1x16x16xf32>
    %1228 = vector.shape_cast %1227 : vector<1x16x16xf32> to vector<16x16xf32>
    %c29_356 = arith.constant 29 : index
    %1229 = memref.load %arg3[%c29_356] : memref<144xf32, #tpu.memory_space<smem>>
    %1230 = vector.broadcast %1229 : f32 to vector<16x16xf32>
    %1231 = arith.mulf %1230, %1228 : vector<16x16xf32>
    %1232 = arith.addf %1214, %1231 : vector<16x16xf32>
    %c65_357 = arith.constant 65 : index
    %1233 = memref.load %arg3[%c65_357] : memref<144xf32, #tpu.memory_space<smem>>
    %1234 = vector.broadcast %1233 : f32 to vector<16x16xf32>
    %1235 = arith.mulf %1234, %1228 : vector<16x16xf32>
    %1236 = arith.addf %1218, %1235 : vector<16x16xf32>
    %c101_358 = arith.constant 101 : index
    %1237 = memref.load %arg3[%c101_358] : memref<144xf32, #tpu.memory_space<smem>>
    %1238 = vector.broadcast %1237 : f32 to vector<16x16xf32>
    %1239 = arith.mulf %1238, %1228 : vector<16x16xf32>
    %1240 = arith.addf %1222, %1239 : vector<16x16xf32>
    %c137_359 = arith.constant 137 : index
    %1241 = memref.load %arg3[%c137_359] : memref<144xf32, #tpu.memory_space<smem>>
    %1242 = vector.broadcast %1241 : f32 to vector<16x16xf32>
    %1243 = arith.mulf %1242, %1228 : vector<16x16xf32>
    %1244 = arith.addf %1226, %1243 : vector<16x16xf32>
    %c3_360 = arith.constant 3 : index
    %c8_361 = arith.constant 8 : index
    %c7_362 = arith.constant 7 : index
    %1245 = vector.load %arg7[%c3_360, %c8_361, %c7_362] : memref<4x32x32xf32, #tpu.memory_space<vmem>>, vector<1x16x16xf32>
    %1246 = vector.shape_cast %1245 : vector<1x16x16xf32> to vector<16x16xf32>
    %c30_363 = arith.constant 30 : index
    %1247 = memref.load %arg3[%c30_363] : memref<144xf32, #tpu.memory_space<smem>>
    %1248 = vector.broadcast %1247 : f32 to vector<16x16xf32>
    %1249 = arith.mulf %1248, %1246 : vector<16x16xf32>
    %1250 = arith.addf %1232, %1249 : vector<16x16xf32>
    %c66_364 = arith.constant 66 : index
    %1251 = memref.load %arg3[%c66_364] : memref<144xf32, #tpu.memory_space<smem>>
    %1252 = vector.broadcast %1251 : f32 to vector<16x16xf32>
    %1253 = arith.mulf %1252, %1246 : vector<16x16xf32>
    %1254 = arith.addf %1236, %1253 : vector<16x16xf32>
    %c102_365 = arith.constant 102 : index
    %1255 = memref.load %arg3[%c102_365] : memref<144xf32, #tpu.memory_space<smem>>
    %1256 = vector.broadcast %1255 : f32 to vector<16x16xf32>
    %1257 = arith.mulf %1256, %1246 : vector<16x16xf32>
    %1258 = arith.addf %1240, %1257 : vector<16x16xf32>
    %c138_366 = arith.constant 138 : index
    %1259 = memref.load %arg3[%c138_366] : memref<144xf32, #tpu.memory_space<smem>>
    %1260 = vector.broadcast %1259 : f32 to vector<16x16xf32>
    %1261 = arith.mulf %1260, %1246 : vector<16x16xf32>
    %1262 = arith.addf %1244, %1261 : vector<16x16xf32>
    %c3_367 = arith.constant 3 : index
    %c8_368 = arith.constant 8 : index
    %c8_369 = arith.constant 8 : index
    %1263 = vector.load %arg7[%c3_367, %c8_368, %c8_369] : memref<4x32x32xf32, #tpu.memory_space<vmem>>, vector<1x16x16xf32>
    %1264 = vector.shape_cast %1263 : vector<1x16x16xf32> to vector<16x16xf32>
    %c31_370 = arith.constant 31 : index
    %1265 = memref.load %arg3[%c31_370] : memref<144xf32, #tpu.memory_space<smem>>
    %1266 = vector.broadcast %1265 : f32 to vector<16x16xf32>
    %1267 = arith.mulf %1266, %1264 : vector<16x16xf32>
    %1268 = arith.addf %1250, %1267 : vector<16x16xf32>
    %c67_371 = arith.constant 67 : index
    %1269 = memref.load %arg3[%c67_371] : memref<144xf32, #tpu.memory_space<smem>>
    %1270 = vector.broadcast %1269 : f32 to vector<16x16xf32>
    %1271 = arith.mulf %1270, %1264 : vector<16x16xf32>
    %1272 = arith.addf %1254, %1271 : vector<16x16xf32>
    %c103_372 = arith.constant 103 : index
    %1273 = memref.load %arg3[%c103_372] : memref<144xf32, #tpu.memory_space<smem>>
    %1274 = vector.broadcast %1273 : f32 to vector<16x16xf32>
    %1275 = arith.mulf %1274, %1264 : vector<16x16xf32>
    %1276 = arith.addf %1258, %1275 : vector<16x16xf32>
    %c139_373 = arith.constant 139 : index
    %1277 = memref.load %arg3[%c139_373] : memref<144xf32, #tpu.memory_space<smem>>
    %1278 = vector.broadcast %1277 : f32 to vector<16x16xf32>
    %1279 = arith.mulf %1278, %1264 : vector<16x16xf32>
    %1280 = arith.addf %1262, %1279 : vector<16x16xf32>
    %c3_374 = arith.constant 3 : index
    %c8_375 = arith.constant 8 : index
    %c9_376 = arith.constant 9 : index
    %1281 = vector.load %arg7[%c3_374, %c8_375, %c9_376] : memref<4x32x32xf32, #tpu.memory_space<vmem>>, vector<1x16x16xf32>
    %1282 = vector.shape_cast %1281 : vector<1x16x16xf32> to vector<16x16xf32>
    %c32_377 = arith.constant 32 : index
    %1283 = memref.load %arg3[%c32_377] : memref<144xf32, #tpu.memory_space<smem>>
    %1284 = vector.broadcast %1283 : f32 to vector<16x16xf32>
    %1285 = arith.mulf %1284, %1282 : vector<16x16xf32>
    %1286 = arith.addf %1268, %1285 : vector<16x16xf32>
    %c68_378 = arith.constant 68 : index
    %1287 = memref.load %arg3[%c68_378] : memref<144xf32, #tpu.memory_space<smem>>
    %1288 = vector.broadcast %1287 : f32 to vector<16x16xf32>
    %1289 = arith.mulf %1288, %1282 : vector<16x16xf32>
    %1290 = arith.addf %1272, %1289 : vector<16x16xf32>
    %c104_379 = arith.constant 104 : index
    %1291 = memref.load %arg3[%c104_379] : memref<144xf32, #tpu.memory_space<smem>>
    %1292 = vector.broadcast %1291 : f32 to vector<16x16xf32>
    %1293 = arith.mulf %1292, %1282 : vector<16x16xf32>
    %1294 = arith.addf %1276, %1293 : vector<16x16xf32>
    %c140_380 = arith.constant 140 : index
    %1295 = memref.load %arg3[%c140_380] : memref<144xf32, #tpu.memory_space<smem>>
    %1296 = vector.broadcast %1295 : f32 to vector<16x16xf32>
    %1297 = arith.mulf %1296, %1282 : vector<16x16xf32>
    %1298 = arith.addf %1280, %1297 : vector<16x16xf32>
    %c3_381 = arith.constant 3 : index
    %c9_382 = arith.constant 9 : index
    %c7_383 = arith.constant 7 : index
    %1299 = vector.load %arg7[%c3_381, %c9_382, %c7_383] : memref<4x32x32xf32, #tpu.memory_space<vmem>>, vector<1x16x16xf32>
    %1300 = vector.shape_cast %1299 : vector<1x16x16xf32> to vector<16x16xf32>
    %c33_384 = arith.constant 33 : index
    %1301 = memref.load %arg3[%c33_384] : memref<144xf32, #tpu.memory_space<smem>>
    %1302 = vector.broadcast %1301 : f32 to vector<16x16xf32>
    %1303 = arith.mulf %1302, %1300 : vector<16x16xf32>
    %1304 = arith.addf %1286, %1303 : vector<16x16xf32>
    %c69_385 = arith.constant 69 : index
    %1305 = memref.load %arg3[%c69_385] : memref<144xf32, #tpu.memory_space<smem>>
    %1306 = vector.broadcast %1305 : f32 to vector<16x16xf32>
    %1307 = arith.mulf %1306, %1300 : vector<16x16xf32>
    %1308 = arith.addf %1290, %1307 : vector<16x16xf32>
    %c105_386 = arith.constant 105 : index
    %1309 = memref.load %arg3[%c105_386] : memref<144xf32, #tpu.memory_space<smem>>
    %1310 = vector.broadcast %1309 : f32 to vector<16x16xf32>
    %1311 = arith.mulf %1310, %1300 : vector<16x16xf32>
    %1312 = arith.addf %1294, %1311 : vector<16x16xf32>
    %c141_387 = arith.constant 141 : index
    %1313 = memref.load %arg3[%c141_387] : memref<144xf32, #tpu.memory_space<smem>>
    %1314 = vector.broadcast %1313 : f32 to vector<16x16xf32>
    %1315 = arith.mulf %1314, %1300 : vector<16x16xf32>
    %1316 = arith.addf %1298, %1315 : vector<16x16xf32>
    %c3_388 = arith.constant 3 : index
    %c9_389 = arith.constant 9 : index
    %c8_390 = arith.constant 8 : index
    %1317 = vector.load %arg7[%c3_388, %c9_389, %c8_390] : memref<4x32x32xf32, #tpu.memory_space<vmem>>, vector<1x16x16xf32>
    %1318 = vector.shape_cast %1317 : vector<1x16x16xf32> to vector<16x16xf32>
    %c34_391 = arith.constant 34 : index
    %1319 = memref.load %arg3[%c34_391] : memref<144xf32, #tpu.memory_space<smem>>
    %1320 = vector.broadcast %1319 : f32 to vector<16x16xf32>
    %1321 = arith.mulf %1320, %1318 : vector<16x16xf32>
    %1322 = arith.addf %1304, %1321 : vector<16x16xf32>
    %c70_392 = arith.constant 70 : index
    %1323 = memref.load %arg3[%c70_392] : memref<144xf32, #tpu.memory_space<smem>>
    %1324 = vector.broadcast %1323 : f32 to vector<16x16xf32>
    %1325 = arith.mulf %1324, %1318 : vector<16x16xf32>
    %1326 = arith.addf %1308, %1325 : vector<16x16xf32>
    %c106_393 = arith.constant 106 : index
    %1327 = memref.load %arg3[%c106_393] : memref<144xf32, #tpu.memory_space<smem>>
    %1328 = vector.broadcast %1327 : f32 to vector<16x16xf32>
    %1329 = arith.mulf %1328, %1318 : vector<16x16xf32>
    %1330 = arith.addf %1312, %1329 : vector<16x16xf32>
    %c142_394 = arith.constant 142 : index
    %1331 = memref.load %arg3[%c142_394] : memref<144xf32, #tpu.memory_space<smem>>
    %1332 = vector.broadcast %1331 : f32 to vector<16x16xf32>
    %1333 = arith.mulf %1332, %1318 : vector<16x16xf32>
    %1334 = arith.addf %1316, %1333 : vector<16x16xf32>
    %c3_395 = arith.constant 3 : index
    %c9_396 = arith.constant 9 : index
    %c9_397 = arith.constant 9 : index
    %1335 = vector.load %arg7[%c3_395, %c9_396, %c9_397] : memref<4x32x32xf32, #tpu.memory_space<vmem>>, vector<1x16x16xf32>
    %1336 = vector.shape_cast %1335 : vector<1x16x16xf32> to vector<16x16xf32>
    %c35_398 = arith.constant 35 : index
    %1337 = memref.load %arg3[%c35_398] : memref<144xf32, #tpu.memory_space<smem>>
    %1338 = vector.broadcast %1337 : f32 to vector<16x16xf32>
    %1339 = arith.mulf %1338, %1336 : vector<16x16xf32>
    %1340 = arith.addf %1322, %1339 : vector<16x16xf32>
    %c71_399 = arith.constant 71 : index
    %1341 = memref.load %arg3[%c71_399] : memref<144xf32, #tpu.memory_space<smem>>
    %1342 = vector.broadcast %1341 : f32 to vector<16x16xf32>
    %1343 = arith.mulf %1342, %1336 : vector<16x16xf32>
    %1344 = arith.addf %1326, %1343 : vector<16x16xf32>
    %c107_400 = arith.constant 107 : index
    %1345 = memref.load %arg3[%c107_400] : memref<144xf32, #tpu.memory_space<smem>>
    %1346 = vector.broadcast %1345 : f32 to vector<16x16xf32>
    %1347 = arith.mulf %1346, %1336 : vector<16x16xf32>
    %1348 = arith.addf %1330, %1347 : vector<16x16xf32>
    %c143_401 = arith.constant 143 : index
    %1349 = memref.load %arg3[%c143_401] : memref<144xf32, #tpu.memory_space<smem>>
    %1350 = vector.broadcast %1349 : f32 to vector<16x16xf32>
    %1351 = arith.mulf %1350, %1336 : vector<16x16xf32>
    %1352 = arith.addf %1334, %1351 : vector<16x16xf32>
    %c0_402 = arith.constant 0 : index
    %c0_403 = arith.constant 0 : index
    %c0_404 = arith.constant 0 : index
    %c0_405 = arith.constant 0 : index
    %1353 = vector.load %arg5[%c0_402, %c0_403, %c0_404, %c0_405] : memref<1x4x16x16xf32, #tpu.memory_space<vmem>>, vector<1x1x16x16xf32>
    %1354 = vector.shape_cast %1353 : vector<1x1x16x16xf32> to vector<16x16xf32>
    %1355 = arith.addf %1340, %1354 : vector<16x16xf32>
    %c0_406 = arith.constant 0 : index
    %c0_407 = arith.constant 0 : index
    %c0_408 = arith.constant 0 : index
    %c0_409 = arith.constant 0 : index
    %1356 = vector.load %arg6[%c0_406, %c0_407, %c0_408, %c0_409] : memref<1x4x16x16xf32, #tpu.memory_space<vmem>>, vector<1x1x16x16xf32>
    %1357 = vector.shape_cast %1356 : vector<1x1x16x16xf32> to vector<16x16xf32>
    %1358 = vector.shape_cast %1355 : vector<16x16xf32> to vector<1x1x16x16xf32>
    tpu.vector_store %arg6[%c0_406, %c0_407, %c0_408, %c0_409], %1358 {strides = array<i32>} : memref<1x4x16x16xf32, #tpu.memory_space<vmem>>, vector<1x1x16x16xf32>,
    %c0_410 = arith.constant 0 : index
    %c1_411 = arith.constant 1 : index
    %c0_412 = arith.constant 0 : index
    %c0_413 = arith.constant 0 : index
    %1359 = vector.load %arg5[%c0_410, %c1_411, %c0_412, %c0_413] : memref<1x4x16x16xf32, #tpu.memory_space<vmem>>, vector<1x1x16x16xf32>
    %1360 = vector.shape_cast %1359 : vector<1x1x16x16xf32> to vector<16x16xf32>
    %1361 = arith.addf %1344, %1360 : vector<16x16xf32>
    %c0_414 = arith.constant 0 : index
    %c1_415 = arith.constant 1 : index
    %c0_416 = arith.constant 0 : index
    %c0_417 = arith.constant 0 : index
    %1362 = vector.load %arg6[%c0_414, %c1_415, %c0_416, %c0_417] : memref<1x4x16x16xf32, #tpu.memory_space<vmem>>, vector<1x1x16x16xf32>
    %1363 = vector.shape_cast %1362 : vector<1x1x16x16xf32> to vector<16x16xf32>
    %1364 = vector.shape_cast %1361 : vector<16x16xf32> to vector<1x1x16x16xf32>
    tpu.vector_store %arg6[%c0_414, %c1_415, %c0_416, %c0_417], %1364 {strides = array<i32>} : memref<1x4x16x16xf32, #tpu.memory_space<vmem>>, vector<1x1x16x16xf32>,
    %c0_418 = arith.constant 0 : index
    %c2_419 = arith.constant 2 : index
    %c0_420 = arith.constant 0 : index
    %c0_421 = arith.constant 0 : index
    %1365 = vector.load %arg5[%c0_418, %c2_419, %c0_420, %c0_421] : memref<1x4x16x16xf32, #tpu.memory_space<vmem>>, vector<1x1x16x16xf32>
    %1366 = vector.shape_cast %1365 : vector<1x1x16x16xf32> to vector<16x16xf32>
    %1367 = arith.addf %1348, %1366 : vector<16x16xf32>
    %c0_422 = arith.constant 0 : index
    %c2_423 = arith.constant 2 : index
    %c0_424 = arith.constant 0 : index
    %c0_425 = arith.constant 0 : index
    %1368 = vector.load %arg6[%c0_422, %c2_423, %c0_424, %c0_425] : memref<1x4x16x16xf32, #tpu.memory_space<vmem>>, vector<1x1x16x16xf32>
    %1369 = vector.shape_cast %1368 : vector<1x1x16x16xf32> to vector<16x16xf32>
    %1370 = vector.shape_cast %1367 : vector<16x16xf32> to vector<1x1x16x16xf32>
    tpu.vector_store %arg6[%c0_422, %c2_423, %c0_424, %c0_425], %1370 {strides = array<i32>} : memref<1x4x16x16xf32, #tpu.memory_space<vmem>>, vector<1x1x16x16xf32>,
    %c0_426 = arith.constant 0 : index
    %c3_427 = arith.constant 3 : index
    %c0_428 = arith.constant 0 : index
    %c0_429 = arith.constant 0 : index
    %1371 = vector.load %arg5[%c0_426, %c3_427, %c0_428, %c0_429] : memref<1x4x16x16xf32, #tpu.memory_space<vmem>>, vector<1x1x16x16xf32>
    %1372 = vector.shape_cast %1371 : vector<1x1x16x16xf32> to vector<16x16xf32>
    %1373 = arith.addf %1352, %1372 : vector<16x16xf32>
    %c0_430 = arith.constant 0 : index
    %c3_431 = arith.constant 3 : index
    %c0_432 = arith.constant 0 : index
    %c0_433 = arith.constant 0 : index
    %1374 = vector.load %arg6[%c0_430, %c3_431, %c0_432, %c0_433] : memref<1x4x16x16xf32, #tpu.memory_space<vmem>>, vector<1x1x16x16xf32>
    %1375 = vector.shape_cast %1374 : vector<1x1x16x16xf32> to vector<16x16xf32>
    %1376 = vector.shape_cast %1373 : vector<16x16xf32> to vector<1x1x16x16xf32>
    tpu.vector_store %arg6[%c0_430, %c3_431, %c0_432, %c0_433], %1376 {strides = array<i32>} : memref<1x4x16x16xf32, #tpu.memory_space<vmem>>, vector<1x1x16x16xf32>,
    return
  }
  func.func @transform_0(%arg0: i32) -> i32 {
    %c0_i32 = arith.constant 0 : i32
    %c0_i32_0 = arith.constant 0 : i32
    return %c0_i32 : i32
  }
  func.func @transform_1(%arg0: i32) -> i32 {
    %c0_i32 = arith.constant 0 : i32
    %c0_i32_0 = arith.constant 0 : i32
    return %c0_i32 : i32
  }
  func.func @transform_2(%arg0: i32) -> i32 {
    %c0_i32 = arith.constant 0 : i32
    %c0_i32_0 = arith.constant 0 : i32
    return %c0_i32 : i32
  }
  func.func @transform_3(%arg0: i32) -> i32 {
    %c0_i32 = arith.constant 0 : i32
    %c0_i32_0 = arith.constant 0 : i32
    return %c0_i32 : i32
  }
  func.func @transform_4(%arg0: i32) -> (i32, i32, i32, i32) {
    %c0_i32 = arith.constant 0 : i32
    %c0_i32_0 = arith.constant 0 : i32
    %c0_i32_1 = arith.constant 0 : i32
    %c0_i32_2 = arith.constant 0 : i32
    return %arg0, %c0_i32, %c0_i32_0, %c0_i32_1 : i32, i32, i32, i32
  }
  func.func @transform_5(%arg0: i32) -> (i32, i32, i32, i32) {
    %c0_i32 = arith.constant 0 : i32
    %c0_i32_0 = arith.constant 0 : i32
    %c0_i32_1 = arith.constant 0 : i32
    %c0_i32_2 = arith.constant 0 : i32
    return %arg0, %c0_i32, %c0_i32_0, %c0_i32_1 : i32, i32, i32, i32
  }
}

</mosaic_0001>

<bundles_post_ra>
// kernel: tpu_custom_call.1
= control target key start
LH: loop header
LB: loop body
LE: loop exit
PB: predicated region body
PF: predicated region fallthrough
CT: control target
= control target key end

     0   :  { %s7325_s0 = inlined_call_operand.hbm [shape: f32[144], index: 0, kind: input, shape index: {}]   ;;  %s7326_s1 = inlined_call_operand.vmem [shape: f32[4], index: 1, kind: input, shape index: {}]   ;;  %s7327_s2 = inlined_call_operand.vmem [shape: f32[144], index: 2, kind: input, shape index: {}]   ;;  %s7328_s3 = inlined_call_operand.vmem [shape: f32[4], index: 3, kind: input, shape index: {}]   ;;  %s7329_s4 = inlined_call_operand.hbm [shape: f32[2,4,16,16], index: 4, kind: input, shape index: {}]   ;;  %s7330_s5 = inlined_call_operand.hbm [shape: f32[2,4,16,16], index: 5, kind: output, shape index: {}]  }
   0x1   :  { %7347 = sst [smem:[#allocation145_spill]] %s7325_s0 }
   0x2   :  { %7348 = sst [smem:[#allocation146_spill]] %s7326_s1 }
   0x3   :  { %7349 = sst [smem:[#allocation147_spill]] %s7327_s2 }
   0x4   :  { %7350 = sst [smem:[#allocation148_spill]] %s7328_s3 }
   0x5   :  { %7351 = sst [smem:[#allocation149_spill]] %s7329_s4 }
   0x6   :  { %10 = vsyncpa [#allocation6], 0 }
   0x7   :  { %11 = vsyncpa [#allocation7], 0 }
   0x8   :  { %12 = vsyncpa [#allocation10], 0 }
   0x9   :  { %13 = vsyncpa [#allocation4], 0 }
   0xa   :  { %15 = vsyncpa [#allocation4 + $0x1], 0 }
   0xb   :  { %16 = vsyncpa [#allocation5], 0 }
   0xc   :  { %18 = vsyncpa [#allocation5 + $0x1], 0  ;;  %s4634_s18 = smov 0   ;;  %s4636_s19 = smov 0  }
   0xd   :  { %s4638_s20 = smov 0   ;;  %s4640_s21 = smov 0  }
   0xe LB: > { %7352 = sst [smem:[#allocation19_spill]] %s4574_s18  ;;  %s4655_s22 = sadd.s32 4294967295, %s4586_s21   ;;  %s4586_s21 = sphi %s4640_s21, %s7653_s21   ;;  %s4582_s20 = sphi %s4638_s20, %s7656_s20   ;;  %s4578_s19 = sphi %s4636_s19, %s7655_s19   ;;  %s4574_s18 = sphi %s4634_s18, %s7654_s18  }
   0xf   : > { %7353 = sst [smem:[#allocation20_spill]] %s4578_s19  ;;  %s3971_s23 = sadd.s32 4294967294, %s4586_s21  }
  0x10   : > { %7354 = sst [smem:[#allocation21_spill]] %s4582_s20  ;;  %p128_p0 = scmp.ne.s32.totalorder %s4578_s19, %s4574_s18 }
  0x11   : > { %7355 = sst [smem:[#allocation22_spill]] %s4586_s21  ;;  %p7331_p1 = scmp.eq.s32.totalorder %s4655_s22, 0 }
  0x12   : > { %p158_p3 = scmp.eq.s32.totalorder %s3971_s23, 1  ;;  %p3972_p5 = scmp.ge.s32.totalorder %s4586_s21, 1 }
  0x13   : > { %p4664_p4 = por %p7331_p1, %p128_p0  ;;  %p165_p7 = scmp.lt.s32.totalorder %s4586_s21, 3 }
  0x14   : > { %p4669_p6 = por %p158_p3, %p128_p0  ;;  %s7359_s2 = sld [smem:[#allocation147_spill]] }
  0x15   : > { %s7356_s24 = scalar_select %p4664_p4, 1, 0 }
  0x16   : > { %s7357_s25 = scalar_select %p4669_p6, 1, 0 }
  0x17   : > { %p4677_p8 = pnand %p3972_p5, %p165_p7  ;;  %s7361_s1 = sld [smem:[#allocation146_spill]] }
  0x18   : > { %7358 = sst [smem:[#allocation23_spill]] %s7357_s25 }
  0x19   : > { %p4319_p10 = pneg %p4677_p8  ;;  %s7363_s3 = sld [smem:[#allocation148_spill]] }
  0x1a   : > { %s198_s28 = sshll.u32 %s7359_s2, 4  ;;  %s199_s28 = int_to_ptr.vmem [resolvable:$true] %s198_s28 }
  0x1b   : > { %p4689_p11 = pnand %p4319_p10, %p7331_p1  ;;  %s4420_s12 = scalar_lea.vmem %s199_s28, 32 }
  0x1c   : > { %p4421_p12 = scmp.ne.s32.totalorder %s199_s28, %s4420_s12  ;;  %p4428_p5 = scmp.lt.s32.totalorder %s199_s28, %s199_s28 }
  0x1d   : > { %s187_s7 = sshll.u32 %s7361_s1, 4  ;;  %p4422_p13 = pneg %p4689_p11  ;;  %s4693_s7 = int_to_ptr.vmem [resolvable:$true] %s187_s7 }
  0x1e   : > { %p4429_p7 = scmp.lt.s32.totalorder %s4420_s12, %s4420_s12 }
  0x1f   : > { %s209_s11 = sshll.u32 %s7363_s3, 4  ;;  %p4423_p0 = pnand %p4422_p13, %p4421_p12  ;;  %s4698_s11 = int_to_ptr.vmem [resolvable:$true] %s209_s11 }
  0x20   : > { %p4430_p10 = por %p4429_p7, %p4428_p5 }
  0x21   : > { %p4424_p3 = pneg %p4423_p0 }
  0x23   : > { %p4431_p9 = pnand %p4430_p10, %p4424_p3 }
  0x25   : > { %4434 = shalt.err (!%p4431_p9)
}
  0x26   : > { %s4588_s13 = smov [#allocation9]   ;;  %s7364_s0 = sld [smem:[#allocation145_spill]] }
  0x27   : > { %4328 = dma.vmem_to_smem (!%p4689_p11), %s199_s28, 32, %s4588_s13, [#allocation10]  }
  0x2c   : > { %s4435_s16 = scalar_lea.hbm %s7364_s0, 32 }
  0x2d   : > { %p4436_p1 = scmp.ne.s32.totalorder %s7364_s0, %s4435_s16  ;;  %p4442_p9 = scmp.lt.u32.totalorder %s4435_s16, %s7364_s0 }
  0x2f   : > { %p4438_p12 = pnand %p4436_p1, %p4422_p13 }
  0x31   : > { %p4439_p0 = pneg %p4438_p12 }
  0x33   : > { %p4444_p3 = pnand %p4442_p9, %p4439_p0 }
  0x35   : > { %4447 = shalt.err (!%p4444_p3)
}
  0x36   : > { %s4589_s30 = smov [#allocation3]   ;;  %s4448_s9 = scalar_lea.vmem %s4693_s7, 16 }
  0x37   : > { %4322 = dma.hbm_to_smem (!%p4689_p11), %s7364_s0, 32, %s4589_s30, [#allocation6]  }
  0x38   : > { %p4449_p1 = scmp.ne.s32.totalorder %s4693_s7, %s4448_s9  ;;  %p4456_p10 = scmp.lt.s32.totalorder %s4693_s7, %s4693_s7 }
  0x39   : > { %p4457_p12 = scmp.lt.s32.totalorder %s4448_s9, %s4448_s9 }
  0x3a   : > { %p4451_p5 = pnand %p4449_p1, %p4422_p13 }
  0x3b   : > { %p4458_p0 = por %p4457_p12, %p4456_p10 }
  0x3c   : > { %p4452_p7 = pneg %p4451_p5 }
  0x3e   : > { %p4459_p9 = pnand %p4458_p0, %p4452_p7 }
  0x40   : > { %4462 = shalt.err (!%p4459_p9)
}
  0x41   : > { %s4590_s10 = smov [#allocation8]   ;;  %s4463_s12 = scalar_lea.vmem %s4698_s11, 16 }
  0x42   : > { %4325 = dma.vmem_to_smem (!%p4689_p11), %s4693_s7, 16, %s4590_s10, [#allocation7]  }
  0x43   : > { %p4464_p3 = scmp.ne.s32.totalorder %s4698_s11, %s4463_s12  ;;  %p4471_p2 = scmp.lt.s32.totalorder %s4698_s11, %s4698_s11 }
  0x44   : > { %p4472_p10 = scmp.lt.s32.totalorder %s4463_s12, %s4463_s12 }
  0x45   : > { %p4466_p1 = pnand %p4464_p3, %p4422_p13 }
  0x46   : > { %p4473_p7 = por %p4472_p10, %p4471_p2 }
  0x47   : > { %p4467_p5 = pneg %p4466_p1 }
  0x49   : > { %p4474_p12 = pnand %p4473_p7, %p4467_p5 }
  0x4b   : > { %4477 = shalt.err (!%p4474_p12)
}
  0x4c   : > { %s4591_s13 = smov [#allocation11]   ;;  %s4745_s7 = sadd.s32 1, %s4586_s21  }
  0x4d   : > { %4331 = dma.vmem_to_smem (!%p4689_p11), %s4698_s11, 16, %s4591_s13, [#allocation10]  }
  0x4e   : > { %7365 = sst [smem:[#allocation24_spill]] %s4745_s7  ;;  %s112_s14 = ssub.s32 %s4586_s21, %s4745_s7 }
  0x4f   : > { %p113_p2 = scmp.eq.s32.totalorder %s112_s14, 0  ;;  %s115_s15 = sadd.s32 1, %s4582_s20 }
  0x50   : > { %p122_p13 = scmp.ne.s32.totalorder %s4582_s20, %s4578_s19  ;;  %p123_p0 = scmp.eq.s32.totalorder %s4586_s21, 0 }
  0x51   : > { %s4754_s8 = scalar_select %p113_p2, %s4582_s20, %s115_s15  }
  0x52   : > { %p124_p9 = por %p123_p0, %p122_p13  ;;  %p7367_p3 = scmp.eq.s32.totalorder %s4655_s22, 1 }
  0x53   : > { %7366 = sst [smem:[#allocation25_spill]] %s4754_s8  ;;  %p4344_p5 = scmp.lt.s32.totalorder %s4586_s21, 2 }
  0x54   : > { %p4758_p1 = por %p7367_p3, %p122_p13  ;;  %s220_s17 = sand.u32 1, %s4582_s20  }
  0x55   : > { %s3978_s23 = sshll.u32 %s220_s17, 6  ;;  %s4297_s11 = sshll.u32 %s4586_s21, 10 }
  0x56   : > { %s7368_s16 = scalar_select %p4758_p1, 1, 0 }
  0x57   : > { %s7369_s4 = sld [smem:[#allocation149_spill]]  ;;  %s224_s28 = scalar_lea.vmem [#allocation12], %s3978_s23 }
  0x58   : > { %s231_s6 = sshll.u32 %s224_s28, 4  ;;  %p4772_p11 = pnand %p4344_p5, %p124_p9  ;;  %s4770_s6 = int_to_ptr.vmem [resolvable:$true] %s231_s6 }
  0x59   : > { %s4776_s10 = scalar_lea.sflag [#allocation4], %s220_s17 }
  0x5a   : > { %p4480_p7 = pneg %p4772_p11 }
  0x5d   : > { %s4768_s30 = scalar_lea.hbm %s7369_s4, %s4297_s11  ;;  %s4483_s15 = scalar_lea.hbm %s7369_s4, 2048 }
  0x5e   : > { %s4478_s12 = scalar_lea.hbm %s4768_s30, 1024  ;;  %p4484_p13 = scmp.lt.u32.totalorder %s4768_s30, %s7369_s4 }
  0x5f   : > { %p4479_p10 = scmp.ne.s32.totalorder %s4768_s30, %s4478_s12  ;;  %p4485_p0 = scmp.lt.u32.totalorder %s4483_s15, %s4478_s12 }
  0x60   : > { %p4487_p3 = scmp.lt.u32.totalorder %s4478_s12, %s4768_s30 }
  0x61   : > { %p4481_p12 = pnand %p4480_p7, %p4479_p10  ;;  %p4486_p9 = por %p4485_p0, %p4484_p13 }
  0x63   : > { %p4482_p2 = pneg %p4481_p12  ;;  %p4488_p5 = por %p4487_p3, %p4486_p9 }
  0x65   : > { %p4489_p6 = pnand %p4488_p5, %p4482_p2 }
  0x67   : > { %4492 = shalt.err (!%p4489_p6)
}
  0x68   : > { %s4493_s17 = scalar_lea.vmem %s4770_s6, 1024  ;;  %s4592_s26 = smov [#allocation12]  }
  0x69   : > { %p4494_p10 = scmp.ne.s32.totalorder %s4770_s6, %s4493_s17  ;;  %s4498_s27 = sshll.u32 %s4592_s26, 4  ;;  %s4499_s27 = int_to_ptr.vmem [resolvable:$false] %s4498_s27 }
  0x6a   : > { %s4500_s28 = scalar_lea.vmem %s4499_s27, 2048  ;;  %p4501_p4 = scmp.lt.s32.totalorder %s4770_s6, %s4499_s27 }
  0x6b   : > { %p4496_p12 = pnand %p4494_p10, %p4480_p7  ;;  %p4502_p13 = scmp.lt.s32.totalorder %s4500_s28, %s4493_s17 }
  0x6d   : > { %p4497_p1 = pneg %p4496_p12  ;;  %p4503_p0 = por %p4502_p13, %p4501_p4 }
  0x6f   : > { %p4504_p9 = pnand %p4503_p0, %p4497_p1 }
  0x71   : > { %4507 = shalt.err (!%p4504_p9)
}
  0x72   : > { %s4593_s12 = smov 128   ;;  %s4594_s13 = smov 8  }
  0x73   : > { %4335 = dma.hbm_to_vmem [thread:$0]  (!%p4772_p11), %s4768_s30, 1024, %s4770_s6, %s4776_s10, %s4593_s12, %s4593_s12, %s4594_s13  }
  0x74   : > { %243 = sbr.rel (%p4677_p8) target bundleno = 1524 (0x5f4), region = 40 }
  0x7b   : > { %p7371_p6 = scmp.eq.s32.totalorder %s4655_s22, 0 }
  0x7d   : > { %4553 = dma.done.wait (%p7371_p6), [#allocation6], 32   ;;  %p7372_p7 = pmov %p7371_p6 }
  0x7e   : > { %p7373_p4 = pmov %p7371_p6 }
  0x7f   : > { %4555 = vsyncadd (%p7372_p7), [#allocation6], 4294967264 }
  0x80   : > { %4557 = dma.done.wait (%p7373_p4), [#allocation7], 16   ;;  %p7374_p1 = pmov %p7373_p4 }
  0x82   : > { %4559 = vsyncadd (%p7374_p1), [#allocation7], 4294967280  ;;  %p7375_p2 = pmov %p7374_p1 }
  0x83   : > { %p7376_p11 = pmov %p7374_p1 }
  0x84   : > { %4561 = dma.done.wait (%p7375_p2), [#allocation10], 48  }
  0x85   : > { %4563 = vsyncadd (%p7376_p11), [#allocation10], 4294967248  ;;  %s4819_s29 = sand.u32 1, %s4578_s19   ;;  %p7377_p8 = scmp.ne.s32.totalorder %s7356_s24, 0 }
  0x86   : > { %s7335_s30 = sshll.u32 %s4819_s29, 6  ;;  %s262_s6 = scalar_lea.sflag [#allocation4], %s4819_s29 }
  0x87   : > { %s4825_s9 = scalar_lea.vmem [#allocation12], %s7335_s30 }
  0x88   : > { %4565 = dma.done.wait (%p7377_p8), %s262_s6, 1024  }
  0x89   : > { %4567 = vsyncadd (%p7377_p8), %s262_s6, 4294966272 }
  0x8a   : > { %270 = sfence }
  0x8b   : > { %v310_v0 = vld [vmem:[%s4825_s9] sm:$0xff]  ;;  %v312_v1 = vld [vmem:[%s4825_s9 + $0x10] sm:$0xff]  ;;  %vm293_vm0 = vcmask 261120   ;;  %s7334_s10 = smov 8   ;;  %v311_v2 = vld [vmem:[%s4825_s9 + $0x8] sm:$0xff]  ;;  %v4596_v4 = vmov 0.0  }
  0x8c   : > { %326 = vrot.lane.b32.xlu0 %v310_v0, %s7334_s10  ;;  %330 = vrot.lane.b32.xlu1 %v312_v1, %s7334_s10  ;;  %v313_v3 = vld [vmem:[%s4825_s9 + $0x18] sm:$0xff]  ;;  %294 = vst.msk [vmem:[#allocation2] sm:$0xff] %vm293_vm0, %v4596_v4  ;;  %295 = vst.msk [vmem:[#allocation2 + $0x8] sm:$0xff] %vm293_vm0, %v4596_v4  ;;  %v314_v5 = vld [vmem:[%s4825_s9 + $0x20] sm:$0xff]  ;;  %vm350_vm1 = vcmask 195648   ;;  %s3994_s24 = sld [smem:[#allocation3 + $0x1]] }
  0x8d   : > { %296 = vst.msk [vmem:[#allocation2 + $0x10] sm:$0xff] %vm293_vm0, %v4596_v4  ;;  %297 = vst.msk [vmem:[#allocation2 + $0x18] sm:$0xff] %vm293_vm0, %v4596_v4  ;;  %v315_v6 = vld [vmem:[%s4825_s9 + $0x28] sm:$0xff]  ;;  %v316_v7 = vld [vmem:[%s4825_s9 + $0x30] sm:$0xff]  ;;  %s3995_s14 = sld [smem:[#allocation3 + $0x25]]  ;;  %s3996_s15 = sld [smem:[#allocation3 + $0x49]] }
  0x8e   : > { %298 = vst.msk [vmem:[#allocation2 + $0x20] sm:$0xff] %vm293_vm0, %v4596_v4  ;;  %299 = vst.msk [vmem:[#allocation2 + $0x28] sm:$0xff] %vm293_vm0, %v4596_v4  ;;  %v317_v8 = vld [vmem:[%s4825_s9 + $0x38] sm:$0xff]  ;;  %s3997_s23 = sld [smem:[#allocation3 + $0x6d]]  ;;  %s7336_s11 = smov 127   ;;  %vm3766_vm2 = vcmask 130048  }
  0x8f   : > { %300 = vst.msk [vmem:[#allocation2 + $0x30] sm:$0xff] %vm293_vm0, %v4596_v4  ;;  %301 = vst.msk [vmem:[#allocation2 + $0x38] sm:$0xff] %vm293_vm0, %v4596_v4  ;;  %s3998_s17 = sld [smem:[#allocation3 + $0x2]]  ;;  %s3999_s26 = sld [smem:[#allocation3 + $0x26]] }
  0x90   : > { %302 = vst.msk [vmem:[#allocation2 + $0x40] sm:$0xff] %vm293_vm0, %v4596_v4  ;;  %303 = vst.msk [vmem:[#allocation2 + $0x48] sm:$0xff] %vm293_vm0, %v4596_v4  ;;  %328 = vrot.lane.b32.xlu0 %v311_v2, %s7334_s10  ;;  %332 = vrot.lane.b32.xlu1 %v313_v3, %s7334_s10  ;;  %s4000_s27 = sld [smem:[#allocation3 + $0x4a]]  ;;  %s4001_s28 = sld [smem:[#allocation3 + $0x6e]] }
  0x91   : > { %304 = vst.msk [vmem:[#allocation2 + $0x50] sm:$0xff] %vm293_vm0, %v4596_v4  ;;  %305 = vst.msk [vmem:[#allocation2 + $0x58] sm:$0xff] %vm293_vm0, %v4596_v4  ;;  %s7338_s12 = smov 126   ;;  %s4006_s13 = sld [smem:[#allocation3 + $0x4]] }
  0x92   : > { %306 = vst.msk [vmem:[#allocation2 + $0x60] sm:$0xff] %vm293_vm0, %v4596_v4  ;;  %307 = vst.msk [vmem:[#allocation2 + $0x68] sm:$0xff] %vm293_vm0, %v4596_v4  ;;  %v398_v13 = vstv %s3994_s24  ;;  %s4007_s6 = sld [smem:[#allocation3 + $0x28]]  ;;  %s4008_s24 = sld [smem:[#allocation3 + $0x4c]] }
  0x93   : > { %308 = vst.msk [vmem:[#allocation2 + $0x70] sm:$0xff] %vm293_vm0, %v4596_v4  ;;  %309 = vst.msk [vmem:[#allocation2 + $0x78] sm:$0xff] %vm293_vm0, %v4596_v4  ;;  %v412_v18 = vstv %s3995_s14  ;;  %v426_v24 = vstv %s3996_s15  ;;  %s4009_s14 = sld [smem:[#allocation3 + $0x70]]  ;;  %s4010_s15 = sld [smem:[#allocation3 + $0x5]] }
  0x94   : > { %334 = vrot.lane.b32.xlu0 %v314_v5, %s7334_s10  ;;  %336 = vrot.lane.b32.xlu1 %v315_v6, %s7334_s10  ;;  %v440_v27 = vstv %s3997_s23  ;;  %s4011_s23 = sld [smem:[#allocation3 + $0x29]]  ;;  %s5554_s30 = sld [smem:[#allocation3 + $0x4b]] }
  0x95   : > { %v454_v30 = vstv %s3998_s17  ;;  %v468_v33 = vstv %s3999_s26  ;;  %s4012_s17 = sld [smem:[#allocation3 + $0x4d]]  ;;  %s4013_s26 = sld [smem:[#allocation3 + $0x71]] }
  0x96   : > { %v482_v36 = vstv %s4000_s27  ;;  %v496_v39 = vstv %s4001_s28  ;;  %s4018_s27 = sld [smem:[#allocation3 + $0x7]]  ;;  %s4019_s28 = sld [smem:[#allocation3 + $0x2b]] }
  0x97   : > { %v536_v43 = vstv %s4006_s13  ;;  %s4020_s13 = sld [smem:[#allocation3 + $0x4f]]  ;;  %s5560_s0 = sld [smem:[#allocation3 + $0x6]] }
  0x98   : > { %338 = vrot.lane.b32.xlu0 %v316_v7, %s7334_s10  ;;  %340 = vrot.lane.b32.xlu1 %v317_v8, %s7334_s10  ;;  %v550_v47 = vstv %s4007_s6  ;;  %v564_v50 = vstv %s4008_s24  ;;  %s4021_s6 = sld [smem:[#allocation3 + $0x73]]  ;;  %s4022_s24 = sld [smem:[#allocation3 + $0x8]] }
  0x99   : > { %v578_v53 = vstv %s4009_s14  ;;  %v592_v56 = vstv %s4010_s15  ;;  %s4023_s14 = sld [smem:[#allocation3 + $0x2c]]  ;;  %s4024_s15 = sld [smem:[#allocation3 + $0x50]] }
  0x9a   : > { %v606_v59 = vstv %s4011_s23  ;;  %s4025_s23 = sld [smem:[#allocation3 + $0x74]]  ;;  %s5551_s10 = sld [smem:[#allocation3 + $0x27]] }
  0x9b   : > { %v620_v62 = vstv %s4012_s17  ;;  %v634_v1 = vstv %s4013_s26  ;;  %s4030_s17 = sld [smem:[#allocation3 + $0xa]]  ;;  %s4031_s26 = sld [smem:[#allocation3 + $0x2e]] }
  0x9c   : > { %v674_v5 = vstv %s4018_s27  ;;  %s4032_s27 = sld [smem:[#allocation3 + $0x52]]  ;;  %s5564_s2 = sld [smem:[#allocation3 + $0x4e]] }
  0x9d   : > { %s5562_s1 = sld [smem:[#allocation3 + $0x2a]]  ;;  %s5578_s4 = sld [smem:[#allocation3 + $0x51]] }
  0x9e   : > { %s5566_s3 = sld [smem:[#allocation3 + $0x72]]  ;;  %s5580_s8 = sld [smem:[#allocation3 + $0x75]] }
  0x9f   : > { %s7489_s20 = smov 126   ;;  %s5584_s19 = sld [smem:[#allocation3 + $0xc]] }
  0xa0   : > { %s5586_s7 = sld [smem:[#allocation3 + $0x30]]  ;;  %s5589_s21 = sld [smem:[#allocation3 + $0x54]] }
  0xa1   : > { %s5591_s25 = sld [smem:[#allocation3 + $0x78]]  ;;  %s5607_s18 = sld [smem:[#allocation3 + $0x33]] }
  0xa2   : > { %p7646_p5 = scmp.ne.s32.totalorder %s7368_s16, 0 }
  0xfe   : > { %v327_v9 = vpop.permute.xlu0 %326  ;;  %v331_v10 = vpop.permute.xlu1 %330 }
  0xff   : > { %351 = vst.msk [vmem:[#allocation2 + $0x8] sm:$0xff] %vm350_vm1, %v327_v9  ;;  %353 = vst.msk [vmem:[#allocation2 + $0x28] sm:$0xff] %vm350_vm1, %v331_v10  ;;  %v688_v9 = vstv %s4019_s28  ;;  %s4033_s28 = sld [smem:[#allocation3 + $0x76]] }
 0x102   : > { %v329_v11 = vpop.permute.xlu0 %328  ;;  %v333_v12 = vpop.permute.xlu1 %332 }
 0x103   : > { %352 = vst.msk [vmem:[#allocation2 + $0x10] sm:$0xff] %vm350_vm1, %v329_v11  ;;  %354 = vst.msk [vmem:[#allocation2 + $0x30] sm:$0xff] %vm350_vm1, %v333_v12  ;;  %v702_v12 = vstv %s4020_s13  ;;  %s4034_s13 = sld [smem:[#allocation3 + $0xb]] }
 0x106   : > { %v371_v14 = vld [vmem:[#allocation2 + $0x7] sm:$0xff]  ;;  %v335_v15 = vpop.permute.xlu0 %334  ;;  %v337_v16 = vpop.permute.xlu1 %336 }
 0x107   : > { %v399_v17 = vmul.f32 %v398_v13, %v371_v14  ;;  %355 = vst.msk [vmem:[#allocation2 + $0x48] sm:$0xff] %vm350_vm1, %v335_v15  ;;  %356 = vst.msk [vmem:[#allocation2 + $0x50] sm:$0xff] %vm350_vm1, %v337_v16  ;;  %v413_v23 = vmul.f32 %v412_v18, %v371_v14  ;;  %v427_v26 = vmul.f32 %v426_v24, %v371_v14  ;;  %v509_v42 = vld [vmem:[#allocation2 + $0x8] sm:$0xff]  ;;  %v716_v15 = vstv %s4021_s6  ;;  %s4035_s6 = sld [smem:[#allocation3 + $0x2f]] }
 0x108   : > { %v441_v29 = vmul.f32 %v440_v27, %v371_v14  ;;  %v455_v32 = vmul.f32 %v454_v30, %v371_v14  ;;  %v469_v35 = vmul.f32 %v468_v33, %v371_v14  ;;  %v483_v38 = vmul.f32 %v482_v36, %v371_v14 }
 0x109   : > { %403 = vrot.lane.b32.xlu0 %v399_v17, %s7336_s11  ;;  %v497_v41 = vmul.f32 %v496_v39, %v371_v14  ;;  %v537_v45 = vmul.f32 %v536_v43, %v509_v42  ;;  %v551_v49 = vmul.f32 %v550_v47, %v509_v42  ;;  %v565_v52 = vmul.f32 %v564_v50, %v509_v42 }
 0x10a   : > { %v372_v19 = vld [vmem:[#allocation2 + $0xf] sm:$0xff]  ;;  %v339_v20 = vpop.permute.xlu0 %338  ;;  %v341_v21 = vpop.permute.xlu1 %340  ;;  %v579_v55 = vmul.f32 %v578_v53, %v509_v42  ;;  %v593_v58 = vmul.f32 %v592_v56, %v509_v42  ;;  %v607_v61 = vmul.f32 %v606_v59, %v509_v42  ;;  %v621_v0 = vmul.f32 %v620_v62, %v509_v42 }
 0x10b   : > { %v400_v22 = vmul.f32 %v398_v13, %v372_v19  ;;  %357 = vst.msk [vmem:[#allocation2 + $0x68] sm:$0xff] %vm350_vm1, %v339_v20  ;;  %358 = vst.msk [vmem:[#allocation2 + $0x70] sm:$0xff] %vm350_vm1, %v341_v21  ;;  %v414_v25 = vmul.f32 %v412_v18, %v372_v19  ;;  %v428_v28 = vmul.f32 %v426_v24, %v372_v19  ;;  %v510_v46 = vld [vmem:[#allocation2 + $0x10] sm:$0xff]  ;;  %v730_v18 = vstv %s4022_s24  ;;  %s4036_s24 = sld [smem:[#allocation3 + $0x53]] }
 0x10c   : > { %v442_v31 = vmul.f32 %v440_v27, %v372_v19  ;;  %v456_v34 = vmul.f32 %v454_v30, %v372_v19  ;;  %v470_v37 = vmul.f32 %v468_v33, %v372_v19  ;;  %v484_v40 = vmul.f32 %v482_v36, %v372_v19  ;;  %v647_v4 = vld [vmem:[#allocation2 + $0x9] sm:$0xff]  ;;  %v648_v8 = vld [vmem:[#allocation2 + $0x11] sm:$0xff] }
 0x10d   : > { %405 = vrot.lane.b32.xlu1 %v400_v22, %s7336_s11  ;;  %417 = vrot.lane.b32.xlu0 %v413_v23, %s7336_s11  ;;  %v498_v44 = vmul.f32 %v496_v39, %v372_v19  ;;  %v538_v48 = vmul.f32 %v536_v43, %v510_v46  ;;  %v552_v51 = vmul.f32 %v550_v47, %v510_v46  ;;  %v744_v21 = vstv %s4023_s14  ;;  %s4037_s14 = sld [smem:[#allocation3 + $0x77]] }
 0x10e   : > { %v566_v54 = vmul.f32 %v564_v50, %v510_v46  ;;  %v580_v57 = vmul.f32 %v578_v53, %v510_v46  ;;  %v594_v60 = vmul.f32 %v592_v56, %v510_v46  ;;  %v608_v63 = vmul.f32 %v606_v59, %v510_v46 }
 0x10f   : > { %v622_v2 = vmul.f32 %v620_v62, %v510_v46  ;;  %v635_v3 = vmul.f32 %v634_v1, %v509_v42  ;;  %v636_v6 = vmul.f32 %v634_v1, %v510_v46  ;;  %v675_v7 = vmul.f32 %v674_v5, %v647_v4 }
 0x110   : > { %v676_v10 = vmul.f32 %v674_v5, %v648_v8  ;;  %v689_v11 = vmul.f32 %v688_v9, %v647_v4  ;;  %v690_v13 = vmul.f32 %v688_v9, %v648_v8  ;;  %v703_v14 = vmul.f32 %v702_v12, %v647_v4 }
 0x111   : > { %419 = vrot.lane.b32.xlu1 %v414_v25, %s7336_s11  ;;  %431 = vrot.lane.b32.xlu0 %v427_v26, %s7336_s11  ;;  %v704_v16 = vmul.f32 %v702_v12, %v648_v8  ;;  %v717_v17 = vmul.f32 %v716_v15, %v647_v4  ;;  %v718_v19 = vmul.f32 %v716_v15, %v648_v8  ;;  %v758_v24 = vstv %s4024_s15  ;;  %s4930_s15 = sld [smem:[#allocation3 + $0xd]] }
 0x112   : > { %v731_v20 = vmul.f32 %v730_v18, %v647_v4  ;;  %v732_v22 = vmul.f32 %v730_v18, %v648_v8  ;;  %v745_v23 = vmul.f32 %v744_v21, %v647_v4  ;;  %v746_v25 = vmul.f32 %v744_v21, %v648_v8 }
 0x113   : > { %v759_v26 = vmul.f32 %v758_v24, %v647_v4  ;;  %v772_v27 = vstv %s4025_s23  ;;  %v760_v30 = vmul.f32 %v758_v24, %v648_v8  ;;  %v883_v47 = vstv %s4035_s6  ;;  %s4938_s23 = sld [smem:[#allocation3 + $0x31]]  ;;  %s4049_s6 = sld [smem:[#allocation3 + $0x7a]] }
 0x114   : > { %v774_v33 = vmul.f32 %v772_v27, %v648_v8  ;;  %v911_v56 = vstv %s4037_s14  ;;  %s5009_s14 = sld [smem:[#allocation3 + $0x34]] }
 0x115   : > { %433 = vrot.lane.b32.xlu1 %v428_v28, %s7336_s11  ;;  %445 = vrot.lane.b32.xlu0 %v441_v29, %s7336_s11  ;;  %v786_v28 = vld [vmem:[#allocation2 + $0x27] sm:$0xff]  ;;  %v813_v29 = vstv %s4030_s17  ;;  %s4044_s17 = sld [smem:[#allocation3 + $0x55]] }
 0x116   : > { %v884_v50 = vmul.f32 %v883_v47, %v786_v28 }
 0x117   : > { %v951_v62 = vstv %s4930_s15  ;;  %s4056_s15 = sld [smem:[#allocation3 + $0x58]] }
 0x119   : > { %447 = vrot.lane.b32.xlu1 %v442_v31, %s7336_s11  ;;  %459 = vrot.lane.b32.xlu0 %v455_v32, %s7338_s12  ;;  %v773_v31 = vmul.f32 %v772_v27, %v647_v4  ;;  %v814_v32 = vmul.f32 %v813_v29, %v786_v28  ;;  %v965_v4 = vstv %s4938_s23  ;;  %s4057_s23 = sld [smem:[#allocation3 + $0x7c]] }
 0x11b   : > { %v979_v9 = vstv %s4044_s17  ;;  %s4058_s17 = sld [smem:[#allocation3 + $0x11]] }
 0x11d   : > { %461 = vrot.lane.b32.xlu1 %v456_v34, %s7338_s12  ;;  %473 = vrot.lane.b32.xlu0 %v469_v35, %s7338_s12  ;;  %v787_v34 = vld [vmem:[#allocation2 + $0x2f] sm:$0xff]  ;;  %v827_v35 = vstv %s4031_s26  ;;  %s4045_s26 = sld [smem:[#allocation3 + $0x79]] }
 0x11e   : > { %v815_v36 = vmul.f32 %v813_v29, %v787_v34  ;;  %v829_v39 = vmul.f32 %v827_v35, %v787_v34  ;;  %v913_v1 = vmul.f32 %v911_v56, %v787_v34 }
 0x121   : > { %475 = vrot.lane.b32.xlu1 %v470_v37, %s7338_s12  ;;  %487 = vrot.lane.b32.xlu0 %v483_v38, %s7338_s12  ;;  %v828_v37 = vmul.f32 %v827_v35, %v786_v28  ;;  %v841_v38 = vstv %s4032_s27  ;;  %s4046_s27 = sld [smem:[#allocation3 + $0xe]] }
 0x122   : > { %v843_v42 = vmul.f32 %v841_v38, %v787_v34 }
 0x125   : > { %489 = vrot.lane.b32.xlu1 %v484_v40, %s7338_s12  ;;  %501 = vrot.lane.b32.xlu0 %v497_v41, %s7338_s12  ;;  %v842_v40 = vmul.f32 %v841_v38, %v786_v28  ;;  %v855_v41 = vstv %s4033_s28  ;;  %s4047_s28 = sld [smem:[#allocation3 + $0x32]] }
 0x126   : > { %v856_v43 = vmul.f32 %v855_v41, %v786_v28 }
 0x129   : > { %503 = vrot.lane.b32.xlu1 %v498_v44, %s7338_s12  ;;  %541 = vrot.lane.b32.xlu0 %v537_v45, %s7336_s11  ;;  %v869_v44 = vstv %s4034_s13  ;;  %v857_v45 = vmul.f32 %v855_v41, %v787_v34  ;;  %s4048_s13 = sld [smem:[#allocation3 + $0x56]] }
 0x12a   : > { %v870_v46 = vmul.f32 %v869_v44, %v786_v28 }
 0x12b   : > { %v1021_v24 = vstv %s4047_s28  ;;  %s4061_s28 = sld [smem:[#allocation3 + $0x7d]] }
 0x12d   : > { %543 = vrot.lane.b32.xlu1 %v538_v48, %s7336_s11  ;;  %555 = vrot.lane.b32.xlu0 %v551_v49, %s7336_s11  ;;  %v871_v49 = vmul.f32 %v869_v44, %v787_v34 }
 0x12f   : > { %v1035_v29 = vstv %s4048_s13  ;;  %s5073_s13 = sld [smem:[#allocation3 + $0x13]] }
 0x131   : > { %557 = vrot.lane.b32.xlu1 %v552_v51, %s7336_s11  ;;  %569 = vrot.lane.b32.xlu0 %v565_v52, %s7336_s11  ;;  %v897_v51 = vstv %s4036_s24  ;;  %s4999_s24 = sld [smem:[#allocation3 + $0x10]] }
 0x132   : > { %v899_v59 = vmul.f32 %v897_v51, %v787_v34 }
 0x135   : > { %571 = vrot.lane.b32.xlu1 %v566_v54, %s7336_s11  ;;  %583 = vrot.lane.b32.xlu0 %v579_v55, %s7336_s11  ;;  %v885_v54 = vmul.f32 %v883_v47, %v787_v34  ;;  %v898_v55 = vmul.f32 %v897_v51, %v786_v28  ;;  %v1049_v34 = vstv %s4049_s6  ;;  %s5083_s6 = sld [smem:[#allocation3 + $0x37]] }
 0x139   : > { %585 = vrot.lane.b32.xlu1 %v580_v57, %s7336_s11  ;;  %597 = vrot.lane.b32.xlu0 %v593_v58, %s7338_s12 }
 0x13d   : > { %599 = vrot.lane.b32.xlu1 %v594_v60, %s7338_s12  ;;  %611 = vrot.lane.b32.xlu0 %v607_v61, %s7338_s12  ;;  %v912_v60 = vmul.f32 %v911_v56, %v786_v28  ;;  %v4946_v61 = vld [vmem:[#allocation2 + $0x28] sm:$0xff] }
 0x13e   : > { %v966_v8 = vmul.f32 %v965_v4, %v4946_v61  ;;  %v1022_v28 = vmul.f32 %v1021_v24, %v4946_v61  ;;  %v1050_v38 = vmul.f32 %v1049_v34, %v4946_v61 }
 0x141   : > { %613 = vrot.lane.b32.xlu1 %v608_v63, %s7338_s12  ;;  %625 = vrot.lane.b32.xlu0 %v621_v0, %s7338_s12 }
 0x145   : > { %627 = vrot.lane.b32.xlu1 %v622_v2, %s7338_s12  ;;  %639 = vrot.lane.b32.xlu0 %v635_v3, %s7338_s12  ;;  %v952_v2 = vmul.f32 %v951_v62, %v4946_v61  ;;  %v4956_v3 = vld [vmem:[#allocation2 + $0x30] sm:$0xff] }
 0x146   : > { %v967_v12 = vmul.f32 %v965_v4, %v4956_v3  ;;  %v1145_v4 = vstv %s4058_s17  ;;  %s4072_s17 = sld [smem:[#allocation3 + $0x5c]] }
 0x149   : > { %641 = vrot.lane.b32.xlu1 %v636_v6, %s7338_s12  ;;  %679 = vrot.lane.b32.xlu0 %v675_v7, %s7336_s11  ;;  %v953_v7 = vmul.f32 %v951_v62, %v4956_v3 }
 0x14d   : > { %681 = vrot.lane.b32.xlu1 %v676_v10, %s7336_s11  ;;  %693 = vrot.lane.b32.xlu0 %v689_v11, %s7336_s11 }
 0x151   : > { %695 = vrot.lane.b32.xlu1 %v690_v13, %s7336_s11  ;;  %707 = vrot.lane.b32.xlu0 %v703_v14, %s7336_s11  ;;  %v980_v13 = vmul.f32 %v979_v9, %v4946_v61  ;;  %v993_v14 = vstv %s4045_s26  ;;  %s4059_s26 = sld [smem:[#allocation3 + $0x35]] }
 0x152   : > { %v994_v18 = vmul.f32 %v993_v14, %v4946_v61 }
 0x155   : > { %709 = vrot.lane.b32.xlu1 %v704_v16, %s7336_s11  ;;  %721 = vrot.lane.b32.xlu0 %v717_v17, %s7336_s11  ;;  %v981_v17 = vmul.f32 %v979_v9, %v4956_v3 }
 0x159   : > { %723 = vrot.lane.b32.xlu1 %v718_v19, %s7336_s11  ;;  %735 = vrot.lane.b32.xlu0 %v731_v20, %s7338_s12  ;;  %v1007_v19 = vstv %s4046_s27  ;;  %s4060_s27 = sld [smem:[#allocation3 + $0x59]] }
 0x15a   : > { %v1009_v27 = vmul.f32 %v1007_v19, %v4956_v3 }
 0x15d   : > { %737 = vrot.lane.b32.xlu1 %v732_v22, %s7338_s12  ;;  %749 = vrot.lane.b32.xlu0 %v745_v23, %s7338_s12  ;;  %v995_v22 = vmul.f32 %v993_v14, %v4956_v3  ;;  %v1008_v23 = vmul.f32 %v1007_v19, %v4946_v61 }
 0x161   : > { %751 = vrot.lane.b32.xlu1 %v746_v25, %s7338_s12  ;;  %763 = vrot.lane.b32.xlu0 %v759_v26, %s7338_s12 }
 0x165   : > { %765 = vrot.lane.b32.xlu1 %v760_v30, %s7338_s12  ;;  %777 = vrot.lane.b32.xlu0 %v773_v31, %s7338_s12 }
 0x169   : > { %779 = vrot.lane.b32.xlu1 %v774_v33, %s7338_s12  ;;  %818 = vrot.lane.b32.xlu0 %v814_v32, %s7336_s11  ;;  %v1023_v32 = vmul.f32 %v1021_v24, %v4956_v3  ;;  %v1036_v33 = vmul.f32 %v1035_v29, %v4946_v61  ;;  %v1131_v61 = vstv %s4057_s23  ;;  %s4071_s23 = sld [smem:[#allocation3 + $0x38]] }
 0x16d   : > { %820 = vrot.lane.b32.xlu1 %v815_v36, %s7336_s11  ;;  %832 = vrot.lane.b32.xlu0 %v828_v37, %s7336_s11  ;;  %v1037_v37 = vmul.f32 %v1035_v29, %v4956_v3  ;;  %v1187_v29 = vstv %s4061_s28  ;;  %s5157_s28 = sld [smem:[#allocation3 + $0x3a]] }
 0x171   : > { %834 = vrot.lane.b32.xlu1 %v829_v39, %s7336_s11  ;;  %846 = vrot.lane.b32.xlu0 %v842_v40, %s7336_s11  ;;  %v5019_v39 = vld [vmem:[#allocation2 + $0x29] sm:$0xff]  ;;  %v1089_v40 = vstv %s4999_s24  ;;  %s4068_s24 = sld [smem:[#allocation3 + $0x5b]] }
 0x172   : > { %v1090_v44 = vmul.f32 %v1089_v40, %v5019_v39 }
 0x175   : > { %848 = vrot.lane.b32.xlu1 %v843_v42, %s7336_s11  ;;  %860 = vrot.lane.b32.xlu0 %v856_v43, %s7336_s11  ;;  %v1051_v43 = vmul.f32 %v1049_v34, %v4956_v3  ;;  %v1132_v3 = vmul.f32 %v1131_v61, %v5019_v39 }
 0x179   : > { %862 = vrot.lane.b32.xlu1 %v857_v45, %s7336_s11  ;;  %874 = vrot.lane.b32.xlu0 %v870_v46, %s7338_s12  ;;  %v5030_v45 = vld [vmem:[#allocation2 + $0x31] sm:$0xff]  ;;  %v1103_v46 = vstv %s5009_s14  ;;  %s4069_s14 = sld [smem:[#allocation3 + $0x7f]] }
 0x17a   : > { %v1104_v51 = vmul.f32 %v1103_v46, %v5019_v39  ;;  %v1133_v9 = vmul.f32 %v1131_v61, %v5030_v45 }
 0x17b   : > { %v4928_v48 = vpop.permute.xlu0 %403 }
 0x17d   : > { %876 = vrot.lane.b32.xlu1 %v871_v49, %s7338_s12  ;;  %888 = vrot.lane.b32.xlu0 %v884_v50, %s7338_s12  ;;  %v1091_v50 = vmul.f32 %v1089_v40, %v5030_v45  ;;  %v1228_v40 = vstv %s5073_s13  ;;  %s4080_s13 = sld [smem:[#allocation3 + $0x5e]] }
 0x17f   : > { %v4934_v52 = vpop.permute.xlu1 %405  ;;  %v4936_v53 = vpop.permute.xlu0 %417 }
 0x181   : > { %890 = vrot.lane.b32.xlu1 %v885_v54, %s7338_s12  ;;  %902 = vrot.lane.b32.xlu0 %v898_v55, %s7338_s12  ;;  %v1117_v54 = vstv %s4056_s15  ;;  %s4070_s15 = sld [smem:[#allocation3 + $0x14]] }
 0x183   : > { %v4942_v57 = vpop.permute.xlu1 %419  ;;  %v4944_v58 = vpop.permute.xlu0 %431 }
 0x185   : > { %904 = vrot.lane.b32.xlu1 %v899_v59, %s7338_s12  ;;  %916 = vrot.lane.b32.xlu0 %v912_v60, %s7338_s12  ;;  %v1105_v59 = vmul.f32 %v1103_v46, %v5030_v45  ;;  %v1118_v60 = vmul.f32 %v1117_v54, %v5019_v39  ;;  %v1189_v46 = vmul.f32 %v1187_v29, %v5030_v45 }
 0x187   : > { %v4951_v63 = vpop.permute.xlu1 %433  ;;  %v4953_v0 = vpop.permute.xlu0 %445 }
 0x189   : > { %918 = vrot.lane.b32.xlu1 %v913_v1, %s7338_s12  ;;  %956 = vrot.lane.b32.xlu0 %v952_v2, %s7336_s11  ;;  %v1119_v2 = vmul.f32 %v1117_v54, %v5030_v45  ;;  %v1242_v54 = vstv %s5083_s6  ;;  %s4081_s6 = sld [smem:[#allocation3 + $0x82]] }
 0x18b   : > { %v4961_v5 = vpop.permute.xlu1 %447  ;;  %v4963_v6 = vpop.permute.xlu0 %459 }
 0x18d   : > { %958 = vrot.lane.b32.xlu1 %v953_v7, %s7336_s11  ;;  %970 = vrot.lane.b32.xlu0 %v966_v8, %s7336_s11 }
 0x18f   : > { %v4969_v10 = vpop.permute.xlu1 %461  ;;  %v4971_v11 = vpop.permute.xlu0 %473 }
 0x191   : > { %972 = vrot.lane.b32.xlu1 %v967_v12, %s7336_s11  ;;  %984 = vrot.lane.b32.xlu0 %v980_v13, %s7336_s11  ;;  %v1146_v12 = vmul.f32 %v1145_v4, %v5019_v39  ;;  %v1159_v13 = vstv %s4059_s26  ;;  %s4073_s26 = sld [smem:[#allocation3 + $0x80]] }
 0x192   : > { %v1160_v19 = vmul.f32 %v1159_v13, %v5019_v39 }
 0x193   : > { %v4977_v15 = vpop.permute.xlu1 %475  ;;  %v4979_v16 = vpop.permute.xlu0 %487 }
 0x195   : > { %986 = vrot.lane.b32.xlu1 %v981_v17, %s7336_s11  ;;  %998 = vrot.lane.b32.xlu0 %v994_v18, %s7336_s11  ;;  %v1147_v18 = vmul.f32 %v1145_v4, %v5030_v45 }
 0x197   : > { %v4985_v20 = vpop.permute.xlu1 %489  ;;  %v4987_v21 = vpop.permute.xlu0 %501 }
 0x199   : > { %1000 = vrot.lane.b32.xlu1 %v995_v22, %s7336_s11  ;;  %1012 = vrot.lane.b32.xlu0 %v1008_v23, %s7338_s12  ;;  %v1173_v22 = vstv %s4060_s27  ;;  %s5147_s27 = sld [smem:[#allocation3 + $0x16]] }
 0x19a   : > { %v1175_v34 = vmul.f32 %v1173_v22, %v5030_v45 }
 0x19b   : > { %v4993_v25 = vpop.permute.xlu1 %503  ;;  %v4995_v26 = vpop.permute.xlu0 %541 }
 0x19c   : > { %7378 = vst [vmem:[#allocation26_spill] sm:$0xff] %v4993_v25 }
 0x19d   : > { %1014 = vrot.lane.b32.xlu1 %v1009_v27, %s7338_s12  ;;  %1026 = vrot.lane.b32.xlu0 %v1022_v28, %s7338_s12  ;;  %v1161_v27 = vmul.f32 %v1159_v13, %v5030_v45  ;;  %v1174_v28 = vmul.f32 %v1173_v22, %v5019_v39 }
 0x19f   : > { %v5003_v30 = vpop.permute.xlu1 %543  ;;  %v5005_v31 = vpop.permute.xlu0 %555 }
 0x1a1   : > { %1028 = vrot.lane.b32.xlu1 %v1023_v32, %s7338_s12  ;;  %1040 = vrot.lane.b32.xlu0 %v1036_v33, %s7338_s12 }
 0x1a3   : > { %v5013_v35 = vpop.permute.xlu1 %557  ;;  %v5015_v36 = vpop.permute.xlu0 %569 }
 0x1a4   : > { %7379 = vst [vmem:[#allocation27_spill] sm:$0xff] %v5015_v36 }
 0x1a5   : > { %1042 = vrot.lane.b32.xlu1 %v1037_v37, %s7338_s12  ;;  %1054 = vrot.lane.b32.xlu0 %v1050_v38, %s7338_s12  ;;  %v1188_v37 = vmul.f32 %v1187_v29, %v5019_v39  ;;  %v5093_v38 = vld [vmem:[#allocation2 + $0x47] sm:$0xff] }
 0x1a6   : > { %v1243_v61 = vmul.f32 %v1242_v54, %v5093_v38 }
 0x1a7   : > { %v5024_v41 = vpop.permute.xlu1 %571  ;;  %v5026_v42 = vpop.permute.xlu0 %583 }
 0x1a8   : > { %7380 = vst [vmem:[#allocation28_spill] sm:$0xff] %v5024_v41  ;;  %7381 = vst [vmem:[#allocation29_spill] sm:$0xff] %v5026_v42 }
 0x1a9   : > { %1056 = vrot.lane.b32.xlu1 %v1051_v43, %s7338_s12  ;;  %1094 = vrot.lane.b32.xlu0 %v1090_v44, %s7336_s11 }
 0x1ab   : > { %v5035_v47 = vpop.permute.xlu1 %585  ;;  %v5037_v49 = vpop.permute.xlu0 %597 }
 0x1ac   : > { %7382 = vst [vmem:[#allocation30_spill] sm:$0xff] %v5035_v47 }
 0x1ad   : > { %1096 = vrot.lane.b32.xlu1 %v1091_v50, %s7336_s11  ;;  %1108 = vrot.lane.b32.xlu0 %v1104_v51, %s7336_s11  ;;  %v1229_v50 = vmul.f32 %v1228_v40, %v5093_v38  ;;  %v5104_v51 = vld [vmem:[#allocation2 + $0x4f] sm:$0xff] }
 0x1ae   : > { %v1244_v4 = vmul.f32 %v1242_v54, %v5104_v51 }
 0x1af   : > { %v5043_v55 = vpop.permute.xlu1 %599  ;;  %v5045_v56 = vpop.permute.xlu0 %611 }
 0x1b1   : > { %1110 = vrot.lane.b32.xlu1 %v1105_v59, %s7336_s11  ;;  %1122 = vrot.lane.b32.xlu0 %v1118_v60, %s7336_s11  ;;  %v1230_v60 = vmul.f32 %v1228_v40, %v5104_v51  ;;  %v1298_v40 = vstv %s4071_s23  ;;  %s4085_s23 = sld [smem:[#allocation3 + $0x83]] }
 0x1b3   : > { %v5051_v62 = vpop.permute.xlu1 %613  ;;  %v5053_v1 = vpop.permute.xlu0 %625 }
 0x1b4   : > { %7383 = vst [vmem:[#allocation31_spill] sm:$0xff] %v5051_v62  ;;  %7384 = vst [vmem:[#allocation32_spill] sm:$0xff] %v5053_v1 }
 0x1b5   : > { %1124 = vrot.lane.b32.xlu1 %v1119_v2, %s7336_s11  ;;  %1136 = vrot.lane.b32.xlu0 %v1132_v3, %s7336_s11  ;;  %v1256_v2 = vstv %s4068_s24  ;;  %s4082_s24 = sld [smem:[#allocation3 + $0x17]] }
 0x1b7   : > { %v5059_v7 = vpop.permute.xlu1 %627  ;;  %v5061_v8 = vpop.permute.xlu0 %639 }
 0x1b8   : > { %7385 = vst [vmem:[#allocation33_spill] sm:$0xff] %v5059_v7  ;;  %7386 = vst [vmem:[#allocation34_spill] sm:$0xff] %v5061_v8  ;;  %v807_v8 = vstv %s5580_s8  ;;  %v4398_v7 = vld [vmem:[#allocation2 + $0x8] sm:$0xff]  ;;  %s5920_s8 = sld [smem:[#allocation3 + $0x18]] }
 0x1b9   : > { %1138 = vrot.lane.b32.xlu1 %v1133_v9, %s7336_s11  ;;  %1150 = vrot.lane.b32.xlu0 %v1146_v12, %s7338_s12  ;;  %v1257_v9 = vmul.f32 %v1256_v2, %v5093_v38  ;;  %v1270_v12 = vstv %s4069_s14  ;;  %s4083_s14 = sld [smem:[#allocation3 + $0x3b]] }
 0x1ba   : > { %v1271_v22 = vmul.f32 %v1270_v12, %v5093_v38 }
 0x1bb   : > { %v5067_v14 = vpop.permute.xlu1 %641  ;;  %v5069_v17 = vpop.permute.xlu0 %679 }
 0x1bc   : > { %7387 = vst [vmem:[#allocation35_spill] sm:$0xff] %v5067_v14  ;;  %7388 = vst [vmem:[#allocation36_spill] sm:$0xff] %v5069_v17 }
 0x1bd   : > { %1152 = vrot.lane.b32.xlu1 %v1147_v18, %s7338_s12  ;;  %1164 = vrot.lane.b32.xlu0 %v1160_v19, %s7338_s12  ;;  %v1258_v19 = vmul.f32 %v1256_v2, %v5104_v51 }
 0x1bf   : > { %v5077_v23 = vpop.permute.xlu1 %681  ;;  %v5079_v24 = vpop.permute.xlu0 %693 }
 0x1c0   : > { %7389 = vst [vmem:[#allocation37_spill] sm:$0xff] %v5077_v23  ;;  %7390 = vst [vmem:[#allocation38_spill] sm:$0xff] %v5079_v24  ;;  %v4399_v23 = vld [vmem:[#allocation2 + $0x10] sm:$0xff] }
 0x1c1   : > { %1166 = vrot.lane.b32.xlu1 %v1161_v27, %s7338_s12  ;;  %1178 = vrot.lane.b32.xlu0 %v1174_v28, %s7338_s12  ;;  %v1284_v27 = vstv %s4070_s15  ;;  %s4084_s15 = sld [smem:[#allocation3 + $0x5f]] }
 0x1c2   : > { %v1286_v54 = vmul.f32 %v1284_v27, %v5104_v51 }
 0x1c3   : > { %v5087_v32 = vpop.permute.xlu1 %695  ;;  %v5089_v33 = vpop.permute.xlu0 %707 }
 0x1c4   : > { %7391 = vst [vmem:[#allocation39_spill] sm:$0xff] %v5087_v32  ;;  %7392 = vst [vmem:[#allocation40_spill] sm:$0xff] %v5089_v33 }
 0x1c5   : > { %1180 = vrot.lane.b32.xlu1 %v1175_v34, %s7338_s12  ;;  %1192 = vrot.lane.b32.xlu0 %v1188_v37, %s7338_s12  ;;  %v1272_v34 = vmul.f32 %v1270_v12, %v5104_v51  ;;  %v1285_v37 = vmul.f32 %v1284_v27, %v5093_v38 }
 0x1c7   : > { %v5098_v43 = vpop.permute.xlu1 %709  ;;  %v5100_v44 = vpop.permute.xlu0 %721 }
 0x1c8   : > { %7393 = vst [vmem:[#allocation41_spill] sm:$0xff] %v5098_v43  ;;  %7394 = vst [vmem:[#allocation42_spill] sm:$0xff] %v5100_v44  ;;  %v4396_v43 = vld [vmem:[#allocation2 + $0x7] sm:$0xff] }
 0x1c9   : > { %1194 = vrot.lane.b32.xlu1 %v1189_v46, %s7338_s12  ;;  %1233 = vrot.lane.b32.xlu0 %v1229_v50, %s7336_s11 }
 0x1cb   : > { %v5109_v39 = vpop.permute.xlu1 %723  ;;  %v5111_v59 = vpop.permute.xlu0 %735 }
 0x1cc   : > { %7395 = vst [vmem:[#allocation43_spill] sm:$0xff] %v5109_v39  ;;  %7396 = vst [vmem:[#allocation44_spill] sm:$0xff] %v5111_v59  ;;  %v1422_v39 = vstv %s4082_s24  ;;  %s4096_s24 = sld [smem:[#allocation3 + $0x62]] }
 0x1cd   : > { %1235 = vrot.lane.b32.xlu1 %v1230_v60, %s7336_s11  ;;  %1247 = vrot.lane.b32.xlu0 %v1243_v61, %s7336_s11  ;;  %v1299_v60 = vmul.f32 %v1298_v40, %v5093_v38  ;;  %v1312_v61 = vstv %s4072_s17  ;;  %s5221_s17 = sld [smem:[#allocation3 + $0x19]] }
 0x1ce   : > { %v1313_v12 = vmul.f32 %v1312_v61, %v5093_v38 }
 0x1cf   : > { %v5117_v45 = vpop.permute.xlu1 %737  ;;  %v5119_v3 = vpop.permute.xlu0 %749 }
 0x1d0   : > { %7397 = vst [vmem:[#allocation45_spill] sm:$0xff] %v5117_v45  ;;  %7398 = vst [vmem:[#allocation46_spill] sm:$0xff] %v5119_v3 }
 0x1d1   : > { %1249 = vrot.lane.b32.xlu1 %v1244_v4, %s7336_s11  ;;  %1261 = vrot.lane.b32.xlu0 %v1257_v9, %s7336_s11  ;;  %v1300_v9 = vmul.f32 %v1298_v40, %v5104_v51  ;;  %v1366_v40 = vstv %s5147_s27  ;;  %s4092_s27 = sld [smem:[#allocation3 + $0x61]] }
 0x1d3   : > { %v5125_v13 = vpop.permute.xlu1 %751  ;;  %v5127_v18 = vpop.permute.xlu0 %763 }
 0x1d4   : > { %7399 = vst [vmem:[#allocation47_spill] sm:$0xff] %v5125_v13  ;;  %7400 = vst [vmem:[#allocation48_spill] sm:$0xff] %v5127_v18 }
 0x1d5   : > { %1263 = vrot.lane.b32.xlu1 %v1258_v19, %s7336_s11  ;;  %1275 = vrot.lane.b32.xlu0 %v1271_v22, %s7336_s11  ;;  %v1326_v19 = vstv %s4073_s26  ;;  %s5231_s26 = sld [smem:[#allocation3 + $0x3d]] }
 0x1d7   : > { %v5133_v28 = vpop.permute.xlu1 %765  ;;  %v5135_v29 = vpop.permute.xlu0 %777 }
 0x1d8   : > { %7401 = vst [vmem:[#allocation49_spill] sm:$0xff] %v5133_v28  ;;  %7402 = vst [vmem:[#allocation50_spill] sm:$0xff] %v5135_v29  ;;  %v656_v29 = vstv %s5562_s1  ;;  %v662_v28 = vstv %s5564_s2  ;;  %s5736_s1 = sld [smem:[#allocation3 + $0x7b]]  ;;  %s5766_s2 = sld [smem:[#allocation3 + $0x12]] }
 0x1d9   : > { %1277 = vrot.lane.b32.xlu1 %v1272_v34, %s7336_s11  ;;  %1289 = vrot.lane.b32.xlu0 %v1285_v37, %s7338_s12  ;;  %v1314_v34 = vmul.f32 %v1312_v61, %v5104_v51  ;;  %v1327_v37 = vmul.f32 %v1326_v19, %v5093_v38  ;;  %v1380_v61 = vstv %s5157_s28  ;;  %s4093_s28 = sld [smem:[#allocation3 + $0x85]] }
 0x1db   : > { %v5141_v46 = vpop.permute.xlu1 %779  ;;  %v5143_v50 = vpop.permute.xlu0 %818 }
 0x1dc   : > { %7403 = vst [vmem:[#allocation51_spill] sm:$0xff] %v5141_v46  ;;  %7404 = vst [vmem:[#allocation52_spill] sm:$0xff] %v5143_v50 }
 0x1dd   : > { %1291 = vrot.lane.b32.xlu1 %v1286_v54, %s7338_s12  ;;  %1303 = vrot.lane.b32.xlu0 %v1299_v60, %s7338_s12  ;;  %v5167_v54 = vld [vmem:[#allocation2 + $0x48] sm:$0xff] }
 0x1de   : > { %v1367_v46 = vmul.f32 %v1366_v40, %v5167_v54 }
 0x1df   : > { %v5151_v2 = vpop.permute.xlu1 %820  ;;  %v5153_v4 = vpop.permute.xlu0 %832 }
 0x1e0   : > { %7405 = vst [vmem:[#allocation53_spill] sm:$0xff] %v5151_v2  ;;  %7406 = vst [vmem:[#allocation54_spill] sm:$0xff] %v5153_v4  ;;  %v668_v4 = vstv %s5566_s3  ;;  %s5772_s3 = sld [smem:[#allocation3 + $0x36]] }
 0x1e1   : > { %1305 = vrot.lane.b32.xlu1 %v1300_v9, %s7338_s12  ;;  %1317 = vrot.lane.b32.xlu0 %v1313_v12, %s7338_s12  ;;  %v1328_v12 = vmul.f32 %v1326_v19, %v5104_v51 }
 0x1e3   : > { %v5161_v22 = vpop.permute.xlu1 %834  ;;  %v5163_v27 = vpop.permute.xlu0 %846 }
 0x1e4   : > { %7407 = vst [vmem:[#allocation55_spill] sm:$0xff] %v5161_v22  ;;  %7408 = vst [vmem:[#allocation56_spill] sm:$0xff] %v5163_v27  ;;  %v5178_v27 = vld [vmem:[#allocation2 + $0x50] sm:$0xff] }
 0x1e5   : > { %1319 = vrot.lane.b32.xlu1 %v1314_v34, %s7338_s12  ;;  %1331 = vrot.lane.b32.xlu0 %v1327_v37, %s7338_s12  ;;  %v1368_v37 = vmul.f32 %v1366_v40, %v5178_v27 }
 0x1e7   : > { %v5172_v60 = vpop.permute.xlu1 %848  ;;  %v5174_v9 = vpop.permute.xlu0 %860 }
 0x1e8   : > { %7409 = vst [vmem:[#allocation57_spill] sm:$0xff] %v5172_v60  ;;  %7410 = vst [vmem:[#allocation58_spill] sm:$0xff] %v5174_v9  ;;  %v1381_v9 = vmul.f32 %v1380_v61, %v5167_v54  ;;  %v1394_v60 = vstv %s4080_s13  ;;  %s4094_s13 = sld [smem:[#allocation3 + $0x1a]] }
 0x1e9   : > { %1333 = vrot.lane.b32.xlu1 %v1328_v12, %s7338_s12  ;;  %1371 = vrot.lane.b32.xlu0 %v1367_v46, %s7336_s11  ;;  %v1382_v46 = vmul.f32 %v1380_v61, %v5178_v27  ;;  %v1395_v12 = vmul.f32 %v1394_v60, %v5167_v54 }
 0x1eb   : > { %v5183_v38 = vpop.permute.xlu1 %862  ;;  %v5185_v34 = vpop.permute.xlu0 %874 }
 0x1ec   : > { %7411 = vst [vmem:[#allocation59_spill] sm:$0xff] %v5183_v38  ;;  %7412 = vst [vmem:[#allocation60_spill] sm:$0xff] %v5185_v34  ;;  %v1408_v38 = vstv %s4081_s6  ;;  %s4095_s6 = sld [smem:[#allocation3 + $0x3e]]  ;;  %v4397_v34 = vld [vmem:[#allocation2 + $0xf] sm:$0xff] }
 0x1ed   : > { %1373 = vrot.lane.b32.xlu1 %v1368_v37, %s7336_s11  ;;  %1385 = vrot.lane.b32.xlu0 %v1381_v9, %s7336_s11  ;;  %v1396_v9 = vmul.f32 %v1394_v60, %v5178_v27  ;;  %v1409_v37 = vmul.f32 %v1408_v38, %v5167_v54 }
 0x1ef   : > { %v5191_v51 = vpop.permute.xlu1 %876  ;;  %v5193_v19 = vpop.permute.xlu0 %888 }
 0x1f0   : > { %7413 = vst [vmem:[#allocation61_spill] sm:$0xff] %v5191_v51  ;;  %7414 = vst [vmem:[#allocation62_spill] sm:$0xff] %v5193_v19  ;;  %v650_v51 = vstv %s5560_s0  ;;  %s5695_s0 = sld [smem:[#allocation3 + $0x57]] }
 0x1f1   : > { %1387 = vrot.lane.b32.xlu1 %v1382_v46, %s7336_s11  ;;  %1399 = vrot.lane.b32.xlu0 %v1395_v12, %s7336_s11  ;;  %v1410_v46 = vmul.f32 %v1408_v38, %v5178_v27  ;;  %v1423_v12 = vmul.f32 %v1422_v39, %v5167_v54 }
 0x1f3   : > { %v5199_v40 = vpop.permute.xlu1 %890  ;;  %v5201_v22 = vpop.permute.xlu0 %902 }
 0x1f4   : > { %7415 = vst [vmem:[#allocation63_spill] sm:$0xff] %v5199_v40  ;;  %7416 = vst [vmem:[#allocation64_spill] sm:$0xff] %v5201_v22  ;;  %v1436_v40 = vstv %s4083_s14  ;;  %s4097_s14 = sld [smem:[#allocation3 + $0x86]] }
 0x1f5   : > { %1401 = vrot.lane.b32.xlu1 %v1396_v9, %s7336_s11  ;;  %1413 = vrot.lane.b32.xlu0 %v1409_v37, %s7336_s11  ;;  %v1424_v9 = vmul.f32 %v1422_v39, %v5178_v27  ;;  %v1437_v37 = vmul.f32 %v1436_v40, %v5167_v54 }
 0x1f7   : > { %v5207_v61 = vpop.permute.xlu1 %904  ;;  %v5209_v19 = vpop.permute.xlu0 %916 }
 0x1f8   : > { %7417 = vst [vmem:[#allocation65_spill] sm:$0xff] %v5207_v61  ;;  %7418 = vst [vmem:[#allocation66_spill] sm:$0xff] %v5209_v19  ;;  %v1450_v61 = vstv %s4084_s15  ;;  %v1464_v19 = vstv %s4085_s23  ;;  %s5295_s15 = sld [smem:[#allocation3 + $0x1c]]  ;;  %s5305_s23 = sld [smem:[#allocation3 + $0x40]] }
 0x1f9   : > { %1415 = vrot.lane.b32.xlu1 %v1410_v46, %s7336_s11  ;;  %1427 = vrot.lane.b32.xlu0 %v1423_v12, %s7338_s12  ;;  %v1438_v12 = vmul.f32 %v1436_v40, %v5178_v27  ;;  %v1504_v40 = vstv %s5221_s17  ;;  %s4104_s17 = sld [smem:[#allocation3 + $0x64]] }
 0x1fb   : > { %v5215_v60 = vpop.permute.xlu1 %918  ;;  %v5217_v22 = vpop.permute.xlu0 %956 }
 0x1fc   : > { %7419 = vst [vmem:[#allocation67_spill] sm:$0xff] %v5215_v60  ;;  %7420 = vst [vmem:[#allocation68_spill] sm:$0xff] %v5217_v22  ;;  %v1451_v60 = vmul.f32 %v1450_v61, %v5167_v54 }
 0x1fd   : > { %1429 = vrot.lane.b32.xlu1 %v1424_v9, %s7338_s12  ;;  %1441 = vrot.lane.b32.xlu0 %v1437_v37, %s7338_s12  ;;  %v1452_v37 = vmul.f32 %v1450_v61, %v5178_v27  ;;  %v1518_v61 = vstv %s5231_s26  ;;  %s4105_s26 = sld [smem:[#allocation3 + $0x88]] }
 0x1ff   : > { %v5225_v38 = vpop.permute.xlu1 %958  ;;  %v5227_v46 = vpop.permute.xlu0 %970 }
 0x200   : > { %7421 = vst [vmem:[#allocation69_spill] sm:$0xff] %v5225_v38  ;;  %7422 = vst [vmem:[#allocation70_spill] sm:$0xff] %v5227_v46  ;;  %v1465_v46 = vmul.f32 %v1464_v19, %v5167_v54  ;;  %v5241_v38 = vld [vmem:[#allocation2 + $0x49] sm:$0xff] }
 0x201   : > { %1443 = vrot.lane.b32.xlu1 %v1438_v12, %s7338_s12  ;;  %1455 = vrot.lane.b32.xlu0 %v1451_v60, %s7338_s12  ;;  %v1466_v60 = vmul.f32 %v1464_v19, %v5178_v27 }
 0x203   : > { %v5235_v39 = vpop.permute.xlu1 %972  ;;  %v5237_v9 = vpop.permute.xlu0 %984 }
 0x204   : > { %7423 = vst [vmem:[#allocation71_spill] sm:$0xff] %v5235_v39  ;;  %7424 = vst [vmem:[#allocation72_spill] sm:$0xff] %v5237_v9  ;;  %v1505_v9 = vmul.f32 %v1504_v40, %v5241_v38  ;;  %v5252_v39 = vld [vmem:[#allocation2 + $0x51] sm:$0xff] }
 0x205   : > { %1457 = vrot.lane.b32.xlu1 %v1452_v37, %s7338_s12  ;;  %1469 = vrot.lane.b32.xlu0 %v1465_v46, %s7338_s12  ;;  %v1506_v46 = vmul.f32 %v1504_v40, %v5252_v39 }
 0x207   : > { %v5246_v12 = vpop.permute.xlu1 %986  ;;  %v5248_v22 = vpop.permute.xlu0 %998 }
 0x208   : > { %7425 = vst [vmem:[#allocation73_spill] sm:$0xff] %v5246_v12  ;;  %7426 = vst [vmem:[#allocation74_spill] sm:$0xff] %v5248_v22  ;;  %v1519_v22 = vmul.f32 %v1518_v61, %v5241_v38  ;;  %v1532_v12 = vstv %s4092_s27  ;;  %s4106_s27 = sld [smem:[#allocation3 + $0x1d]] }
 0x209   : > { %1471 = vrot.lane.b32.xlu1 %v1466_v60, %s7338_s12  ;;  %1509 = vrot.lane.b32.xlu0 %v1505_v9, %s7336_s11  ;;  %v1520_v9 = vmul.f32 %v1518_v61, %v5252_v39  ;;  %v1533_v60 = vmul.f32 %v1532_v12, %v5241_v38 }
 0x20b   : > { %v5257_v54 = vpop.permute.xlu1 %1000  ;;  %v5259_v37 = vpop.permute.xlu0 %1012 }
 0x20c   : > { %7427 = vst [vmem:[#allocation75_spill] sm:$0xff] %v5257_v54  ;;  %7428 = vst [vmem:[#allocation76_spill] sm:$0xff] %v5259_v37  ;;  %v1546_v54 = vstv %s4093_s28  ;;  %s4107_s28 = sld [smem:[#allocation3 + $0x41]] }
 0x20d   : > { %1511 = vrot.lane.b32.xlu1 %v1506_v46, %s7336_s11  ;;  %1523 = vrot.lane.b32.xlu0 %v1519_v22, %s7336_s11  ;;  %v1534_v22 = vmul.f32 %v1532_v12, %v5252_v39  ;;  %v1547_v46 = vmul.f32 %v1546_v54, %v5241_v38 }
 0x20f   : > { %v5265_v27 = vpop.permute.xlu1 %1014  ;;  %v5267_v19 = vpop.permute.xlu0 %1026 }
 0x210   : > { %7429 = vst [vmem:[#allocation77_spill] sm:$0xff] %v5265_v27  ;;  %7430 = vst [vmem:[#allocation78_spill] sm:$0xff] %v5267_v19  ;;  %v1560_v27 = vstv %s4094_s13  ;;  %s4108_s13 = sld [smem:[#allocation3 + $0x65]] }
 0x211   : > { %1525 = vrot.lane.b32.xlu1 %v1520_v9, %s7336_s11  ;;  %1537 = vrot.lane.b32.xlu0 %v1533_v60, %s7336_s11  ;;  %v1548_v9 = vmul.f32 %v1546_v54, %v5252_v39  ;;  %v1561_v60 = vmul.f32 %v1560_v27, %v5241_v38 }
 0x213   : > { %v5273_v40 = vpop.permute.xlu1 %1028  ;;  %v5275_v37 = vpop.permute.xlu0 %1040 }
 0x214   : > { %7431 = vst [vmem:[#allocation79_spill] sm:$0xff] %v5273_v40  ;;  %7432 = vst [vmem:[#allocation80_spill] sm:$0xff] %v5275_v37  ;;  %v1574_v40 = vstv %s4095_s6  ;;  %s4109_s6 = sld [smem:[#allocation3 + $0x89]] }
 0x215   : > { %1539 = vrot.lane.b32.xlu1 %v1534_v22, %s7336_s11  ;;  %1551 = vrot.lane.b32.xlu0 %v1547_v46, %s7336_s11  ;;  %v1562_v22 = vmul.f32 %v1560_v27, %v5252_v39  ;;  %v1575_v46 = vmul.f32 %v1574_v40, %v5241_v38 }
 0x217   : > { %v5281_v61 = vpop.permute.xlu1 %1042  ;;  %v5283_v19 = vpop.permute.xlu0 %1054 }
 0x218   : > { %7433 = vst [vmem:[#allocation81_spill] sm:$0xff] %v5281_v61  ;;  %7434 = vst [vmem:[#allocation82_spill] sm:$0xff] %v5283_v19  ;;  %v1588_v61 = vstv %s4096_s24  ;;  %v1602_v19 = vstv %s4097_s14  ;;  %s5369_s24 = sld [smem:[#allocation3 + $0x1f]]  ;;  %s5379_s14 = sld [smem:[#allocation3 + $0x43]] }
 0x219   : > { %1553 = vrot.lane.b32.xlu1 %v1548_v9, %s7336_s11  ;;  %1565 = vrot.lane.b32.xlu0 %v1561_v60, %s7338_s12  ;;  %v1576_v60 = vmul.f32 %v1574_v40, %v5252_v39  ;;  %v1643_v40 = vstv %s5295_s15  ;;  %s4116_s15 = sld [smem:[#allocation3 + $0x67]] }
 0x21b   : > { %v5289_v12 = vpop.permute.xlu1 %1056  ;;  %v5291_v37 = vpop.permute.xlu0 %1094 }
 0x21c   : > { %7435 = vst [vmem:[#allocation83_spill] sm:$0xff] %v5289_v12  ;;  %7436 = vst [vmem:[#allocation84_spill] sm:$0xff] %v5291_v37  ;;  %v1589_v12 = vmul.f32 %v1588_v61, %v5241_v38 }
 0x21d   : > { %1567 = vrot.lane.b32.xlu1 %v1562_v22, %s7338_s12  ;;  %1579 = vrot.lane.b32.xlu0 %v1575_v46, %s7338_s12  ;;  %v1590_v46 = vmul.f32 %v1588_v61, %v5252_v39  ;;  %v1657_v61 = vstv %s5305_s23  ;;  %s4117_s23 = sld [smem:[#allocation3 + $0x8b]] }
 0x21f   : > { %v5299_v54 = vpop.permute.xlu1 %1096  ;;  %v5301_v9 = vpop.permute.xlu0 %1108 }
 0x220   : > { %7437 = vst [vmem:[#allocation85_spill] sm:$0xff] %v5299_v54  ;;  %7438 = vst [vmem:[#allocation86_spill] sm:$0xff] %v5301_v9  ;;  %v1603_v9 = vmul.f32 %v1602_v19, %v5241_v38  ;;  %v5315_v54 = vld [vmem:[#allocation2 + $0x67] sm:$0xff] }
 0x221   : > { %1581 = vrot.lane.b32.xlu1 %v1576_v60, %s7338_s12  ;;  %1593 = vrot.lane.b32.xlu0 %v1589_v12, %s7338_s12  ;;  %v1604_v12 = vmul.f32 %v1602_v19, %v5252_v39 }
 0x223   : > { %v5309_v27 = vpop.permute.xlu1 %1110  ;;  %v5311_v22 = vpop.permute.xlu0 %1122 }
 0x224   : > { %7439 = vst [vmem:[#allocation87_spill] sm:$0xff] %v5309_v27  ;;  %7440 = vst [vmem:[#allocation88_spill] sm:$0xff] %v5311_v22  ;;  %v1644_v22 = vmul.f32 %v1643_v40, %v5315_v54  ;;  %v5326_v27 = vld [vmem:[#allocation2 + $0x6f] sm:$0xff] }
 0x225   : > { %1595 = vrot.lane.b32.xlu1 %v1590_v46, %s7338_s12  ;;  %1607 = vrot.lane.b32.xlu0 %v1603_v9, %s7338_s12  ;;  %v1645_v9 = vmul.f32 %v1643_v40, %v5326_v27 }
 0x227   : > { %v5320_v60 = vpop.permute.xlu1 %1124  ;;  %v5322_v37 = vpop.permute.xlu0 %1136 }
 0x228   : > { %7441 = vst [vmem:[#allocation89_spill] sm:$0xff] %v5320_v60  ;;  %7442 = vst [vmem:[#allocation90_spill] sm:$0xff] %v5322_v37  ;;  %v1658_v37 = vmul.f32 %v1657_v61, %v5315_v54  ;;  %v1671_v60 = vstv %s4104_s17  ;;  %s4118_s17 = sld [smem:[#allocation3 + $0x20]] }
 0x229   : > { %1609 = vrot.lane.b32.xlu1 %v1604_v12, %s7338_s12  ;;  %1648 = vrot.lane.b32.xlu0 %v1644_v22, %s7336_s11  ;;  %v1659_v22 = vmul.f32 %v1657_v61, %v5326_v27  ;;  %v1672_v12 = vmul.f32 %v1671_v60, %v5315_v54 }
 0x22b   : > { %v5331_v38 = vpop.permute.xlu1 %1138  ;;  %v5333_v46 = vpop.permute.xlu0 %1150 }
 0x22c   : > { %7443 = vst [vmem:[#allocation91_spill] sm:$0xff] %v5331_v38  ;;  %7444 = vst [vmem:[#allocation92_spill] sm:$0xff] %v5333_v46  ;;  %v1685_v38 = vstv %s4105_s26  ;;  %s4119_s26 = sld [smem:[#allocation3 + $0x44]] }
 0x22d   : > { %1650 = vrot.lane.b32.xlu1 %v1645_v9, %s7336_s11  ;;  %1662 = vrot.lane.b32.xlu0 %v1658_v37, %s7336_s11  ;;  %v1673_v37 = vmul.f32 %v1671_v60, %v5326_v27  ;;  %v1686_v9 = vmul.f32 %v1685_v38, %v5315_v54 }
 0x22f   : > { %v5339_v39 = vpop.permute.xlu1 %1152  ;;  %v5341_v19 = vpop.permute.xlu0 %1164 }
 0x230   : > { %7445 = vst [vmem:[#allocation93_spill] sm:$0xff] %v5339_v39  ;;  %7446 = vst [vmem:[#allocation94_spill] sm:$0xff] %v5341_v19  ;;  %v1699_v39 = vstv %s4106_s27  ;;  %s4120_s27 = sld [smem:[#allocation3 + $0x68]] }
 0x231   : > { %1664 = vrot.lane.b32.xlu1 %v1659_v22, %s7336_s11  ;;  %1676 = vrot.lane.b32.xlu0 %v1672_v12, %s7336_s11  ;;  %v1687_v22 = vmul.f32 %v1685_v38, %v5326_v27  ;;  %v1700_v12 = vmul.f32 %v1699_v39, %v5315_v54 }
 0x233   : > { %v5347_v40 = vpop.permute.xlu1 %1166  ;;  %v5349_v46 = vpop.permute.xlu0 %1178 }
 0x234   : > { %7447 = vst [vmem:[#allocation95_spill] sm:$0xff] %v5347_v40  ;;  %7448 = vst [vmem:[#allocation96_spill] sm:$0xff] %v5349_v46  ;;  %v1713_v40 = vstv %s4107_s28  ;;  %s4121_s28 = sld [smem:[#allocation3 + $0x8c]] }
 0x235   : > { %1678 = vrot.lane.b32.xlu1 %v1673_v37, %s7336_s11  ;;  %1690 = vrot.lane.b32.xlu0 %v1686_v9, %s7336_s11  ;;  %v1701_v37 = vmul.f32 %v1699_v39, %v5326_v27  ;;  %v1714_v9 = vmul.f32 %v1713_v40, %v5315_v54 }
 0x237   : > { %v5355_v61 = vpop.permute.xlu1 %1180  ;;  %v5357_v19 = vpop.permute.xlu0 %1192 }
 0x238   : > { %7449 = vst [vmem:[#allocation97_spill] sm:$0xff] %v5355_v61  ;;  %7450 = vst [vmem:[#allocation98_spill] sm:$0xff] %v5357_v19  ;;  %v1727_v61 = vstv %s4108_s13  ;;  %v1741_v19 = vstv %s4109_s6  ;;  %s5443_s13 = sld [smem:[#allocation3 + $0x22]]  ;;  %s5453_s6 = sld [smem:[#allocation3 + $0x46]] }
 0x239   : > { %1692 = vrot.lane.b32.xlu1 %v1687_v22, %s7336_s11  ;;  %1704 = vrot.lane.b32.xlu0 %v1700_v12, %s7338_s12  ;;  %v1715_v12 = vmul.f32 %v1713_v40, %v5326_v27  ;;  %v1781_v40 = vstv %s5369_s24  ;;  %s4128_s24 = sld [smem:[#allocation3 + $0x6a]] }
 0x23b   : > { %v5363_v60 = vpop.permute.xlu1 %1194  ;;  %v5365_v46 = vpop.permute.xlu0 %1233 }
 0x23c   : > { %7451 = vst [vmem:[#allocation99_spill] sm:$0xff] %v5363_v60  ;;  %7452 = vst [vmem:[#allocation100_spill] sm:$0xff] %v5365_v46  ;;  %v1728_v60 = vmul.f32 %v1727_v61, %v5315_v54 }
 0x23d   : > { %1706 = vrot.lane.b32.xlu1 %v1701_v37, %s7338_s12  ;;  %1718 = vrot.lane.b32.xlu0 %v1714_v9, %s7338_s12  ;;  %v1729_v9 = vmul.f32 %v1727_v61, %v5326_v27  ;;  %v1795_v61 = vstv %s5379_s14  ;;  %s4129_s14 = sld [smem:[#allocation3 + $0x8e]] }
 0x23f   : > { %v5373_v38 = vpop.permute.xlu1 %1235  ;;  %v5375_v22 = vpop.permute.xlu0 %1247 }
 0x240   : > { %7453 = vst [vmem:[#allocation101_spill] sm:$0xff] %v5373_v38  ;;  %7454 = vst [vmem:[#allocation102_spill] sm:$0xff] %v5375_v22  ;;  %v1742_v22 = vmul.f32 %v1741_v19, %v5315_v54  ;;  %v5389_v38 = vld [vmem:[#allocation2 + $0x68] sm:$0xff] }
 0x241   : > { %1720 = vrot.lane.b32.xlu1 %v1715_v12, %s7338_s12  ;;  %1732 = vrot.lane.b32.xlu0 %v1728_v60, %s7338_s12  ;;  %v1743_v60 = vmul.f32 %v1741_v19, %v5326_v27 }
 0x243   : > { %v5383_v39 = vpop.permute.xlu1 %1249  ;;  %v5385_v37 = vpop.permute.xlu0 %1261 }
 0x244   : > { %7455 = vst [vmem:[#allocation103_spill] sm:$0xff] %v5383_v39  ;;  %7456 = vst [vmem:[#allocation104_spill] sm:$0xff] %v5385_v37  ;;  %v1782_v37 = vmul.f32 %v1781_v40, %v5389_v38  ;;  %v5400_v39 = vld [vmem:[#allocation2 + $0x70] sm:$0xff] }
 0x245   : > { %1734 = vrot.lane.b32.xlu1 %v1729_v9, %s7338_s12  ;;  %1746 = vrot.lane.b32.xlu0 %v1742_v22, %s7338_s12  ;;  %v1783_v22 = vmul.f32 %v1781_v40, %v5400_v39 }
 0x247   : > { %v5394_v12 = vpop.permute.xlu1 %1263  ;;  %v5396_v46 = vpop.permute.xlu0 %1275 }
 0x248   : > { %7457 = vst [vmem:[#allocation105_spill] sm:$0xff] %v5394_v12  ;;  %7458 = vst [vmem:[#allocation106_spill] sm:$0xff] %v5396_v46  ;;  %v1796_v46 = vmul.f32 %v1795_v61, %v5389_v38  ;;  %v1809_v12 = vstv %s4116_s15  ;;  %s4130_s15 = sld [smem:[#allocation3 + $0x23]] }
 0x249   : > { %1748 = vrot.lane.b32.xlu1 %v1743_v60, %s7338_s12  ;;  %1786 = vrot.lane.b32.xlu0 %v1782_v37, %s7336_s11  ;;  %v1797_v37 = vmul.f32 %v1795_v61, %v5400_v39  ;;  %v1810_v60 = vmul.f32 %v1809_v12, %v5389_v38 }
 0x24b   : > { %v5405_v54 = vpop.permute.xlu1 %1277  ;;  %v5407_v9 = vpop.permute.xlu0 %1289 }
 0x24c   : > { %7459 = vst [vmem:[#allocation107_spill] sm:$0xff] %v5405_v54  ;;  %7460 = vst [vmem:[#allocation108_spill] sm:$0xff] %v5407_v9  ;;  %v1823_v54 = vstv %s4117_s23  ;;  %s5493_s23 = sld [smem:[#allocation3 + $0x47]] }
 0x24d   : > { %1788 = vrot.lane.b32.xlu1 %v1783_v22, %s7336_s11  ;;  %1800 = vrot.lane.b32.xlu0 %v1796_v46, %s7336_s11  ;;  %v1811_v46 = vmul.f32 %v1809_v12, %v5400_v39  ;;  %v1824_v22 = vmul.f32 %v1823_v54, %v5389_v38 }
 0x24f   : > { %v5413_v27 = vpop.permute.xlu1 %1291  ;;  %v5415_v19 = vpop.permute.xlu0 %1303 }
 0x250   : > { %7461 = vst [vmem:[#allocation109_spill] sm:$0xff] %v5413_v27  ;;  %7462 = vst [vmem:[#allocation110_spill] sm:$0xff] %v5415_v19  ;;  %v1837_v27 = vstv %s4118_s17  ;;  %s5503_s17 = sld [smem:[#allocation3 + $0x6b]] }
 0x251   : > { %1802 = vrot.lane.b32.xlu1 %v1797_v37, %s7336_s11  ;;  %1814 = vrot.lane.b32.xlu0 %v1810_v60, %s7336_s11  ;;  %v1825_v37 = vmul.f32 %v1823_v54, %v5400_v39  ;;  %v1838_v60 = vmul.f32 %v1837_v27, %v5389_v38 }
 0x253   : > { %v5421_v40 = vpop.permute.xlu1 %1305  ;;  %v5423_v9 = vpop.permute.xlu0 %1317 }
 0x254   : > { %7463 = vst [vmem:[#allocation111_spill] sm:$0xff] %v5421_v40  ;;  %7464 = vst [vmem:[#allocation112_spill] sm:$0xff] %v5423_v9  ;;  %v1851_v40 = vstv %s4119_s26  ;;  %s5514_s26 = sld [smem:[#allocation3 + $0x8f]] }
 0x255   : > { %1816 = vrot.lane.b32.xlu1 %v1811_v46, %s7336_s11  ;;  %1828 = vrot.lane.b32.xlu0 %v1824_v22, %s7336_s11  ;;  %v1839_v46 = vmul.f32 %v1837_v27, %v5400_v39  ;;  %v1852_v22 = vmul.f32 %v1851_v40, %v5389_v38 }
 0x257   : > { %v5429_v61 = vpop.permute.xlu1 %1319  ;;  %v5431_v19 = vpop.permute.xlu0 %1331 }
 0x258   : > { %7465 = vst [vmem:[#allocation113_spill] sm:$0xff] %v5429_v61  ;;  %7466 = vst [vmem:[#allocation114_spill] sm:$0xff] %v5431_v19  ;;  %v1865_v61 = vstv %s4120_s27  ;;  %v1879_v19 = vstv %s4121_s28  ;;  %s5524_s27 = sld [smem:[#allocation8]] }
 0x259   : > { %1830 = vrot.lane.b32.xlu1 %v1825_v37, %s7336_s11  ;;  %1842 = vrot.lane.b32.xlu0 %v1838_v60, %s7338_s12  ;;  %v1853_v60 = vmul.f32 %v1851_v40, %v5400_v39  ;;  %v1919_v40 = vstv %s5443_s13  ;;  %s5526_s28 = sld [smem:[#allocation3]]  ;;  %s5529_s13 = sld [smem:[#allocation8 + $0x1]] }
 0x25b   : > { %v5437_v12 = vpop.permute.xlu1 %1333  ;;  %v5439_v9 = vpop.permute.xlu0 %1371 }
 0x25c   : > { %7467 = vst [vmem:[#allocation115_spill] sm:$0xff] %v5437_v12  ;;  %7468 = vst [vmem:[#allocation116_spill] sm:$0xff] %v5439_v9  ;;  %v1866_v12 = vmul.f32 %v1865_v61, %v5389_v38 }
 0x25d   : > { %1844 = vrot.lane.b32.xlu1 %v1839_v46, %s7338_s12  ;;  %1856 = vrot.lane.b32.xlu0 %v1852_v22, %s7338_s12  ;;  %v1867_v22 = vmul.f32 %v1865_v61, %v5400_v39  ;;  %v1933_v61 = vstv %s5453_s6  ;;  %s5531_s6 = sld [smem:[#allocation3 + $0x24]] }
 0x25f   : > { %v5447_v54 = vpop.permute.xlu1 %1373  ;;  %v5449_v37 = vpop.permute.xlu0 %1385 }
 0x260   : > { %7469 = vst [vmem:[#allocation117_spill] sm:$0xff] %v5447_v54  ;;  %7470 = vst [vmem:[#allocation118_spill] sm:$0xff] %v5449_v37  ;;  %v1880_v37 = vmul.f32 %v1879_v19, %v5389_v38  ;;  %v5463_v54 = vld [vmem:[#allocation2 + $0x69] sm:$0xff] }
 0x261   : > { %1858 = vrot.lane.b32.xlu1 %v1853_v60, %s7338_s12  ;;  %1870 = vrot.lane.b32.xlu0 %v1866_v12, %s7338_s12  ;;  %v1881_v12 = vmul.f32 %v1879_v19, %v5400_v39 }
 0x263   : > { %v5457_v27 = vpop.permute.xlu1 %1387  ;;  %v5459_v46 = vpop.permute.xlu0 %1399 }
 0x264   : > { %7471 = vst [vmem:[#allocation119_spill] sm:$0xff] %v5457_v27  ;;  %7472 = vst [vmem:[#allocation120_spill] sm:$0xff] %v5459_v46  ;;  %v1920_v46 = vmul.f32 %v1919_v40, %v5463_v54  ;;  %v5474_v27 = vld [vmem:[#allocation2 + $0x71] sm:$0xff] }
 0x265   : > { %1872 = vrot.lane.b32.xlu1 %v1867_v22, %s7338_s12  ;;  %1884 = vrot.lane.b32.xlu0 %v1880_v37, %s7338_s12  ;;  %v1921_v37 = vmul.f32 %v1919_v40, %v5474_v27 }
 0x267   : > { %v5468_v60 = vpop.permute.xlu1 %1401  ;;  %v5470_v9 = vpop.permute.xlu0 %1413 }
 0x268   : > { %7473 = vst [vmem:[#allocation121_spill] sm:$0xff] %v5468_v60  ;;  %7474 = vst [vmem:[#allocation122_spill] sm:$0xff] %v5470_v9  ;;  %v1934_v9 = vmul.f32 %v1933_v61, %v5463_v54  ;;  %v1947_v60 = vstv %s4128_s24  ;;  %s5535_s24 = sld [smem:[#allocation8 + $0x2]] }
 0x269   : > { %1886 = vrot.lane.b32.xlu1 %v1881_v12, %s7338_s12  ;;  %1924 = vrot.lane.b32.xlu0 %v1920_v46, %s7336_s11  ;;  %v1935_v46 = vmul.f32 %v1933_v61, %v5474_v27  ;;  %v1948_v12 = vmul.f32 %v1947_v60, %v5463_v54 }
 0x26b   : > { %v5479_v38 = vpop.permute.xlu1 %1415  ;;  %v5481_v22 = vpop.permute.xlu0 %1427 }
 0x26c   : > { %7475 = vst [vmem:[#allocation123_spill] sm:$0xff] %v5479_v38  ;;  %7476 = vst [vmem:[#allocation124_spill] sm:$0xff] %v5481_v22  ;;  %v1961_v38 = vstv %s4129_s14  ;;  %s5537_s14 = sld [smem:[#allocation3 + $0x48]] }
 0x26d   : > { %1926 = vrot.lane.b32.xlu1 %v1921_v37, %s7336_s11  ;;  %1938 = vrot.lane.b32.xlu0 %v1934_v9, %s7336_s11  ;;  %v1949_v9 = vmul.f32 %v1947_v60, %v5474_v27 }
 0x26f   : > { %v5487_v39 = vpop.permute.xlu1 %1429  ;;  %v5489_v19 = vpop.permute.xlu0 %1441 }
 0x270   : > { %7477 = vst [vmem:[#allocation125_spill] sm:$0xff] %v5487_v39  ;;  %7478 = vst [vmem:[#allocation126_spill] sm:$0xff] %v5489_v19  ;;  %v1962_v19 = vmul.f32 %v1961_v38, %v5463_v54  ;;  %v1975_v39 = vstv %s4130_s15  ;;  %s5539_s15 = sld [smem:[#allocation8 + $0x3]] }
 0x271   : > { %1940 = vrot.lane.b32.xlu1 %v1935_v46, %s7336_s11  ;;  %1952 = vrot.lane.b32.xlu0 %v1948_v12, %s7336_s11  ;;  %v1963_v12 = vmul.f32 %v1961_v38, %v5474_v27  ;;  %v2003_v38 = vstv %s5503_s17  ;;  %s5549_s17 = sld [smem:[#allocation3 + $0x3]] }
 0x273   : > { %v5497_v40 = vpop.permute.xlu1 %1443  ;;  %v5499_v37 = vpop.permute.xlu0 %1455 }
 0x274   : > { %7479 = vst [vmem:[#allocation127_spill] sm:$0xff] %v5497_v40  ;;  %7480 = vst [vmem:[#allocation128_spill] sm:$0xff] %v5499_v37  ;;  %v1976_v37 = vmul.f32 %v1975_v39, %v5463_v54  ;;  %v1989_v40 = vstv %s5493_s23  ;;  %s5541_s23 = sld [smem:[#allocation3 + $0x6c]] }
 0x275   : > { %1954 = vrot.lane.b32.xlu1 %v1949_v9, %s7336_s11  ;;  %1966 = vrot.lane.b32.xlu0 %v1962_v19, %s7336_s11  ;;  %v1977_v19 = vmul.f32 %v1975_v39, %v5474_v27 }
 0x277   : > { %v5507_v61 = vpop.permute.xlu1 %1457  ;;  %v5509_v46 = vpop.permute.xlu0 %1469 }
 0x278   : > { %7481 = vst [vmem:[#allocation129_spill] sm:$0xff] %v5507_v61  ;;  %7482 = vst [vmem:[#allocation130_spill] sm:$0xff] %v5509_v46  ;;  %v1990_v61 = vmul.f32 %v1989_v40, %v5463_v54  ;;  %v2005_v46 = vmul.f32 %v2003_v38, %v5474_v27 }
 0x279   : > { %1968 = vrot.lane.b32.xlu1 %v1963_v12, %s7336_s11  ;;  %1980 = vrot.lane.b32.xlu0 %v1976_v37, %s7338_s12  ;;  %v1991_v12 = vmul.f32 %v1989_v40, %v5474_v27  ;;  %s5556_s11 = sld [smem:[#allocation3 + $0x6f]] }
 0x27a   : > { %v392_v22 = vstv %s5541_s23  ;;  %s6092_s23 = sld [smem:[#allocation3 + $0x8a]] }
 0x27b   : > { %v5518_v60 = vpop.permute.xlu1 %1471  ;;  %v5520_v9 = vpop.permute.xlu0 %1509  ;;  %v393_v3 = vmul.f32 %v4396_v43, %v392_v22  ;;  %v394_v45 = vmul.f32 %v4397_v34, %v392_v22 }
 0x27c   : > { %7483 = vst [vmem:[#allocation131_spill] sm:$0xff] %v5518_v60  ;;  %7484 = vst [vmem:[#allocation132_spill] sm:$0xff] %v5520_v9  ;;  %v2004_v60 = vmul.f32 %v2003_v38, %v5463_v54  ;;  %v369_v9 = vstv %s5539_s15  ;;  %s6086_s15 = sld [smem:[#allocation3 + $0x66]] }
 0x27d   : > { %1982 = vrot.lane.b32.xlu1 %v1977_v19, %s7338_s12  ;;  %1994 = vrot.lane.b32.xlu0 %v1990_v61, %s7338_s12  ;;  %v2017_v61 = vstv %s5514_s26  ;;  %s5574_s26 = sld [smem:[#allocation3 + $0x9]]  ;;  %v395_v22 = vadd.f32 %v393_v3, %v369_v9  ;;  %v5637_v17 = vadd.f32 %v394_v45, %v369_v9 }
 0x27e   : > { %v2019_v38 = vmul.f32 %v2017_v61, %v5474_v27  ;;  %v524_v27 = vstv %s5554_s30  ;;  %s5926_s30 = sld [smem:[#allocation3 + $0x3c]] }
 0x27f   : > { %v5543_v39 = vpop.permute.xlu1 %1511  ;;  %v5545_v37 = vpop.permute.xlu0 %1523 }
 0x280   : > { %7485 = vst [vmem:[#allocation133_spill] sm:$0xff] %v5543_v39  ;;  %7486 = vst [vmem:[#allocation134_spill] sm:$0xff] %v5545_v37  ;;  %v366_v37 = vstv %s5535_s24  ;;  %v386_v39 = vstv %s5537_s14  ;;  %s6063_s24 = sld [smem:[#allocation3 + $0x1e]]  ;;  %s6069_s14 = sld [smem:[#allocation3 + $0x42]] }
 0x281   : > { %1996 = vrot.lane.b32.xlu1 %v1991_v12, %s7338_s12  ;;  %2008 = vrot.lane.b32.xlu0 %v2004_v60, %s7338_s12  ;;  %v2018_v12 = vmul.f32 %v2017_v61, %v5463_v54  ;;  %s5576_s12 = sld [smem:[#allocation3 + $0x2d]]  ;;  %v360_v54 = vstv %s5524_s27  ;;  %s5602_s27 = sld [smem:[#allocation3 + $0xf]]  ;;  %v530_v61 = vstv %s5556_s11  ;;  %v387_v33 = vmul.f32 %v4396_v43, %v386_v39 }
 0x282   : > { %v388_v32 = vmul.f32 %v4397_v34, %v386_v39  ;;  %v5652_v45 = vmul.f32 %v4399_v23, %v530_v61  ;;  %s5975_s11 = sld [smem:[#allocation3 + $0x84]] }
 0x283   : > { %v5568_v40 = vpop.permute.xlu1 %1525  ;;  %v5570_v19 = vpop.permute.xlu0 %1537  ;;  %v789_v14 = vstv %s5574_s26  ;;  %v389_v39 = vadd.f32 %v387_v33, %v366_v37  ;;  %v5648_v33 = vmul.f32 %v4399_v23, %v524_v27  ;;  %s6131_s26 = sld [smem:[#allocation3 + $0x45]] }
 0x284   : > { %7487 = vst [vmem:[#allocation135_spill] sm:$0xff] %v5568_v40  ;;  %7488 = vst [vmem:[#allocation136_spill] sm:$0xff] %v5570_v19  ;;  %v363_v19 = vstv %s5529_s13  ;;  %v380_v40 = vstv %s5531_s6  ;;  %v390_v25 = vadd.f32 %v388_v32, %v366_v37  ;;  %v4401_v37 = vld [vmem:[#allocation2 + $0x11] sm:$0xff]  ;;  %s6025_s13 = sld [smem:[#allocation3 + $0x63]]  ;;  %s6049_s6 = sld [smem:[#allocation3 + $0x87]] }
 0x285   : > { %2010 = vrot.lane.b32.xlu1 %v2005_v46, %s7489_s20  ;;  %2022 = vrot.lane.b32.xlu0 %v2018_v12, %s7489_s20  ;;  %v374_v12 = vstv %s5526_s28  ;;  %v381_v13 = vmul.f32 %v4396_v43, %v380_v40  ;;  %v382_v50 = vmul.f32 %v4397_v34, %v380_v40  ;;  %s6000_s28 = sld [smem:[#allocation3 + $0x3f]] }
 0x286   : > { %v376_v18 = vmul.f32 %v4397_v34, %v374_v12 }
 0x287   : > { %v5593_v60 = vpop.permute.xlu1 %1539  ;;  %v5595_v46 = vpop.permute.xlu0 %1551  ;;  %v795_v47 = vstv %s5576_s12  ;;  %v383_v40 = vadd.f32 %v381_v13, %v363_v19  ;;  %v384_v62 = vadd.f32 %v382_v50, %v363_v19  ;;  %v4400_v50 = vld [vmem:[#allocation2 + $0x9] sm:$0xff]  ;;  %v5655_v19 = vmul.f32 %v4401_v37, %v650_v51  ;;  %s5998_s12 = sld [smem:[#allocation3 + $0x1b]] }
 0x288   : > { %7490 = vst [vmem:[#allocation137_spill] sm:$0xff] %v5593_v60  ;;  %7491 = vst [vmem:[#allocation138_spill] sm:$0xff] %v5595_v46  ;;  %v512_v46 = vstv %s5549_s17  ;;  %v518_v60 = vstv %s5551_s10  ;;  %v378_v59 = vadd.f32 %v376_v18, %v360_v54  ;;  %v651_v9 = vmul.f32 %v4400_v50, %v650_v51  ;;  %s5951_s10 = sld [smem:[#allocation3 + $0x60]]  ;;  %s6113_s17 = sld [smem:[#allocation3 + $0x21]] }
 0x289   : > { %2024 = vrot.lane.b32.xlu1 %v2019_v38, %s7489_s20  ;;  %v375_v38 = vmul.f32 %v4396_v43, %v374_v12  ;;  %v513_v24 = vmul.f32 %v4398_v7, %v512_v46  ;;  %v5639_v36 = vmul.f32 %v4399_v23, %v518_v60 }
 0x28a   : > { %v410_v3 = vadd.f32 %v4934_v52, %v378_v59  ;;  %v5669_v52 = vmul.f32 %v4401_v37, %v668_v4  ;;  %v4402_v59 = vld [vmem:[#allocation2 + $0x27] sm:$0xff] }
 0x28b   : > { %v5618_v2 = vpop.permute.xlu1 %1553  ;;  %v5620_v44 = vpop.permute.xlu0 %1565  ;;  %v377_v12 = vadd.f32 %v375_v38, %v360_v54  ;;  %v5641_v38 = vmul.f32 %v4398_v7, %v524_v27  ;;  %v5657_v54 = vmul.f32 %v4400_v50, %v656_v29  ;;  %v5664_v27 = vmul.f32 %v4401_v37, %v662_v28 }
 0x28c   : > { %7492 = vst [vmem:[#allocation139_spill] sm:$0xff] %v5618_v2  ;;  %7493 = vst [vmem:[#allocation140_spill] sm:$0xff] %v5620_v44  ;;  %v801_v2 = vstv %s5578_s4  ;;  %v514_v44 = vmul.f32 %v4399_v23, %v512_v46  ;;  %v5660_v46 = vmul.f32 %v4401_v37, %v656_v29  ;;  %v5667_v23 = vmul.f32 %v4400_v50, %v668_v4  ;;  %s5799_s4 = sld [smem:[#allocation3 + $0x5a]] }
 0x28d   : > { %v409_v34 = vadd.f32 %v4928_v48, %v377_v12  ;;  %v5650_v48 = vmul.f32 %v4398_v7, %v530_v61  ;;  %v5671_v61 = vmul.f32 %v4402_v59, %v789_v14  ;;  %v424_v37 = vadd.f32 %v4942_v57, %v384_v62 }
 0x28f   : > { %v5630_v42 = vpop.permute.xlu1 %1567  ;;  %v5632_v41 = vpop.permute.xlu0 %1579  ;;  %v465_v32 = vadd.f32 %v4963_v6, %v409_v34  ;;  %v5662_v6 = vmul.f32 %v4400_v50, %v662_v28  ;;  %v5684_v34 = vmul.f32 %v4402_v59, %v801_v2  ;;  %v5688_v50 = vmul.f32 %v4402_v59, %v807_v8 }
 0x290   : > { %7494 = vst [vmem:[#allocation141_spill] sm:$0xff] %v5630_v42  ;;  %v519_v42 = vmul.f32 %v4398_v7, %v518_v60  ;;  %v423_v60 = vadd.f32 %v4936_v53, %v383_v40  ;;  %v466_v7 = vadd.f32 %v4969_v10, %v410_v3  ;;  %v4403_v40 = vld [vmem:[#allocation2 + $0x2f] sm:$0xff]  ;;  %v5680_v10 = vmul.f32 %v4402_v59, %v795_v47 }
 0x291   : > { %v515_v29 = vadd.f32 %v513_v24, %v465_v32  ;;  %v5678_v28 = vmul.f32 %v4403_v40, %v789_v14  ;;  %v5682_v4 = vmul.f32 %v4403_v40, %v795_v47  ;;  %v5686_v3 = vmul.f32 %v4403_v40, %v801_v2  ;;  %v4404_v47 = vld [vmem:[#allocation2 + $0x28] sm:$0xff]  ;;  %v4405_v2 = vld [vmem:[#allocation2 + $0x30] sm:$0xff] }
 0x292   : > { %v479_v53 = vadd.f32 %v4971_v11, %v423_v60  ;;  %v437_v11 = vadd.f32 %v4944_v58, %v389_v39  ;;  %v5693_v32 = vmul.f32 %v4403_v40, %v807_v8  ;;  %v516_v14 = vadd.f32 %v514_v44, %v466_v7 }
 0x293   : > { %v5643_v13 = vpop.permute.xlu1 %1581  ;;  %v5645_v18 = vpop.permute.xlu0 %1593  ;;  %v547_v24 = vadd.f32 %v4995_v26, %v515_v29  ;;  %v7497_v60 = vstv %s5584_s19  ;;  %v7499_v58 = vstv %s5586_s7  ;;  %v480_v44 = vadd.f32 %v4977_v15, %v424_v37  ;;  %s5848_s19 = sld [smem:[#allocation3 + $0x15]]  ;;  %s5899_s7 = sld [smem:[#allocation3 + $0x81]] }
 0x294   : > { %v5699_v43 = vmul.f32 %v4404_v47, %v7497_v60  ;;  %v7498_v59 = vmov %v7497_v60  ;;  %v5707_v62 = vmul.f32 %v4404_v47, %v7499_v58  ;;  %v493_v39 = vadd.f32 %v4979_v16, %v437_v11 }
 0x295   : > { %v5703_v57 = vmul.f32 %v4405_v2, %v7498_v59  ;;  %v521_v7 = vadd.f32 %v519_v42, %v479_v53  ;;  %v603_v29 = vadd.f32 %v5037_v49, %v547_v24  ;;  %v438_v40 = vadd.f32 %v4951_v63, %v390_v25 }
 0x296   : > { %v451_v60 = vadd.f32 %v4953_v0, %v395_v22  ;;  %v548_v59 = vadd.f32 %v5003_v30, %v516_v14  ;;  %v5721_v1 = vmul.f32 %v4405_v2, %v7499_v58  ;;  %v7503_v42 = vstv %s5591_s25  ;;  %s5875_s25 = sld [smem:[#allocation3 + $0x5d]] }
 0x297   : > { %v5673_v51 = vpop.permute.xlu1 %1595  ;;  %v5675_v12 = vpop.permute.xlu0 %1607  ;;  %v5734_v49 = vmul.f32 %v4404_v47, %v7503_v42  ;;  %v494_v63 = vadd.f32 %v4985_v20, %v438_v40  ;;  %v7504_v30 = vmov %v7503_v42  ;;  %v522_v53 = vadd.f32 %v5639_v36, %v480_v44 }
 0x298   : > { %7495 = vst [vmem:[#allocation142_spill] sm:$0xff] %v5673_v51  ;;  %7496 = vst [vmem:[#allocation143_spill] sm:$0xff] %v5675_v12  ;;  %v7501_v12 = vstv %s5589_s21  ;;  %v507_v0 = vadd.f32 %v4987_v21, %v451_v60  ;;  %v604_v25 = vadd.f32 %v5043_v55, %v548_v59  ;;  %v527_v37 = vadd.f32 %v5641_v38, %v493_v39  ;;  %v4406_v21 = vld [vmem:[#allocation2 + $0x29] sm:$0xff]  ;;  %s5850_s21 = sld [smem:[#allocation3 + $0x39]] }
 0x299   : > { %v5726_v51 = vmul.f32 %v4404_v47, %v7501_v12  ;;  %v7502_v15 = vmov %v7501_v12  ;;  %v653_v24 = vadd.f32 %v651_v9, %v603_v29  ;;  %v452_v20 = vadd.f32 %v4961_v5, %v5637_v17  ;;  %v4407_v47 = vld [vmem:[#allocation2 + $0x31] sm:$0xff]  ;;  %v7510_v17 = vld [vmem:[#allocation26_spill] sm:$0xff] }
 0x29a   : > { %v5730_v16 = vmul.f32 %v4405_v2, %v7502_v15  ;;  %v7505_v55 = vstv %s5602_s27  ;;  %v7507_v40 = vstv %s5607_s18  ;;  %v562_v36 = vadd.f32 %v5013_v35, %v522_v53  ;;  %v7509_v9 = vld [vmem:[#allocation36_spill] sm:$0xff]  ;;  %v7511_v15 = vld [vmem:[#allocation31_spill] sm:$0xff]  ;;  %s6147_s27 = sld [smem:[#allocation3 + $0x69]] }
 0x29b   : > { %v5709_v26 = vpop.permute.xlu1 %1609  ;;  %v5711_v8 = vpop.permute.xlu0 %1648  ;;  %v5756_v14 = vmul.f32 %v4406_v21, %v7505_v55  ;;  %v5764_v60 = vmul.f32 %v4406_v21, %v7507_v40  ;;  %v1077_v5 = vstv %s5695_s0  ;;  %v508_v44 = vadd.f32 %v7510_v17, %v452_v20  ;;  %v7514_v20 = vld [vmem:[#allocation28_spill] sm:$0xff]  ;;  %v7516_v40 = vld [vmem:[#allocation37_spill] sm:$0xff]  ;;  %v7520_v17 = vld [vmem:[#allocation34_spill] sm:$0xff]  ;;  %s6161_s0 = sld [smem:[#allocation3 + $0x8d]] }
 0x29c   : > { %7500 = vst [vmem:[#allocation144_spill] sm:$0xff] %v5709_v26  ;;  %v561_v26 = vadd.f32 %v5005_v31, %v521_v7  ;;  %v5743_v31 = vmul.f32 %v4405_v2, %v7504_v30  ;;  %v7506_v2 = vmov %v7505_v55  ;;  %v528_v39 = vadd.f32 %v5648_v33, %v494_v63  ;;  %v7512_v30 = vld [vmem:[#allocation32_spill] sm:$0xff]  ;;  %v7515_v33 = vld [vmem:[#allocation29_spill] sm:$0xff] }
 0x29d   : > { %v5760_v7 = vmul.f32 %v4407_v47, %v7506_v2  ;;  %v533_v29 = vadd.f32 %v5650_v48, %v507_v0  ;;  %v654_v59 = vadd.f32 %v5655_v19, %v604_v25  ;;  %v618_v42 = vadd.f32 %v7511_v15, %v562_v36  ;;  %v7518_v25 = vld [vmem:[#allocation38_spill] sm:$0xff] }
 0x29e   : > { %v617_v11 = vadd.f32 %v5045_v56, %v561_v26  ;;  %v7508_v56 = vld [vmem:[#allocation27_spill] sm:$0xff]  ;;  %v685_v26 = vadd.f32 %v7509_v9, %v653_v24  ;;  %v7513_v24 = vld [vmem:[#allocation44_spill] sm:$0xff]  ;;  %v576_v2 = vadd.f32 %v7514_v20, %v528_v39  ;;  %v7517_v0 = vstv %s5607_s18  ;;  %s5823_s18 = sld [smem:[#allocation3 + $0x7e]] }
 0x29f   : > { %v5745_v22 = vpop.permute.xlu1 %1650  ;;  %v5747_v12 = vpop.permute.xlu0 %1662  ;;  %v575_v38 = vadd.f32 %v7508_v56, %v527_v37  ;;  %v589_v63 = vadd.f32 %v7515_v33, %v533_v29  ;;  %v686_v48 = vadd.f32 %v7516_v40, %v654_v59  ;;  %v5791_v19 = vmul.f32 %v4407_v47, %v7517_v0  ;;  %v7521_v29 = vld [vmem:[#allocation45_spill] sm:$0xff] }
 0x2a0   : > { %v659_v37 = vadd.f32 %v5657_v54, %v617_v11  ;;  %v741_v55 = vadd.f32 %v7513_v24, %v685_v26  ;;  %v5794_v9 = vmul.f32 %v4406_v21, %v1077_v5  ;;  %v5796_v36 = vmul.f32 %v4407_v47, %v1077_v5  ;;  %v7519_v11 = vld [vmem:[#allocation33_spill] sm:$0xff]  ;;  %v7523_v24 = vld [vmem:[#allocation46_spill] sm:$0xff] }
 0x2a1   : > { %v631_v53 = vadd.f32 %v7512_v30, %v575_v38  ;;  %v1083_v38 = vstv %s5736_s1  ;;  %v534_v54 = vadd.f32 %v5652_v45, %v508_v44  ;;  %v632_v26 = vadd.f32 %v7519_v11, %v576_v2  ;;  %v7524_v45 = vld [vmem:[#allocation30_spill] sm:$0xff]  ;;  %s4599_s1 = smov 1  }
 0x2a2   : > { %v699_v56 = vadd.f32 %v7518_v25, %v659_v37  ;;  %v645_v39 = vadd.f32 %v7520_v17, %v589_v63  ;;  %v742_v59 = vadd.f32 %v7521_v29, %v686_v48  ;;  %v660_v5 = vadd.f32 %v5660_v46, %v618_v42  ;;  %v7525_v48 = vld [vmem:[#allocation39_spill] sm:$0xff]  ;;  %v7526_v25 = vld [vmem:[#allocation40_spill] sm:$0xff] }
 0x2a3   : > { %v5778_v58 = vpop.permute.xlu1 %1664  ;;  %v5780_v35 = vpop.permute.xlu0 %1676  ;;  %v665_v37 = vadd.f32 %v5662_v6, %v631_v53  ;;  %v792_v33 = vadd.f32 %v5671_v61, %v741_v55  ;;  %v590_v44 = vadd.f32 %v7524_v45, %v534_v54  ;;  %v5814_v2 = vmul.f32 %v4406_v21, %v1083_v38  ;;  %v7527_v17 = vld [vmem:[#allocation52_spill] sm:$0xff]  ;;  %v7528_v6 = vld [vmem:[#allocation35_spill] sm:$0xff]  ;;  %v7533_v45 = vld [vmem:[#allocation41_spill] sm:$0xff] }
 0x2a4   : > { %v755_v20 = vadd.f32 %v7523_v24, %v699_v56  ;;  %v5816_v40 = vmul.f32 %v4407_v47, %v1083_v38  ;;  %v1204_v63 = vstv %s5766_s2  ;;  %v700_v0 = vadd.f32 %v7525_v48, %v660_v5  ;;  %v7530_v56 = vld [vmem:[#allocation47_spill] sm:$0xff]  ;;  %v7531_v54 = vld [vmem:[#allocation48_spill] sm:$0xff]  ;;  %v7536_v48 = vld [vmem:[#allocation54_spill] sm:$0xff]  ;;  %s4140_s2 = sld [smem:[#allocation9 + $0x1]] }
 0x2a5   : > { %v713_v11 = vadd.f32 %v7526_v25, %v665_v37  ;;  %v824_v29 = vadd.f32 %v7527_v17, %v792_v33  ;;  %v1210_v46 = vstv %s5772_s3  ;;  %v646_v42 = vadd.f32 %v7528_v6, %v590_v44  ;;  %v7532_v24 = vld [vmem:[#allocation60_spill] sm:$0xff]  ;;  %s4141_s3 = sld [smem:[#allocation9 + $0x25]] }
 0x2a6   : > { %v666_v61 = vadd.f32 %v5664_v27, %v632_v26  ;;  %v671_v53 = vadd.f32 %v5667_v23, %v645_v39  ;;  %v793_v21 = vadd.f32 %v5678_v28, %v742_v59  ;;  %v756_v38 = vadd.f32 %v7530_v56, %v700_v0  ;;  %v7534_v27 = vld [vmem:[#allocation42_spill] sm:$0xff]  ;;  %v7535_v23 = vld [vmem:[#allocation53_spill] sm:$0xff]  ;;  %v4409_v17 = vld [vmem:[#allocation2 + $0x4f] sm:$0xff] }
 0x2a7   : > { %v5805_v15 = vpop.permute.xlu1 %1678  ;;  %v5807_v30 = vpop.permute.xlu0 %1690  ;;  %v769_v5 = vadd.f32 %v7531_v54, %v713_v11  ;;  %v798_v37 = vadd.f32 %v5680_v10, %v755_v20  ;;  %v880_v33 = vadd.f32 %v7532_v24, %v824_v29  ;;  %v4408_v28 = vld [vmem:[#allocation2 + $0x47] sm:$0xff]  ;;  %v5843_v6 = vmul.f32 %v4409_v17, %v1204_v63  ;;  %v7537_v20 = vld [vmem:[#allocation49_spill] sm:$0xff] }
 0x2a8   : > { %7522 = vst [vmem:[#allocation27_spill] sm:$0xff] %v5807_v30  ;;  %v714_v44 = vadd.f32 %v7533_v45, %v666_v61  ;;  %v727_v26 = vadd.f32 %v7534_v27, %v671_v53  ;;  %v825_v39 = vadd.f32 %v7535_v23, %v793_v21  ;;  %v5840_v59 = vmul.f32 %v4408_v28, %v1204_v63  ;;  %v7538_v61 = vld [vmem:[#allocation50_spill] sm:$0xff]  ;;  %v7539_v21 = vld [vmem:[#allocation61_spill] sm:$0xff] }
 0x2a9   : > { %v838_v25 = vadd.f32 %v7536_v48, %v798_v37  ;;  %v5845_v0 = vmul.f32 %v4408_v28, %v1210_v46  ;;  %v1216_v11 = vstv %s5799_s4  ;;  %v672_v10 = vadd.f32 %v5669_v52, %v646_v42  ;;  %v7540_v45 = vld [vmem:[#allocation62_spill] sm:$0xff]  ;;  %v7541_v52 = vld [vmem:[#allocation43_spill] sm:$0xff]  ;;  %s4142_s4 = sld [smem:[#allocation9 + $0x49]] }
 0x2aa   : > { %v770_v29 = vadd.f32 %v7537_v20, %v714_v44  ;;  %v783_v53 = vadd.f32 %v7538_v61, %v727_v26  ;;  %v881_v56 = vadd.f32 %v7539_v21, %v825_v39  ;;  %v799_v37 = vadd.f32 %v5682_v4, %v756_v38  ;;  %v7542_v39 = vld [vmem:[#allocation55_spill] sm:$0xff]  ;;  %v7543_v61 = vld [vmem:[#allocation56_spill] sm:$0xff] }
 0x2ab   : > { %v5829_v47 = vpop.permute.xlu1 %1692  ;;  %v5831_v55 = vpop.permute.xlu0 %1704  ;;  %v804_v24 = vadd.f32 %v5684_v34, %v769_v5  ;;  %v894_v27 = vadd.f32 %v7540_v45, %v838_v25  ;;  %v930_v23 = vadd.f32 %v5699_v43, %v880_v33  ;;  %v728_v42 = vadd.f32 %v7541_v52, %v672_v10  ;;  %v7545_v34 = vld [vmem:[#allocation51_spill] sm:$0xff] }
 0x2ac   : > { %7529 = vst [vmem:[#allocation36_spill] sm:$0xff] %v5829_v47  ;;  %v5865_v44 = vmul.f32 %v4409_v17, %v1210_v46  ;;  %v5867_v48 = vmul.f32 %v4408_v28, %v1216_v11  ;;  %v5869_v26 = vmul.f32 %v4409_v17, %v1216_v11  ;;  %v839_v20 = vadd.f32 %v7542_v39, %v799_v37  ;;  %v7544_v47 = vld [vmem:[#allocation68_spill] sm:$0xff]  ;;  %v7546_v10 = vld [vmem:[#allocation63_spill] sm:$0xff] }
 0x2ad   : > { %v852_v21 = vadd.f32 %v7543_v61, %v804_v24  ;;  %v962_v4 = vadd.f32 %v7544_v47, %v930_v23  ;;  %v1222_v38 = vstv %s5823_s18  ;;  %v784_v5 = vadd.f32 %v7545_v34, %v728_v42  ;;  %v7547_v47 = vld [vmem:[#allocation64_spill] sm:$0xff]  ;;  %v7549_v42 = vld [vmem:[#allocation57_spill] sm:$0xff]  ;;  %s4143_s18 = sld [smem:[#allocation9 + $0x6d]] }
 0x2ae   : > { %v805_v43 = vadd.f32 %v5686_v3, %v770_v29  ;;  %v810_v46 = vadd.f32 %v5688_v50, %v783_v53  ;;  %v931_v33 = vadd.f32 %v5703_v57, %v881_v56  ;;  %v895_v37 = vadd.f32 %v7546_v10, %v839_v20  ;;  %v7548_v23 = vld [vmem:[#allocation76_spill] sm:$0xff]  ;;  %v7550_v3 = vld [vmem:[#allocation58_spill] sm:$0xff]  ;;  %v7551_v61 = vld [vmem:[#allocation69_spill] sm:$0xff] }
 0x2af   : > { %v5856_v54 = vpop.permute.xlu1 %1706  ;;  %v5858_v63 = vpop.permute.xlu0 %1718  ;;  %v908_v24 = vadd.f32 %v7547_v47, %v852_v21  ;;  %v936_v45 = vadd.f32 %v5707_v62, %v894_v27  ;;  %v1018_v52 = vadd.f32 %v7548_v23, %v962_v4  ;;  %v5892_v53 = vmul.f32 %v4408_v28, %v1222_v38  ;;  %v7552_v57 = vld [vmem:[#allocation70_spill] sm:$0xff]  ;;  %v7553_v27 = vld [vmem:[#allocation65_spill] sm:$0xff] }
 0x2b0   : > { %v853_v39 = vadd.f32 %v7549_v42, %v805_v43  ;;  %v866_v29 = vadd.f32 %v7550_v3, %v810_v46  ;;  %v963_v50 = vadd.f32 %v7551_v61, %v931_v33  ;;  %v5895_v34 = vmul.f32 %v4409_v17, %v1222_v38  ;;  %v7554_v4 = vld [vmem:[#allocation66_spill] sm:$0xff]  ;;  %v7555_v10 = vld [vmem:[#allocation77_spill] sm:$0xff]  ;;  %v4410_v42 = vld [vmem:[#allocation2 + $0x48] sm:$0xff] }
 0x2b1   : > { %v976_v56 = vadd.f32 %v7552_v57, %v936_v45  ;;  %v1342_v30 = vstv %s5848_s19  ;;  %v1348_v20 = vstv %s5850_s21  ;;  %v811_v62 = vadd.f32 %v5693_v32, %v784_v5  ;;  %v7557_v33 = vld [vmem:[#allocation78_spill] sm:$0xff]  ;;  %v7558_v32 = vld [vmem:[#allocation59_spill] sm:$0xff]  ;;  %v4411_v3 = vld [vmem:[#allocation2 + $0x50] sm:$0xff]  ;;  %s7644_s19 = smov 127   ;;  %s4144_s21 = sld [smem:[#allocation9 + $0x2]] }
 0x2b2   : > { %v909_v21 = vadd.f32 %v7553_v27, %v853_v39  ;;  %v922_v43 = vadd.f32 %v7554_v4, %v866_v29  ;;  %v1019_v46 = vadd.f32 %v7555_v10, %v963_v50  ;;  %v937_v17 = vadd.f32 %v5721_v1, %v895_v37  ;;  %v7559_v50 = vld [vmem:[#allocation71_spill] sm:$0xff]  ;;  %v7560_v37 = vld [vmem:[#allocation72_spill] sm:$0xff] }
 0x2b3   : > { %v5881_v25 = vpop.permute.xlu1 %1720  ;;  %v5883_v11 = vpop.permute.xlu0 %1732  ;;  %v942_v38 = vadd.f32 %v5726_v51, %v908_v24  ;;  %v1032_v45 = vadd.f32 %v7557_v33, %v976_v56  ;;  %v1068_v23 = vadd.f32 %v5756_v14, %v1018_v52  ;;  %v867_v5 = vadd.f32 %v7558_v32, %v811_v62  ;;  %v7561_v24 = vld [vmem:[#allocation84_spill] sm:$0xff]  ;;  %v7562_v14 = vld [vmem:[#allocation67_spill] sm:$0xff] }
 0x2b4   : > { %v5914_v39 = vmul.f32 %v4410_v42, %v1342_v30  ;;  %v5916_v29 = vmul.f32 %v4411_v3, %v1342_v30  ;;  %v5918_v61 = vmul.f32 %v4410_v42, %v1348_v20  ;;  %v977_v1 = vadd.f32 %v7559_v50, %v937_v17  ;;  %v7564_v17 = vld [vmem:[#allocation79_spill] sm:$0xff]  ;;  %v7565_v33 = vld [vmem:[#allocation80_spill] sm:$0xff] }
 0x2b5   : > { %v990_v51 = vadd.f32 %v7560_v37, %v942_v38  ;;  %v1100_v57 = vadd.f32 %v7561_v24, %v1068_v23  ;;  %v1354_v56 = vstv %s5875_s25  ;;  %v923_v52 = vadd.f32 %v7562_v14, %v867_v5  ;;  %v7566_v50 = vld [vmem:[#allocation92_spill] sm:$0xff]  ;;  %v7567_v5 = vld [vmem:[#allocation73_spill] sm:$0xff]  ;;  %s4145_s25 = sld [smem:[#allocation9 + $0x26]] }
 0x2b6   : > { %v943_v62 = vadd.f32 %v5730_v16, %v909_v21  ;;  %v948_v30 = vadd.f32 %v5734_v49, %v922_v43  ;;  %v1069_v27 = vadd.f32 %v5760_v7, %v1019_v46  ;;  %v1033_v38 = vadd.f32 %v7564_v17, %v977_v1  ;;  %v7568_v16 = vld [vmem:[#allocation74_spill] sm:$0xff]  ;;  %v7569_v14 = vld [vmem:[#allocation85_spill] sm:$0xff] }
 0x2b7   : > { %v5905_v47 = vpop.permute.xlu1 %1734  ;;  %v5907_v28 = vpop.permute.xlu0 %1746  ;;  %v1046_v23 = vadd.f32 %v7565_v33, %v990_v51  ;;  %v1074_v32 = vadd.f32 %v5764_v60, %v1032_v45  ;;  %v1156_v37 = vadd.f32 %v7566_v50, %v1100_v57  ;;  %v5943_v43 = vmul.f32 %v4411_v3, %v1348_v20  ;;  %v7570_v7 = vld [vmem:[#allocation86_spill] sm:$0xff]  ;;  %v7571_v45 = vld [vmem:[#allocation81_spill] sm:$0xff] }
 0x2b8   : > { %7556 = vst [vmem:[#allocation26_spill] sm:$0xff] %v5907_v28  ;;  %v991_v24 = vadd.f32 %v7567_v5, %v943_v62  ;;  %v1004_v21 = vadd.f32 %v7568_v16, %v948_v30  ;;  %v1101_v49 = vadd.f32 %v7569_v14, %v1069_v27  ;;  %v5948_v28 = vmul.f32 %v4411_v3, %v1354_v56  ;;  %v7572_v57 = vld [vmem:[#allocation82_spill] sm:$0xff]  ;;  %v7573_v30 = vld [vmem:[#allocation93_spill] sm:$0xff]  ;;  %v7576_v14 = vld [vmem:[#allocation87_spill] sm:$0xff] }
 0x2b9   : > { %v1114_v46 = vadd.f32 %v7570_v7, %v1074_v32  ;;  %v1360_v1 = vstv %s5899_s7  ;;  %v949_v60 = vadd.f32 %v5743_v31, %v923_v52  ;;  %v1080_v33 = vadd.f32 %v5794_v9, %v1046_v23  ;;  %v7574_v32 = vld [vmem:[#allocation94_spill] sm:$0xff]  ;;  %v7575_v31 = vld [vmem:[#allocation75_spill] sm:$0xff]  ;;  %v7577_v7 = vld [vmem:[#allocation88_spill] sm:$0xff]  ;;  %s4146_s7 = sld [smem:[#allocation9 + $0x4a]] }
 0x2ba   : > { %v1047_v51 = vadd.f32 %v7571_v45, %v991_v24  ;;  %v1060_v62 = vadd.f32 %v7572_v57, %v1004_v21  ;;  %v1157_v20 = vadd.f32 %v7573_v30, %v1101_v49  ;;  %v1207_v5 = vadd.f32 %v5840_v59, %v1156_v37  ;;  %v7578_v57 = vld [vmem:[#allocation100_spill] sm:$0xff]  ;;  %v7579_v9 = vld [vmem:[#allocation83_spill] sm:$0xff] }
 0x2bb   : > { %v5932_v4 = vpop.permute.xlu1 %1748  ;;  %v5934_v10 = vpop.permute.xlu0 %1786  ;;  %v1170_v50 = vadd.f32 %v7574_v32, %v1114_v46  ;;  %v1005_v52 = vadd.f32 %v7575_v31, %v949_v60  ;;  %v5966_v24 = vmul.f32 %v4410_v42, %v1360_v1  ;;  %v5968_v16 = vmul.f32 %v4411_v3, %v1360_v1  ;;  %v7580_v46 = vld [vmem:[#allocation95_spill] sm:$0xff]  ;;  %v7581_v60 = vld [vmem:[#allocation96_spill] sm:$0xff]  ;;  %v7583_v31 = vld [vmem:[#allocation89_spill] sm:$0xff] }
 0x2bc   : > { %7563 = vst [vmem:[#allocation31_spill] sm:$0xff] %v5932_v4  ;;  %v5946_v4 = vmul.f32 %v4410_v42, %v1354_v56  ;;  %v1075_v56 = vadd.f32 %v5791_v19, %v1033_v38  ;;  %v1480_v21 = vstv %s5920_s8  ;;  %v1128_v45 = vadd.f32 %v7577_v7, %v1080_v33  ;;  %v7582_v32 = vld [vmem:[#allocation108_spill] sm:$0xff]  ;;  %s4147_s8 = sld [smem:[#allocation9 + $0x6e]] }
 0x2bd   : > { %v1239_v30 = vadd.f32 %v7578_v57, %v1207_v5  ;;  %v1486_v19 = vstv %s5926_s30  ;;  %v1061_v38 = vadd.f32 %v7579_v9, %v1005_v52  ;;  %v1081_v59 = vadd.f32 %v5796_v36, %v1047_v51  ;;  %v7584_v36 = vld [vmem:[#allocation90_spill] sm:$0xff]  ;;  %v4413_v57 = vld [vmem:[#allocation2 + $0x51] sm:$0xff]  ;;  %s4152_s30 = sld [smem:[#allocation9 + $0x4]] }
 0x2be   : > { %v1115_v49 = vadd.f32 %v7576_v14, %v1075_v56  ;;  %v1086_v23 = vadd.f32 %v5814_v2, %v1060_v62  ;;  %v1208_v42 = vadd.f32 %v5843_v6, %v1157_v20  ;;  %v1184_v56 = vadd.f32 %v7581_v60, %v1128_v45  ;;  %v7585_v2 = vld [vmem:[#allocation101_spill] sm:$0xff]  ;;  %v4412_v6 = vld [vmem:[#allocation2 + $0x49] sm:$0xff]  ;;  %v7586_v14 = vld [vmem:[#allocation102_spill] sm:$0xff] }
 0x2bf   : > { %v5957_v27 = vpop.permute.xlu1 %1788  ;;  %v5959_v17 = vpop.permute.xlu0 %1800  ;;  %v1213_v33 = vadd.f32 %v5845_v0, %v1170_v50  ;;  %v1295_v5 = vadd.f32 %v7582_v32, %v1239_v30  ;;  %v1129_v52 = vadd.f32 %v7583_v31, %v1081_v59  ;;  %v1481_v20 = vmul.f32 %v4412_v6, %v1480_v21  ;;  %v7587_v50 = vld [vmem:[#allocation97_spill] sm:$0xff]  ;;  %v7588_v59 = vld [vmem:[#allocation98_spill] sm:$0xff] }
 0x2c0   : > { %v1171_v1 = vadd.f32 %v7580_v46, %v1115_v49  ;;  %v1142_v51 = vadd.f32 %v7584_v36, %v1086_v23  ;;  %v1240_v62 = vadd.f32 %v7585_v2, %v1208_v42  ;;  %v5993_v9 = vmul.f32 %v4413_v57, %v1480_v21  ;;  %v7589_v42 = vld [vmem:[#allocation109_spill] sm:$0xff]  ;;  %v7592_v31 = vld [vmem:[#allocation110_spill] sm:$0xff] }
 0x2c1   : > { %v1253_v7 = vadd.f32 %v7586_v14, %v1213_v33  ;;  %v5995_v49 = vmul.f32 %v4412_v6, %v1486_v19  ;;  %v1492_v45 = vstv %s5951_s10  ;;  %v1087_v0 = vadd.f32 %v5816_v40, %v1061_v38  ;;  %v7593_v40 = vld [vmem:[#allocation91_spill] sm:$0xff]  ;;  %s4153_s10 = sld [smem:[#allocation9 + $0x28]] }
 0x2c2   : > { %v1185_v30 = vadd.f32 %v7587_v50, %v1129_v52  ;;  %v1198_v23 = vadd.f32 %v7588_v59, %v1142_v51  ;;  %v1296_v46 = vadd.f32 %v7589_v42, %v1240_v62  ;;  %v1214_v33 = vadd.f32 %v5865_v44, %v1171_v1  ;;  %v7594_v62 = vld [vmem:[#allocation103_spill] sm:$0xff]  ;;  %v7595_v59 = vld [vmem:[#allocation104_spill] sm:$0xff] }
 0x2c3   : > { %v5981_v3 = vpop.permute.xlu1 %1802  ;;  %v5983_v37 = vpop.permute.xlu0 %1814  ;;  %v1219_v32 = vadd.f32 %v5867_v48, %v1184_v56  ;;  %v1309_v36 = vadd.f32 %v7592_v31, %v1253_v7  ;;  %v1345_v2 = vadd.f32 %v5914_v39, %v1295_v5  ;;  %v1143_v38 = vadd.f32 %v7593_v40, %v1087_v0  ;;  %v7597_v48 = vld [vmem:[#allocation99_spill] sm:$0xff] }
 0x2c4   : > { %v6015_v52 = vmul.f32 %v4413_v57, %v1486_v19  ;;  %v6017_v14 = vmul.f32 %v4412_v6, %v1492_v45  ;;  %v6019_v51 = vmul.f32 %v4413_v57, %v1492_v45  ;;  %v1254_v50 = vadd.f32 %v7594_v62, %v1214_v33  ;;  %v7599_v0 = vld [vmem:[#allocation111_spill] sm:$0xff] }
 0x2c5   : > { %v1267_v42 = vadd.f32 %v7595_v59, %v1219_v32  ;;  %v1498_v1 = vstv %s5975_s11  ;;  %v1199_v56 = vadd.f32 %v7597_v48, %v1143_v38  ;;  %v1220_v39 = vadd.f32 %v5869_v26, %v1185_v30  ;;  %v7602_v38 = vld [vmem:[#allocation105_spill] sm:$0xff]  ;;  %v7603_v26 = vld [vmem:[#allocation106_spill] sm:$0xff]  ;;  %s4154_s11 = sld [smem:[#allocation9 + $0x4c]] }
 0x2c6   : > { %v1225_v19 = vadd.f32 %v5892_v53, %v1198_v23  ;;  %v1346_v5 = vadd.f32 %v5916_v29, %v1296_v46  ;;  %v1310_v33 = vadd.f32 %v7599_v0, %v1254_v50  ;;  %v1351_v31 = vadd.f32 %v5918_v61, %v1309_v36  ;;  %v7604_v59 = vld [vmem:[#allocation117_spill] sm:$0xff]  ;;  %v7605_v29 = vld [vmem:[#allocation118_spill] sm:$0xff] }
 0x2c7   : > { %v6006_v60 = vpop.permute.xlu1 %1816  ;;  %v6008_v21 = vpop.permute.xlu0 %1828  ;;  %v1268_v62 = vadd.f32 %v7602_v38, %v1220_v39  ;;  %v6042_v23 = vmul.f32 %v4412_v6, %v1498_v1  ;;  %v6045_v48 = vmul.f32 %v4413_v57, %v1498_v1  ;;  %v1625_v50 = vstv %s6000_s28  ;;  %v7606_v36 = vld [vmem:[#allocation113_spill] sm:$0xff]  ;;  %v7610_v38 = vld [vmem:[#allocation107_spill] sm:$0xff]  ;;  %s4156_s28 = sld [smem:[#allocation9 + $0x5]] }
 0x2c8   : > { %7590 = vst [vmem:[#allocation32_spill] sm:$0xff] %v6006_v60  ;;  %7591 = vst [vmem:[#allocation44_spill] sm:$0xff] %v6008_v21  ;;  %v7596_v21 = vld [vmem:[#allocation116_spill] sm:$0xff]  ;;  %v1281_v30 = vadd.f32 %v7603_v26, %v1225_v19  ;;  %v1378_v53 = vadd.f32 %v7604_v59, %v1346_v5  ;;  %v1391_v46 = vadd.f32 %v7605_v29, %v1351_v31  ;;  %v7608_v0 = vld [vmem:[#allocation125_spill] sm:$0xff] }
 0x2c9   : > { %v1377_v44 = vadd.f32 %v7596_v21, %v1345_v2  ;;  %v7600_v21 = vld [vmem:[#allocation112_spill] sm:$0xff]  ;;  %v1226_v61 = vadd.f32 %v5895_v34, %v1199_v56  ;;  %v1352_v57 = vadd.f32 %v5943_v43, %v1310_v33  ;;  %v7609_v5 = vld [vmem:[#allocation126_spill] sm:$0xff]  ;;  %v1631_v33 = vstv %s6025_s13  ;;  %s4157_s13 = sld [smem:[#allocation9 + $0x29]] }
 0x2ca   : > { %v1323_v32 = vadd.f32 %v7600_v21, %v1267_v42  ;;  %v7601_v2 = vld [vmem:[#allocation124_spill] sm:$0xff]  ;;  %v1324_v42 = vadd.f32 %v7606_v36, %v1268_v62  ;;  %v1434_v19 = vadd.f32 %v7608_v0, %v1378_v53  ;;  %v1447_v31 = vadd.f32 %v7609_v5, %v1391_v46  ;;  %v4414_v56 = vld [vmem:[#allocation2 + $0x67] sm:$0xff] }
 0x2cb   : > { %v6031_v7 = vpop.permute.xlu1 %1830  ;;  %v6033_v45 = vpop.permute.xlu0 %1842  ;;  %v1433_v40 = vadd.f32 %v7601_v2, %v1377_v44  ;;  %v7607_v44 = vld [vmem:[#allocation114_spill] sm:$0xff]  ;;  %v1282_v34 = vadd.f32 %v7610_v38, %v1226_v61  ;;  %v4415_v26 = vld [vmem:[#allocation2 + $0x6f] sm:$0xff]  ;;  %v1626_v59 = vmul.f32 %v4414_v56, %v1625_v50  ;;  %v1632_v60 = vmul.f32 %v4414_v56, %v1631_v33 }
 0x2cc   : > { %7598 = vst [vmem:[#allocation28_spill] sm:$0xff] %v6031_v7  ;;  %v1619_v7 = vstv %s5998_s12  ;;  %v1337_v39 = vadd.f32 %v7607_v44, %v1281_v30  ;;  %v1357_v1 = vadd.f32 %v5946_v4, %v1323_v32  ;;  %v7611_v53 = vld [vmem:[#allocation119_spill] sm:$0xff]  ;;  %v7612_v36 = vld [vmem:[#allocation120_spill] sm:$0xff]  ;;  %v1358_v32 = vadd.f32 %v5948_v28, %v1324_v42  ;;  %v7620_v28 = vld [vmem:[#allocation122_spill] sm:$0xff]  ;;  %s4155_s12 = sld [smem:[#allocation9 + $0x70]] }
 0x2cd   : > { %v1483_v2 = vadd.f32 %v1481_v20, %v1433_v40  ;;  %v1620_v62 = vmul.f32 %v4414_v56, %v1619_v7  ;;  %v1621_v30 = vmul.f32 %v4415_v26, %v1619_v7  ;;  %v1392_v29 = vadd.f32 %v7611_v53, %v1352_v57  ;;  %v7613_v0 = vld [vmem:[#allocation132_spill] sm:$0xff]  ;;  %v7614_v4 = vld [vmem:[#allocation115_spill] sm:$0xff] }
 0x2ce   : > { %v1405_v44 = vadd.f32 %v7612_v36, %v1357_v1  ;;  %v1338_v20 = vadd.f32 %v7614_v4, %v1282_v34  ;;  %v1363_v40 = vadd.f32 %v5966_v24, %v1337_v39  ;;  %v1484_v7 = vadd.f32 %v5993_v9, %v1434_v19  ;;  %v7616_v57 = vld [vmem:[#allocation127_spill] sm:$0xff]  ;;  %v7617_v5 = vld [vmem:[#allocation128_spill] sm:$0xff]  ;;  %v7619_v34 = vld [vmem:[#allocation121_spill] sm:$0xff] }
 0x2cf   : > { %v6055_v21 = vpop.permute.xlu1 %1844  ;;  %v6057_v6 = vpop.permute.xlu0 %1856  ;;  %v1515_v43 = vadd.f32 %v7613_v0, %v1483_v2  ;;  %v1448_v1 = vadd.f32 %v7616_v57, %v1392_v29  ;;  %v1489_v38 = vadd.f32 %v5995_v49, %v1447_v31  ;;  %v7618_v53 = vld [vmem:[#allocation140_spill] sm:$0xff]  ;;  %v1406_v0 = vadd.f32 %v7619_v34, %v1358_v32  ;;  %v7621_v24 = vld [vmem:[#allocation133_spill] sm:$0xff]  ;;  %v7622_v9 = vld [vmem:[#allocation134_spill] sm:$0xff] }
 0x2d0   : > { %v1461_v2 = vadd.f32 %v7617_v5, %v1405_v44  ;;  %v1419_v42 = vadd.f32 %v7620_v28, %v1363_v40  ;;  %v1516_v39 = vadd.f32 %v7621_v24, %v1484_v7  ;;  %v1627_v4 = vmul.f32 %v4415_v26, %v1625_v50  ;;  %v7623_v31 = vld [vmem:[#allocation129_spill] sm:$0xff]  ;;  %v7626_v34 = vld [vmem:[#allocation123_spill] sm:$0xff] }
 0x2d1   : > { %v1571_v36 = vadd.f32 %v7618_v53, %v1515_v43  ;;  %v1529_v19 = vadd.f32 %v7622_v9, %v1489_v38  ;;  %v1637_v29 = vstv %s6049_s6  ;;  %v1364_v49 = vadd.f32 %v5968_v16, %v1338_v20  ;;  %v7624_v43 = vld [vmem:[#allocation130_spill] sm:$0xff]  ;;  %v7625_v40 = vld [vmem:[#allocation141_spill] sm:$0xff]  ;;  %s4158_s6 = sld [smem:[#allocation9 + $0x4d]] }
 0x2d2   : > { %v1462_v44 = vadd.f32 %v7623_v31, %v1406_v0  ;;  %v1475_v32 = vadd.f32 %v7624_v43, %v1419_v42  ;;  %v1572_v50 = vadd.f32 %v7625_v40, %v1516_v39  ;;  %v1495_v5 = vadd.f32 %v6017_v14, %v1461_v2  ;;  %v7627_v42 = vld [vmem:[#allocation135_spill] sm:$0xff]  ;;  %v7628_v39 = vld [vmem:[#allocation136_spill] sm:$0xff]  ;;  %v7631_v40 = vld [vmem:[#allocation138_spill] sm:$0xff] }
 0x2d3   : > { %v6075_v46 = vpop.permute.xlu1 %1858  ;;  %v6077_v61 = vpop.permute.xlu0 %1870  ;;  %v1585_v38 = vadd.f32 %v5632_v41, %v1529_v19  ;;  %v1622_v53 = vadd.f32 %v1620_v62, %v1571_v36  ;;  %v1420_v16 = vadd.f32 %v7626_v34, %v1364_v49  ;;  %v1638_v20 = vmul.f32 %v4414_v56, %v1637_v29 }
 0x2d4   : > { %7615 = vst [vmem:[#allocation29_spill] sm:$0xff] %v6077_v61  ;;  %v6089_v61 = vmul.f32 %v4415_v26, %v1631_v33  ;;  %v1490_v33 = vadd.f32 %v6015_v52, %v1448_v1  ;;  %v6106_v0 = vmul.f32 %v4415_v26, %v1637_v29  ;;  %v1757_v28 = vstv %s6063_s24  ;;  %v7629_v52 = vld [vmem:[#allocation131_spill] sm:$0xff]  ;;  %v7630_v29 = vld [vmem:[#allocation137_spill] sm:$0xff]  ;;  %s4159_s24 = sld [smem:[#allocation9 + $0x71]] }
 0x2d5   : > { %v1543_v9 = vadd.f32 %v7628_v39, %v1495_v5  ;;  %v1654_v31 = vadd.f32 %v5711_v8, %v1622_v53  ;;  %v1763_v43 = vstv %s6069_s14  ;;  %v1476_v14 = vadd.f32 %v7629_v52, %v1420_v16  ;;  %v7634_v39 = vld [vmem:[#allocation139_spill] sm:$0xff]  ;;  %s4164_s14 = sld [smem:[#allocation9 + $0x7]] }
 0x2d6   : > { %v1530_v24 = vadd.f32 %v7627_v42, %v1490_v33  ;;  %v1496_v41 = vadd.f32 %v6019_v51, %v1462_v44  ;;  %v1501_v62 = vadd.f32 %v6042_v23, %v1475_v32  ;;  %v1623_v56 = vadd.f32 %v1621_v30, %v1572_v50  ;;  %v4416_v44 = vld [vmem:[#allocation2 + $0x68] sm:$0xff]  ;;  %v4417_v50 = vld [vmem:[#allocation2 + $0x70] sm:$0xff] }
 0x2d7   : > { %v6098_v7 = vpop.permute.xlu1 %1872  ;;  %v6100_v57 = vpop.permute.xlu0 %1884  ;;  %v1599_v8 = vadd.f32 %v5645_v18, %v1543_v9  ;;  %v1628_v36 = vadd.f32 %v1626_v59, %v1585_v38  ;;  %v1710_v19 = vadd.f32 %v5831_v55, %v1654_v31  ;;  %v1769_v23 = vstv %s6086_s15  ;;  %v7632_v18 = vld [vmem:[#allocation142_spill] sm:$0xff]  ;;  %v7633_v59 = vld [vmem:[#allocation143_spill] sm:$0xff]  ;;  %s4165_s15 = sld [smem:[#allocation9 + $0x2b]] }
 0x2d8   : > { %v1586_v2 = vadd.f32 %v5643_v13, %v1530_v24  ;;  %v1544_v49 = vadd.f32 %v7630_v29, %v1496_v41  ;;  %v1557_v33 = vadd.f32 %v7631_v40, %v1501_v62  ;;  %v1655_v51 = vadd.f32 %v5745_v22, %v1623_v56  ;;  %v7635_v56 = vld [vmem:[#allocation144_spill] sm:$0xff]  ;;  %v7636_v29 = vld [vmem:[#allocation27_spill] sm:$0xff] }
 0x2d9   : > { %v1668_v30 = vadd.f32 %v5747_v12, %v1628_v36  ;;  %v1758_v32 = vmul.f32 %v4416_v44, %v1757_v28  ;;  %v1759_v5 = vmul.f32 %v4417_v50, %v1757_v28  ;;  %v1775_v53 = vstv %s6092_s23  ;;  %s4166_s23 = sld [smem:[#allocation9 + $0x4f]] }
 0x2da   : > { %v1502_v13 = vadd.f32 %v6045_v48, %v1476_v14  ;;  %v1600_v55 = vadd.f32 %v7632_v18, %v1544_v49  ;;  %v1613_v38 = vadd.f32 %v7633_v59, %v1557_v33  ;;  %v1711_v34 = vadd.f32 %v5856_v54, %v1655_v51  ;;  %v4418_v51 = vld [vmem:[#allocation2 + $0x69] sm:$0xff] }
 0x2db   : > { %v6118_v26 = vpop.permute.xlu1 %1886  ;;  %v6120_v1 = vpop.permute.xlu0 %1924  ;;  %v1629_v12 = vadd.f32 %v1627_v4, %v1586_v2  ;;  %v1634_v42 = vadd.f32 %v1632_v60, %v1599_v8  ;;  %v1724_v28 = vadd.f32 %v5858_v63, %v1668_v30  ;;  %v1760_v24 = vadd.f32 %v1758_v32, %v1710_v19 }
 0x2dc   : > { %v1558_v9 = vadd.f32 %v7634_v39, %v1502_v13  ;;  %v1764_v31 = vmul.f32 %v4416_v44, %v1763_v43  ;;  %v1765_v48 = vmul.f32 %v4417_v50, %v1763_v43  ;;  %v1770_v52 = vmul.f32 %v4416_v44, %v1769_v23 }
 0x2dd   : > { %v1669_v14 = vadd.f32 %v5778_v58, %v1629_v12  ;;  %v1682_v41 = vadd.f32 %v5780_v35, %v1634_v42  ;;  %v1792_v54 = vadd.f32 %v5934_v10, %v1760_v24  ;;  %v1895_v62 = vstv %s6113_s17  ;;  %v7639_v24 = vld [vmem:[#allocation31_spill] sm:$0xff]  ;;  %s4167_s17 = sld [smem:[#allocation9 + $0x73]] }
 0x2de   : > { %v1614_v4 = vadd.f32 %v7635_v56, %v1558_v9  ;;  %v1635_v60 = vadd.f32 %v6089_v61, %v1600_v55  ;;  %v1640_v63 = vadd.f32 %v1638_v20, %v1613_v38  ;;  %v1761_v2 = vadd.f32 %v1759_v5, %v1711_v34  ;;  %v4419_v34 = vld [vmem:[#allocation2 + $0x71] sm:$0xff] }
 0x2df   : > { %v6137_v22 = vpop.permute.xlu1 %1926  ;;  %v6139_v16 = vpop.permute.xlu0 %1938  ;;  %v1725_v58 = vadd.f32 %v5881_v25, %v1669_v14  ;;  %v1738_v35 = vadd.f32 %v5883_v11, %v1682_v41  ;;  %v1766_v36 = vadd.f32 %v1764_v31, %v1724_v28  ;;  %v1848_v10 = vadd.f32 %v6033_v45, %v1792_v54  ;;  %v7637_v45 = vld [vmem:[#allocation26_spill] sm:$0xff] }
 0x2e0   : > { %v1683_v19 = vadd.f32 %v5805_v15, %v1635_v60  ;;  %v1696_v49 = vadd.f32 %v7636_v29, %v1640_v63  ;;  %v1793_v61 = vadd.f32 %v5957_v27, %v1761_v2  ;;  %v1771_v20 = vmul.f32 %v4417_v50, %v1769_v23 }
 0x2e1   : > { %v1806_v40 = vadd.f32 %v5959_v17, %v1766_v36  ;;  %v1776_v33 = vmul.f32 %v4416_v44, %v1775_v53  ;;  %v1896_v30 = vmul.f32 %v4418_v51, %v1895_v62  ;;  %v1901_v25 = vstv %s6131_s26  ;;  %v7638_v44 = vld [vmem:[#allocation36_spill] sm:$0xff]  ;;  %s4168_s26 = sld [smem:[#allocation9 + $0x8]] }
 0x2e2   : > { %v1641_v11 = vadd.f32 %v6106_v0, %v1614_v4  ;;  %v1739_v32 = vadd.f32 %v5905_v47, %v1683_v19  ;;  %v1752_v5 = vadd.f32 %v7637_v45, %v1696_v49  ;;  %v1849_v15 = vadd.f32 %v6055_v21, %v1793_v61 }
 0x2e3   : > { %v6151_v8 = vpop.permute.xlu1 %1940  ;;  %v6153_v43 = vpop.permute.xlu0 %1952  ;;  %v1767_v23 = vadd.f32 %v1765_v48, %v1725_v58  ;;  %v1772_v18 = vadd.f32 %v1770_v52, %v1738_v35  ;;  %v1862_v55 = vadd.f32 %v6057_v6, %v1806_v40  ;;  %v1898_v17 = vadd.f32 %v1896_v30, %v1848_v10  ;;  %v7643_v40 = vld [vmem:[#allocation28_spill] sm:$0xff] }
 0x2e4   : > { %v1697_v59 = vadd.f32 %v7638_v44, %v1641_v11  ;;  %v1777_v38 = vmul.f32 %v4417_v50, %v1775_v53  ;;  %v1897_v12 = vmul.f32 %v4419_v34, %v1895_v62  ;;  %v1902_v0 = vmul.f32 %v4418_v51, %v1901_v25  ;;  %v7640_v53 = vld [vmem:[#allocation29_spill] sm:$0xff] }
 0x2e5   : > { %v1807_v47 = vadd.f32 %v5981_v3, %v1767_v23  ;;  %v1820_v42 = vadd.f32 %v5983_v37, %v1772_v18  ;;  %v1930_v21 = vadd.f32 %v6120_v1, %v1898_v17  ;;  %v1907_v28 = vstv %s6147_s27  ;;  %v7641_v3 = vld [vmem:[#allocation32_spill] sm:$0xff]  ;;  %s4169_s27 = sld [smem:[#allocation9 + $0x2c]] }
 0x2e6   : > { %v1753_v39 = vadd.f32 %v7639_v24, %v1697_v59  ;;  %v1773_v9 = vadd.f32 %v1771_v20, %v1739_v32  ;;  %v1778_v31 = vadd.f32 %v1776_v33, %v1752_v5  ;;  %v1899_v6 = vadd.f32 %v1897_v12, %v1849_v15  ;;  %v7642_v37 = vld [vmem:[#allocation44_spill] sm:$0xff] }
 0x2e7   : > { %v1955_v13 = vpop.permute.xlu1 %1954  ;;  %v1967_v27 = vpop.permute.xlu0 %1966  ;;  %v1863_v50 = vadd.f32 %v6075_v46, %v1807_v47  ;;  %v1876_v14 = vadd.f32 %v7640_v53, %v1820_v42  ;;  %v1904_v41 = vadd.f32 %v1902_v0, %v1862_v55  ;;  %v1903_v4 = vmul.f32 %v4419_v34, %v1901_v25 }
 0x2e8   : > { %v1821_v62 = vadd.f32 %v7641_v3, %v1773_v9  ;;  %v1834_v56 = vadd.f32 %v7642_v37, %v1778_v31  ;;  %v1913_v1 = vstv %s6161_s0  ;;  %v1931_v60 = vadd.f32 %v6137_v22, %v1899_v6  ;;  %s4170_s0 = sld [smem:[#allocation9 + $0x50]] }
 0x2e9   : > { %v1944_v63 = vadd.f32 %v6139_v16, %v1904_v41  ;;  %v1908_v2 = vmul.f32 %v4418_v51, %v1907_v28  ;;  %v1779_v35 = vadd.f32 %v1777_v38, %v1753_v39  ;;  %v1905_v29 = vadd.f32 %v1903_v4, %v1863_v50 }
 0x2ea   : > { %v1877_v36 = vadd.f32 %v6098_v7, %v1821_v62  ;;  %v1890_v46 = vadd.f32 %v6100_v57, %v1834_v56  ;;  %v1909_v33 = vmul.f32 %v4419_v34, %v1907_v28  ;;  %v1914_v16 = vmul.f32 %v4418_v51, %v1913_v1 }
 0x2eb   : > { %v1969_v48 = vpop.permute.xlu1 %1968  ;;  %v1981_v52 = vpop.permute.xlu0 %1980  ;;  %v1910_v49 = vadd.f32 %v1908_v2, %v1876_v14  ;;  %v1835_v22 = vadd.f32 %v7643_v40, %v1779_v35  ;;  %v1945_v30 = vadd.f32 %v6151_v8, %v1905_v29  ;;  %v1915_v55 = vmul.f32 %v4419_v34, %v1913_v1 }
 0x2ec   : > { %v1986_v54 = vadd.f32 %v1981_v52, %v1930_v21  ;;  %v1911_v57 = vadd.f32 %v1909_v33, %v1877_v36  ;;  %v1916_v32 = vadd.f32 %v1914_v16, %v1890_v46  ;;  %v2117_v39 = vstv %s4140_s2  ;;  %s4176_s2 = sld [smem:[#allocation9 + $0xa]] }
 0x2ed   : > { %v1958_v25 = vadd.f32 %v6153_v43, %v1910_v49  ;;  %v1891_v15 = vadd.f32 %v6118_v26, %v1835_v22  ;;  %v2131_v52 = vstv %s4141_s3  ;;  %v2145_v3 = vstv %s4142_s4  ;;  %s4177_s3 = sld [smem:[#allocation9 + $0x2e]]  ;;  %s4178_s4 = sld [smem:[#allocation9 + $0x52]] }
 0x2ee   : > { %v2030_v58 = vmax.f32 %v1986_v54, 0.0  ;;  %v1959_v51 = vadd.f32 %v1955_v13, %v1911_v57  ;;  %v1972_v17 = vadd.f32 %v1967_v27, %v1916_v32  ;;  %v2159_v4 = vstv %s4143_s18  ;;  %s4179_s18 = sld [smem:[#allocation9 + $0x76]] }
 0x2ef   : > { %v1983_v10 = vpop.permute.xlu1 %1982  ;;  %v1995_v19 = vpop.permute.xlu0 %1994  ;;  %v1917_v38 = vadd.f32 %v1915_v55, %v1891_v15  ;;  %v2187_v35 = vstv %s4145_s25  ;;  %v2215_v49 = vstv %s4147_s8  ;;  %v2255_v22 = vstv %s4152_s30  ;;  %s4181_s25 = sld [smem:[#allocation9 + $0x2f]]  ;;  %s6339_s30 = sld [smem:[#allocation9]] }
 0x2f0   : > { %v1987_v61 = vadd.f32 %v1983_v10, %v1931_v60  ;;  %v2000_v20 = vadd.f32 %v1995_v19, %v1944_v63  ;;  %2040 = vrot.lane.b32.xlu0 %v2030_v58, %s4599_s1  ;;  %v2173_v63 = vstv %s4144_s21  ;;  %v2201_v10 = vstv %s4146_s7  ;;  %s4180_s21 = sld [smem:[#allocation9 + $0xb]]  ;;  %s6335_s8 = sld [smem:[#allocation9 + $0x77]] }
 0x2f1   : > { %v1973_v26 = vadd.f32 %v1969_v48, %v1917_v38  ;;  %v2283_v57 = vstv %s4154_s11  ;;  %s6329_s7 = sld [smem:[#allocation9 + $0x53]]  ;;  %s6346_s11 = sld [smem:[#allocation11]] }
 0x2f2   : > { %v2031_v7 = vmax.f32 %v1987_v61, 0.0  ;;  %v2032_v11 = vmax.f32 %v2000_v20, 0.0 }
 0x2f3   : > { %v1997_v45 = vpop.permute.xlu1 %1996  ;;  %v2009_v5 = vpop.permute.xlu0 %2008 }
 0x2f4   : > { %v2001_v23 = vadd.f32 %v1997_v45, %v1945_v30  ;;  %v2014_v18 = vadd.f32 %v2009_v5, %v1958_v25  ;;  %2042 = vrot.lane.b32.xlu1 %v2031_v7, %s4599_s1  ;;  %2050 = vrot.lane.b32.xlu0 %v2032_v11, %s4599_s1  ;;  %v2269_v25 = vstv %s4153_s10  ;;  %v2297_v5 = vstv %s4155_s12  ;;  %s6344_s10 = sld [smem:[#allocation9 + $0xd]]  ;;  %s6350_s12 = sld [smem:[#allocation9 + $0x24]] }
 0x2f6   : > { %v2033_v8 = vmax.f32 %v2001_v23, 0.0  ;;  %v2034_v44 = vmax.f32 %v2014_v18, 0.0  ;;  %v2311_v18 = vstv %s4156_s28  ;;  %s6358_s28 = sld [smem:[#allocation9 + $0x48]] }
 0x2f7   : > { %v2011_v43 = vpop.permute.xlu1 %2010  ;;  %v2023_v59 = vpop.permute.xlu0 %2022 }
 0x2f8   : > { %v2015_v12 = vadd.f32 %v2011_v43, %v1959_v51  ;;  %v2028_v0 = vadd.f32 %v2023_v59, %v1972_v17  ;;  %2052 = vrot.lane.b32.xlu1 %v2033_v8, %s4599_s1  ;;  %2060 = vrot.lane.b32.xlu0 %v2034_v44, %s4599_s1  ;;  %v2325_v17 = vstv %s4157_s13  ;;  %v2339_v43 = vstv %s4158_s6  ;;  %s6361_s13 = sld [smem:[#allocation9 + $0x31]] }
 0x2f9   : > { %s6364_s6 = sld [smem:[#allocation11 + $0x1]] }
 0x2fa   : > { %v2035_v47 = vmax.f32 %v2015_v12, 0.0  ;;  %v2036_v42 = vmax.f32 %v2028_v0, 0.0  ;;  %v2353_v12 = vstv %s4159_s24  ;;  %s6368_s24 = sld [smem:[#allocation9 + $0x3]] }
 0x2fb   : > { %v2025_v21 = vpop.permute.xlu1 %2024 }
 0x2fc   : > { %v2029_v28 = vadd.f32 %v2025_v21, %v1973_v26  ;;  %2062 = vrot.lane.b32.xlu1 %v2035_v47, %s4599_s1  ;;  %2070 = vrot.lane.b32.xlu0 %v2036_v42, %s4599_s1  ;;  %v2393_v42 = vstv %s4164_s14  ;;  %s6370_s14 = sld [smem:[#allocation11 + $0x2]] }
 0x2fe   : > { %v2037_v13 = vmax.f32 %v2029_v28, 0.0 }
 0x300   : > { %2072 = vrot.lane.b32.xlu1 %v2037_v13, %s4599_s1  ;;  %s4171_s1 = sld [smem:[#allocation9 + $0x74]] }
 0x362   : > { %v2041_v27 = vpop.permute.xlu0 %2040 }
 0x363   : > { %2046 = vst.msk [vmem:[#allocation2 + $0x8] sm:$0xff] %vm350_vm1, %v2041_v27  ;;  %v2407_v27 = vstv %s4165_s15  ;;  %s6372_s15 = sld [smem:[#allocation11 + $0x3]] }
 0x366   : > { %v2043_v34 = vpop.permute.xlu1 %2042  ;;  %v2051_v24 = vpop.permute.xlu0 %2050 }
 0x367   : > { %2047 = vst.msk [vmem:[#allocation2 + $0x10] sm:$0xff] %vm350_vm1, %v2043_v34  ;;  %2056 = vst.msk [vmem:[#allocation2 + $0x28] sm:$0xff] %vm350_vm1, %v2051_v24 }
 0x36a   : > { %v2053_v9 = vpop.permute.xlu1 %2052  ;;  %v2061_v31 = vpop.permute.xlu0 %2060  ;;  %v6200_v6 = vld [vmem:[#allocation2 + $0x7] sm:$0xff] }
 0x36b   : > { %2057 = vst.msk [vmem:[#allocation2 + $0x30] sm:$0xff] %vm350_vm1, %v2053_v9  ;;  %2066 = vst.msk [vmem:[#allocation2 + $0x48] sm:$0xff] %vm350_vm1, %v2061_v31  ;;  %v2118_v48 = vmul.f32 %v2117_v39, %v6200_v6  ;;  %v2132_v54 = vmul.f32 %v2131_v52, %v6200_v6  ;;  %v2146_v56 = vmul.f32 %v2145_v3, %v6200_v6  ;;  %v6237_v40 = vld [vmem:[#allocation2 + $0x8] sm:$0xff] }
 0x36c   : > { %v2160_v60 = vmul.f32 %v2159_v4, %v6200_v6  ;;  %v2174_v58 = vmul.f32 %v2173_v63, %v6200_v6  ;;  %v2188_v46 = vmul.f32 %v2187_v35, %v6200_v6  ;;  %v2202_v29 = vmul.f32 %v2201_v10, %v6200_v6 }
 0x36d   : > { %2122 = vrot.lane.b32.xlu0 %v2118_v48, %s7644_s19  ;;  %v2216_v20 = vmul.f32 %v2215_v49, %v6200_v6  ;;  %v2256_v16 = vmul.f32 %v2255_v22, %v6237_v40  ;;  %v2270_v11 = vmul.f32 %v2269_v25, %v6237_v40  ;;  %v2284_v45 = vmul.f32 %v2283_v57, %v6237_v40 }
 0x36e   : > { %v2063_v50 = vpop.permute.xlu1 %2062  ;;  %v2071_v53 = vpop.permute.xlu0 %2070  ;;  %v6206_v14 = vld [vmem:[#allocation2 + $0xf] sm:$0xff]  ;;  %v2298_v23 = vmul.f32 %v2297_v5, %v6237_v40  ;;  %v2312_v51 = vmul.f32 %v2311_v18, %v6237_v40  ;;  %v2326_v44 = vmul.f32 %v2325_v17, %v6237_v40  ;;  %v2340_v38 = vmul.f32 %v2339_v43, %v6237_v40 }
 0x36f   : > { %2067 = vst.msk [vmem:[#allocation2 + $0x50] sm:$0xff] %vm350_vm1, %v2063_v50  ;;  %2076 = vst.msk [vmem:[#allocation2 + $0x68] sm:$0xff] %vm350_vm1, %v2071_v53  ;;  %v2119_v41 = vmul.f32 %v2117_v39, %v6206_v14  ;;  %v2133_v37 = vmul.f32 %v2131_v52, %v6206_v14  ;;  %v2147_v1 = vmul.f32 %v2145_v3, %v6206_v14  ;;  %v6243_v30 = vld [vmem:[#allocation2 + $0x10] sm:$0xff]  ;;  %v2421_v39 = vstv %s4166_s23  ;;  %s6380_s23 = sld [smem:[#allocation9 + $0x6c]] }
 0x370   : > { %v2161_v2 = vmul.f32 %v2159_v4, %v6206_v14  ;;  %v2175_v36 = vmul.f32 %v2173_v63, %v6206_v14  ;;  %v2189_v19 = vmul.f32 %v2187_v35, %v6206_v14  ;;  %v2203_v61 = vmul.f32 %v2201_v10, %v6206_v14  ;;  %v6273_v47 = vld [vmem:[#allocation2 + $0x9] sm:$0xff]  ;;  %v6279_v13 = vld [vmem:[#allocation2 + $0x11] sm:$0xff] }
 0x371   : > { %2124 = vrot.lane.b32.xlu1 %v2119_v41, %s7644_s19  ;;  %2136 = vrot.lane.b32.xlu0 %v2132_v54, %s7644_s19  ;;  %v2217_v33 = vmul.f32 %v2215_v49, %v6206_v14  ;;  %v2257_v7 = vmul.f32 %v2255_v22, %v6243_v30  ;;  %v2271_v32 = vmul.f32 %v2269_v25, %v6243_v30  ;;  %v2435_v48 = vstv %s4167_s17  ;;  %s6382_s17 = sld [smem:[#allocation9 + $0x55]] }
 0x372   : > { %v2073_v62 = vpop.permute.xlu1 %2072  ;;  %v2285_v15 = vmul.f32 %v2283_v57, %v6243_v30  ;;  %v2299_v55 = vmul.f32 %v2297_v5, %v6243_v30  ;;  %v2313_v8 = vmul.f32 %v2311_v18, %v6243_v30  ;;  %v2327_v59 = vmul.f32 %v2325_v17, %v6243_v30  ;;  %v6315_v10 = vld [vmem:[#allocation2 + $0x2f] sm:$0xff] }
 0x373   : > { %2077 = vst.msk [vmem:[#allocation2 + $0x70] sm:$0xff] %vm350_vm1, %v2073_v62  ;;  %v2341_v0 = vmul.f32 %v2339_v43, %v6243_v30  ;;  %v2354_v26 = vmul.f32 %v2353_v12, %v6237_v40  ;;  %v2355_v21 = vmul.f32 %v2353_v12, %v6243_v30  ;;  %v2394_v28 = vmul.f32 %v2393_v42, %v6273_v47 }
 0x374   : > { %v2395_v34 = vmul.f32 %v2393_v42, %v6279_v13  ;;  %v2408_v24 = vmul.f32 %v2407_v27, %v6273_v47  ;;  %v2409_v9 = vmul.f32 %v2407_v27, %v6279_v13  ;;  %v2422_v31 = vmul.f32 %v2421_v39, %v6273_v47 }
 0x375   : > { %2138 = vrot.lane.b32.xlu1 %v2133_v37, %s7644_s19  ;;  %2150 = vrot.lane.b32.xlu0 %v2146_v56, %s7644_s19  ;;  %v2423_v52 = vmul.f32 %v2421_v39, %v6279_v13  ;;  %v2436_v50 = vmul.f32 %v2435_v48, %v6273_v47  ;;  %v2449_v53 = vstv %s4168_s26  ;;  %v2437_v41 = vmul.f32 %v2435_v48, %v6279_v13  ;;  %s6392_s26 = sld [smem:[#allocation9 + $0x79]] }
 0x376   : > { %v2450_v54 = vmul.f32 %v2449_v53, %v6273_v47  ;;  %v2463_v3 = vstv %s4169_s27  ;;  %v2451_v62 = vmul.f32 %v2449_v53, %v6279_v13  ;;  %v2477_v56 = vstv %s4170_s0  ;;  %s6394_s27 = sld [smem:[#allocation9 + $0x27]]  ;;  %s6412_s0 = sld [smem:[#allocation9 + $0xe]] }
 0x377   : > { %v2464_v37 = vmul.f32 %v2463_v3, %v6273_v47  ;;  %v2465_v4 = vmul.f32 %v2463_v3, %v6279_v13  ;;  %v2479_v63 = vmul.f32 %v2477_v56, %v6279_v13  ;;  %v2531_v35 = vstv %s4176_s2  ;;  %s6431_s2 = sld [smem:[#allocation9 + $0x6f]] }
 0x378   : > { %v2669_v42 = vstv %s6344_s10  ;;  %v2105_v27 = vstv %s6358_s28  ;;  %v2683_v53 = vstv %s6361_s13  ;;  %v2231_v3 = vstv %s6368_s24  ;;  %s6517_s10 = sld [smem:[#allocation9 + $0x7c]]  ;;  %s6537_s28 = sld [smem:[#allocation9 + $0x72]] }
 0x379   : > { %2152 = vrot.lane.b32.xlu1 %v2147_v1, %s7644_s19  ;;  %2164 = vrot.lane.b32.xlu0 %v2160_v60, %s7644_s19  ;;  %v2478_v1 = vmul.f32 %v2477_v56, %v6273_v47  ;;  %v2491_v60 = vstv %s4171_s1  ;;  %s6415_s1 = sld [smem:[#allocation9 + $0x4b]]  ;;  %v2106_v56 = vmul.f32 %v2105_v27, %v6200_v6  ;;  %s6546_s13 = sld [smem:[#allocation9 + $0x35]] }
 0x37a   : > { %s6578_s24 = sld [smem:[#allocation9 + $0x7d]] }
 0x37d   : > { %2166 = vrot.lane.b32.xlu1 %v2161_v2, %s7644_s19  ;;  %2178 = vrot.lane.b32.xlu0 %v2174_v58, %s7489_s20  ;;  %v2492_v2 = vmul.f32 %v2491_v60, %v6273_v47  ;;  %v6309_v58 = vld [vmem:[#allocation2 + $0x27] sm:$0xff] }
 0x381   : > { %2180 = vrot.lane.b32.xlu1 %v2175_v36, %s7489_s20  ;;  %2192 = vrot.lane.b32.xlu0 %v2188_v46, %s7489_s20  ;;  %v2493_v36 = vmul.f32 %v2491_v60, %v6279_v13  ;;  %v2532_v46 = vmul.f32 %v2531_v35, %v6309_v58 }
 0x385   : > { %2194 = vrot.lane.b32.xlu1 %v2189_v19, %s7489_s20  ;;  %2206 = vrot.lane.b32.xlu0 %v2202_v29, %s7489_s20  ;;  %v2545_v19 = vstv %s4177_s3  ;;  %v2533_v29 = vmul.f32 %v2531_v35, %v6315_v10  ;;  %s6441_s3 = sld [smem:[#allocation9 + $0x32]] }
 0x386   : > { %v2546_v49 = vmul.f32 %v2545_v19, %v6309_v58 }
 0x389   : > { %2208 = vrot.lane.b32.xlu1 %v2203_v61, %s7489_s20  ;;  %2220 = vrot.lane.b32.xlu0 %v2216_v20, %s7489_s20  ;;  %v2559_v61 = vstv %s4178_s4  ;;  %v2547_v20 = vmul.f32 %v2545_v19, %v6315_v10  ;;  %s6458_s4 = sld [smem:[#allocation9 + $0x56]] }
 0x38a   : > { %v2560_v22 = vmul.f32 %v2559_v61, %v6309_v58 }
 0x38d   : > { %2222 = vrot.lane.b32.xlu1 %v2217_v33, %s7489_s20  ;;  %2260 = vrot.lane.b32.xlu0 %v2256_v16, %s7644_s19  ;;  %v2573_v33 = vstv %s4179_s18  ;;  %v2561_v16 = vmul.f32 %v2559_v61, %v6315_v10  ;;  %s6474_s18 = sld [smem:[#allocation9 + $0x7a]] }
 0x38e   : > { %v2574_v25 = vmul.f32 %v2573_v33, %v6309_v58 }
 0x391   : > { %2262 = vrot.lane.b32.xlu1 %v2257_v7, %s7644_s19  ;;  %2274 = vrot.lane.b32.xlu0 %v2270_v11, %s7644_s19  ;;  %v2587_v7 = vstv %s4180_s21  ;;  %v2575_v11 = vmul.f32 %v2573_v33, %v6315_v10  ;;  %s6488_s21 = sld [smem:[#allocation9 + $0x10]] }
 0x392   : > { %v2588_v57 = vmul.f32 %v2587_v7, %v6309_v58  ;;  %v2589_v5 = vmul.f32 %v2587_v7, %v6315_v10 }
 0x395   : > { %2276 = vrot.lane.b32.xlu1 %v2271_v32, %s7644_s19  ;;  %2288 = vrot.lane.b32.xlu0 %v2284_v45, %s7644_s19  ;;  %v2601_v32 = vstv %s4181_s25  ;;  %s6498_s25 = sld [smem:[#allocation9 + $0x34]] }
 0x399   : > { %2290 = vrot.lane.b32.xlu1 %v2285_v15, %s7644_s19  ;;  %2302 = vrot.lane.b32.xlu0 %v2298_v23, %s7644_s19  ;;  %v2602_v15 = vmul.f32 %v2601_v32, %v6309_v58  ;;  %v2615_v23 = vstv %s6329_s7  ;;  %s6502_s7 = sld [smem:[#allocation9 + $0x6]] }
 0x39a   : > { %v2616_v17 = vmul.f32 %v2615_v23, %v6309_v58 }
 0x39d   : > { %2304 = vrot.lane.b32.xlu1 %v2299_v55, %s7644_s19  ;;  %2316 = vrot.lane.b32.xlu0 %v2312_v51, %s7489_s20  ;;  %v2603_v51 = vmul.f32 %v2601_v32, %v6315_v10 }
 0x3a1   : > { %2318 = vrot.lane.b32.xlu1 %v2313_v8, %s7489_s20  ;;  %2330 = vrot.lane.b32.xlu0 %v2326_v44, %s7489_s20  ;;  %v2629_v8 = vstv %s6335_s8  ;;  %v2093_v44 = vstv %s6339_s30  ;;  %s6509_s8 = sld [smem:[#allocation9 + $0x58]]  ;;  %s6513_s30 = sld [smem:[#allocation9 + $0x2a]] }
 0x3a2   : > { %v2630_v12 = vmul.f32 %v2629_v8, %v6309_v58  ;;  %v2631_v39 = vmul.f32 %v2629_v8, %v6315_v10  ;;  %v2095_v48 = vmul.f32 %v2093_v44, %v6206_v14  ;;  %v2243_v8 = vstv %s6415_s1  ;;  %s6634_s1 = sld [smem:[#allocation9 + $0x14]] }
 0x3a5   : > { %2332 = vrot.lane.b32.xlu1 %v2327_v59, %s7489_s20  ;;  %2344 = vrot.lane.b32.xlu0 %v2340_v38, %s7489_s20  ;;  %v2617_v38 = vmul.f32 %v2615_v23, %v6315_v10 }
 0x3a9   : > { %2346 = vrot.lane.b32.xlu1 %v2341_v0, %s7489_s20  ;;  %2358 = vrot.lane.b32.xlu0 %v2354_v26, %s7489_s20  ;;  %v2094_v0 = vmul.f32 %v2093_v44, %v6200_v6  ;;  %v6385_v26 = vld [vmem:[#allocation2 + $0x28] sm:$0xff] }
 0x3aa   : > { %v2684_v35 = vmul.f32 %v2683_v53, %v6385_v26 }
 0x3ad   : > { %2360 = vrot.lane.b32.xlu1 %v2355_v21, %s7489_s20  ;;  %2398 = vrot.lane.b32.xlu0 %v2394_v28, %s7644_s19  ;;  %v2079_v21 = vstv %s6346_s11  ;;  %v2099_v28 = vstv %s6350_s12  ;;  %s6525_s11 = sld [smem:[#allocation9 + $0x4e]]  ;;  %s6530_s12 = sld [smem:[#allocation9 + $0x11]] }
 0x3b1   : > { %2400 = vrot.lane.b32.xlu1 %v2395_v34, %s7644_s19  ;;  %2412 = vrot.lane.b32.xlu0 %v2408_v24, %s7644_s19 }
 0x3b5   : > { %2414 = vrot.lane.b32.xlu1 %v2409_v9, %s7644_s19  ;;  %2426 = vrot.lane.b32.xlu0 %v2422_v31, %s7644_s19  ;;  %v2670_v9 = vmul.f32 %v2669_v42, %v6385_v26  ;;  %v2096_v31 = vadd.f32 %v2094_v0, %v2079_v21 }
 0x3b9   : > { %2428 = vrot.lane.b32.xlu1 %v2423_v52, %s7644_s19  ;;  %2440 = vrot.lane.b32.xlu0 %v2436_v50, %s7644_s19  ;;  %v2100_v52 = vmul.f32 %v2099_v28, %v6200_v6  ;;  %v6405_v50 = vld [vmem:[#allocation2 + $0x30] sm:$0xff] }
 0x3bd   : > { %2442 = vrot.lane.b32.xlu1 %v2437_v41, %s7644_s19  ;;  %2454 = vrot.lane.b32.xlu0 %v2450_v54, %s7489_s20  ;;  %v2082_v41 = vstv %s6364_s6  ;;  %v2101_v54 = vmul.f32 %v2099_v28, %v6206_v14  ;;  %s6562_s6 = sld [smem:[#allocation9 + $0x59]] }
 0x3be   : > { %v2102_v19 = vadd.f32 %v2100_v52, %v2082_v41 }
 0x3bf   : > { %v2103_v61 = vadd.f32 %v2101_v54, %v2082_v41 }
 0x3c1   : > { %2456 = vrot.lane.b32.xlu1 %v2451_v62, %s7489_s20  ;;  %2468 = vrot.lane.b32.xlu0 %v2464_v37, %s7489_s20  ;;  %v2085_v37 = vstv %s6370_s14  ;;  %s6592_s14 = sld [smem:[#allocation9 + $0x13]] }
 0x3c5   : > { %2470 = vrot.lane.b32.xlu1 %v2465_v4, %s7489_s20  ;;  %2482 = vrot.lane.b32.xlu0 %v2478_v1, %s7489_s20  ;;  %v2088_v4 = vstv %s6372_s15  ;;  %v2111_v1 = vstv %s6380_s23  ;;  %s6602_s15 = sld [smem:[#allocation9 + $0x37]]  ;;  %s6606_s23 = sld [smem:[#allocation9 + $0x9]] }
 0x3c9   : > { %2484 = vrot.lane.b32.xlu1 %v2479_v63, %s7489_s20  ;;  %2496 = vrot.lane.b32.xlu0 %v2492_v2, %s7489_s20  ;;  %v2671_v2 = vmul.f32 %v2669_v42, %v6405_v50 }
 0x3cd   : > { %2498 = vrot.lane.b32.xlu1 %v2493_v36, %s7489_s20  ;;  %2536 = vrot.lane.b32.xlu0 %v2532_v46, %s7644_s19  ;;  %v2697_v36 = vstv %s6382_s17  ;;  %v2097_v46 = vadd.f32 %v2095_v48, %v2079_v21  ;;  %v2249_v48 = vstv %s6431_s2  ;;  %s6613_s17 = sld [smem:[#allocation9 + $0x5b]]  ;;  %s6641_s2 = sld [smem:[#allocation9 + $0x75]] }
 0x3d1   : > { %2538 = vrot.lane.b32.xlu1 %v2533_v29, %s7644_s19  ;;  %2550 = vrot.lane.b32.xlu0 %v2546_v49, %s7644_s19  ;;  %v2232_v49 = vmul.f32 %v2231_v3, %v6237_v40 }
 0x3d5   : > { %2552 = vrot.lane.b32.xlu1 %v2547_v20, %s7644_s19  ;;  %2564 = vrot.lane.b32.xlu0 %v2560_v22, %s7644_s19  ;;  %v2711_v20 = vstv %s6392_s26  ;;  %v2237_v22 = vstv %s6394_s27  ;;  %s6617_s26 = sld [smem:[#allocation9 + $0x2d]]  ;;  %s6621_s27 = sld [smem:[#allocation9 + $0x7f]] }
 0x3d9   : > { %2566 = vrot.lane.b32.xlu1 %v2561_v16, %s7644_s19  ;;  %2578 = vrot.lane.b32.xlu0 %v2574_v25, %s7644_s19  ;;  %v2108_v25 = vadd.f32 %v2106_v56, %v2085_v37  ;;  %v2713_v56 = vmul.f32 %v2711_v20, %v6405_v50 }
 0x3dd   : > { %2580 = vrot.lane.b32.xlu1 %v2575_v11, %s7644_s19  ;;  %2592 = vrot.lane.b32.xlu0 %v2588_v57, %s7489_s20  ;;  %v2107_v11 = vmul.f32 %v2105_v27, %v6206_v14  ;;  %v2112_v57 = vmul.f32 %v2111_v1, %v6200_v6  ;;  %v2725_v6 = vstv %s6412_s0  ;;  %s6629_s0 = sld [smem:[#allocation9 + $0x51]] }
 0x3df   : > { %v2123_v45 = vpop.permute.xlu0 %2122  ;;  %v2109_v42 = vadd.f32 %v2107_v11, %v2085_v37  ;;  %v2114_v21 = vadd.f32 %v2112_v57, %v2088_v4  ;;  %v2767_v57 = vstv %s6474_s18  ;;  %s6682_s18 = sld [smem:[#allocation9 + $0x80]] }
 0x3e0   : > { %v2128_v62 = vadd.f32 %v2123_v45, %v2096_v31 }
 0x3e1   : > { %2594 = vrot.lane.b32.xlu1 %v2589_v5, %s7489_s20  ;;  %2606 = vrot.lane.b32.xlu0 %v2602_v15, %s7489_s20  ;;  %v2685_v5 = vmul.f32 %v2683_v53, %v6405_v50  ;;  %v2698_v15 = vmul.f32 %v2697_v36, %v6385_v26 }
 0x3e3   : > { %v6352_v18 = vpop.permute.xlu1 %2124  ;;  %v6354_v55 = vpop.permute.xlu0 %2136 }
 0x3e4   : > { %v2129_v33 = vadd.f32 %v6352_v18, %v2097_v46  ;;  %v2142_v16 = vadd.f32 %v6354_v55, %v2102_v19  ;;  %v2233_v55 = vmul.f32 %v2231_v3, %v6243_v30 }
 0x3e5   : > { %2608 = vrot.lane.b32.xlu1 %v2603_v51, %s7489_s20  ;;  %2620 = vrot.lane.b32.xlu0 %v2616_v17, %s7489_s20  ;;  %v2238_v51 = vmul.f32 %v2237_v22, %v6237_v40  ;;  %v2113_v17 = vmul.f32 %v2111_v1, %v6206_v14  ;;  %v2699_v14 = vmul.f32 %v2697_v36, %v6405_v50 }
 0x3e6   : > { %v2726_v1 = vmul.f32 %v2725_v6, %v6385_v26 }
 0x3e7   : > { %v6374_v43 = vpop.permute.xlu1 %2138  ;;  %v6376_v59 = vpop.permute.xlu0 %2150  ;;  %v2115_v3 = vadd.f32 %v2113_v17, %v2088_v4 }
 0x3e8   : > { %v2143_v44 = vadd.f32 %v6374_v43, %v2103_v61  ;;  %v2239_v43 = vmul.f32 %v2237_v22, %v6243_v30  ;;  %v2753_v22 = vstv %s6458_s4  ;;  %s6666_s4 = sld [smem:[#allocation9 + $0x5c]] }
 0x3e9   : > { %2622 = vrot.lane.b32.xlu1 %v2617_v38, %s7489_s20  ;;  %2634 = vrot.lane.b32.xlu0 %v2630_v12, %s7489_s20  ;;  %v2156_v38 = vadd.f32 %v6376_v59, %v2108_v25  ;;  %v2244_v59 = vmul.f32 %v2243_v8, %v6237_v40  ;;  %v2754_v11 = vmul.f32 %v2753_v22, %v6385_v26 }
 0x3eb   : > { %v6397_v34 = vpop.permute.xlu1 %2152  ;;  %v6399_v24 = vpop.permute.xlu0 %2164 }
 0x3ec   : > { %v2157_v52 = vadd.f32 %v6397_v34, %v2109_v42  ;;  %v2170_v53 = vadd.f32 %v6399_v24, %v2114_v21  ;;  %v2245_v34 = vmul.f32 %v2243_v8, %v6243_v30  ;;  %v2250_v24 = vmul.f32 %v2249_v48, %v6237_v40 }
 0x3ed   : > { %2636 = vrot.lane.b32.xlu1 %v2631_v39, %s7489_s20  ;;  %2674 = vrot.lane.b32.xlu0 %v2670_v9, %s7644_s19  ;;  %v2712_v39 = vmul.f32 %v2711_v20, %v6385_v26  ;;  %v2251_v40 = vmul.f32 %v2249_v48, %v6243_v30  ;;  %v2821_v8 = vstv %s6498_s25  ;;  %s6706_s25 = sld [smem:[#allocation9 + $0x3a]] }
 0x3ef   : > { %v6421_v60 = vpop.permute.xlu1 %2166  ;;  %v2179_v63 = vpop.permute.xlu0 %2178 }
 0x3f0   : > { %v2184_v29 = vadd.f32 %v2179_v63, %v2128_v62  ;;  %v2739_v63 = vstv %s6441_s3  ;;  %v2171_v4 = vadd.f32 %v6421_v60, %v2115_v3  ;;  %s6650_s3 = sld [smem:[#allocation9 + $0x38]] }
 0x3f1   : > { %2676 = vrot.lane.b32.xlu1 %v2671_v2, %s7644_s19  ;;  %2688 = vrot.lane.b32.xlu0 %v2684_v35, %s7644_s19  ;;  %v2740_v61 = vmul.f32 %v2739_v63, %v6385_v26  ;;  %v2741_v25 = vmul.f32 %v2739_v63, %v6405_v50 }
 0x3f2   : > { %v6435_v7 = vadd.f32 %v2232_v49, %v2184_v29  ;;  %v2727_v49 = vmul.f32 %v2725_v6, %v6405_v50  ;;  %v6519_v6 = vld [vmem:[#allocation2 + $0x31] sm:$0xff] }
 0x3f3   : > { %v2181_v32 = vpop.permute.xlu1 %2180  ;;  %v2193_v45 = vpop.permute.xlu0 %2192 }
 0x3f4   : > { %v2185_v23 = vadd.f32 %v2181_v32, %v2129_v33  ;;  %v2198_v18 = vadd.f32 %v2193_v45, %v2142_v16  ;;  %v2755_v45 = vmul.f32 %v2753_v22, %v6405_v50  ;;  %v2387_v22 = vstv %s6537_s28  ;;  %s6745_s28 = sld [smem:[#allocation9 + $0x78]] }
 0x3f5   : > { %2690 = vrot.lane.b32.xlu1 %v2685_v5, %s7644_s19  ;;  %2702 = vrot.lane.b32.xlu0 %v2698_v15, %s7644_s19  ;;  %v2768_v5 = vmul.f32 %v2767_v57, %v6385_v26  ;;  %v6506_v15 = vld [vmem:[#allocation2 + $0x29] sm:$0xff] }
 0x3f6   : > { %v6452_v12 = vadd.f32 %v2233_v55, %v2185_v23  ;;  %v6454_v0 = vadd.f32 %v2238_v51, %v2198_v18  ;;  %v2807_v23 = vstv %s6488_s21  ;;  %v2769_v51 = vmul.f32 %v2767_v57, %v6405_v50  ;;  %s6696_s21 = sld [smem:[#allocation9 + $0x16]] }
 0x3f7   : > { %v2195_v28 = vpop.permute.xlu1 %2194  ;;  %v2207_v27 = vpop.permute.xlu0 %2206  ;;  %v2808_v17 = vmul.f32 %v2807_v23, %v6506_v15 }
 0x3f8   : > { %v2199_v9 = vadd.f32 %v2195_v28, %v2143_v44  ;;  %v2212_v31 = vadd.f32 %v2207_v27, %v2156_v38  ;;  %v2369_v44 = vstv %s6502_s7  ;;  %v2809_v28 = vmul.f32 %v2807_v23, %v6519_v6  ;;  %s6710_s7 = sld [smem:[#allocation9 + $0xc]] }
 0x3f9   : > { %2704 = vrot.lane.b32.xlu1 %v2699_v14, %s7644_s19  ;;  %2716 = vrot.lane.b32.xlu0 %v2712_v39, %s7644_s19  ;;  %v2822_v27 = vmul.f32 %v2821_v8, %v6506_v15  ;;  %v2835_v39 = vstv %s6509_s8  ;;  %s6717_s8 = sld [smem:[#allocation9 + $0x5e]] }
 0x3fa   : > { %v6467_v41 = vadd.f32 %v2239_v43, %v2199_v9  ;;  %v6469_v54 = vadd.f32 %v2244_v59, %v2212_v31  ;;  %v2370_v9 = vmul.f32 %v2369_v44, %v6273_v47  ;;  %v2375_v31 = vstv %s6513_s30  ;;  %s6721_s30 = sld [smem:[#allocation9 + $0x30]] }
 0x3fb   : > { %v2209_v62 = vpop.permute.xlu1 %2208  ;;  %v2221_v37 = vpop.permute.xlu0 %2220  ;;  %v2836_v3 = vmul.f32 %v2835_v39, %v6506_v15 }
 0x3fc   : > { %v2213_v2 = vadd.f32 %v2209_v62, %v2157_v52  ;;  %v2226_v35 = vadd.f32 %v2221_v37, %v2170_v53  ;;  %v2823_v53 = vmul.f32 %v2821_v8, %v6519_v6  ;;  %v2849_v62 = vstv %s6517_s10  ;;  %s6725_s10 = sld [smem:[#allocation9 + $0x82]] }
 0x3fd   : > { %2718 = vrot.lane.b32.xlu1 %v2713_v56, %s7644_s19  ;;  %2730 = vrot.lane.b32.xlu0 %v2726_v1, %s7489_s20  ;;  %v2371_v1 = vmul.f32 %v2369_v44, %v6279_v13 }
 0x3fe   : > { %v6481_v36 = vadd.f32 %v2245_v34, %v2213_v2  ;;  %v6483_v46 = vadd.f32 %v2250_v24, %v2226_v35 }
 0x3ff   : > { %v2223_v19 = vpop.permute.xlu1 %2222  ;;  %v2261_v29 = vpop.permute.xlu0 %2260 }
 0x400   : > { %v2227_v20 = vadd.f32 %v2223_v19, %v2171_v4  ;;  %v2266_v38 = vadd.f32 %v2261_v29, %v6435_v7  ;;  %v2837_v19 = vmul.f32 %v2835_v39, %v6519_v6  ;;  %v2850_v29 = vmul.f32 %v2849_v62, %v6506_v15 }
 0x401   : > { %2732 = vrot.lane.b32.xlu1 %v2727_v49, %s7489_s20  ;;  %2744 = vrot.lane.b32.xlu0 %v2740_v61, %s7489_s20  ;;  %v2863_v49 = vstv %s6530_s12  ;;  %s6738_s12 = sld [smem:[#allocation9 + $0x17]] }
 0x402   : > { %v6493_v60 = vadd.f32 %v2251_v40, %v2227_v20  ;;  %v2865_v44 = vmul.f32 %v2863_v49, %v6519_v6 }
 0x403   : > { %v2263_v33 = vpop.permute.xlu1 %2262  ;;  %v2275_v16 = vpop.permute.xlu0 %2274 }
 0x404   : > { %v2267_v7 = vadd.f32 %v2263_v33, %v6452_v12  ;;  %v2280_v43 = vadd.f32 %v2275_v16, %v6454_v0  ;;  %v2376_v12 = vmul.f32 %v2375_v31, %v6273_v47  ;;  %v2381_v0 = vstv %s6525_s11  ;;  %s6733_s11 = sld [smem:[#allocation9 + $0x54]] }
 0x405   : > { %2746 = vrot.lane.b32.xlu1 %v2741_v25, %s7489_s20  ;;  %2758 = vrot.lane.b32.xlu0 %v2754_v11, %s7489_s20 }
 0x407   : > { %v2277_v30 = vpop.permute.xlu1 %2276  ;;  %v2289_v32 = vpop.permute.xlu0 %2288 }
 0x408   : > { %v2281_v63 = vadd.f32 %v2277_v30, %v6467_v41  ;;  %v2294_v2 = vadd.f32 %v2289_v32, %v6469_v54  ;;  %v2377_v41 = vmul.f32 %v2375_v31, %v6279_v13  ;;  %v2382_v54 = vmul.f32 %v2381_v0, %v6273_v47 }
 0x409   : > { %2760 = vrot.lane.b32.xlu1 %v2755_v45, %s7489_s20  ;;  %2772 = vrot.lane.b32.xlu0 %v2768_v5, %s7489_s20  ;;  %v2851_v30 = vmul.f32 %v2849_v62, %v6519_v6  ;;  %v2864_v32 = vmul.f32 %v2863_v49, %v6506_v15  ;;  %v2877_v45 = vstv %s6546_s13  ;;  %s6754_s13 = sld [smem:[#allocation9 + $0x3b]] }
 0x40b   : > { %v2291_v18 = vpop.permute.xlu1 %2290  ;;  %v2303_v55 = vpop.permute.xlu0 %2302 }
 0x40c   : > { %v2295_v40 = vadd.f32 %v2291_v18, %v6481_v36  ;;  %v2308_v33 = vadd.f32 %v2303_v55, %v6483_v46  ;;  %v2383_v36 = vmul.f32 %v2381_v0, %v6279_v13  ;;  %v2388_v46 = vmul.f32 %v2387_v22, %v6273_v47 }
 0x40d   : > { %2774 = vrot.lane.b32.xlu1 %v2769_v51, %s7489_s20  ;;  %2812 = vrot.lane.b32.xlu0 %v2808_v17, %s7644_s19  ;;  %v2389_v47 = vmul.f32 %v2387_v22, %v6279_v13 }
 0x40f   : > { %v2305_v42 = vpop.permute.xlu1 %2304  ;;  %v2317_v21 = vpop.permute.xlu0 %2316 }
 0x410   : > { %v2322_v14 = vadd.f32 %v2317_v21, %v2266_v38  ;;  %v2309_v18 = vadd.f32 %v2305_v42, %v6493_v60  ;;  %v2878_v38 = vmul.f32 %v2877_v45, %v6506_v15 }
 0x411   : > { %2814 = vrot.lane.b32.xlu1 %v2809_v28, %s7644_s19  ;;  %2826 = vrot.lane.b32.xlu0 %v2822_v27, %s7644_s19  ;;  %v2891_v28 = vstv %s6562_s6  ;;  %s6770_s6 = sld [smem:[#allocation9 + $0x5f]] }
 0x412   : > { %v6541_v59 = vadd.f32 %v2370_v9, %v2322_v14  ;;  %v2879_v14 = vmul.f32 %v2877_v45, %v6519_v6  ;;  %v2892_v39 = vmul.f32 %v2891_v28, %v6506_v15  ;;  %v2905_v9 = vstv %s6578_s24  ;;  %s6786_s24 = sld [smem:[#allocation9 + $0x83]] }
 0x413   : > { %v2319_v48 = vpop.permute.xlu1 %2318  ;;  %v2331_v52 = vpop.permute.xlu0 %2330  ;;  %v2907_v62 = vmul.f32 %v2905_v9, %v6519_v6 }
 0x414   : > { %v2323_v37 = vadd.f32 %v2319_v48, %v2267_v7  ;;  %v2336_v56 = vadd.f32 %v2331_v52, %v2280_v43  ;;  %v2893_v7 = vmul.f32 %v2891_v28, %v6519_v6  ;;  %v2906_v43 = vmul.f32 %v2905_v9, %v6506_v15  ;;  %v6610_v48 = vld [vmem:[#allocation2 + $0x47] sm:$0xff] }
 0x415   : > { %2828 = vrot.lane.b32.xlu1 %v2823_v53, %s7644_s19  ;;  %2840 = vrot.lane.b32.xlu0 %v2836_v3, %s7644_s19  ;;  %v2945_v52 = vstv %s6592_s14  ;;  %v2525_v28 = vstv %s6641_s2  ;;  %s6800_s14 = sld [smem:[#allocation9 + $0x19]]  ;;  %s6849_s2 = sld [smem:[#allocation9 + $0x7b]] }
 0x416   : > { %v6555_v35 = vadd.f32 %v2371_v1, %v2323_v37  ;;  %v6557_v34 = vadd.f32 %v2376_v12, %v2336_v56  ;;  %v2946_v37 = vmul.f32 %v2945_v52, %v6610_v48  ;;  %v6623_v56 = vld [vmem:[#allocation2 + $0x4f] sm:$0xff]  ;;  %v2959_v1 = vstv %s6602_s15  ;;  %s6810_s15 = sld [smem:[#allocation9 + $0x3d]] }
 0x417   : > { %v2333_v24 = vpop.permute.xlu1 %2332  ;;  %v2345_v4 = vpop.permute.xlu0 %2344  ;;  %v2507_v12 = vstv %s6606_s23  ;;  %s6814_s23 = sld [smem:[#allocation9 + $0xf]] }
 0x418   : > { %v2337_v61 = vadd.f32 %v2333_v24, %v2281_v63  ;;  %v2350_v20 = vadd.f32 %v2345_v4, %v2294_v2  ;;  %v2947_v24 = vmul.f32 %v2945_v52, %v6623_v56  ;;  %v2960_v4 = vmul.f32 %v2959_v1, %v6610_v48 }
 0x419   : > { %2842 = vrot.lane.b32.xlu1 %v2837_v19, %s7644_s19  ;;  %2854 = vrot.lane.b32.xlu0 %v2850_v29, %s7644_s19  ;;  %v2973_v29 = vstv %s6613_s17  ;;  %v2508_v49 = vmul.f32 %v2507_v12, %v6309_v58  ;;  %s6821_s17 = sld [smem:[#allocation9 + $0x61]] }
 0x41a   : > { %v6571_v16 = vadd.f32 %v2377_v41, %v2337_v61  ;;  %v6573_v25 = vadd.f32 %v2382_v54, %v2350_v20  ;;  %v2513_v61 = vstv %s6617_s26  ;;  %s6825_s26 = sld [smem:[#allocation9 + $0x33]] }
 0x41b   : > { %v2347_v11 = vpop.permute.xlu1 %2346  ;;  %v2359_v57 = vpop.permute.xlu0 %2358 }
 0x41c   : > { %v2351_v5 = vadd.f32 %v2347_v11, %v2295_v40  ;;  %v2364_v23 = vadd.f32 %v2359_v57, %v2308_v33  ;;  %v2961_v40 = vmul.f32 %v2959_v1, %v6623_v56  ;;  %v2974_v33 = vmul.f32 %v2973_v29, %v6610_v48 }
 0x41d   : > { %2856 = vrot.lane.b32.xlu1 %v2851_v30, %s7644_s19  ;;  %2868 = vrot.lane.b32.xlu0 %v2864_v32, %s7489_s20  ;;  %v2987_v11 = vstv %s6621_s27  ;;  %v2509_v32 = vmul.f32 %v2507_v12, %v6315_v10  ;;  %s6829_s27 = sld [smem:[#allocation9 + $0x85]] }
 0x41e   : > { %v6585_v55 = vadd.f32 %v2383_v36, %v2351_v5  ;;  %v6587_v51 = vadd.f32 %v2388_v46, %v2364_v23 }
 0x41f   : > { %v2361_v17 = vpop.permute.xlu1 %2360  ;;  %v2399_v8 = vpop.permute.xlu0 %2398 }
 0x420   : > { %v2365_v21 = vadd.f32 %v2361_v17, %v2309_v18  ;;  %v2404_v0 = vadd.f32 %v2399_v8, %v6541_v59  ;;  %v2975_v17 = vmul.f32 %v2973_v29, %v6623_v56  ;;  %v2988_v8 = vmul.f32 %v2987_v11, %v6610_v48 }
 0x421   : > { %2870 = vrot.lane.b32.xlu1 %v2865_v44, %s7489_s20  ;;  %2882 = vrot.lane.b32.xlu0 %v2878_v38, %s7489_s20  ;;  %v3001_v44 = vstv %s6634_s1  ;;  %s6842_s1 = sld [smem:[#allocation9 + $0x1a]] }
 0x422   : > { %v6597_v60 = vadd.f32 %v2389_v47, %v2365_v21  ;;  %v3003_v12 = vmul.f32 %v3001_v44, %v6623_v56 }
 0x423   : > { %v2401_v42 = vpop.permute.xlu1 %2400  ;;  %v2413_v27 = vpop.permute.xlu0 %2412 }
 0x424   : > { %v2405_v59 = vadd.f32 %v2401_v42, %v6555_v35  ;;  %v2418_v20 = vadd.f32 %v2413_v27, %v6557_v34  ;;  %v2514_v35 = vmul.f32 %v2513_v61, %v6309_v58  ;;  %v2519_v34 = vstv %s6629_s0  ;;  %s6837_s0 = sld [smem:[#allocation9 + $0x57]] }
 0x425   : > { %2884 = vrot.lane.b32.xlu1 %v2879_v14, %s7489_s20  ;;  %2896 = vrot.lane.b32.xlu0 %v2892_v39, %s7489_s20 }
 0x427   : > { %v2415_v13 = vpop.permute.xlu1 %2414  ;;  %v2427_v31 = vpop.permute.xlu0 %2426 }
 0x428   : > { %v2419_v45 = vadd.f32 %v2415_v13, %v6571_v16  ;;  %v2432_v5 = vadd.f32 %v2427_v31, %v6573_v25  ;;  %v2515_v16 = vmul.f32 %v2513_v61, %v6315_v10  ;;  %v2520_v25 = vmul.f32 %v2519_v34, %v6309_v58 }
 0x429   : > { %2898 = vrot.lane.b32.xlu1 %v2893_v7, %s7489_s20  ;;  %2910 = vrot.lane.b32.xlu0 %v2906_v43, %s7489_s20  ;;  %v2989_v13 = vmul.f32 %v2987_v11, %v6623_v56  ;;  %v3002_v31 = vmul.f32 %v3001_v44, %v6610_v48  ;;  %v3015_v7 = vstv %s6650_s3  ;;  %s6858_s3 = sld [smem:[#allocation9 + $0x3e]] }
 0x42b   : > { %v2429_v53 = vpop.permute.xlu1 %2428  ;;  %v2441_v3 = vpop.permute.xlu0 %2440 }
 0x42c   : > { %v2433_v47 = vadd.f32 %v2429_v53, %v6585_v55  ;;  %v2446_v42 = vadd.f32 %v2441_v3, %v6587_v51  ;;  %v2521_v55 = vmul.f32 %v2519_v34, %v6315_v10  ;;  %v2526_v51 = vmul.f32 %v2525_v28, %v6309_v58 }
 0x42d   : > { %2912 = vrot.lane.b32.xlu1 %v2907_v62, %s7489_s20  ;;  %2950 = vrot.lane.b32.xlu0 %v2946_v37, %s7644_s19  ;;  %v2527_v58 = vmul.f32 %v2525_v28, %v6315_v10 }
 0x42f   : > { %v2443_v63 = vpop.permute.xlu1 %2442  ;;  %v2455_v2 = vpop.permute.xlu0 %2454 }
 0x430   : > { %v2460_v19 = vadd.f32 %v2455_v2, %v2404_v0  ;;  %v2447_v53 = vadd.f32 %v2443_v63, %v6597_v60  ;;  %v3016_v0 = vmul.f32 %v3015_v7, %v6610_v48 }
 0x431   : > { %2952 = vrot.lane.b32.xlu1 %v2947_v24, %s7644_s19  ;;  %2964 = vrot.lane.b32.xlu0 %v2960_v4, %s7644_s19  ;;  %v3029_v24 = vstv %s6666_s4  ;;  %s6874_s4 = sld [smem:[#allocation9 + $0x62]] }
 0x432   : > { %v6645_v41 = vadd.f32 %v2508_v49, %v2460_v19  ;;  %v3017_v19 = vmul.f32 %v3015_v7, %v6623_v56  ;;  %v3030_v29 = vmul.f32 %v3029_v24, %v6610_v48  ;;  %v3043_v49 = vstv %s6682_s18  ;;  %s6890_s18 = sld [smem:[#allocation9 + $0x86]] }
 0x433   : > { %v2457_v54 = vpop.permute.xlu1 %2456  ;;  %v2469_v22 = vpop.permute.xlu0 %2468  ;;  %v3045_v11 = vmul.f32 %v3043_v49, %v6623_v56 }
 0x434   : > { %v2461_v57 = vadd.f32 %v2457_v54, %v2405_v59  ;;  %v2474_v30 = vadd.f32 %v2469_v22, %v2418_v20  ;;  %v3031_v59 = vmul.f32 %v3029_v24, %v6623_v56  ;;  %v3044_v20 = vmul.f32 %v3043_v49, %v6610_v48  ;;  %v6714_v54 = vld [vmem:[#allocation2 + $0x48] sm:$0xff] }
 0x435   : > { %2966 = vrot.lane.b32.xlu1 %v2961_v40, %s7644_s19  ;;  %2978 = vrot.lane.b32.xlu0 %v2974_v33, %s7644_s19  ;;  %v3083_v22 = vstv %s6696_s21  ;;  %v2663_v24 = vstv %s6745_s28  ;;  %s6904_s21 = sld [smem:[#allocation9 + $0x1c]]  ;;  %s6953_s28 = sld [smem:[#allocation9 + $0x7e]] }
 0x436   : > { %v6659_v23 = vadd.f32 %v2509_v32, %v2461_v57  ;;  %v6661_v36 = vadd.f32 %v2514_v35, %v2474_v30  ;;  %v3084_v57 = vmul.f32 %v3083_v22, %v6714_v54  ;;  %v6727_v30 = vld [vmem:[#allocation2 + $0x50] sm:$0xff]  ;;  %v3097_v32 = vstv %s6706_s25  ;;  %s6914_s25 = sld [smem:[#allocation9 + $0x40]] }
 0x437   : > { %v2471_v46 = vpop.permute.xlu1 %2470  ;;  %v2483_v18 = vpop.permute.xlu0 %2482  ;;  %v2645_v35 = vstv %s6710_s7  ;;  %s6918_s7 = sld [smem:[#allocation9 + $0x12]] }
 0x438   : > { %v2475_v38 = vadd.f32 %v2471_v46, %v2419_v45  ;;  %v2488_v21 = vadd.f32 %v2483_v18, %v2432_v5  ;;  %v3085_v46 = vmul.f32 %v3083_v22, %v6727_v30  ;;  %v3098_v18 = vmul.f32 %v3097_v32, %v6714_v54 }
 0x439   : > { %2980 = vrot.lane.b32.xlu1 %v2975_v17, %s7644_s19  ;;  %2992 = vrot.lane.b32.xlu0 %v2988_v8, %s7644_s19  ;;  %v3111_v8 = vstv %s6717_s8  ;;  %v2646_v44 = vmul.f32 %v2645_v35, %v6385_v26  ;;  %s6925_s8 = sld [smem:[#allocation9 + $0x64]] }
 0x43a   : > { %v6675_v27 = vadd.f32 %v2515_v16, %v2475_v38  ;;  %v6677_v14 = vadd.f32 %v2520_v25, %v2488_v21  ;;  %v2651_v38 = vstv %s6721_s30  ;;  %s6929_s30 = sld [smem:[#allocation9 + $0x36]] }
 0x43b   : > { %v2485_v39 = vpop.permute.xlu1 %2484  ;;  %v2497_v9 = vpop.permute.xlu0 %2496 }
 0x43c   : > { %v2489_v43 = vadd.f32 %v2485_v39, %v2433_v47  ;;  %v2502_v52 = vadd.f32 %v2497_v9, %v2446_v42  ;;  %v3099_v47 = vmul.f32 %v3097_v32, %v6727_v30  ;;  %v3112_v42 = vmul.f32 %v3111_v8, %v6714_v54 }
 0x43d   : > { %2994 = vrot.lane.b32.xlu1 %v2989_v13, %s7644_s19  ;;  %3006 = vrot.lane.b32.xlu0 %v3002_v31, %s7489_s20  ;;  %v3125_v39 = vstv %s6725_s10  ;;  %v2647_v31 = vmul.f32 %v2645_v35, %v6405_v50  ;;  %s6933_s10 = sld [smem:[#allocation9 + $0x88]] }
 0x43e   : > { %v6689_v3 = vadd.f32 %v2521_v55, %v2489_v43  ;;  %v6691_v62 = vadd.f32 %v2526_v51, %v2502_v52 }
 0x43f   : > { %v2499_v37 = vpop.permute.xlu1 %2498  ;;  %v2537_v1 = vpop.permute.xlu0 %2536 }
 0x440   : > { %v2503_v2 = vadd.f32 %v2499_v37, %v2447_v53  ;;  %v2542_v34 = vadd.f32 %v2537_v1, %v6645_v41  ;;  %v3113_v37 = vmul.f32 %v3111_v8, %v6727_v30  ;;  %v3126_v1 = vmul.f32 %v3125_v39, %v6714_v54 }
 0x441   : > { %3008 = vrot.lane.b32.xlu1 %v3003_v12, %s7489_s20  ;;  %3020 = vrot.lane.b32.xlu0 %v3016_v0, %s7489_s20  ;;  %v3139_v12 = vstv %s6738_s12  ;;  %s6946_s12 = sld [smem:[#allocation9 + $0x1d]] }
 0x442   : > { %v6701_v60 = vadd.f32 %v2527_v58, %v2503_v2  ;;  %v3141_v35 = vmul.f32 %v3139_v12, %v6727_v30 }
 0x443   : > { %v2539_v63 = vpop.permute.xlu1 %2538  ;;  %v2551_v4 = vpop.permute.xlu0 %2550 }
 0x444   : > { %v2543_v41 = vadd.f32 %v2539_v63, %v6659_v23  ;;  %v2556_v21 = vadd.f32 %v2551_v4, %v6661_v36  ;;  %v2652_v23 = vmul.f32 %v2651_v38, %v6385_v26  ;;  %v2657_v36 = vstv %s6733_s11  ;;  %s6941_s11 = sld [smem:[#allocation9 + $0x5a]] }
 0x445   : > { %3022 = vrot.lane.b32.xlu1 %v3017_v19, %s7489_s20  ;;  %3034 = vrot.lane.b32.xlu0 %v3030_v29, %s7489_s20 }
 0x447   : > { %v2553_v10 = vpop.permute.xlu1 %2552  ;;  %v2565_v61 = vpop.permute.xlu0 %2564 }
 0x448   : > { %v2557_v7 = vadd.f32 %v2553_v10, %v6675_v27  ;;  %v2570_v43 = vadd.f32 %v2565_v61, %v6677_v14  ;;  %v2653_v27 = vmul.f32 %v2651_v38, %v6405_v50  ;;  %v2658_v14 = vmul.f32 %v2657_v36, %v6385_v26 }
 0x449   : > { %3036 = vrot.lane.b32.xlu1 %v3031_v59, %s7489_s20  ;;  %3048 = vrot.lane.b32.xlu0 %v3044_v20, %s7489_s20  ;;  %v3127_v10 = vmul.f32 %v3125_v39, %v6727_v30  ;;  %v3140_v61 = vmul.f32 %v3139_v12, %v6714_v54  ;;  %v3153_v59 = vstv %s6754_s13  ;;  %s6962_s13 = sld [smem:[#allocation9 + $0x41]] }
 0x44b   : > { %v2567_v40 = vpop.permute.xlu1 %2566  ;;  %v2579_v33 = vpop.permute.xlu0 %2578 }
 0x44c   : > { %v2571_v58 = vadd.f32 %v2567_v40, %v6689_v3  ;;  %v2584_v63 = vadd.f32 %v2579_v33, %v6691_v62  ;;  %v2659_v3 = vmul.f32 %v2657_v36, %v6405_v50  ;;  %v2664_v62 = vmul.f32 %v2663_v24, %v6385_v26 }
 0x44d   : > { %3050 = vrot.lane.b32.xlu1 %v3045_v11, %s7489_s20  ;;  %3088 = vrot.lane.b32.xlu0 %v3084_v57, %s7644_s19  ;;  %v2665_v26 = vmul.f32 %v2663_v24, %v6405_v50 }
 0x44f   : > { %v2581_v45 = vpop.permute.xlu1 %2580  ;;  %v2593_v5 = vpop.permute.xlu0 %2592 }
 0x450   : > { %v2598_v17 = vadd.f32 %v2593_v5, %v2542_v34  ;;  %v2585_v40 = vadd.f32 %v2581_v45, %v6701_v60  ;;  %v3154_v34 = vmul.f32 %v3153_v59, %v6714_v54 }
 0x451   : > { %3090 = vrot.lane.b32.xlu1 %v3085_v46, %s7644_s19  ;;  %3102 = vrot.lane.b32.xlu0 %v3098_v18, %s7644_s19  ;;  %v3167_v46 = vstv %s6770_s6  ;;  %s6978_s6 = sld [smem:[#allocation9 + $0x65]] }
 0x452   : > { %v6749_v16 = vadd.f32 %v2646_v44, %v2598_v17  ;;  %v3155_v17 = vmul.f32 %v3153_v59, %v6727_v30  ;;  %v3168_v8 = vmul.f32 %v3167_v46, %v6714_v54  ;;  %v3181_v44 = vstv %s6786_s24  ;;  %s6994_s24 = sld [smem:[#allocation9 + $0x89]] }
 0x453   : > { %v2595_v25 = vpop.permute.xlu1 %2594  ;;  %v2607_v28 = vpop.permute.xlu0 %2606  ;;  %v3183_v39 = vmul.f32 %v3181_v44, %v6727_v30 }
 0x454   : > { %v2599_v9 = vadd.f32 %v2595_v25, %v2543_v41  ;;  %v2612_v13 = vadd.f32 %v2607_v28, %v2556_v21  ;;  %v3169_v41 = vmul.f32 %v3167_v46, %v6727_v30  ;;  %v3182_v21 = vmul.f32 %v3181_v44, %v6714_v54  ;;  %v6818_v25 = vld [vmem:[#allocation2 + $0x49] sm:$0xff] }
 0x455   : > { %3104 = vrot.lane.b32.xlu1 %v3099_v47, %s7644_s19  ;;  %3116 = vrot.lane.b32.xlu0 %v3112_v42, %s7644_s19  ;;  %v3221_v28 = vstv %s6800_s14  ;;  %v2801_v46 = vstv %s6849_s2  ;;  %s7008_s14 = sld [smem:[#allocation9 + $0x1f]]  ;;  %s7057_s2 = sld [smem:[#allocation9 + $0x81]] }
 0x456   : > { %v6763_v52 = vadd.f32 %v2647_v31, %v2599_v9  ;;  %v6765_v55 = vadd.f32 %v2652_v23, %v2612_v13  ;;  %v3222_v9 = vmul.f32 %v3221_v28, %v6818_v25  ;;  %v6831_v13 = vld [vmem:[#allocation2 + $0x51] sm:$0xff]  ;;  %v3235_v31 = vstv %s6810_s15  ;;  %s7018_s15 = sld [smem:[#allocation9 + $0x43]] }
 0x457   : > { %v2609_v51 = vpop.permute.xlu1 %2608  ;;  %v2621_v53 = vpop.permute.xlu0 %2620  ;;  %v2783_v23 = vstv %s6814_s23  ;;  %s7022_s23 = sld [smem:[#allocation9 + $0x15]] }
 0x458   : > { %v2613_v0 = vadd.f32 %v2609_v51, %v2557_v7  ;;  %v2626_v2 = vadd.f32 %v2621_v53, %v2570_v43  ;;  %v3223_v51 = vmul.f32 %v3221_v28, %v6831_v13  ;;  %v3236_v53 = vmul.f32 %v3235_v31, %v6818_v25 }
 0x459   : > { %3118 = vrot.lane.b32.xlu1 %v3113_v37, %s7644_s19  ;;  %3130 = vrot.lane.b32.xlu0 %v3126_v1, %s7644_s19  ;;  %v3249_v1 = vstv %s6821_s17  ;;  %v2784_v12 = vmul.f32 %v2783_v23, %v6506_v15  ;;  %s7029_s17 = sld [smem:[#allocation9 + $0x67]] }
 0x45a   : > { %v6779_v4 = vadd.f32 %v2653_v27, %v2613_v0  ;;  %v6781_v19 = vadd.f32 %v2658_v14, %v2626_v2  ;;  %v2789_v0 = vstv %s6825_s26  ;;  %s7033_s26 = sld [smem:[#allocation9 + $0x39]] }
 0x45b   : > { %v2623_v29 = vpop.permute.xlu1 %2622  ;;  %v2635_v49 = vpop.permute.xlu0 %2634 }
 0x45c   : > { %v2627_v20 = vadd.f32 %v2623_v29, %v2571_v58  ;;  %v2640_v22 = vadd.f32 %v2635_v49, %v2584_v63  ;;  %v3237_v58 = vmul.f32 %v3235_v31, %v6831_v13  ;;  %v3250_v63 = vmul.f32 %v3249_v1, %v6818_v25 }
 0x45d   : > { %3132 = vrot.lane.b32.xlu1 %v3127_v10, %s7644_s19  ;;  %3144 = vrot.lane.b32.xlu0 %v3140_v61, %s7489_s20  ;;  %v3263_v29 = vstv %s6829_s27  ;;  %v2785_v61 = vmul.f32 %v2783_v23, %v6519_v6  ;;  %s7037_s27 = sld [smem:[#allocation9 + $0x8b]] }
 0x45e   : > { %v6793_v33 = vadd.f32 %v2659_v3, %v2627_v20  ;;  %v6795_v11 = vadd.f32 %v2664_v62, %v2640_v22 }
 0x45f   : > { %v2637_v57 = vpop.permute.xlu1 %2636  ;;  %v2675_v32 = vpop.permute.xlu0 %2674 }
 0x460   : > { %v2641_v5 = vadd.f32 %v2637_v57, %v2585_v40  ;;  %v2680_v36 = vadd.f32 %v2675_v32, %v6749_v16  ;;  %v3251_v57 = vmul.f32 %v3249_v1, %v6831_v13  ;;  %v3264_v32 = vmul.f32 %v3263_v29, %v6818_v25 }
 0x461   : > { %3146 = vrot.lane.b32.xlu1 %v3141_v35, %s7489_s20  ;;  %3158 = vrot.lane.b32.xlu0 %v3154_v34, %s7489_s20  ;;  %v3277_v35 = vstv %s6842_s1  ;;  %s7050_s1 = sld [smem:[#allocation9 + $0x20]] }
 0x462   : > { %v6805_v60 = vadd.f32 %v2665_v26, %v2641_v5  ;;  %v3279_v23 = vmul.f32 %v3277_v35, %v6831_v13 }
 0x463   : > { %v2677_v45 = vpop.permute.xlu1 %2676  ;;  %v2689_v18 = vpop.permute.xlu0 %2688 }
 0x464   : > { %v2681_v16 = vadd.f32 %v2677_v45, %v6763_v52  ;;  %v2694_v2 = vadd.f32 %v2689_v18, %v6765_v55  ;;  %v2790_v52 = vmul.f32 %v2789_v0, %v6506_v15  ;;  %v2795_v55 = vstv %s6837_s0  ;;  %s7045_s0 = sld [smem:[#allocation9 + $0x5d]] }
 0x465   : > { %3160 = vrot.lane.b32.xlu1 %v3155_v17, %s7489_s20  ;;  %3172 = vrot.lane.b32.xlu0 %v3168_v8, %s7489_s20 }
 0x467   : > { %v2691_v50 = vpop.permute.xlu1 %2690  ;;  %v2703_v38 = vpop.permute.xlu0 %2702 }
 0x468   : > { %v2695_v59 = vadd.f32 %v2691_v50, %v6779_v4  ;;  %v2708_v20 = vadd.f32 %v2703_v38, %v6781_v19  ;;  %v2791_v4 = vmul.f32 %v2789_v0, %v6519_v6  ;;  %v2796_v19 = vmul.f32 %v2795_v55, %v6506_v15 }
 0x469   : > { %3174 = vrot.lane.b32.xlu1 %v3169_v41, %s7489_s20  ;;  %3186 = vrot.lane.b32.xlu0 %v3182_v21, %s7489_s20  ;;  %v3265_v50 = vmul.f32 %v3263_v29, %v6831_v13  ;;  %v3278_v38 = vmul.f32 %v3277_v35, %v6818_v25  ;;  %v3291_v41 = vstv %s6858_s3  ;;  %s7064_s3 = sld [smem:[#allocation9 + $0x44]] }
 0x46b   : > { %v2705_v47 = vpop.permute.xlu1 %2704  ;;  %v2717_v42 = vpop.permute.xlu0 %2716 }
 0x46c   : > { %v2709_v26 = vadd.f32 %v2705_v47, %v6793_v33  ;;  %v2722_v45 = vadd.f32 %v2717_v42, %v6795_v11  ;;  %v2797_v33 = vmul.f32 %v2795_v55, %v6519_v6  ;;  %v2802_v11 = vmul.f32 %v2801_v46, %v6506_v15 }
 0x46d   : > { %3188 = vrot.lane.b32.xlu1 %v3183_v39, %s7489_s20  ;;  %3226 = vrot.lane.b32.xlu0 %v3222_v9, %s7644_s19  ;;  %v2803_v15 = vmul.f32 %v2801_v46, %v6519_v6 }
 0x46f   : > { %v2719_v7 = vpop.permute.xlu1 %2718  ;;  %v2731_v43 = vpop.permute.xlu0 %2730 }
 0x470   : > { %v2736_v37 = vadd.f32 %v2731_v43, %v2680_v36  ;;  %v2723_v47 = vadd.f32 %v2719_v7, %v6805_v60  ;;  %v3292_v36 = vmul.f32 %v3291_v41, %v6818_v25 }
 0x471   : > { %3228 = vrot.lane.b32.xlu1 %v3223_v51, %s7644_s19  ;;  %3240 = vrot.lane.b32.xlu0 %v3236_v53, %s7644_s19  ;;  %v3305_v51 = vstv %s6874_s4  ;;  %s7076_s4 = sld [smem:[#allocation9 + $0x68]] }
 0x472   : > { %v6853_v27 = vadd.f32 %v2784_v12, %v2736_v37  ;;  %v3293_v37 = vmul.f32 %v3291_v41, %v6831_v13  ;;  %v3306_v1 = vmul.f32 %v3305_v51, %v6818_v25  ;;  %v3319_v12 = vstv %s6890_s18  ;;  %s7088_s18 = sld [smem:[#allocation9 + $0x8c]] }
 0x473   : > { %v2733_v14 = vpop.permute.xlu1 %2732  ;;  %v2745_v24 = vpop.permute.xlu0 %2744  ;;  %v3321_v29 = vmul.f32 %v3319_v12, %v6831_v13 }
 0x474   : > { %v2737_v49 = vadd.f32 %v2733_v14, %v2681_v16  ;;  %v2750_v10 = vadd.f32 %v2745_v24, %v2694_v2  ;;  %v3307_v16 = vmul.f32 %v3305_v51, %v6831_v13  ;;  %v3320_v2 = vmul.f32 %v3319_v12, %v6818_v25  ;;  %v6922_v14 = vld [vmem:[#allocation2 + $0x67] sm:$0xff] }
 0x475   : > { %3242 = vrot.lane.b32.xlu1 %v3237_v58, %s7644_s19  ;;  %3254 = vrot.lane.b32.xlu0 %v3250_v63, %s7644_s19  ;;  %v3359_v24 = vstv %s6904_s21  ;;  %v2939_v51 = vstv %s6953_s28  ;;  %s7098_s21 = sld [smem:[#allocation9 + $0x22]]  ;;  %s7144_s28 = sld [smem:[#allocation9 + $0x84]] }
 0x476   : > { %v6867_v22 = vadd.f32 %v2785_v61, %v2737_v49  ;;  %v6869_v3 = vadd.f32 %v2790_v52, %v2750_v10  ;;  %v3360_v49 = vmul.f32 %v3359_v24, %v6922_v14  ;;  %v6935_v10 = vld [vmem:[#allocation2 + $0x6f] sm:$0xff]  ;;  %v3373_v61 = vstv %s6914_s25  ;;  %s7106_s25 = sld [smem:[#allocation9 + $0x46]] }
 0x477   : > { %v2747_v62 = vpop.permute.xlu1 %2746  ;;  %v2759_v40 = vpop.permute.xlu0 %2758  ;;  %v2921_v52 = vstv %s6918_s7  ;;  %s7110_s7 = sld [smem:[#allocation9 + $0x18]] }
 0x478   : > { %v2751_v34 = vadd.f32 %v2747_v62, %v2695_v59  ;;  %v2764_v5 = vadd.f32 %v2759_v40, %v2708_v20  ;;  %v3361_v62 = vmul.f32 %v3359_v24, %v6935_v10  ;;  %v3374_v40 = vmul.f32 %v3373_v61, %v6922_v14 }
 0x479   : > { %3256 = vrot.lane.b32.xlu1 %v3251_v57, %s7644_s19  ;;  %3268 = vrot.lane.b32.xlu0 %v3264_v32, %s7644_s19  ;;  %v3387_v32 = vstv %s6925_s8  ;;  %v2922_v35 = vmul.f32 %v2921_v52, %v6610_v48  ;;  %s7117_s8 = sld [smem:[#allocation9 + $0x6a]] }
 0x47a   : > { %v6883_v18 = vadd.f32 %v2791_v4, %v2751_v34  ;;  %v6885_v17 = vadd.f32 %v2796_v19, %v2764_v5  ;;  %v2927_v34 = vstv %s6929_s30  ;;  %s7121_s30 = sld [smem:[#allocation9 + $0x3c]] }
 0x47b   : > { %v2761_v8 = vpop.permute.xlu1 %2760  ;;  %v2773_v44 = vpop.permute.xlu0 %2772 }
 0x47c   : > { %v2765_v21 = vadd.f32 %v2761_v8, %v2709_v26  ;;  %v2778_v28 = vadd.f32 %v2773_v44, %v2722_v45  ;;  %v3375_v26 = vmul.f32 %v3373_v61, %v6935_v10  ;;  %v3388_v45 = vmul.f32 %v3387_v32, %v6922_v14 }
 0x47d   : > { %3270 = vrot.lane.b32.xlu1 %v3265_v50, %s7644_s19  ;;  %3282 = vrot.lane.b32.xlu0 %v3278_v38, %s7489_s20  ;;  %v3401_v8 = vstv %s6933_s10  ;;  %v2923_v38 = vmul.f32 %v2921_v52, %v6623_v56  ;;  %s7125_s10 = sld [smem:[#allocation9 + $0x8e]] }
 0x47e   : > { %v6897_v42 = vadd.f32 %v2797_v33, %v2765_v21  ;;  %v6899_v39 = vadd.f32 %v2802_v11, %v2778_v28 }
 0x47f   : > { %v2775_v9 = vpop.permute.xlu1 %2774  ;;  %v2813_v31 = vpop.permute.xlu0 %2812 }
 0x480   : > { %v2779_v43 = vadd.f32 %v2775_v9, %v2723_v47  ;;  %v2818_v55 = vadd.f32 %v2813_v31, %v6853_v27  ;;  %v3389_v9 = vmul.f32 %v3387_v32, %v6935_v10  ;;  %v3402_v31 = vmul.f32 %v3401_v8, %v6922_v14 }
 0x481   : > { %3284 = vrot.lane.b32.xlu1 %v3279_v23, %s7489_s20  ;;  %3296 = vrot.lane.b32.xlu0 %v3292_v36, %s7489_s20  ;;  %v3415_v23 = vstv %s6946_s12  ;;  %s7137_s12 = sld [smem:[#allocation9 + $0x23]] }
 0x482   : > { %v6909_v60 = vadd.f32 %v2803_v15, %v2779_v43  ;;  %v3417_v52 = vmul.f32 %v3415_v23, %v6935_v10 }
 0x483   : > { %v2815_v7 = vpop.permute.xlu1 %2814  ;;  %v2827_v53 = vpop.permute.xlu0 %2826 }
 0x484   : > { %v2819_v27 = vadd.f32 %v2815_v7, %v6867_v22  ;;  %v2832_v5 = vadd.f32 %v2827_v53, %v6869_v3  ;;  %v2928_v22 = vmul.f32 %v2927_v34, %v6610_v48  ;;  %v2933_v3 = vstv %s6941_s11  ;;  %s7133_s11 = sld [smem:[#allocation9 + $0x60]] }
 0x485   : > { %3298 = vrot.lane.b32.xlu1 %v3293_v37, %s7489_s20  ;;  %3310 = vrot.lane.b32.xlu0 %v3306_v1, %s7489_s20 }
 0x487   : > { %v2829_v6 = vpop.permute.xlu1 %2828  ;;  %v2841_v0 = vpop.permute.xlu0 %2840 }
 0x488   : > { %v2833_v41 = vadd.f32 %v2829_v6, %v6883_v18  ;;  %v2846_v21 = vadd.f32 %v2841_v0, %v6885_v17  ;;  %v2929_v18 = vmul.f32 %v2927_v34, %v6623_v56  ;;  %v2934_v17 = vmul.f32 %v2933_v3, %v6610_v48 }
 0x489   : > { %3312 = vrot.lane.b32.xlu1 %v3307_v16, %s7489_s20  ;;  %3324 = vrot.lane.b32.xlu0 %v3320_v2, %s7489_s20  ;;  %v3403_v6 = vmul.f32 %v3401_v8, %v6935_v10  ;;  %v3416_v0 = vmul.f32 %v3415_v23, %v6922_v14  ;;  %v3429_v16 = vstv %s6962_s13  ;;  %s7149_s13 = sld [smem:[#allocation9 + $0x47]] }
 0x48b   : > { %v2843_v58 = vpop.permute.xlu1 %2842  ;;  %v2855_v63 = vpop.permute.xlu0 %2854 }
 0x48c   : > { %v2847_v15 = vadd.f32 %v2843_v58, %v6897_v42  ;;  %v2860_v7 = vadd.f32 %v2855_v63, %v6899_v39  ;;  %v2935_v42 = vmul.f32 %v2933_v3, %v6623_v56  ;;  %v2940_v39 = vmul.f32 %v2939_v51, %v6610_v48 }
 0x48d   : > { %3326 = vrot.lane.b32.xlu1 %v3321_v29, %s7489_s20  ;;  %3364 = vrot.lane.b32.xlu0 %v3360_v49, %s7644_s19  ;;  %v2941_v48 = vmul.f32 %v2939_v51, %v6623_v56 }
 0x48f   : > { %v2857_v59 = vpop.permute.xlu1 %2856  ;;  %v2869_v20 = vpop.permute.xlu0 %2868 }
 0x490   : > { %v2874_v57 = vadd.f32 %v2869_v20, %v2818_v55  ;;  %v2861_v58 = vadd.f32 %v2857_v59, %v6909_v60  ;;  %v3430_v55 = vmul.f32 %v3429_v16, %v6922_v14 }
 0x491   : > { %3366 = vrot.lane.b32.xlu1 %v3361_v62, %s7644_s19  ;;  %3378 = vrot.lane.b32.xlu0 %v3374_v40, %s7644_s19  ;;  %v3443_v62 = vstv %s6978_s6  ;;  %s7159_s6 = sld [smem:[#allocation9 + $0x6b]] }
 0x492   : > { %v6957_v4 = vadd.f32 %v2922_v35, %v2874_v57  ;;  %v3431_v57 = vmul.f32 %v3429_v16, %v6935_v10  ;;  %v3444_v32 = vmul.f32 %v3443_v62, %v6922_v14  ;;  %v3457_v35 = vstv %s6994_s24  ;;  %s7169_s24 = sld [smem:[#allocation9 + $0x8f]] }
 0x493   : > { %v2871_v19 = vpop.permute.xlu1 %2870  ;;  %v2883_v46 = vpop.permute.xlu0 %2882  ;;  %v3459_v8 = vmul.f32 %v3457_v35, %v6935_v10 }
 0x494   : > { %v2875_v44 = vadd.f32 %v2871_v19, %v2819_v27  ;;  %v2888_v50 = vadd.f32 %v2883_v46, %v2832_v5  ;;  %v3445_v27 = vmul.f32 %v3443_v62, %v6935_v10  ;;  %v3458_v5 = vmul.f32 %v3457_v35, %v6922_v14  ;;  %v7026_v19 = vld [vmem:[#allocation2 + $0x68] sm:$0xff] }
 0x495   : > { %3380 = vrot.lane.b32.xlu1 %v3375_v26, %s7644_s19  ;;  %3392 = vrot.lane.b32.xlu0 %v3388_v45, %s7644_s19  ;;  %v3497_v46 = vstv %s7008_s14  ;;  %s7192_s14 = sld [smem:[#allocation9 + $0x3f]] }
 0x496   : > { %v6971_v28 = vadd.f32 %v2923_v38, %v2875_v44  ;;  %v6973_v33 = vadd.f32 %v2928_v22, %v2888_v50  ;;  %v3498_v44 = vmul.f32 %v3497_v46, %v7026_v19  ;;  %v7039_v50 = vld [vmem:[#allocation2 + $0x70] sm:$0xff]  ;;  %v3511_v38 = vstv %s7018_s15  ;;  %s4600_s15 = smov 7  }
 0x497   : > { %v2885_v11 = vpop.permute.xlu1 %2884  ;;  %v2897_v47 = vpop.permute.xlu0 %2896  ;;  %v3059_v22 = vstv %s7022_s23  ;;  %s7199_s23 = sld [smem:[#allocation9 + $0x63]] }
 0x498   : > { %v2889_v36 = vadd.f32 %v2885_v11, %v2833_v41  ;;  %v2902_v43 = vadd.f32 %v2897_v47, %v2846_v21  ;;  %v3499_v11 = vmul.f32 %v3497_v46, %v7039_v50  ;;  %v3512_v47 = vmul.f32 %v3511_v38, %v7026_v19 }
 0x499   : > { %3394 = vrot.lane.b32.xlu1 %v3389_v9, %s7644_s19  ;;  %3406 = vrot.lane.b32.xlu0 %v3402_v31, %s7644_s19  ;;  %v3525_v31 = vstv %s7029_s17  ;;  %v3060_v23 = vmul.f32 %v3059_v22, %v6714_v54  ;;  %s4257_s17 = sld [smem:[#allocation9 + $0x42]] }
 0x49a   : > { %v6987_v53 = vadd.f32 %v2929_v18, %v2889_v36  ;;  %v6989_v37 = vadd.f32 %v2934_v17, %v2902_v43  ;;  %v3065_v36 = vstv %s7033_s26  ;;  %s7228_s26 = sld [smem:[#allocation9 + $0x66]] }
 0x49b   : > { %v2899_v1 = vpop.permute.xlu1 %2898  ;;  %v2911_v12 = vpop.permute.xlu0 %2910  ;;  %v3066_v16 = vmul.f32 %v3065_v36, %v6714_v54  ;;  %v3067_v62 = vmul.f32 %v3065_v36, %v6727_v30 }
 0x49c   : > { %v2903_v2 = vadd.f32 %v2899_v1, %v2847_v15  ;;  %v2916_v24 = vadd.f32 %v2911_v12, %v2860_v7  ;;  %v3513_v15 = vmul.f32 %v3511_v38, %v7039_v50  ;;  %v3526_v7 = vmul.f32 %v3525_v31, %v7026_v19 }
 0x49d   : > { %3408 = vrot.lane.b32.xlu1 %v3403_v6, %s7644_s19  ;;  %3420 = vrot.lane.b32.xlu0 %v3416_v0, %s7489_s20  ;;  %v3539_v1 = vstv %s7037_s27  ;;  %v3061_v0 = vmul.f32 %v3059_v22, %v6727_v30  ;;  %s7231_s27 = sld [smem:[#allocation9 + $0x8a]] }
 0x49e   : > { %v7001_v63 = vadd.f32 %v2935_v42, %v2903_v2  ;;  %v7003_v29 = vadd.f32 %v2940_v39, %v2916_v24 }
 0x49f   : > { %v2913_v49 = vpop.permute.xlu1 %2912  ;;  %v2951_v61 = vpop.permute.xlu0 %2950 }
 0x4a0   : > { %v2917_v20 = vadd.f32 %v2913_v49, %v2861_v58  ;;  %v2956_v3 = vadd.f32 %v2951_v61, %v6957_v4  ;;  %v3527_v49 = vmul.f32 %v3525_v31, %v7039_v50  ;;  %v3540_v61 = vmul.f32 %v3539_v1, %v7026_v19 }
 0x4a1   : > { %3422 = vrot.lane.b32.xlu1 %v3417_v52, %s7489_s20  ;;  %3434 = vrot.lane.b32.xlu0 %v3430_v55, %s7489_s20  ;;  %v3553_v52 = vstv %s7050_s1  ;;  %s4269_s1 = sld [smem:[#allocation9 + $0x45]] }
 0x4a2   : > { %v7013_v60 = vadd.f32 %v2941_v48, %v2917_v20  ;;  %v3555_v22 = vmul.f32 %v3553_v52, %v7039_v50 }
 0x4a3   : > { %v2953_v59 = vpop.permute.xlu1 %2952  ;;  %v2965_v40 = vpop.permute.xlu0 %2964 }
 0x4a4   : > { %v2957_v4 = vadd.f32 %v2953_v59, %v6971_v28  ;;  %v2970_v43 = vadd.f32 %v2965_v40, %v6973_v33  ;;  %v3071_v28 = vstv %s7045_s0  ;;  %s4268_s0 = sld [smem:[#allocation9 + $0x21]] }
 0x4a5   : > { %3436 = vrot.lane.b32.xlu1 %v3431_v57, %s7489_s20  ;;  %3448 = vrot.lane.b32.xlu0 %v3444_v32, %s7489_s20 }
 0x4a7   : > { %v2967_v56 = vpop.permute.xlu1 %2966  ;;  %v2979_v34 = vpop.permute.xlu0 %2978 }
 0x4a8   : > { %v2971_v33 = vadd.f32 %v2967_v56, %v6987_v53  ;;  %v2984_v2 = vadd.f32 %v2979_v34, %v6989_v37  ;;  %v3072_v53 = vmul.f32 %v3071_v28, %v6714_v54  ;;  %v3077_v37 = vstv %s7057_s2  ;;  %s7242_s2 = sld [smem:[#allocation9 + $0x69]] }
 0x4a9   : > { %3450 = vrot.lane.b32.xlu1 %v3445_v27, %s7489_s20  ;;  %3462 = vrot.lane.b32.xlu0 %v3458_v5, %s7489_s20  ;;  %v3541_v56 = vmul.f32 %v3539_v1, %v7039_v50  ;;  %v3554_v34 = vmul.f32 %v3553_v52, %v7026_v19  ;;  %v3567_v27 = vstv %s7064_s3  ;;  %v7114_v1 = vld [vmem:[#allocation2 + $0x69] sm:$0xff]  ;;  %s7245_s3 = sld [smem:[#allocation9 + $0x8d]] }
 0x4aa   : > { %v3569_v31 = vmul.f32 %v3567_v27, %v7039_v50 }
 0x4ab   : > { %v2981_v26 = vpop.permute.xlu1 %2980  ;;  %v2993_v45 = vpop.permute.xlu0 %2992 }
 0x4ac   : > { %v2985_v48 = vadd.f32 %v2981_v26, %v7001_v63  ;;  %v2998_v59 = vadd.f32 %v2993_v45, %v7003_v29  ;;  %v3078_v63 = vmul.f32 %v3077_v37, %v6714_v54  ;;  %v3079_v54 = vmul.f32 %v3077_v37, %v6727_v30 }
 0x4ad   : > { %3464 = vrot.lane.b32.xlu1 %v3459_v8, %s7489_s20  ;;  %3502 = vrot.lane.b32.xlu0 %v3498_v44, %s7644_s19  ;;  %v3073_v8 = vmul.f32 %v3071_v28, %v6727_v30  ;;  %v3203_v37 = vstv %s7121_s30 }
 0x4af   : > { %v2995_v41 = vpop.permute.xlu1 %2994  ;;  %v3007_v21 = vpop.permute.xlu0 %3006 }
 0x4b0   : > { %v3012_v9 = vadd.f32 %v3007_v21, %v2956_v3  ;;  %v2999_v29 = vadd.f32 %v2995_v41, %v7013_v60  ;;  %v3568_v3 = vmul.f32 %v3567_v27, %v7026_v19 }
 0x4b1   : > { %3504 = vrot.lane.b32.xlu1 %v3499_v11, %s7644_s19  ;;  %3516 = vrot.lane.b32.xlu0 %v3512_v47, %s7644_s19  ;;  %v3581_v47 = vstv %s7076_s4  ;;  %s4601_s4 = smov 121  }
 0x4b2   : > { %v3062_v18 = vadd.f32 %v3060_v23, %v3012_v9  ;;  %v3582_v23 = vmul.f32 %v3581_v47, %v7026_v19 }
 0x4b3   : > { %v3009_v17 = vpop.permute.xlu1 %3008  ;;  %v3021_v51 = vpop.permute.xlu0 %3020 }
 0x4b4   : > { %v3013_v12 = vadd.f32 %v3009_v17, %v2957_v4  ;;  %v3026_v6 = vadd.f32 %v3021_v51, %v2970_v43  ;;  %v3595_v43 = vstv %s7088_s18  ;;  %v3583_v17 = vmul.f32 %v3581_v47, %v7039_v50  ;;  %s7645_s18 = sshll.u32 %s4819_s29, 6 }
 0x4b5   : > { %3518 = vrot.lane.b32.xlu1 %v3513_v15, %s7644_s19  ;;  %3530 = vrot.lane.b32.xlu0 %v3526_v7, %s7644_s19  ;;  %v3596_v51 = vmul.f32 %v3595_v43, %v7026_v19  ;;  %v3215_v47 = vstv %s7144_s28 }
 0x4b6   : > { %v3063_v24 = vadd.f32 %v3061_v0, %v3013_v12  ;;  %v3068_v42 = vadd.f32 %v3066_v16, %v3026_v6  ;;  %v3635_v12 = vstv %s7098_s21  ;;  %v3597_v16 = vmul.f32 %v3595_v43, %v7039_v50  ;;  %s292_s21 = scalar_lea.vmem [#allocation13], %s7645_s18 }
 0x4b7   : > { %v3023_v39 = vpop.permute.xlu1 %3022  ;;  %v3035_v58 = vpop.permute.xlu0 %3034  ;;  %v3636_v28 = vmul.f32 %v3635_v12, %v7114_v1 }
 0x4b8   : > { %v3027_v55 = vadd.f32 %v3023_v39, %v2971_v33  ;;  %v3040_v20 = vadd.f32 %v3035_v58, %v2984_v2  ;;  %v3197_v39 = vstv %s7110_s7  ;;  %s3855_s7 = sshll.u32 %s292_s21, 4  ;;  %s7279_s7 = int_to_ptr.vmem [resolvable:$true] %s3855_s7 }
 0x4b9   : > { %3532 = vrot.lane.b32.xlu1 %v3527_v49, %s7644_s19  ;;  %3544 = vrot.lane.b32.xlu0 %v3540_v61, %s7644_s19  ;;  %v3199_v27 = vmul.f32 %v3197_v39, %v6831_v13 }
 0x4ba   : > { %v3069_v40 = vadd.f32 %v3067_v62, %v3027_v55  ;;  %v3074_v57 = vadd.f32 %v3072_v53, %v3040_v20  ;;  %v3663_v62 = vstv %s7117_s8  ;;  %v3198_v53 = vmul.f32 %v3197_v39, %v6818_v25 }
 0x4bb   : > { %v3037_v32 = vpop.permute.xlu1 %3036  ;;  %v3049_v35 = vpop.permute.xlu0 %3048 }
 0x4bc   : > { %v3041_v5 = vadd.f32 %v3037_v32, %v2985_v48  ;;  %v3054_v46 = vadd.f32 %v3049_v35, %v2998_v59  ;;  %v3664_v32 = vmul.f32 %v3663_v62, %v7114_v1  ;;  %v3677_v35 = vstv %s7125_s10 }
 0x4bd   : > { %3546 = vrot.lane.b32.xlu1 %v3541_v56, %s7644_s19  ;;  %3558 = vrot.lane.b32.xlu0 %v3554_v34, %s7489_s20 }
 0x4be   : > { %v3075_v26 = vadd.f32 %v3073_v8, %v3041_v5  ;;  %v3080_v45 = vadd.f32 %v3078_v63, %v3054_v46  ;;  %v3204_v5 = vmul.f32 %v3203_v37, %v6818_v25  ;;  %v3209_v46 = vstv %s7133_s11  ;;  %s4508_s11 = scalar_lea.vmem %s7279_s7, 1024 }
 0x4bf   : > { %v3051_v44 = vpop.permute.xlu1 %3050  ;;  %v3089_v38 = vpop.permute.xlu0 %3088  ;;  %p4509_p3 = scmp.ne.s32.totalorder %s7279_s7, %s4508_s11 }
 0x4c0   : > { %v3055_v21 = vadd.f32 %v3051_v44, %v2999_v29  ;;  %v3094_v11 = vadd.f32 %v3089_v38, %v3062_v18  ;;  %v3678_v44 = vmul.f32 %v3677_v35, %v7114_v1  ;;  %v3691_v38 = vstv %s7137_s12  ;;  %s4602_s12 = smov [#allocation13]  }
 0x4c1   : > { %3560 = vrot.lane.b32.xlu1 %v3555_v22, %s7489_s20  ;;  %3572 = vrot.lane.b32.xlu0 %v3568_v3, %s7489_s20  ;;  %p4510_p10 = pnand %p4509_p3, %p7646_p5  ;;  %s4512_s28 = sshll.u32 %s4602_s12, 4  ;;  %s4513_s28 = int_to_ptr.vmem [resolvable:$false] %s4512_s28 }
 0x4c2   : > { %v3081_v60 = vadd.f32 %v3079_v54, %v3055_v21  ;;  %v3205_v21 = vmul.f32 %v3203_v37, %v6831_v13  ;;  %p4515_p13 = scmp.lt.s32.totalorder %s7279_s7, %s4513_s28 }
 0x4c3   : > { %v3091_v41 = vpop.permute.xlu1 %3090  ;;  %v3103_v9 = vpop.permute.xlu0 %3102  ;;  %p4511_p12 = pneg %p4510_p10 }
 0x4c4   : > { %v3095_v36 = vadd.f32 %v3091_v41, %v3063_v24  ;;  %v3108_v4 = vadd.f32 %v3103_v9, %v3068_v42  ;;  %v7127_v24 = vld [vmem:[#allocation2 + $0x71] sm:$0xff]  ;;  %v3649_v42 = vstv %s7106_s25  ;;  %s4298_s25 = sshll.u32 %s4655_s22, 10  ;;  %s3842_s22 = scalar_lea.sflag [#allocation5], %s4819_s29 }
 0x4c5   : > { %3574 = vrot.lane.b32.xlu1 %v3569_v31, %s7489_s20  ;;  %3586 = vrot.lane.b32.xlu0 %v3582_v23, %s7489_s20  ;;  %v3637_v61 = vmul.f32 %v3635_v12, %v7127_v24  ;;  %v3650_v52 = vmul.f32 %v3649_v42, %v7114_v1  ;;  %v3679_v31 = vmul.f32 %v3677_v35, %v7127_v24  ;;  %s7277_s10 = scalar_lea.hbm %s7330_s5, %s4298_s25 }
 0x4c6   : > { %v3692_v23 = vmul.f32 %v3691_v38, %v7114_v1  ;;  %v3693_v12 = vmul.f32 %v3691_v38, %v7127_v24 }
 0x4c7   : > { %v3105_v30 = vpop.permute.xlu1 %3104  ;;  %v3117_v18 = vpop.permute.xlu0 %3116 }
 0x4c8   : > { %v3109_v15 = vadd.f32 %v3105_v30, %v3069_v40  ;;  %v3122_v7 = vadd.f32 %v3117_v18, %v3074_v57  ;;  %v3651_v57 = vmul.f32 %v3649_v42, %v7127_v24  ;;  %v3211_v30 = vmul.f32 %v3209_v46, %v6831_v13 }
 0x4c9   : > { %3588 = vrot.lane.b32.xlu1 %v3583_v17, %s7489_s20  ;;  %3600 = vrot.lane.b32.xlu0 %v3596_v51, %s7489_s20  ;;  %v3216_v18 = vmul.f32 %v3215_v47, %v6818_v25 }
 0x4cb   : > { %v3119_v6 = vpop.permute.xlu1 %3118  ;;  %v3131_v0 = vpop.permute.xlu0 %3130 }
 0x4cc   : > { %v3123_v33 = vadd.f32 %v3119_v6, %v3075_v26  ;;  %v3136_v2 = vadd.f32 %v3131_v0, %v3080_v45  ;;  %v3665_v45 = vmul.f32 %v3663_v62, %v7127_v24 }
 0x4cd   : > { %3602 = vrot.lane.b32.xlu1 %v3597_v16, %s7489_s20  ;;  %3640 = vrot.lane.b32.xlu0 %v3636_v28, %s7644_s19  ;;  %v3719_v28 = vstv %s7159_s6 }
 0x4cf   : > { %v3133_v58 = vpop.permute.xlu1 %3132  ;;  %v3145_v49 = vpop.permute.xlu0 %3144 }
 0x4d0   : > { %v3137_v55 = vadd.f32 %v3133_v58, %v3081_v60  ;;  %v3150_v20 = vadd.f32 %v3145_v49, %v3094_v11  ;;  %v3210_v11 = vmul.f32 %v3209_v46, %v6818_v25  ;;  %v3720_v58 = vmul.f32 %v3719_v28, %v7114_v1 }
 0x4d1   : > { %3642 = vrot.lane.b32.xlu1 %v3637_v61, %s7644_s19  ;;  %3654 = vrot.lane.b32.xlu0 %v3650_v52, %s7644_s19  ;;  %v3733_v52 = vstv %s7169_s24 }
 0x4d2   : > { %v3200_v48 = vadd.f32 %v3198_v53, %v3150_v20  ;;  %v3721_v20 = vmul.f32 %v3719_v28, %v7127_v24  ;;  %v3734_v62 = vmul.f32 %v3733_v52, %v7114_v1 }
 0x4d3   : > { %v3147_v59 = vpop.permute.xlu1 %3146  ;;  %v3159_v40 = vpop.permute.xlu0 %3158 }
 0x4d4   : > { %v3151_v56 = vadd.f32 %v3147_v59, %v3095_v36  ;;  %v3164_v34 = vadd.f32 %v3159_v40, %v3108_v4  ;;  %v3705_v36 = vstv %s7149_s13  ;;  %s4514_s13 = scalar_lea.vmem %s4513_s28, 2048 }
 0x4d5   : > { %3656 = vrot.lane.b32.xlu1 %v3651_v57, %s7644_s19  ;;  %3668 = vrot.lane.b32.xlu0 %v3664_v32, %s7644_s19  ;;  %v3706_v6 = vmul.f32 %v3705_v36, %v7114_v1  ;;  %v3707_v39 = vmul.f32 %v3705_v36, %v7127_v24  ;;  %v3735_v57 = vmul.f32 %v3733_v52, %v7127_v24  ;;  %p4516_p0 = scmp.lt.s32.totalorder %s4514_s13, %s4508_s11 }
 0x4d6   : > { %v3201_v8 = vadd.f32 %v3199_v27, %v3151_v56  ;;  %v3206_v63 = vadd.f32 %v3204_v5, %v3164_v34  ;;  %v3747_v34 = vld [vmem:[%s4825_s9 + $0x8] sm:$0xff]  ;;  %v4280_v27 = vld [vmem:[%s4825_s9 + $0x10] sm:$0xff] }
 0x4d7   : > { %v3161_v29 = vpop.permute.xlu1 %3160  ;;  %v3173_v26 = vpop.permute.xlu0 %3172  ;;  %p4517_p9 = por %p4516_p0, %p4515_p13 }
 0x4d8   : > { %v3165_v22 = vadd.f32 %v3161_v29, %v3109_v15  ;;  %v3178_v3 = vadd.f32 %v3173_v26, %v3122_v7  ;;  %v3341_v26 = vstv %s7192_s14 }
 0x4d9   : > { %3670 = vrot.lane.b32.xlu1 %v3665_v45, %s7644_s19  ;;  %3682 = vrot.lane.b32.xlu0 %v3678_v44, %s7644_s19  ;;  %v4281_v45 = vld [vmem:[%s4825_s9 + $0x18] sm:$0xff]  ;;  %v4284_v44 = vld [vmem:[%s4825_s9 + $0x20] sm:$0xff]  ;;  %p4518_p6 = pnand %p4517_p9, %p4511_p12 }
 0x4da   : > { %v3207_v54 = vadd.f32 %v3205_v21, %v3165_v22  ;;  %v3212_v60 = vadd.f32 %v3210_v11, %v3178_v3 }
 0x4db   : > { %v3175_v41 = vpop.permute.xlu1 %3174  ;;  %v3187_v9 = vpop.permute.xlu0 %3186 }
 0x4dc   : > { %v3179_v4 = vadd.f32 %v3175_v41, %v3123_v33  ;;  %v3192_v43 = vadd.f32 %v3187_v9, %v3136_v2  ;;  %v3217_v33 = vmul.f32 %v3215_v47, %v6831_v13  ;;  %v4285_v41 = vld [vmem:[%s4825_s9 + $0x28] sm:$0xff]  ;;  %v4288_v9 = vld [vmem:[%s4825_s9 + $0x30] sm:$0xff] }
 0x4dd   : > { %3684 = vrot.lane.b32.xlu1 %v3679_v31, %s7644_s19  ;;  %3696 = vrot.lane.b32.xlu0 %v3692_v23, %s7489_s20  ;;  %s7186_s19 = sld [smem:[#allocation9 + $0x1b]] }
 0x4de   : > { %v3213_v17 = vadd.f32 %v3211_v30, %v3179_v4  ;;  %v3218_v51 = vadd.f32 %v3216_v18, %v3192_v43  ;;  %v3343_v18 = vmul.f32 %v3341_v26, %v6935_v10 }
 0x4df   : > { %v3189_v15 = vpop.permute.xlu1 %3188  ;;  %v3227_v7 = vpop.permute.xlu0 %3226 }
 0x4e0   : > { %v3193_v0 = vadd.f32 %v3189_v15, %v3137_v55  ;;  %v3232_v16 = vadd.f32 %v3227_v7, %v3200_v48  ;;  %v3746_v48 = vld [vmem:[%s4825_s9] sm:$0xff]  ;;  %v4289_v15 = vld [vmem:[%s4825_s9 + $0x38] sm:$0xff]  ;;  %s4256_s9 = sld [smem:[#allocation9 + $0x1e]] }
 0x4e1   : > { %3698 = vrot.lane.b32.xlu1 %v3693_v12, %s7489_s20  ;;  %3710 = vrot.lane.b32.xlu0 %v3706_v6, %s7489_s20 }
 0x4e2   : > { %v3219_v25 = vadd.f32 %v3217_v33, %v3193_v0 }
 0x4e3   : > { %v3229_v2 = vpop.permute.xlu1 %3228  ;;  %v3241_v42 = vpop.permute.xlu0 %3240  ;;  %v3335_v56 = vstv %s7186_s19 }
 0x4e4   : > { %v3233_v49 = vadd.f32 %v3229_v2, %v3201_v8  ;;  %v3246_v61 = vadd.f32 %v3241_v42, %v3206_v63  ;;  %v3336_v29 = vmul.f32 %v3335_v56, %v6922_v14  ;;  %v3337_v47 = vmul.f32 %v3335_v56, %v6935_v10 }
 0x4e5   : > { %3712 = vrot.lane.b32.xlu1 %v3707_v39, %s7489_s20  ;;  %3724 = vrot.lane.b32.xlu0 %v3720_v58, %s7489_s20 }
 0x4e6   : > { %v3473_v56 = vstv %s4256_s9 }
 0x4e7   : > { %v3243_v13 = vpop.permute.xlu1 %3242  ;;  %v3255_v55 = vpop.permute.xlu0 %3254 }
 0x4e8   : > { %v3247_v53 = vadd.f32 %v3243_v13, %v3207_v54  ;;  %v3260_v37 = vadd.f32 %v3255_v55, %v3212_v60  ;;  %v3342_v54 = vmul.f32 %v3341_v26, %v6922_v14  ;;  %v3347_v60 = vstv %s7199_s23 }
 0x4e9   : > { %3726 = vrot.lane.b32.xlu1 %v3721_v20, %s7489_s20  ;;  %3738 = vrot.lane.b32.xlu0 %v3734_v62, %s7489_s20  ;;  %v3349_v33 = vmul.f32 %v3347_v60, %v6935_v10 }
 0x4eb   : > { %v3257_v59 = vpop.permute.xlu1 %3256  ;;  %v3269_v40 = vpop.permute.xlu0 %3268 }
 0x4ec   : > { %v3261_v32 = vadd.f32 %v3257_v59, %v3213_v17  ;;  %v3274_v35 = vadd.f32 %v3269_v40, %v3218_v51  ;;  %v3348_v17 = vmul.f32 %v3347_v60, %v6922_v14 }
 0x4ed   : > { %3740 = vrot.lane.b32.xlu1 %v3735_v57, %s7489_s20  ;;  %3750 = vrot.lane.b32.xlu0 %v3746_v48, %s4600_s15  ;;  %s7207_s20 = sld [smem:[#allocation9 + $0x87]] }
 0x4ef   : > { %v3271_v5 = vpop.permute.xlu1 %3270  ;;  %v3283_v46 = vpop.permute.xlu0 %3282 }
 0x4f0   : > { %v3275_v8 = vadd.f32 %v3271_v5, %v3219_v25  ;;  %v3288_v63 = vadd.f32 %v3283_v46, %v3232_v16  ;;  %v3474_v46 = vmul.f32 %v3473_v56, %v7026_v19 }
 0x4f1   : > { %3752 = vrot.lane.b32.xlu1 %v3747_v34, %s4600_s15  ;;  %3774 = vrot.lane.b32.xlu0 %v4280_v27, %s4600_s15 }
 0x4f2   : > { %v3338_v38 = vadd.f32 %v3336_v29, %v3288_v63 }
 0x4f3   : > { %v3285_v22 = vpop.permute.xlu1 %3284  ;;  %v3297_v3 = vpop.permute.xlu0 %3296  ;;  %v3353_v51 = vstv %s7207_s20 }
 0x4f4   : > { %v3289_v21 = vadd.f32 %v3285_v22, %v3233_v49  ;;  %v3302_v11 = vadd.f32 %v3297_v3, %v3246_v61  ;;  %v3354_v25 = vmul.f32 %v3353_v51, %v6922_v14  ;;  %v3355_v52 = vmul.f32 %v3353_v51, %v6935_v10 }
 0x4f5   : > { %3776 = vrot.lane.b32.xlu1 %v4281_v45, %s4600_s15  ;;  %3798 = vrot.lane.b32.xlu0 %v4284_v44, %s4600_s15  ;;  %v3485_v3 = vstv %s7228_s26 }
 0x4f6   : > { %v3339_v31 = vadd.f32 %v3337_v47, %v3289_v21  ;;  %v3344_v23 = vadd.f32 %v3342_v54, %v3302_v11  ;;  %v3487_v51 = vmul.f32 %v3485_v3, %v7039_v50 }
 0x4f7   : > { %v3299_v36 = vpop.permute.xlu1 %3298  ;;  %v3311_v4 = vpop.permute.xlu0 %3310 }
 0x4f8   : > { %v3303_v43 = vadd.f32 %v3299_v36, %v3247_v53  ;;  %v3316_v30 = vadd.f32 %v3311_v4, %v3260_v37 }
 0x4f9   : > { %3800 = vrot.lane.b32.xlu1 %v4285_v41, %s4600_s15  ;;  %3822 = vrot.lane.b32.xlu0 %v4288_v9, %s4600_s15 }
 0x4fa   : > { %v3345_v7 = vadd.f32 %v3343_v18, %v3303_v43  ;;  %v3350_v12 = vadd.f32 %v3348_v17, %v3316_v30 }
 0x4fb   : > { %v3313_v6 = vpop.permute.xlu1 %3312  ;;  %v3325_v0 = vpop.permute.xlu0 %3324 }
 0x4fc   : > { %v3317_v16 = vadd.f32 %v3313_v6, %v3261_v32  ;;  %v3330_v28 = vadd.f32 %v3325_v0, %v3274_v35 }
 0x4fd   : > { %3824 = vrot.lane.b32.xlu1 %v4289_v15, %s4600_s15 }
 0x4fe   : > { %v3351_v2 = vadd.f32 %v3349_v33, %v3317_v16  ;;  %v3356_v42 = vadd.f32 %v3354_v25, %v3330_v28 }
 0x4ff   : > { %v3327_v39 = vpop.permute.xlu1 %3326  ;;  %v3365_v58 = vpop.permute.xlu0 %3364 }
 0x500   : > { %v3331_v49 = vadd.f32 %v3327_v39, %v3275_v8  ;;  %v3370_v61 = vadd.f32 %v3365_v58, %v3338_v38  ;;  %v3479_v8 = vstv %s4257_s17  ;;  %v3475_v38 = vmul.f32 %v3473_v56, %v7039_v50 }
 0x501   : > { %v3480_v22 = vmul.f32 %v3479_v8, %v7026_v19  ;;  %v3481_v9 = vmul.f32 %v3479_v8, %v7039_v50 }
 0x502   : > { %v3357_v13 = vadd.f32 %v3355_v52, %v3331_v49 }
 0x503   : > { %v3367_v55 = vpop.permute.xlu1 %3366  ;;  %v3379_v20 = vpop.permute.xlu0 %3378 }
 0x504   : > { %v3371_v62 = vadd.f32 %v3367_v55, %v3339_v31  ;;  %v3384_v53 = vadd.f32 %v3379_v20, %v3344_v23  ;;  %v3486_v31 = vmul.f32 %v3485_v3, %v7026_v19  ;;  %v3491_v23 = vstv %s7231_s27 }
 0x505   : > { %v3492_v15 = vmul.f32 %v3491_v23, %v7026_v19  ;;  %v3493_v28 = vmul.f32 %v3491_v23, %v7039_v50  ;;  %v3617_v50 = vstv %s4269_s1 }
 0x507   : > { %v3381_v37 = vpop.permute.xlu1 %3380  ;;  %v3393_v48 = vpop.permute.xlu0 %3392 }
 0x508   : > { %v3385_v59 = vadd.f32 %v3381_v37, %v3345_v7  ;;  %v3398_v14 = vadd.f32 %v3393_v48, %v3350_v12 }
 0x50b   : > { %v3395_v40 = vpop.permute.xlu1 %3394  ;;  %v3407_v57 = vpop.permute.xlu0 %3406 }
 0x50c   : > { %v3399_v32 = vadd.f32 %v3395_v40, %v3351_v2  ;;  %v3412_v35 = vadd.f32 %v3407_v57, %v3356_v42 }
 0x50f   : > { %v3409_v10 = vpop.permute.xlu1 %3408  ;;  %v3421_v34 = vpop.permute.xlu0 %3420 }
 0x510   : > { %v3413_v27 = vadd.f32 %v3409_v10, %v3357_v13  ;;  %v3426_v5 = vadd.f32 %v3421_v34, %v3370_v61  ;;  %v3611_v61 = vstv %s4268_s0 }
 0x511   : > { %v3612_v20 = vmul.f32 %v3611_v61, %v7114_v1  ;;  %v3613_v57 = vmul.f32 %v3611_v61, %v7127_v24 }
 0x512   : > { %v3476_v63 = vadd.f32 %v3474_v46, %v3426_v5 }
 0x513   : > { %v3423_v29 = vpop.permute.xlu1 %3422  ;;  %v3435_v26 = vpop.permute.xlu0 %3434 }
 0x514   : > { %v3427_v45 = vadd.f32 %v3423_v29, %v3371_v62  ;;  %v3440_v44 = vadd.f32 %v3435_v26, %v3384_v53  ;;  %v3619_v29 = vmul.f32 %v3617_v50, %v7127_v24 }
 0x516   : > { %v3477_v21 = vadd.f32 %v3475_v38, %v3427_v45  ;;  %v3482_v11 = vadd.f32 %v3480_v22, %v3440_v44  ;;  %v3629_v45 = vstv %s7245_s3 }
 0x517   : > { %v3437_v47 = vpop.permute.xlu1 %3436  ;;  %v3449_v54 = vpop.permute.xlu0 %3448 }
 0x518   : > { %v3441_v60 = vadd.f32 %v3437_v47, %v3385_v59  ;;  %v3454_v41 = vadd.f32 %v3449_v54, %v3398_v14 }
 0x51a   : > { %v3483_v36 = vadd.f32 %v3481_v9, %v3441_v60  ;;  %v3488_v4 = vadd.f32 %v3486_v31, %v3454_v41  ;;  %v3630_v41 = vmul.f32 %v3629_v45, %v7114_v1 }
 0x51b   : > { %v3451_v43 = vpop.permute.xlu1 %3450  ;;  %v3463_v30 = vpop.permute.xlu0 %3462 }
 0x51c   : > { %v3455_v18 = vadd.f32 %v3451_v43, %v3399_v32  ;;  %v3468_v17 = vadd.f32 %v3463_v30, %v3412_v35  ;;  %v3618_v32 = vmul.f32 %v3617_v50, %v7114_v1  ;;  %v3623_v35 = vstv %s7242_s2 }
 0x51d   : > { %v3624_v26 = vmul.f32 %v3623_v35, %v7114_v1  ;;  %v3625_v60 = vmul.f32 %v3623_v35, %v7127_v24  ;;  %v3631_v30 = vmul.f32 %v3629_v45, %v7127_v24 }
 0x51e   : > { %v3489_v7 = vadd.f32 %v3487_v51, %v3455_v18  ;;  %v3494_v12 = vadd.f32 %v3492_v15, %v3468_v17 }
 0x51f   : > { %v3465_v6 = vpop.permute.xlu1 %3464  ;;  %v3503_v0 = vpop.permute.xlu0 %3502 }
 0x520   : > { %v3469_v16 = vadd.f32 %v3465_v6, %v3413_v27  ;;  %v3508_v19 = vadd.f32 %v3503_v0, %v3476_v63 }
 0x522   : > { %v3495_v33 = vadd.f32 %v3493_v28, %v3469_v16 }
 0x523   : > { %v3505_v25 = vpop.permute.xlu1 %3504  ;;  %v3517_v2 = vpop.permute.xlu0 %3516 }
 0x524   : > { %v3509_v62 = vadd.f32 %v3505_v25, %v3477_v21  ;;  %v3522_v53 = vadd.f32 %v3517_v2, %v3482_v11 }
 0x527   : > { %v3519_v42 = vpop.permute.xlu1 %3518  ;;  %v3531_v39 = vpop.permute.xlu0 %3530 }
 0x528   : > { %v3523_v56 = vadd.f32 %v3519_v42, %v3483_v36  ;;  %v3536_v10 = vadd.f32 %v3531_v39, %v3488_v4 }
 0x52b   : > { %v3533_v58 = vpop.permute.xlu1 %3532  ;;  %v3545_v49 = vpop.permute.xlu0 %3544 }
 0x52c   : > { %v3537_v44 = vadd.f32 %v3533_v58, %v3489_v7  ;;  %v3550_v38 = vadd.f32 %v3545_v49, %v3494_v12 }
 0x52f   : > { %v3547_v52 = vpop.permute.xlu1 %3546  ;;  %v3559_v13 = vpop.permute.xlu0 %3558 }
 0x530   : > { %v3564_v55 = vadd.f32 %v3559_v13, %v3508_v19  ;;  %v3551_v9 = vadd.f32 %v3547_v52, %v3495_v33 }
 0x532   : > { %v3614_v37 = vadd.f32 %v3612_v20, %v3564_v55 }
 0x533   : > { %v3561_v48 = vpop.permute.xlu1 %3560  ;;  %v3573_v59 = vpop.permute.xlu0 %3572 }
 0x534   : > { %v3565_v14 = vadd.f32 %v3561_v48, %v3509_v62  ;;  %v3578_v40 = vadd.f32 %v3573_v59, %v3522_v53 }
 0x536   : > { %v3615_v34 = vadd.f32 %v3613_v57, %v3565_v14  ;;  %v3620_v27 = vadd.f32 %v3618_v32, %v3578_v40 }
 0x537   : > { %v3575_v5 = vpop.permute.xlu1 %3574  ;;  %v3587_v46 = vpop.permute.xlu0 %3586 }
 0x538   : > { %v3579_v8 = vadd.f32 %v3575_v5, %v3523_v56  ;;  %v3592_v63 = vadd.f32 %v3587_v46, %v3536_v10 }
 0x53a   : > { %v3621_v22 = vadd.f32 %v3619_v29, %v3579_v8  ;;  %v3626_v3 = vadd.f32 %v3624_v26, %v3592_v63 }
 0x53b   : > { %v3589_v21 = vpop.permute.xlu1 %3588  ;;  %v3601_v11 = vpop.permute.xlu0 %3600 }
 0x53c   : > { %v3593_v47 = vadd.f32 %v3589_v21, %v3537_v44  ;;  %v3606_v54 = vadd.f32 %v3601_v11, %v3550_v38 }
 0x53e   : > { %v3627_v31 = vadd.f32 %v3625_v60, %v3593_v47  ;;  %v3632_v23 = vadd.f32 %v3630_v41, %v3606_v54 }
 0x53f   : > { %v3603_v36 = vpop.permute.xlu1 %3602  ;;  %v3641_v4 = vpop.permute.xlu0 %3640 }
 0x540   : > { %v3607_v43 = vadd.f32 %v3603_v36, %v3551_v9  ;;  %v3646_v39 = vadd.f32 %v3641_v4, %v3614_v37 }
 0x542   : > { %v3633_v18 = vadd.f32 %v3631_v30, %v3607_v43 }
 0x543   : > { %v3643_v17 = vpop.permute.xlu1 %3642  ;;  %v3655_v51 = vpop.permute.xlu0 %3654 }
 0x544   : > { %v3647_v24 = vadd.f32 %v3643_v17, %v3615_v34  ;;  %v3660_v19 = vadd.f32 %v3655_v51, %v3620_v27 }
 0x547   : > { %v3657_v15 = vpop.permute.xlu1 %3656  ;;  %v3669_v7 = vpop.permute.xlu0 %3668 }
 0x548   : > { %v3661_v62 = vadd.f32 %v3657_v15, %v3621_v22  ;;  %v3674_v53 = vadd.f32 %v3669_v7, %v3626_v3 }
 0x54b   : > { %v3671_v12 = vpop.permute.xlu1 %3670  ;;  %v3683_v6 = vpop.permute.xlu0 %3682 }
 0x54c   : > { %v3675_v32 = vadd.f32 %v3671_v12, %v3627_v31  ;;  %v3688_v35 = vadd.f32 %v3683_v6, %v3632_v23 }
 0x54f   : > { %v3685_v0 = vpop.permute.xlu1 %3684  ;;  %v3697_v16 = vpop.permute.xlu0 %3696 }
 0x550   : > { %v3702_v58 = vadd.f32 %v3697_v16, %v3646_v39  ;;  %v3689_v8 = vadd.f32 %v3685_v0, %v3633_v18 }
 0x553   : > { %v3699_v28 = vpop.permute.xlu1 %3698  ;;  %v3711_v25 = vpop.permute.xlu0 %3710 }
 0x554   : > { %v3703_v13 = vadd.f32 %v3699_v28, %v3647_v24  ;;  %v3716_v55 = vadd.f32 %v3711_v25, %v3660_v19 }
 0x557   : > { %v3713_v1 = vpop.permute.xlu1 %3712  ;;  %v3725_v33 = vpop.permute.xlu0 %3724 }
 0x558   : > { %v3717_v14 = vadd.f32 %v3713_v1, %v3661_v62  ;;  %v3730_v40 = vadd.f32 %v3725_v33, %v3674_v53 }
 0x55b   : > { %v3727_v2 = vpop.permute.xlu1 %3726  ;;  %v3739_v42 = vpop.permute.xlu0 %3738 }
 0x55c   : > { %v3731_v34 = vadd.f32 %v3727_v2, %v3675_v32  ;;  %v3744_v27 = vadd.f32 %v3739_v42, %v3688_v35 }
 0x55f   : > { %v3741_v49 = vpop.permute.xlu1 %3740  ;;  %v3751_v61 = vpop.permute.xlu0 %3750 }
 0x560   : > { %v3756_v52 = vadd.f32 %v3751_v61, %v3702_v58  ;;  %v3745_v26 = vadd.f32 %v3741_v49, %v3689_v8 }
 0x562   : > { %3760 = vrot.lane.b32.xlu0 %v3756_v52, %s4601_s4 }
 0x563   : > { %v3753_v20 = vpop.permute.xlu1 %3752  ;;  %v3775_v50 = vpop.permute.xlu0 %3774 }
 0x564   : > { %v3757_v48 = vadd.f32 %v3753_v20, %v3703_v13  ;;  %v3780_v59 = vadd.f32 %v3775_v50, %v3716_v55 }
 0x566   : > { %3762 = vrot.lane.b32.xlu1 %v3757_v48, %s4601_s4  ;;  %3784 = vrot.lane.b32.xlu0 %v3780_v59, %s4601_s4 }
 0x567   : > { %v3777_v37 = vpop.permute.xlu1 %3776  ;;  %v3799_v57 = vpop.permute.xlu0 %3798 }
 0x568   : > { %v3781_v56 = vadd.f32 %v3777_v37, %v3717_v14  ;;  %v3804_v10 = vadd.f32 %v3799_v57, %v3730_v40 }
 0x56a   : > { %3786 = vrot.lane.b32.xlu1 %v3781_v56, %s4601_s4  ;;  %3808 = vrot.lane.b32.xlu0 %v3804_v10, %s4601_s4 }
 0x56b   : > { %v3801_v5 = vpop.permute.xlu1 %3800  ;;  %v3823_v46 = vpop.permute.xlu0 %3822 }
 0x56c   : > { %v3805_v63 = vadd.f32 %v3801_v5, %v3731_v34  ;;  %v3828_v29 = vadd.f32 %v3823_v46, %v3744_v27 }
 0x56e   : > { %3810 = vrot.lane.b32.xlu1 %v3805_v63, %s4601_s4  ;;  %3832 = vrot.lane.b32.xlu0 %v3828_v29, %s4601_s4 }
 0x56f   : > { %v3825_v45 = vpop.permute.xlu1 %3824 }
 0x570   : > { %v3829_v44 = vadd.f32 %v3825_v45, %v3745_v26 }
 0x572   : > { %3834 = vrot.lane.b32.xlu1 %v3829_v44, %s4601_s4 }
 0x5d4   : > { %v3761_v38 = vpop.permute.xlu0 %3760 }
 0x5d5   : > { %3767 = vst.msk [vmem:[%s292_s21] sm:$0xff] %vm3766_vm2, %v3761_v38 }
 0x5d8   : > { %v3763_v22 = vpop.permute.xlu1 %3762  ;;  %v3785_v3 = vpop.permute.xlu0 %3784 }
 0x5d9   : > { %3768 = vst.msk [vmem:[%s292_s21 + $0x8] sm:$0xff] %vm3766_vm2, %v3763_v22  ;;  %4282 = vst.msk [vmem:[%s292_s21 + $0x10] sm:$0xff] %vm3766_vm2, %v3785_v3 }
 0x5dc   : > { %v3787_v21 = vpop.permute.xlu1 %3786  ;;  %v3809_v11 = vpop.permute.xlu0 %3808 }
 0x5dd   : > { %4283 = vst.msk [vmem:[%s292_s21 + $0x18] sm:$0xff] %vm3766_vm2, %v3787_v21  ;;  %4286 = vst.msk [vmem:[%s292_s21 + $0x20] sm:$0xff] %vm3766_vm2, %v3809_v11 }
 0x5e0   : > { %v3811_v47 = vpop.permute.xlu1 %3810  ;;  %v3833_v54 = vpop.permute.xlu0 %3832 }
 0x5e1   : > { %4287 = vst.msk [vmem:[%s292_s21 + $0x28] sm:$0xff] %vm3766_vm2, %v3811_v47  ;;  %4290 = vst.msk [vmem:[%s292_s21 + $0x30] sm:$0xff] %vm3766_vm2, %v3833_v54 }
 0x5e4   : > { %v3835_v60 = vpop.permute.xlu1 %3834 }
 0x5e5   : > { %4291 = vst.msk [vmem:[%s292_s21 + $0x38] sm:$0xff] %vm3766_vm2, %v3835_v60 }
 0x5e6   : > { %4521 = shalt.err (!%p4518_p6)
}
 0x5e7   : > { %s4522_s6 = scalar_lea.hbm %s7277_s10, 1024  ;;  %s4526_s14 = scalar_lea.hbm %s7330_s5, 2048 }
 0x5e8   : > { %p4523_p7 = scmp.ne.s32.totalorder %s7277_s10, %s4522_s6  ;;  %p4527_p2 = scmp.lt.u32.totalorder %s7277_s10, %s7330_s5 }
 0x5e9   : > { %p4528_p11 = scmp.lt.u32.totalorder %s4526_s14, %s4522_s6  ;;  %p4530_p3 = scmp.lt.u32.totalorder %s4522_s6, %s7277_s10 }
 0x5ea   : > { %p4524_p4 = pnand %p4523_p7, %p7646_p5 }
 0x5eb   : > { %p4529_p8 = por %p4528_p11, %p4527_p2 }
 0x5ec   : > { %p4525_p1 = pneg %p4524_p4 }
 0x5ed   : > { %p4531_p10 = por %p4530_p3, %p4529_p8 }
 0x5ef   : > { %p4532_p12 = pnand %p4531_p10, %p4525_p1 }
 0x5f1   : > { %4535 = shalt.err (!%p4532_p12)
}
 0x5f2   : > { %s4603_s20 = smov 128   ;;  %s7647_s9 = smov 8  }
 0x5f3   : > { %4317 = dma.vmem_to_hbm [thread:$0]  (%p7646_p5), %s7279_s7, 1024, %s7277_s10, %s3842_s22, %s4603_s20, %s4603_s20, %s7647_s9  }
 0x5f4 PF: > { %s7648_s17 = sld [smem:[#allocation19_spill]]  ;;  %s7649_s26 = sld [smem:[#allocation23_spill]] }
 0x5f5   : > { %s7650_s27 = sld [smem:[#allocation22_spill]] }
 0x5fa   : > { %s3870_s0 = sand.u32 1, %s7648_s17   ;;  %p7651_p13 = scmp.ne.s32.totalorder %s7649_s26, 0 }
 0x5fb   : > { %p7652_p0 = scmp.ge.s32.totalorder %s7650_s27, 2  ;;  %s3871_s1 = scalar_lea.sflag [#allocation5], %s3870_s0 }
 0x5fd   : > { %p4337_p9 = pnand %p7652_p0, %p7651_p13 }
 0x5ff   : > { %4569 = dma.done.wait (!%p4337_p9), %s3871_s1, 1024  }
 0x600   : > { %4571 = vsyncadd (!%p4337_p9), %s3871_s1, 4294966272  ;;  %s7653_s21 = sld [smem:[#allocation24_spill]]  ;;  %s7654_s18 = sld [smem:[#allocation20_spill]] }
 0x601   : > { %s7655_s19 = sld [smem:[#allocation21_spill]]  ;;  %s7656_s20 = sld [smem:[#allocation25_spill]] }
 0x606   : > { %p21_p6 = scmp.ge.s32.totalorder %s7653_s21, 4  }
 0x608   :  { %23 = sbr.rel (!%p21_p6) target bundleno = 14 (0xe), region = 112 }
 0x60f   :  { %3876 = vsyncpa [#allocation4], 1 }
 0x610   :  { %3878 = vsyncpa [#allocation4 + $0x1], 1 }
 0x611   :  { %3879 = vsyncpa [#allocation5], 1 }
 0x612   :  { %3881 = vsyncpa [#allocation5 + $0x1], 1 }
 0x613   :  { %3882 = vsyncpa [#allocation6], 1 }
 0x614   :  { %3884 = vsyncpa [#allocation6 + $0x1], 1 }
 0x615   :  { %3885 = vsyncpa [#allocation7], 1 }
 0x616   :  { %3887 = vsyncpa [#allocation7 + $0x1], 1 }
 0x617   :  { %3888 = vsyncpa [#allocation10], 1 }

</bundles_post_ra>
